<compile_context>
chip_gen: v6e
topology: v6e:2x2x1
jax: 0.10.0
libtpu: 0.0.40
codegen_flags: <defaults>
</compile_context>

<pallas_src>
import functools

import jax
import jax.numpy as jnp
from jax.experimental import pallas as pl
from jax.experimental.pallas import tpu as pltpu


def _vmem():
    return pl.BlockSpec(memory_space=pltpu.MemorySpace.VMEM)


def _any():
    return pl.BlockSpec(memory_space=pl.ANY)


# ---------------------------------------------------------------------------
# Fused forward kernel
# ---------------------------------------------------------------------------
def neuralnet_kernel(
        x_ref, pool_ref, cw_ref, cb_ref,
        wi1_ref, bi1_ref, whh1_ref,
        wi2_hbm, bi2_ref, whh2_hbm,
        w12_hbm, b12_ref, wout_hbm, bout_ref,
        out_ref,
        xg_ref, hf_ref, hr_ref,
        wi2_ref, whh2_ref, w12_ref, wout_ref, dma_sem,
        *, seq, hidden):
    f32 = jnp.float32
    bf16 = jnp.bfloat16
    h2w = 2 * hidden            # packed state width (= 128 for hidden=64)

    # --- kick off DMAs for late-used weights (layer 2 + head) ---------------
    # They overlap with the CNN stand-in + the layer-1 recurrence below.
    cp_wi2 = pltpu.make_async_copy(wi2_hbm, wi2_ref, dma_sem.at[0])
    cp_whh2 = pltpu.make_async_copy(whh2_hbm, whh2_ref, dma_sem.at[1])
    cp_w12 = pltpu.make_async_copy(w12_hbm, w12_ref, dma_sem.at[2])
    cp_wout = pltpu.make_async_copy(wout_hbm, wout_ref, dma_sem.at[3])
    cp_wi2.start(); cp_whh2.start(); cp_w12.start(); cp_wout.start()

    # --- CNN stand-in (1x1 conv + ReLU) + per-image global average pool ----
    y = jnp.dot(x_ref[...], cw_ref[...], preferred_element_type=f32)
    y = jnp.maximum(y + cb_ref[...], 0.0)                        # (seq*hw, F)
    emb = jnp.dot(pool_ref[...], y, preferred_element_type=f32)  # (seq, F)

    # fwd/rev lane-select mask: built ONCE, shared by both LSTM layers.
    lane = jax.lax.broadcasted_iota(jnp.int32, (seq, h2w), 1)
    fwd_lane = lane < hidden

    # --- one bidirectional LSTM layer (fwd & rev interleaved in one loop) --
    def bilstm_layer(x_in, wi_ref_, bi_ref_, whh_ref_):
        # Hoisted input projections for BOTH directions in ONE matmul:
        # columns 0:8H carry fwd-direction gates, 8H:16H rev-direction gates.
        # Packed gate order is [i_f i_r | f_f f_r | o_f o_r | g_f g_r].
        xg_ref[...] = (
            jnp.dot(x_in.astype(bf16), wi_ref_[...], preferred_element_type=f32)
            + bi_ref_[...])

        whh = whh_ref_[...]        # loop-invariant (2H, 8H) bf16 weight

        def step(k, carry):
            h, c = carry                               # (1, 2H) = [fwd | rev]
            rk = seq - 1 - k
            gin = (xg_ref[pl.ds(k, 1), pl.ds(0, 4 * h2w)]
                   + xg_ref[pl.ds(rk, 1), pl.ds(4 * h2w, 4 * h2w)])  # (1, 8H)
            gates = gin + jnp.dot(h.astype(bf16), whh,
                                  preferred_element_type=f32)
            sig = jax.nn.sigmoid(gates[:, :3 * h2w])   # [i|f|o] one EUP slab
            g_g = jnp.tanh(gates[:, 3 * h2w:])
            i_g = sig[:, 0 * h2w:1 * h2w]
            f_g = sig[:, 1 * h2w:2 * h2w]
            o_g = sig[:, 2 * h2w:3 * h2w]
            c = f_g * c + i_g * g_g
            h = o_g * jnp.tanh(c)
            hf_ref[pl.ds(k, 1), :] = h      # fwd half valid at time k
            hr_ref[pl.ds(rk, 1), :] = h     # rev half valid at time seq-1-k
            return (h, c)

        zero = jnp.zeros((1, h2w), f32)
        jax.lax.fori_loop(0, seq, step, (zero, zero), unroll=True)

        # row t = [fwd output at t (lanes 0:H) | rev output at t (lanes H:2H)]
        return jnp.where(fwd_lane, hf_ref[...], hr_ref[...])   # (seq, 2H)

    h1 = bilstm_layer(emb, wi1_ref, bi1_ref, whh1_ref)

    # layer-2 weights must have landed (DMA overlapped with layer 1 compute)
    cp_wi2.wait()
    cp_whh2.wait()
    h2 = bilstm_layer(h1, wi2_ref, bi2_ref, whh2_ref)

    # --- head ----------------------------------------------------------------
    cp_w12.wait()
    cp_wout.wait()
    # [h1|h2] @ blockdiag(w1,w2) = [h1@w1 | h2@w2]  -> one MXU matmul
    h12 = jnp.concatenate([h1.astype(bf16), h2.astype(bf16)], axis=1)
    l12 = jnp.maximum(
        jnp.dot(h12, w12_ref[...], preferred_element_type=f32) + b12_ref[...],
        0.0)
    hid = h1 + h2 + l12[:, :h2w] + l12[:, h2w:]

    # Combined output head: col 0 = PE logit, cols 1:10 = global logits
    # (mean over the sequence commutes with the matmul).
    z = jnp.dot(hid.astype(bf16), wout_ref[...], preferred_element_type=f32)
    out_ref[:seq, :] = z + bout_ref[0:1, :]
    out_ref[seq:, :] = jnp.mean(z, axis=0, keepdims=True) + bout_ref[1:2, :]


def neuralnet_forward(x_nchw, kp, hidden):
    b, c, H, W = x_nchw.shape
    hw = H * W
    # NCHW -> (b*H*W, C); rows are image-major (image 0's hw pixels first).
    # TODO(synk): if the (b*hw, 4) DMA shows up in traces, feed (Cin, b*hw)
    # instead; low priority since the real backbone replaces this stage.
    x_flat = jnp.transpose(x_nchw, (0, 2, 3, 1)).reshape(b * hw, c)

    out = pl.pallas_call(
        functools.partial(neuralnet_kernel, seq=b, hidden=hidden),
        out_shape=jax.ShapeDtypeStruct((b + 1, 128), jnp.float32),
        in_specs=[
            _vmem(), _vmem(), _vmem(), _vmem(),      # x, pool, cnn_w, cnn_b
            _vmem(), _vmem(), _vmem(),               # wi1, bi1, whh1
            _any(), _vmem(), _any(),                 # wi2(HBM), bi2, whh2(HBM)
            _any(), _vmem(), _any(), _vmem(),        # w12(HBM), b12, wout(HBM), bout
        ],
        out_specs=_vmem(),
        scratch_shapes=[
            pltpu.VMEM((b, 16 * hidden), jnp.float32),            # xg (shared)
            pltpu.VMEM((b, 2 * hidden), jnp.float32),             # fwd-time h
            pltpu.VMEM((b, 2 * hidden), jnp.float32),             # rev-time h
            pltpu.VMEM((2 * hidden, 16 * hidden), jnp.bfloat16),  # wi2 landing
            pltpu.VMEM((2 * hidden, 8 * hidden), jnp.bfloat16),   # whh2 landing
            pltpu.VMEM((4 * hidden, 4 * hidden), jnp.bfloat16),   # w12 landing
            pltpu.VMEM((2 * hidden, 128), jnp.bfloat16),          # wout landing
            pltpu.SemaphoreType.DMA((4,)),
        ],
    )(x_flat, kp['pool'], kp['cnn_w'], kp['cnn_b'],
      kp['wi1'], kp['bi1'], kp['whh1'],
      kp['wi2'], kp['bi2'], kp['whh2'],
      kp['w12'], kp['b12'], kp['wout'], kp['bout'])

    out_pe = out[:b, 0:1].reshape(1, b, 1)
    out_g = out[b:b + 1, 1:10].reshape(1, 9)
    return out_pe, out_g


# ---------------------------------------------------------------------------
# Parameter init (standard layout, gate order i|f|g|o) and kernel packing
# ---------------------------------------------------------------------------
def init_params(key, cin, feat, hidden):
    s = 0.05
    ks = jax.random.split(key, 12)

    def rnd(k, shape):
        return s * jax.random.normal(k, shape, jnp.float32)

    def lstm_params(k, in_dim):
        kk = jax.random.split(k, 6)
        return (rnd(kk[0], (in_dim, 4 * hidden)),   # W_ih (fwd)
                rnd(kk[1], (hidden, 4 * hidden)),   # W_hh (fwd)
                rnd(kk[2], (1, 4 * hidden)),        # b_ih + b_hh (fwd)
                rnd(kk[3], (in_dim, 4 * hidden)),   # W_ih (rev)
                rnd(kk[4], (hidden, 4 * hidden)),   # W_hh (rev)
                rnd(kk[5], (1, 4 * hidden)))        # b_ih + b_hh (rev)

    return {
        'cnn_w': rnd(ks[0], (cin, feat)),
        'cnn_b': rnd(ks[1], (1, feat)),
        'lstm1': lstm_params(ks[2], feat),
        'lstm2': lstm_params(ks[3], 2 * hidden),
        'w1': rnd(ks[4], (2 * hidden, 2 * hidden)),
        'b1': rnd(ks[5], (1, 2 * hidden)),
        'w2': rnd(ks[6], (2 * hidden, 2 * hidden)),
        'b2': rnd(ks[7], (1, 2 * hidden)),
        'wpe': rnd(ks[8], (2 * hidden, 1)),
        'bpe': rnd(ks[9], (1, 1)),
        'wg': rnd(ks[10], (2 * hidden, 9)),
        'bg': rnd(ks[11], (1, 9)),
    }


def pack_params(p, batch, hw, hidden):
    """Repack standard LSTM/head params into the fused-kernel layout.

    Packed gate order along the 8H axis is [i|f|o|g] (sigmoid gates first, so
    the kernel applies ONE sigmoid over a contiguous 3*2H slab and ONE tanh);
    within each 2H gate block the halves are [fwd | rev].  LSTM + head weights
    are cast to bf16 (accumulation stays f32 inside the kernel).
    """
    bf16 = jnp.bfloat16
    # source order (PyTorch / reference): i, f, g, o  ->  packed slots i,f,o,g
    gate_slot = (0, 1, 3, 2)

    def pack_ih(w, b, off):
        out_w = jnp.zeros((w.shape[0], 8 * hidden), jnp.float32)
        out_b = jnp.zeros((1, 8 * hidden), jnp.float32)
        for g in range(4):
            dst = gate_slot[g] * 2 * hidden + off
            out_w = out_w.at[:, dst:dst + hidden].set(
                w[:, g * hidden:(g + 1) * hidden])
            out_b = out_b.at[:, dst:dst + hidden].set(
                b[:, g * hidden:(g + 1) * hidden])
        return out_w, out_b

    def pack_hh(whh_f, whh_r):
        out = jnp.zeros((2 * hidden, 8 * hidden), jnp.float32)
        for g in range(4):
            dst = gate_slot[g] * 2 * hidden
            out = out.at[:hidden, dst:dst + hidden].set(
                whh_f[:, g * hidden:(g + 1) * hidden])
            out = out.at[hidden:, dst + hidden:dst + 2 * hidden].set(
                whh_r[:, g * hidden:(g + 1) * hidden])
        return out

    def pack_lstm(params):
        wih_f, whh_f, b_f, wih_r, whh_r, b_r = params
        wif, bf = pack_ih(wih_f, b_f, 0)
        wir, br = pack_ih(wih_r, b_r, hidden)
        wi = jnp.concatenate([wif, wir], axis=1)      # (in, 16H): [fwd | rev]
        bi = jnp.concatenate([bf, br], axis=1)        # (1, 16H)
        return wi.astype(bf16), bi, pack_hh(whh_f, whh_r).astype(bf16)

    wi1, bi1, whh1 = pack_lstm(p['lstm1'])
    wi2, bi2, whh2 = pack_lstm(p['lstm2'])

    # Block-diagonal head weight: [h1|h2] @ w12 = [h1@w1 | h2@w2]
    h2w = 2 * hidden
    w12 = jnp.zeros((2 * h2w, 2 * h2w), jnp.float32)
    w12 = w12.at[:h2w, :h2w].set(p['w1'])
    w12 = w12.at[h2w:, h2w:].set(p['w2'])
    b12 = jnp.concatenate([p['b1'], p['b2']], axis=1)

    # Combined lane-padded output head: col 0 = wpe, cols 1:10 = wg.
    wout = jnp.zeros((h2w, 128), jnp.float32)
    wout = wout.at[:, 0:1].set(p['wpe'])
    wout = wout.at[:, 1:10].set(p['wg'])
    bout = jnp.zeros((2, 128), jnp.float32)
    bout = bout.at[0, 0].set(p['bpe'][0, 0])
    bout = bout.at[1, 1:10].set(p['bg'][0])

    # Pooling matrix precomputed once (input-independent), not per call.
    pool = jnp.kron(jnp.eye(batch, dtype=jnp.float32),
                    jnp.ones((1, hw), jnp.float32)) / float(hw)

    return {
        'pool': pool, 'cnn_w': p['cnn_w'], 'cnn_b': p['cnn_b'],
        'wi1': wi1, 'bi1': bi1, 'whh1': whh1,
        'wi2': wi2, 'bi2': bi2, 'whh2': whh2,
        'w12': w12.astype(bf16), 'b12': b12,
        'wout': wout.astype(bf16), 'bout': bout,
    }


# ---------------------------------------------------------------------------
# Pure-JAX f32 reference (standard layout) for correctness cross-check
# ---------------------------------------------------------------------------
def _lstm_ref(x, wih, whh, b, hidden, reverse=False):
    def cell(carry, x_row):
        h, c = carry
        gates = x_row[None, :] @ wih + h @ whh + b
        i = jax.nn.sigmoid(gates[:, :hidden])
        f = jax.nn.sigmoid(gates[:, hidden:2 * hidden])
        g = jnp.tanh(gates[:, 2 * hidden:3 * hidden])
        o = jax.nn.sigmoid(gates[:, 3 * hidden:])
        c = f * c + i * g
        h = o * jnp.tanh(c)
        return (h, c), h[0]

    h0 = jnp.zeros((1, hidden), jnp.float32)
    c0 = jnp.zeros((1, hidden), jnp.float32)
    xs = x[::-1] if reverse else x
    _, ys = jax.lax.scan(cell, (h0, c0), xs)
    return ys[::-1] if reverse else ys


def _bilstm_ref(x, params, hidden):
    wih_f, whh_f, b_f, wih_r, whh_r, b_r = params
    yf = _lstm_ref(x, wih_f, whh_f, b_f, hidden)
    yr = _lstm_ref(x, wih_r, whh_r, b_r, hidden, reverse=True)
    return jnp.concatenate([yf, yr], axis=-1)


def ref_forward(x_nchw, p, hidden):
    b, c, H, W = x_nchw.shape
    x_cl = jnp.transpose(x_nchw, (0, 2, 3, 1)).reshape(b, H * W, c)
    y = jnp.maximum(jnp.einsum('bpc,cf->bpf', x_cl, p['cnn_w']) + p['cnn_b'], 0.0)
    emb = y.mean(axis=1)                                    # (b, F)
    h1 = _bilstm_ref(emb, p['lstm1'], hidden)
    h2 = _bilstm_ref(h1, p['lstm2'], hidden)
    l1 = jnp.maximum(h1 @ p['w1'] + p['b1'], 0.0)
    l2 = jnp.maximum(h2 @ p['w2'] + p['b2'], 0.0)
    hid = h1 + h2 + l1 + l2
    out_pe = hid @ p['wpe'] + p['bpe']
    out_g = hid.mean(axis=0, keepdims=True) @ p['wg'] + p['bg']
    return out_pe.reshape(1, b, 1), out_g.reshape(1, 9)


if __name__ == "__main__":
    key = jax.random.PRNGKey(0)
    kx, kparam = jax.random.split(key)

    # 8 images per study (=> LSTM seq len 8), 4 input channels, 16x16 spatial,
    # embed_size stand-in = 128, LSTM_UNITS = 64 (2H = 128 lanes).
    B, C, H, W = 8, 4, 16, 16
    FEAT = 128
    HIDDEN = 64

    x = jax.random.normal(kx, (B, C, H, W), jnp.float32)
    params = init_params(kparam, C, FEAT, HIDDEN)
    kparams = pack_params(params, B, H * W, HIDDEN)   # packed once, at init

    fwd = jax.jit(functools.partial(neuralnet_forward, hidden=HIDDEN))
    out_pe, out_g = fwd(x, kparams)
    out_pe = jax.block_until_ready(out_pe)
    out_g = jax.block_until_ready(out_g)

    assert out_pe.shape == (1, B, 1)
    assert out_g.shape == (1, 9)

    # Cross-check against a pure-JAX f32 reference.  Tolerance reflects the
    # bf16 weight/operand mixed precision in the kernel (accumulation is f32).
    ref_pe, ref_g = ref_forward(x, params, HIDDEN)
    assert jnp.allclose(out_pe, ref_pe, atol=5e-3, rtol=5e-3)
    assert jnp.allclose(out_g, ref_g, atol=5e-3, rtol=5e-3)

    print("KERNEL_OK")
</pallas_src>

<mosaic_0001>
module attributes {stable_mosaic.version = 11 : i64} {
  func.func @neuralnet_kernel(%arg0: memref<2048x4xf32, #tpu.memory_space<vmem>>, %arg1: memref<8x2048xf32, #tpu.memory_space<vmem>>, %arg2: memref<4x128xf32, #tpu.memory_space<vmem>>, %arg3: memref<1x128xf32, #tpu.memory_space<vmem>>, %arg4: memref<128x1024xbf16, #tpu.memory_space<vmem>>, %arg5: memref<1x1024xf32, #tpu.memory_space<vmem>>, %arg6: memref<128x512xbf16, #tpu.memory_space<vmem>>, %arg7: memref<128x1024xbf16, #tpu.memory_space<any>>, %arg8: memref<1x1024xf32, #tpu.memory_space<vmem>>, %arg9: memref<128x512xbf16, #tpu.memory_space<any>>, %arg10: memref<256x256xbf16, #tpu.memory_space<any>>, %arg11: memref<1x256xf32, #tpu.memory_space<vmem>>, %arg12: memref<128x128xbf16, #tpu.memory_space<any>>, %arg13: memref<2x128xf32, #tpu.memory_space<vmem>>, %arg14: memref<9x128xf32, #tpu.memory_space<vmem>>, %arg15: memref<8x1024xf32, #tpu.memory_space<vmem>>, %arg16: memref<8x128xf32, #tpu.memory_space<vmem>>, %arg17: memref<8x128xf32, #tpu.memory_space<vmem>>, %arg18: memref<128x1024xbf16, #tpu.memory_space<vmem>>, %arg19: memref<128x512xbf16, #tpu.memory_space<vmem>>, %arg20: memref<256x256xbf16, #tpu.memory_space<vmem>>, %arg21: memref<128x128xbf16, #tpu.memory_space<vmem>>, %arg22: memref<4x!tpu.dma_semaphore, #tpu.memory_space<semaphore_mem>>) attributes {dimension_semantics = [], scalar_prefetch = 0 : i64, scratch_operands = 8 : i64, tpu.core_type = #tpu.core_type<tc>} {
    %c0_i32 = arith.constant 0 : i32
    %0 = tpu.memref_slice %arg22[%c0_i32] : memref<4x!tpu.dma_semaphore, #tpu.memory_space<semaphore_mem>> -> memref<1x!tpu.dma_semaphore, #tpu.memory_space<semaphore_mem>>
    %1 = tpu.memref_squeeze %0 : memref<1x!tpu.dma_semaphore, #tpu.memory_space<semaphore_mem>> -> memref<!tpu.dma_semaphore, #tpu.memory_space<semaphore_mem>>
    tpu.enqueue_dma source(%arg7 : memref<128x1024xbf16, #tpu.memory_space<any>>) target(%arg18 : memref<128x1024xbf16, #tpu.memory_space<vmem>>) target_semaphore(%1 : memref<!tpu.dma_semaphore, #tpu.memory_space<semaphore_mem>>)
    %c1_i32 = arith.constant 1 : i32
    %2 = tpu.memref_slice %arg22[%c1_i32] : memref<4x!tpu.dma_semaphore, #tpu.memory_space<semaphore_mem>> -> memref<1x!tpu.dma_semaphore, #tpu.memory_space<semaphore_mem>>
    %3 = tpu.memref_squeeze %2 : memref<1x!tpu.dma_semaphore, #tpu.memory_space<semaphore_mem>> -> memref<!tpu.dma_semaphore, #tpu.memory_space<semaphore_mem>>
    tpu.enqueue_dma source(%arg9 : memref<128x512xbf16, #tpu.memory_space<any>>) target(%arg19 : memref<128x512xbf16, #tpu.memory_space<vmem>>) target_semaphore(%3 : memref<!tpu.dma_semaphore, #tpu.memory_space<semaphore_mem>>)
    %c2_i32 = arith.constant 2 : i32
    %4 = tpu.memref_slice %arg22[%c2_i32] : memref<4x!tpu.dma_semaphore, #tpu.memory_space<semaphore_mem>> -> memref<1x!tpu.dma_semaphore, #tpu.memory_space<semaphore_mem>>
    %5 = tpu.memref_squeeze %4 : memref<1x!tpu.dma_semaphore, #tpu.memory_space<semaphore_mem>> -> memref<!tpu.dma_semaphore, #tpu.memory_space<semaphore_mem>>
    tpu.enqueue_dma source(%arg10 : memref<256x256xbf16, #tpu.memory_space<any>>) target(%arg20 : memref<256x256xbf16, #tpu.memory_space<vmem>>) target_semaphore(%5 : memref<!tpu.dma_semaphore, #tpu.memory_space<semaphore_mem>>)
    %c3_i32 = arith.constant 3 : i32
    %6 = tpu.memref_slice %arg22[%c3_i32] : memref<4x!tpu.dma_semaphore, #tpu.memory_space<semaphore_mem>> -> memref<1x!tpu.dma_semaphore, #tpu.memory_space<semaphore_mem>>
    %7 = tpu.memref_squeeze %6 : memref<1x!tpu.dma_semaphore, #tpu.memory_space<semaphore_mem>> -> memref<!tpu.dma_semaphore, #tpu.memory_space<semaphore_mem>>
    tpu.enqueue_dma source(%arg12 : memref<128x128xbf16, #tpu.memory_space<any>>) target(%arg21 : memref<128x128xbf16, #tpu.memory_space<vmem>>) target_semaphore(%7 : memref<!tpu.dma_semaphore, #tpu.memory_space<semaphore_mem>>)
    %c0 = arith.constant 0 : index
    %c0_0 = arith.constant 0 : index
    %8 = vector.load %arg0[%c0, %c0_0] : memref<2048x4xf32, #tpu.memory_space<vmem>>, vector<2048x4xf32>
    %c0_1 = arith.constant 0 : index
    %c0_2 = arith.constant 0 : index
    %9 = vector.load %arg2[%c0_1, %c0_2] : memref<4x128xf32, #tpu.memory_space<vmem>>, vector<4x128xf32>
    %cst = arith.constant dense<0.000000e+00> : vector<2048x128xf32>
    %10 = tpu.matmul %8, %9, %cst {dimension_numbers = #tpu.dot_dimension_numbers<[1], [0], [0], [1], [0, 0, 1, 1], [], []>} : vector<2048x4xf32>, vector<4x128xf32>, vector<2048x128xf32> -> vector<2048x128xf32>
    %c0_3 = arith.constant 0 : index
    %c0_4 = arith.constant 0 : index
    %11 = vector.load %arg3[%c0_3, %c0_4] : memref<1x128xf32, #tpu.memory_space<vmem>>, vector<1x128xf32>
    %12 = vector.broadcast %11 : vector<1x128xf32> to vector<2048x128xf32>
    %13 = arith.addf %10, %12 : vector<2048x128xf32>
    %cst_5 = arith.constant 0.000000e+00 : f32
    %14 = vector.broadcast %cst_5 : f32 to vector<2048x128xf32>
    %15 = arith.maximumf %13, %14 : vector<2048x128xf32>
    %c0_6 = arith.constant 0 : index
    %c0_7 = arith.constant 0 : index
    %16 = vector.load %arg1[%c0_6, %c0_7] : memref<8x2048xf32, #tpu.memory_space<vmem>>, vector<8x2048xf32>
    %cst_8 = arith.constant dense<0.000000e+00> : vector<8x128xf32>
    %17 = tpu.matmul %16, %15, %cst_8 {dimension_numbers = #tpu.dot_dimension_numbers<[1], [0], [0], [1], [0, 0, 1, 1], [], []>} : vector<8x2048xf32>, vector<2048x128xf32>, vector<8x128xf32> -> vector<8x128xf32>
    %18 = tpu.iota {dimensions = array<i32: 1>} : vector<8x128xi32>
    %c64_i32 = arith.constant 64 : i32
    %19 = vector.broadcast %c64_i32 : i32 to vector<8x128xi32>
    %20 = arith.cmpi slt, %18, %19 : vector<8x128xi32>
    %21 = arith.truncf %17 : vector<8x128xf32> to vector<8x128xbf16>
    %c0_9 = arith.constant 0 : index
    %c0_10 = arith.constant 0 : index
    %22 = vector.load %arg4[%c0_9, %c0_10] : memref<128x1024xbf16, #tpu.memory_space<vmem>>, vector<128x1024xbf16>
    %cst_11 = arith.constant dense<0.000000e+00> : vector<8x1024xf32>
    %23 = tpu.matmul %21, %22, %cst_11 {dimension_numbers = #tpu.dot_dimension_numbers<[1], [0], [0], [1], [0, 0, 1, 1], [], []>} : vector<8x128xbf16>, vector<128x1024xbf16>, vector<8x1024xf32> -> vector<8x1024xf32>
    %c0_12 = arith.constant 0 : index
    %c0_13 = arith.constant 0 : index
    %24 = vector.load %arg5[%c0_12, %c0_13] : memref<1x1024xf32, #tpu.memory_space<vmem>>, vector<1x1024xf32>
    %25 = vector.broadcast %24 : vector<1x1024xf32> to vector<8x1024xf32>
    %26 = arith.addf %23, %25 : vector<8x1024xf32>
    %c0_14 = arith.constant 0 : index
    %c0_15 = arith.constant 0 : index
    %27 = vector.load %arg15[%c0_14, %c0_15] : memref<8x1024xf32, #tpu.memory_space<vmem>>, vector<8x1024xf32>
    tpu.vector_store %arg15[%c0_14, %c0_15], %26 {strides = array<i32>} : memref<8x1024xf32, #tpu.memory_space<vmem>>, vector<8x1024xf32>,
    %c0_16 = arith.constant 0 : index
    %c0_17 = arith.constant 0 : index
    %28 = vector.load %arg6[%c0_16, %c0_17] : memref<128x512xbf16, #tpu.memory_space<vmem>>, vector<128x512xbf16>
    %cst_18 = arith.constant 0.000000e+00 : f32
    %29 = vector.broadcast %cst_18 : f32 to vector<1x128xf32>
    %c0_i32_19 = arith.constant 0 : i32
    %c7_i32 = arith.constant 7 : i32
    %30 = arith.subi %c7_i32, %c0_i32_19 : i32
    %31 = arith.index_cast %c0_i32_19 : i32 to index
    %c0_20 = arith.constant 0 : index
    %32 = vector.load %arg15[%31, %c0_20] : memref<8x1024xf32, #tpu.memory_space<vmem>>, vector<1x512xf32>
    %33 = arith.index_cast %30 : i32 to index
    %c512 = arith.constant 512 : index
    %34 = vector.load %arg15[%33, %c512] : memref<8x1024xf32, #tpu.memory_space<vmem>>, vector<1x512xf32>
    %35 = arith.addf %32, %34 : vector<1x512xf32>
    %36 = arith.truncf %29 : vector<1x128xf32> to vector<1x128xbf16>
    %cst_21 = arith.constant dense<0.000000e+00> : vector<1x512xf32>
    %37 = tpu.matmul %36, %28, %cst_21 {dimension_numbers = #tpu.dot_dimension_numbers<[1], [0], [0], [1], [0, 0, 1, 1], [], []>} : vector<1x128xbf16>, vector<128x512xbf16>, vector<1x512xf32> -> vector<1x512xf32>
    %38 = arith.addf %35, %37 : vector<1x512xf32>
    %39 = vector.extract_strided_slice %38 {offsets = [0, 0], sizes = [1, 384], strides = [1, 1]} : vector<1x512xf32> to vector<1x384xf32>
    %40 = arith.negf %39 : vector<1x384xf32>
    %41 = math.exp %40 : vector<1x384xf32>
    %cst_22 = arith.constant 1.000000e+00 : f32
    %42 = vector.broadcast %cst_22 : f32 to vector<1x384xf32>
    %43 = arith.addf %42, %41 : vector<1x384xf32>
    %44 = arith.divf %42, %43 : vector<1x384xf32>
    %45 = vector.extract_strided_slice %38 {offsets = [0, 384], sizes = [1, 128], strides = [1, 1]} : vector<1x512xf32> to vector<1x128xf32>
    %46 = math.tanh %45 : vector<1x128xf32>
    %47 = vector.extract_strided_slice %44 {offsets = [0, 0], sizes = [1, 128], strides = [1, 1]} : vector<1x384xf32> to vector<1x128xf32>
    %48 = vector.extract_strided_slice %44 {offsets = [0, 128], sizes = [1, 128], strides = [1, 1]} : vector<1x384xf32> to vector<1x128xf32>
    %49 = vector.extract_strided_slice %44 {offsets = [0, 256], sizes = [1, 128], strides = [1, 1]} : vector<1x384xf32> to vector<1x128xf32>
    %50 = arith.mulf %48, %29 : vector<1x128xf32>
    %51 = arith.mulf %47, %46 : vector<1x128xf32>
    %52 = arith.addf %50, %51 : vector<1x128xf32>
    %53 = math.tanh %52 : vector<1x128xf32>
    %54 = arith.mulf %49, %53 : vector<1x128xf32>
    %55 = arith.index_cast %c0_i32_19 : i32 to index
    %c0_23 = arith.constant 0 : index
    %56 = vector.load %arg16[%55, %c0_23] : memref<8x128xf32, #tpu.memory_space<vmem>>, vector<1x128xf32>
    tpu.vector_store %arg16[%55, %c0_23], %54 {strides = array<i32>} : memref<8x128xf32, #tpu.memory_space<vmem>>, vector<1x128xf32>,
    %57 = arith.index_cast %30 : i32 to index
    %c0_24 = arith.constant 0 : index
    %58 = vector.load %arg17[%57, %c0_24] : memref<8x128xf32, #tpu.memory_space<vmem>>, vector<1x128xf32>
    tpu.vector_store %arg17[%57, %c0_24], %54 {strides = array<i32>} : memref<8x128xf32, #tpu.memory_space<vmem>>, vector<1x128xf32>,
    %c1_i32_25 = arith.constant 1 : i32
    %c7_i32_26 = arith.constant 7 : i32
    %59 = arith.subi %c7_i32_26, %c1_i32_25 : i32
    %60 = arith.index_cast %c1_i32_25 : i32 to index
    %c0_27 = arith.constant 0 : index
    %61 = vector.load %arg15[%60, %c0_27] : memref<8x1024xf32, #tpu.memory_space<vmem>>, vector<1x512xf32>
    %62 = arith.index_cast %59 : i32 to index
    %c512_28 = arith.constant 512 : index
    %63 = vector.load %arg15[%62, %c512_28] : memref<8x1024xf32, #tpu.memory_space<vmem>>, vector<1x512xf32>
    %64 = arith.addf %61, %63 : vector<1x512xf32>
    %65 = arith.truncf %54 : vector<1x128xf32> to vector<1x128xbf16>
    %cst_29 = arith.constant dense<0.000000e+00> : vector<1x512xf32>
    %66 = tpu.matmul %65, %28, %cst_29 {dimension_numbers = #tpu.dot_dimension_numbers<[1], [0], [0], [1], [0, 0, 1, 1], [], []>} : vector<1x128xbf16>, vector<128x512xbf16>, vector<1x512xf32> -> vector<1x512xf32>
    %67 = arith.addf %64, %66 : vector<1x512xf32>
    %68 = vector.extract_strided_slice %67 {offsets = [0, 0], sizes = [1, 384], strides = [1, 1]} : vector<1x512xf32> to vector<1x384xf32>
    %69 = arith.negf %68 : vector<1x384xf32>
    %70 = math.exp %69 : vector<1x384xf32>
    %cst_30 = arith.constant 1.000000e+00 : f32
    %71 = vector.broadcast %cst_30 : f32 to vector<1x384xf32>
    %72 = arith.addf %71, %70 : vector<1x384xf32>
    %73 = arith.divf %71, %72 : vector<1x384xf32>
    %74 = vector.extract_strided_slice %67 {offsets = [0, 384], sizes = [1, 128], strides = [1, 1]} : vector<1x512xf32> to vector<1x128xf32>
    %75 = math.tanh %74 : vector<1x128xf32>
    %76 = vector.extract_strided_slice %73 {offsets = [0, 0], sizes = [1, 128], strides = [1, 1]} : vector<1x384xf32> to vector<1x128xf32>
    %77 = vector.extract_strided_slice %73 {offsets = [0, 128], sizes = [1, 128], strides = [1, 1]} : vector<1x384xf32> to vector<1x128xf32>
    %78 = vector.extract_strided_slice %73 {offsets = [0, 256], sizes = [1, 128], strides = [1, 1]} : vector<1x384xf32> to vector<1x128xf32>
    %79 = arith.mulf %77, %52 : vector<1x128xf32>
    %80 = arith.mulf %76, %75 : vector<1x128xf32>
    %81 = arith.addf %79, %80 : vector<1x128xf32>
    %82 = math.tanh %81 : vector<1x128xf32>
    %83 = arith.mulf %78, %82 : vector<1x128xf32>
    %84 = arith.index_cast %c1_i32_25 : i32 to index
    %c0_31 = arith.constant 0 : index
    %85 = vector.load %arg16[%84, %c0_31] : memref<8x128xf32, #tpu.memory_space<vmem>>, vector<1x128xf32>
    tpu.vector_store %arg16[%84, %c0_31], %83 {strides = array<i32>} : memref<8x128xf32, #tpu.memory_space<vmem>>, vector<1x128xf32>,
    %86 = arith.index_cast %59 : i32 to index
    %c0_32 = arith.constant 0 : index
    %87 = vector.load %arg17[%86, %c0_32] : memref<8x128xf32, #tpu.memory_space<vmem>>, vector<1x128xf32>
    tpu.vector_store %arg17[%86, %c0_32], %83 {strides = array<i32>} : memref<8x128xf32, #tpu.memory_space<vmem>>, vector<1x128xf32>,
    %c2_i32_33 = arith.constant 2 : i32
    %c7_i32_34 = arith.constant 7 : i32
    %88 = arith.subi %c7_i32_34, %c2_i32_33 : i32
    %89 = arith.index_cast %c2_i32_33 : i32 to index
    %c0_35 = arith.constant 0 : index
    %90 = vector.load %arg15[%89, %c0_35] : memref<8x1024xf32, #tpu.memory_space<vmem>>, vector<1x512xf32>
    %91 = arith.index_cast %88 : i32 to index
    %c512_36 = arith.constant 512 : index
    %92 = vector.load %arg15[%91, %c512_36] : memref<8x1024xf32, #tpu.memory_space<vmem>>, vector<1x512xf32>
    %93 = arith.addf %90, %92 : vector<1x512xf32>
    %94 = arith.truncf %83 : vector<1x128xf32> to vector<1x128xbf16>
    %cst_37 = arith.constant dense<0.000000e+00> : vector<1x512xf32>
    %95 = tpu.matmul %94, %28, %cst_37 {dimension_numbers = #tpu.dot_dimension_numbers<[1], [0], [0], [1], [0, 0, 1, 1], [], []>} : vector<1x128xbf16>, vector<128x512xbf16>, vector<1x512xf32> -> vector<1x512xf32>
    %96 = arith.addf %93, %95 : vector<1x512xf32>
    %97 = vector.extract_strided_slice %96 {offsets = [0, 0], sizes = [1, 384], strides = [1, 1]} : vector<1x512xf32> to vector<1x384xf32>
    %98 = arith.negf %97 : vector<1x384xf32>
    %99 = math.exp %98 : vector<1x384xf32>
    %cst_38 = arith.constant 1.000000e+00 : f32
    %100 = vector.broadcast %cst_38 : f32 to vector<1x384xf32>
    %101 = arith.addf %100, %99 : vector<1x384xf32>
    %102 = arith.divf %100, %101 : vector<1x384xf32>
    %103 = vector.extract_strided_slice %96 {offsets = [0, 384], sizes = [1, 128], strides = [1, 1]} : vector<1x512xf32> to vector<1x128xf32>
    %104 = math.tanh %103 : vector<1x128xf32>
    %105 = vector.extract_strided_slice %102 {offsets = [0, 0], sizes = [1, 128], strides = [1, 1]} : vector<1x384xf32> to vector<1x128xf32>
    %106 = vector.extract_strided_slice %102 {offsets = [0, 128], sizes = [1, 128], strides = [1, 1]} : vector<1x384xf32> to vector<1x128xf32>
    %107 = vector.extract_strided_slice %102 {offsets = [0, 256], sizes = [1, 128], strides = [1, 1]} : vector<1x384xf32> to vector<1x128xf32>
    %108 = arith.mulf %106, %81 : vector<1x128xf32>
    %109 = arith.mulf %105, %104 : vector<1x128xf32>
    %110 = arith.addf %108, %109 : vector<1x128xf32>
    %111 = math.tanh %110 : vector<1x128xf32>
    %112 = arith.mulf %107, %111 : vector<1x128xf32>
    %113 = arith.index_cast %c2_i32_33 : i32 to index
    %c0_39 = arith.constant 0 : index
    %114 = vector.load %arg16[%113, %c0_39] : memref<8x128xf32, #tpu.memory_space<vmem>>, vector<1x128xf32>
    tpu.vector_store %arg16[%113, %c0_39], %112 {strides = array<i32>} : memref<8x128xf32, #tpu.memory_space<vmem>>, vector<1x128xf32>,
    %115 = arith.index_cast %88 : i32 to index
    %c0_40 = arith.constant 0 : index
    %116 = vector.load %arg17[%115, %c0_40] : memref<8x128xf32, #tpu.memory_space<vmem>>, vector<1x128xf32>
    tpu.vector_store %arg17[%115, %c0_40], %112 {strides = array<i32>} : memref<8x128xf32, #tpu.memory_space<vmem>>, vector<1x128xf32>,
    %c3_i32_41 = arith.constant 3 : i32
    %c7_i32_42 = arith.constant 7 : i32
    %117 = arith.subi %c7_i32_42, %c3_i32_41 : i32
    %118 = arith.index_cast %c3_i32_41 : i32 to index
    %c0_43 = arith.constant 0 : index
    %119 = vector.load %arg15[%118, %c0_43] : memref<8x1024xf32, #tpu.memory_space<vmem>>, vector<1x512xf32>
    %120 = arith.index_cast %117 : i32 to index
    %c512_44 = arith.constant 512 : index
    %121 = vector.load %arg15[%120, %c512_44] : memref<8x1024xf32, #tpu.memory_space<vmem>>, vector<1x512xf32>
    %122 = arith.addf %119, %121 : vector<1x512xf32>
    %123 = arith.truncf %112 : vector<1x128xf32> to vector<1x128xbf16>
    %cst_45 = arith.constant dense<0.000000e+00> : vector<1x512xf32>
    %124 = tpu.matmul %123, %28, %cst_45 {dimension_numbers = #tpu.dot_dimension_numbers<[1], [0], [0], [1], [0, 0, 1, 1], [], []>} : vector<1x128xbf16>, vector<128x512xbf16>, vector<1x512xf32> -> vector<1x512xf32>
    %125 = arith.addf %122, %124 : vector<1x512xf32>
    %126 = vector.extract_strided_slice %125 {offsets = [0, 0], sizes = [1, 384], strides = [1, 1]} : vector<1x512xf32> to vector<1x384xf32>
    %127 = arith.negf %126 : vector<1x384xf32>
    %128 = math.exp %127 : vector<1x384xf32>
    %cst_46 = arith.constant 1.000000e+00 : f32
    %129 = vector.broadcast %cst_46 : f32 to vector<1x384xf32>
    %130 = arith.addf %129, %128 : vector<1x384xf32>
    %131 = arith.divf %129, %130 : vector<1x384xf32>
    %132 = vector.extract_strided_slice %125 {offsets = [0, 384], sizes = [1, 128], strides = [1, 1]} : vector<1x512xf32> to vector<1x128xf32>
    %133 = math.tanh %132 : vector<1x128xf32>
    %134 = vector.extract_strided_slice %131 {offsets = [0, 0], sizes = [1, 128], strides = [1, 1]} : vector<1x384xf32> to vector<1x128xf32>
    %135 = vector.extract_strided_slice %131 {offsets = [0, 128], sizes = [1, 128], strides = [1, 1]} : vector<1x384xf32> to vector<1x128xf32>
    %136 = vector.extract_strided_slice %131 {offsets = [0, 256], sizes = [1, 128], strides = [1, 1]} : vector<1x384xf32> to vector<1x128xf32>
    %137 = arith.mulf %135, %110 : vector<1x128xf32>
    %138 = arith.mulf %134, %133 : vector<1x128xf32>
    %139 = arith.addf %137, %138 : vector<1x128xf32>
    %140 = math.tanh %139 : vector<1x128xf32>
    %141 = arith.mulf %136, %140 : vector<1x128xf32>
    %142 = arith.index_cast %c3_i32_41 : i32 to index
    %c0_47 = arith.constant 0 : index
    %143 = vector.load %arg16[%142, %c0_47] : memref<8x128xf32, #tpu.memory_space<vmem>>, vector<1x128xf32>
    tpu.vector_store %arg16[%142, %c0_47], %141 {strides = array<i32>} : memref<8x128xf32, #tpu.memory_space<vmem>>, vector<1x128xf32>,
    %144 = arith.index_cast %117 : i32 to index
    %c0_48 = arith.constant 0 : index
    %145 = vector.load %arg17[%144, %c0_48] : memref<8x128xf32, #tpu.memory_space<vmem>>, vector<1x128xf32>
    tpu.vector_store %arg17[%144, %c0_48], %141 {strides = array<i32>} : memref<8x128xf32, #tpu.memory_space<vmem>>, vector<1x128xf32>,
    %c4_i32 = arith.constant 4 : i32
    %c7_i32_49 = arith.constant 7 : i32
    %146 = arith.subi %c7_i32_49, %c4_i32 : i32
    %147 = arith.index_cast %c4_i32 : i32 to index
    %c0_50 = arith.constant 0 : index
    %148 = vector.load %arg15[%147, %c0_50] : memref<8x1024xf32, #tpu.memory_space<vmem>>, vector<1x512xf32>
    %149 = arith.index_cast %146 : i32 to index
    %c512_51 = arith.constant 512 : index
    %150 = vector.load %arg15[%149, %c512_51] : memref<8x1024xf32, #tpu.memory_space<vmem>>, vector<1x512xf32>
    %151 = arith.addf %148, %150 : vector<1x512xf32>
    %152 = arith.truncf %141 : vector<1x128xf32> to vector<1x128xbf16>
    %cst_52 = arith.constant dense<0.000000e+00> : vector<1x512xf32>
    %153 = tpu.matmul %152, %28, %cst_52 {dimension_numbers = #tpu.dot_dimension_numbers<[1], [0], [0], [1], [0, 0, 1, 1], [], []>} : vector<1x128xbf16>, vector<128x512xbf16>, vector<1x512xf32> -> vector<1x512xf32>
    %154 = arith.addf %151, %153 : vector<1x512xf32>
    %155 = vector.extract_strided_slice %154 {offsets = [0, 0], sizes = [1, 384], strides = [1, 1]} : vector<1x512xf32> to vector<1x384xf32>
    %156 = arith.negf %155 : vector<1x384xf32>
    %157 = math.exp %156 : vector<1x384xf32>
    %cst_53 = arith.constant 1.000000e+00 : f32
    %158 = vector.broadcast %cst_53 : f32 to vector<1x384xf32>
    %159 = arith.addf %158, %157 : vector<1x384xf32>
    %160 = arith.divf %158, %159 : vector<1x384xf32>
    %161 = vector.extract_strided_slice %154 {offsets = [0, 384], sizes = [1, 128], strides = [1, 1]} : vector<1x512xf32> to vector<1x128xf32>
    %162 = math.tanh %161 : vector<1x128xf32>
    %163 = vector.extract_strided_slice %160 {offsets = [0, 0], sizes = [1, 128], strides = [1, 1]} : vector<1x384xf32> to vector<1x128xf32>
    %164 = vector.extract_strided_slice %160 {offsets = [0, 128], sizes = [1, 128], strides = [1, 1]} : vector<1x384xf32> to vector<1x128xf32>
    %165 = vector.extract_strided_slice %160 {offsets = [0, 256], sizes = [1, 128], strides = [1, 1]} : vector<1x384xf32> to vector<1x128xf32>
    %166 = arith.mulf %164, %139 : vector<1x128xf32>
    %167 = arith.mulf %163, %162 : vector<1x128xf32>
    %168 = arith.addf %166, %167 : vector<1x128xf32>
    %169 = math.tanh %168 : vector<1x128xf32>
    %170 = arith.mulf %165, %169 : vector<1x128xf32>
    %171 = arith.index_cast %c4_i32 : i32 to index
    %c0_54 = arith.constant 0 : index
    %172 = vector.load %arg16[%171, %c0_54] : memref<8x128xf32, #tpu.memory_space<vmem>>, vector<1x128xf32>
    tpu.vector_store %arg16[%171, %c0_54], %170 {strides = array<i32>} : memref<8x128xf32, #tpu.memory_space<vmem>>, vector<1x128xf32>,
    %173 = arith.index_cast %146 : i32 to index
    %c0_55 = arith.constant 0 : index
    %174 = vector.load %arg17[%173, %c0_55] : memref<8x128xf32, #tpu.memory_space<vmem>>, vector<1x128xf32>
    tpu.vector_store %arg17[%173, %c0_55], %170 {strides = array<i32>} : memref<8x128xf32, #tpu.memory_space<vmem>>, vector<1x128xf32>,
    %c5_i32 = arith.constant 5 : i32
    %c7_i32_56 = arith.constant 7 : i32
    %175 = arith.subi %c7_i32_56, %c5_i32 : i32
    %176 = arith.index_cast %c5_i32 : i32 to index
    %c0_57 = arith.constant 0 : index
    %177 = vector.load %arg15[%176, %c0_57] : memref<8x1024xf32, #tpu.memory_space<vmem>>, vector<1x512xf32>
    %178 = arith.index_cast %175 : i32 to index
    %c512_58 = arith.constant 512 : index
    %179 = vector.load %arg15[%178, %c512_58] : memref<8x1024xf32, #tpu.memory_space<vmem>>, vector<1x512xf32>
    %180 = arith.addf %177, %179 : vector<1x512xf32>
    %181 = arith.truncf %170 : vector<1x128xf32> to vector<1x128xbf16>
    %cst_59 = arith.constant dense<0.000000e+00> : vector<1x512xf32>
    %182 = tpu.matmul %181, %28, %cst_59 {dimension_numbers = #tpu.dot_dimension_numbers<[1], [0], [0], [1], [0, 0, 1, 1], [], []>} : vector<1x128xbf16>, vector<128x512xbf16>, vector<1x512xf32> -> vector<1x512xf32>
    %183 = arith.addf %180, %182 : vector<1x512xf32>
    %184 = vector.extract_strided_slice %183 {offsets = [0, 0], sizes = [1, 384], strides = [1, 1]} : vector<1x512xf32> to vector<1x384xf32>
    %185 = arith.negf %184 : vector<1x384xf32>
    %186 = math.exp %185 : vector<1x384xf32>
    %cst_60 = arith.constant 1.000000e+00 : f32
    %187 = vector.broadcast %cst_60 : f32 to vector<1x384xf32>
    %188 = arith.addf %187, %186 : vector<1x384xf32>
    %189 = arith.divf %187, %188 : vector<1x384xf32>
    %190 = vector.extract_strided_slice %183 {offsets = [0, 384], sizes = [1, 128], strides = [1, 1]} : vector<1x512xf32> to vector<1x128xf32>
    %191 = math.tanh %190 : vector<1x128xf32>
    %192 = vector.extract_strided_slice %189 {offsets = [0, 0], sizes = [1, 128], strides = [1, 1]} : vector<1x384xf32> to vector<1x128xf32>
    %193 = vector.extract_strided_slice %189 {offsets = [0, 128], sizes = [1, 128], strides = [1, 1]} : vector<1x384xf32> to vector<1x128xf32>
    %194 = vector.extract_strided_slice %189 {offsets = [0, 256], sizes = [1, 128], strides = [1, 1]} : vector<1x384xf32> to vector<1x128xf32>
    %195 = arith.mulf %193, %168 : vector<1x128xf32>
    %196 = arith.mulf %192, %191 : vector<1x128xf32>
    %197 = arith.addf %195, %196 : vector<1x128xf32>
    %198 = math.tanh %197 : vector<1x128xf32>
    %199 = arith.mulf %194, %198 : vector<1x128xf32>
    %200 = arith.index_cast %c5_i32 : i32 to index
    %c0_61 = arith.constant 0 : index
    %201 = vector.load %arg16[%200, %c0_61] : memref<8x128xf32, #tpu.memory_space<vmem>>, vector<1x128xf32>
    tpu.vector_store %arg16[%200, %c0_61], %199 {strides = array<i32>} : memref<8x128xf32, #tpu.memory_space<vmem>>, vector<1x128xf32>,
    %202 = arith.index_cast %175 : i32 to index
    %c0_62 = arith.constant 0 : index
    %203 = vector.load %arg17[%202, %c0_62] : memref<8x128xf32, #tpu.memory_space<vmem>>, vector<1x128xf32>
    tpu.vector_store %arg17[%202, %c0_62], %199 {strides = array<i32>} : memref<8x128xf32, #tpu.memory_space<vmem>>, vector<1x128xf32>,
    %c6_i32 = arith.constant 6 : i32
    %c7_i32_63 = arith.constant 7 : i32
    %204 = arith.subi %c7_i32_63, %c6_i32 : i32
    %205 = arith.index_cast %c6_i32 : i32 to index
    %c0_64 = arith.constant 0 : index
    %206 = vector.load %arg15[%205, %c0_64] : memref<8x1024xf32, #tpu.memory_space<vmem>>, vector<1x512xf32>
    %207 = arith.index_cast %204 : i32 to index
    %c512_65 = arith.constant 512 : index
    %208 = vector.load %arg15[%207, %c512_65] : memref<8x1024xf32, #tpu.memory_space<vmem>>, vector<1x512xf32>
    %209 = arith.addf %206, %208 : vector<1x512xf32>
    %210 = arith.truncf %199 : vector<1x128xf32> to vector<1x128xbf16>
    %cst_66 = arith.constant dense<0.000000e+00> : vector<1x512xf32>
    %211 = tpu.matmul %210, %28, %cst_66 {dimension_numbers = #tpu.dot_dimension_numbers<[1], [0], [0], [1], [0, 0, 1, 1], [], []>} : vector<1x128xbf16>, vector<128x512xbf16>, vector<1x512xf32> -> vector<1x512xf32>
    %212 = arith.addf %209, %211 : vector<1x512xf32>
    %213 = vector.extract_strided_slice %212 {offsets = [0, 0], sizes = [1, 384], strides = [1, 1]} : vector<1x512xf32> to vector<1x384xf32>
    %214 = arith.negf %213 : vector<1x384xf32>
    %215 = math.exp %214 : vector<1x384xf32>
    %cst_67 = arith.constant 1.000000e+00 : f32
    %216 = vector.broadcast %cst_67 : f32 to vector<1x384xf32>
    %217 = arith.addf %216, %215 : vector<1x384xf32>
    %218 = arith.divf %216, %217 : vector<1x384xf32>
    %219 = vector.extract_strided_slice %212 {offsets = [0, 384], sizes = [1, 128], strides = [1, 1]} : vector<1x512xf32> to vector<1x128xf32>
    %220 = math.tanh %219 : vector<1x128xf32>
    %221 = vector.extract_strided_slice %218 {offsets = [0, 0], sizes = [1, 128], strides = [1, 1]} : vector<1x384xf32> to vector<1x128xf32>
    %222 = vector.extract_strided_slice %218 {offsets = [0, 128], sizes = [1, 128], strides = [1, 1]} : vector<1x384xf32> to vector<1x128xf32>
    %223 = vector.extract_strided_slice %218 {offsets = [0, 256], sizes = [1, 128], strides = [1, 1]} : vector<1x384xf32> to vector<1x128xf32>
    %224 = arith.mulf %222, %197 : vector<1x128xf32>
    %225 = arith.mulf %221, %220 : vector<1x128xf32>
    %226 = arith.addf %224, %225 : vector<1x128xf32>
    %227 = math.tanh %226 : vector<1x128xf32>
    %228 = arith.mulf %223, %227 : vector<1x128xf32>
    %229 = arith.index_cast %c6_i32 : i32 to index
    %c0_68 = arith.constant 0 : index
    %230 = vector.load %arg16[%229, %c0_68] : memref<8x128xf32, #tpu.memory_space<vmem>>, vector<1x128xf32>
    tpu.vector_store %arg16[%229, %c0_68], %228 {strides = array<i32>} : memref<8x128xf32, #tpu.memory_space<vmem>>, vector<1x128xf32>,
    %231 = arith.index_cast %204 : i32 to index
    %c0_69 = arith.constant 0 : index
    %232 = vector.load %arg17[%231, %c0_69] : memref<8x128xf32, #tpu.memory_space<vmem>>, vector<1x128xf32>
    tpu.vector_store %arg17[%231, %c0_69], %228 {strides = array<i32>} : memref<8x128xf32, #tpu.memory_space<vmem>>, vector<1x128xf32>,
    %c7_i32_70 = arith.constant 7 : i32
    %c7_i32_71 = arith.constant 7 : i32
    %233 = arith.subi %c7_i32_71, %c7_i32_70 : i32
    %234 = arith.index_cast %c7_i32_70 : i32 to index
    %c0_72 = arith.constant 0 : index
    %235 = vector.load %arg15[%234, %c0_72] : memref<8x1024xf32, #tpu.memory_space<vmem>>, vector<1x512xf32>
    %236 = arith.index_cast %233 : i32 to index
    %c512_73 = arith.constant 512 : index
    %237 = vector.load %arg15[%236, %c512_73] : memref<8x1024xf32, #tpu.memory_space<vmem>>, vector<1x512xf32>
    %238 = arith.addf %235, %237 : vector<1x512xf32>
    %239 = arith.truncf %228 : vector<1x128xf32> to vector<1x128xbf16>
    %cst_74 = arith.constant dense<0.000000e+00> : vector<1x512xf32>
    %240 = tpu.matmul %239, %28, %cst_74 {dimension_numbers = #tpu.dot_dimension_numbers<[1], [0], [0], [1], [0, 0, 1, 1], [], []>} : vector<1x128xbf16>, vector<128x512xbf16>, vector<1x512xf32> -> vector<1x512xf32>
    %241 = arith.addf %238, %240 : vector<1x512xf32>
    %242 = vector.extract_strided_slice %241 {offsets = [0, 0], sizes = [1, 384], strides = [1, 1]} : vector<1x512xf32> to vector<1x384xf32>
    %243 = arith.negf %242 : vector<1x384xf32>
    %244 = math.exp %243 : vector<1x384xf32>
    %cst_75 = arith.constant 1.000000e+00 : f32
    %245 = vector.broadcast %cst_75 : f32 to vector<1x384xf32>
    %246 = arith.addf %245, %244 : vector<1x384xf32>
    %247 = arith.divf %245, %246 : vector<1x384xf32>
    %248 = vector.extract_strided_slice %241 {offsets = [0, 384], sizes = [1, 128], strides = [1, 1]} : vector<1x512xf32> to vector<1x128xf32>
    %249 = math.tanh %248 : vector<1x128xf32>
    %250 = vector.extract_strided_slice %247 {offsets = [0, 0], sizes = [1, 128], strides = [1, 1]} : vector<1x384xf32> to vector<1x128xf32>
    %251 = vector.extract_strided_slice %247 {offsets = [0, 128], sizes = [1, 128], strides = [1, 1]} : vector<1x384xf32> to vector<1x128xf32>
    %252 = vector.extract_strided_slice %247 {offsets = [0, 256], sizes = [1, 128], strides = [1, 1]} : vector<1x384xf32> to vector<1x128xf32>
    %253 = arith.mulf %251, %226 : vector<1x128xf32>
    %254 = arith.mulf %250, %249 : vector<1x128xf32>
    %255 = arith.addf %253, %254 : vector<1x128xf32>
    %256 = math.tanh %255 : vector<1x128xf32>
    %257 = arith.mulf %252, %256 : vector<1x128xf32>
    %258 = arith.index_cast %c7_i32_70 : i32 to index
    %c0_76 = arith.constant 0 : index
    %259 = vector.load %arg16[%258, %c0_76] : memref<8x128xf32, #tpu.memory_space<vmem>>, vector<1x128xf32>
    tpu.vector_store %arg16[%258, %c0_76], %257 {strides = array<i32>} : memref<8x128xf32, #tpu.memory_space<vmem>>, vector<1x128xf32>,
    %260 = arith.index_cast %233 : i32 to index
    %c0_77 = arith.constant 0 : index
    %261 = vector.load %arg17[%260, %c0_77] : memref<8x128xf32, #tpu.memory_space<vmem>>, vector<1x128xf32>
    tpu.vector_store %arg17[%260, %c0_77], %257 {strides = array<i32>} : memref<8x128xf32, #tpu.memory_space<vmem>>, vector<1x128xf32>,
    %c8_i32 = arith.constant 8 : i32
    %c0_78 = arith.constant 0 : index
    %c0_79 = arith.constant 0 : index
    %262 = vector.load %arg16[%c0_78, %c0_79] : memref<8x128xf32, #tpu.memory_space<vmem>>, vector<8x128xf32>
    %c0_80 = arith.constant 0 : index
    %c0_81 = arith.constant 0 : index
    %263 = vector.load %arg17[%c0_80, %c0_81] : memref<8x128xf32, #tpu.memory_space<vmem>>, vector<8x128xf32>
    %264 = arith.select %20, %262, %263 : vector<8x128xi1>, vector<8x128xf32>
    %c0_i32_82 = arith.constant 0 : i32
    %265 = tpu.memref_slice %arg22[%c0_i32_82] : memref<4x!tpu.dma_semaphore, #tpu.memory_space<semaphore_mem>> -> memref<1x!tpu.dma_semaphore, #tpu.memory_space<semaphore_mem>>
    %266 = tpu.memref_squeeze %265 : memref<1x!tpu.dma_semaphore, #tpu.memory_space<semaphore_mem>> -> memref<!tpu.dma_semaphore, #tpu.memory_space<semaphore_mem>>
    tpu.wait_dma2 semaphore(%266 : memref<!tpu.dma_semaphore, #tpu.memory_space<semaphore_mem>>) src(%arg7 : memref<128x1024xbf16, #tpu.memory_space<any>>) dst(%arg18 : memref<128x1024xbf16, #tpu.memory_space<vmem>>)
    %c1_i32_83 = arith.constant 1 : i32
    %267 = tpu.memref_slice %arg22[%c1_i32_83] : memref<4x!tpu.dma_semaphore, #tpu.memory_space<semaphore_mem>> -> memref<1x!tpu.dma_semaphore, #tpu.memory_space<semaphore_mem>>
    %268 = tpu.memref_squeeze %267 : memref<1x!tpu.dma_semaphore, #tpu.memory_space<semaphore_mem>> -> memref<!tpu.dma_semaphore, #tpu.memory_space<semaphore_mem>>
    tpu.wait_dma2 semaphore(%268 : memref<!tpu.dma_semaphore, #tpu.memory_space<semaphore_mem>>) src(%arg9 : memref<128x512xbf16, #tpu.memory_space<any>>) dst(%arg19 : memref<128x512xbf16, #tpu.memory_space<vmem>>)
    %269 = arith.truncf %264 : vector<8x128xf32> to vector<8x128xbf16>
    %c0_84 = arith.constant 0 : index
    %c0_85 = arith.constant 0 : index
    %270 = vector.load %arg18[%c0_84, %c0_85] : memref<128x1024xbf16, #tpu.memory_space<vmem>>, vector<128x1024xbf16>
    %cst_86 = arith.constant dense<0.000000e+00> : vector<8x1024xf32>
    %271 = tpu.matmul %269, %270, %cst_86 {dimension_numbers = #tpu.dot_dimension_numbers<[1], [0], [0], [1], [0, 0, 1, 1], [], []>} : vector<8x128xbf16>, vector<128x1024xbf16>, vector<8x1024xf32> -> vector<8x1024xf32>
    %c0_87 = arith.constant 0 : index
    %c0_88 = arith.constant 0 : index
    %272 = vector.load %arg8[%c0_87, %c0_88] : memref<1x1024xf32, #tpu.memory_space<vmem>>, vector<1x1024xf32>
    %273 = vector.broadcast %272 : vector<1x1024xf32> to vector<8x1024xf32>
    %274 = arith.addf %271, %273 : vector<8x1024xf32>
    %c0_89 = arith.constant 0 : index
    %c0_90 = arith.constant 0 : index
    %275 = vector.load %arg15[%c0_89, %c0_90] : memref<8x1024xf32, #tpu.memory_space<vmem>>, vector<8x1024xf32>
    tpu.vector_store %arg15[%c0_89, %c0_90], %274 {strides = array<i32>} : memref<8x1024xf32, #tpu.memory_space<vmem>>, vector<8x1024xf32>,
    %c0_91 = arith.constant 0 : index
    %c0_92 = arith.constant 0 : index
    %276 = vector.load %arg19[%c0_91, %c0_92] : memref<128x512xbf16, #tpu.memory_space<vmem>>, vector<128x512xbf16>
    %cst_93 = arith.constant 0.000000e+00 : f32
    %277 = vector.broadcast %cst_93 : f32 to vector<1x128xf32>
    %c0_i32_94 = arith.constant 0 : i32
    %c7_i32_95 = arith.constant 7 : i32
    %278 = arith.subi %c7_i32_95, %c0_i32_94 : i32
    %279 = arith.index_cast %c0_i32_94 : i32 to index
    %c0_96 = arith.constant 0 : index
    %280 = vector.load %arg15[%279, %c0_96] : memref<8x1024xf32, #tpu.memory_space<vmem>>, vector<1x512xf32>
    %281 = arith.index_cast %278 : i32 to index
    %c512_97 = arith.constant 512 : index
    %282 = vector.load %arg15[%281, %c512_97] : memref<8x1024xf32, #tpu.memory_space<vmem>>, vector<1x512xf32>
    %283 = arith.addf %280, %282 : vector<1x512xf32>
    %284 = arith.truncf %277 : vector<1x128xf32> to vector<1x128xbf16>
    %cst_98 = arith.constant dense<0.000000e+00> : vector<1x512xf32>
    %285 = tpu.matmul %284, %276, %cst_98 {dimension_numbers = #tpu.dot_dimension_numbers<[1], [0], [0], [1], [0, 0, 1, 1], [], []>} : vector<1x128xbf16>, vector<128x512xbf16>, vector<1x512xf32> -> vector<1x512xf32>
    %286 = arith.addf %283, %285 : vector<1x512xf32>
    %287 = vector.extract_strided_slice %286 {offsets = [0, 0], sizes = [1, 384], strides = [1, 1]} : vector<1x512xf32> to vector<1x384xf32>
    %288 = arith.negf %287 : vector<1x384xf32>
    %289 = math.exp %288 : vector<1x384xf32>
    %cst_99 = arith.constant 1.000000e+00 : f32
    %290 = vector.broadcast %cst_99 : f32 to vector<1x384xf32>
    %291 = arith.addf %290, %289 : vector<1x384xf32>
    %292 = arith.divf %290, %291 : vector<1x384xf32>
    %293 = vector.extract_strided_slice %286 {offsets = [0, 384], sizes = [1, 128], strides = [1, 1]} : vector<1x512xf32> to vector<1x128xf32>
    %294 = math.tanh %293 : vector<1x128xf32>
    %295 = vector.extract_strided_slice %292 {offsets = [0, 0], sizes = [1, 128], strides = [1, 1]} : vector<1x384xf32> to vector<1x128xf32>
    %296 = vector.extract_strided_slice %292 {offsets = [0, 128], sizes = [1, 128], strides = [1, 1]} : vector<1x384xf32> to vector<1x128xf32>
    %297 = vector.extract_strided_slice %292 {offsets = [0, 256], sizes = [1, 128], strides = [1, 1]} : vector<1x384xf32> to vector<1x128xf32>
    %298 = arith.mulf %296, %277 : vector<1x128xf32>
    %299 = arith.mulf %295, %294 : vector<1x128xf32>
    %300 = arith.addf %298, %299 : vector<1x128xf32>
    %301 = math.tanh %300 : vector<1x128xf32>
    %302 = arith.mulf %297, %301 : vector<1x128xf32>
    %303 = arith.index_cast %c0_i32_94 : i32 to index
    %c0_100 = arith.constant 0 : index
    %304 = vector.load %arg16[%303, %c0_100] : memref<8x128xf32, #tpu.memory_space<vmem>>, vector<1x128xf32>
    tpu.vector_store %arg16[%303, %c0_100], %302 {strides = array<i32>} : memref<8x128xf32, #tpu.memory_space<vmem>>, vector<1x128xf32>,
    %305 = arith.index_cast %278 : i32 to index
    %c0_101 = arith.constant 0 : index
    %306 = vector.load %arg17[%305, %c0_101] : memref<8x128xf32, #tpu.memory_space<vmem>>, vector<1x128xf32>
    tpu.vector_store %arg17[%305, %c0_101], %302 {strides = array<i32>} : memref<8x128xf32, #tpu.memory_space<vmem>>, vector<1x128xf32>,
    %c1_i32_102 = arith.constant 1 : i32
    %c7_i32_103 = arith.constant 7 : i32
    %307 = arith.subi %c7_i32_103, %c1_i32_102 : i32
    %308 = arith.index_cast %c1_i32_102 : i32 to index
    %c0_104 = arith.constant 0 : index
    %309 = vector.load %arg15[%308, %c0_104] : memref<8x1024xf32, #tpu.memory_space<vmem>>, vector<1x512xf32>
    %310 = arith.index_cast %307 : i32 to index
    %c512_105 = arith.constant 512 : index
    %311 = vector.load %arg15[%310, %c512_105] : memref<8x1024xf32, #tpu.memory_space<vmem>>, vector<1x512xf32>
    %312 = arith.addf %309, %311 : vector<1x512xf32>
    %313 = arith.truncf %302 : vector<1x128xf32> to vector<1x128xbf16>
    %cst_106 = arith.constant dense<0.000000e+00> : vector<1x512xf32>
    %314 = tpu.matmul %313, %276, %cst_106 {dimension_numbers = #tpu.dot_dimension_numbers<[1], [0], [0], [1], [0, 0, 1, 1], [], []>} : vector<1x128xbf16>, vector<128x512xbf16>, vector<1x512xf32> -> vector<1x512xf32>
    %315 = arith.addf %312, %314 : vector<1x512xf32>
    %316 = vector.extract_strided_slice %315 {offsets = [0, 0], sizes = [1, 384], strides = [1, 1]} : vector<1x512xf32> to vector<1x384xf32>
    %317 = arith.negf %316 : vector<1x384xf32>
    %318 = math.exp %317 : vector<1x384xf32>
    %cst_107 = arith.constant 1.000000e+00 : f32
    %319 = vector.broadcast %cst_107 : f32 to vector<1x384xf32>
    %320 = arith.addf %319, %318 : vector<1x384xf32>
    %321 = arith.divf %319, %320 : vector<1x384xf32>
    %322 = vector.extract_strided_slice %315 {offsets = [0, 384], sizes = [1, 128], strides = [1, 1]} : vector<1x512xf32> to vector<1x128xf32>
    %323 = math.tanh %322 : vector<1x128xf32>
    %324 = vector.extract_strided_slice %321 {offsets = [0, 0], sizes = [1, 128], strides = [1, 1]} : vector<1x384xf32> to vector<1x128xf32>
    %325 = vector.extract_strided_slice %321 {offsets = [0, 128], sizes = [1, 128], strides = [1, 1]} : vector<1x384xf32> to vector<1x128xf32>
    %326 = vector.extract_strided_slice %321 {offsets = [0, 256], sizes = [1, 128], strides = [1, 1]} : vector<1x384xf32> to vector<1x128xf32>
    %327 = arith.mulf %325, %300 : vector<1x128xf32>
    %328 = arith.mulf %324, %323 : vector<1x128xf32>
    %329 = arith.addf %327, %328 : vector<1x128xf32>
    %330 = math.tanh %329 : vector<1x128xf32>
    %331 = arith.mulf %326, %330 : vector<1x128xf32>
    %332 = arith.index_cast %c1_i32_102 : i32 to index
    %c0_108 = arith.constant 0 : index
    %333 = vector.load %arg16[%332, %c0_108] : memref<8x128xf32, #tpu.memory_space<vmem>>, vector<1x128xf32>
    tpu.vector_store %arg16[%332, %c0_108], %331 {strides = array<i32>} : memref<8x128xf32, #tpu.memory_space<vmem>>, vector<1x128xf32>,
    %334 = arith.index_cast %307 : i32 to index
    %c0_109 = arith.constant 0 : index
    %335 = vector.load %arg17[%334, %c0_109] : memref<8x128xf32, #tpu.memory_space<vmem>>, vector<1x128xf32>
    tpu.vector_store %arg17[%334, %c0_109], %331 {strides = array<i32>} : memref<8x128xf32, #tpu.memory_space<vmem>>, vector<1x128xf32>,
    %c2_i32_110 = arith.constant 2 : i32
    %c7_i32_111 = arith.constant 7 : i32
    %336 = arith.subi %c7_i32_111, %c2_i32_110 : i32
    %337 = arith.index_cast %c2_i32_110 : i32 to index
    %c0_112 = arith.constant 0 : index
    %338 = vector.load %arg15[%337, %c0_112] : memref<8x1024xf32, #tpu.memory_space<vmem>>, vector<1x512xf32>
    %339 = arith.index_cast %336 : i32 to index
    %c512_113 = arith.constant 512 : index
    %340 = vector.load %arg15[%339, %c512_113] : memref<8x1024xf32, #tpu.memory_space<vmem>>, vector<1x512xf32>
    %341 = arith.addf %338, %340 : vector<1x512xf32>
    %342 = arith.truncf %331 : vector<1x128xf32> to vector<1x128xbf16>
    %cst_114 = arith.constant dense<0.000000e+00> : vector<1x512xf32>
    %343 = tpu.matmul %342, %276, %cst_114 {dimension_numbers = #tpu.dot_dimension_numbers<[1], [0], [0], [1], [0, 0, 1, 1], [], []>} : vector<1x128xbf16>, vector<128x512xbf16>, vector<1x512xf32> -> vector<1x512xf32>
    %344 = arith.addf %341, %343 : vector<1x512xf32>
    %345 = vector.extract_strided_slice %344 {offsets = [0, 0], sizes = [1, 384], strides = [1, 1]} : vector<1x512xf32> to vector<1x384xf32>
    %346 = arith.negf %345 : vector<1x384xf32>
    %347 = math.exp %346 : vector<1x384xf32>
    %cst_115 = arith.constant 1.000000e+00 : f32
    %348 = vector.broadcast %cst_115 : f32 to vector<1x384xf32>
    %349 = arith.addf %348, %347 : vector<1x384xf32>
    %350 = arith.divf %348, %349 : vector<1x384xf32>
    %351 = vector.extract_strided_slice %344 {offsets = [0, 384], sizes = [1, 128], strides = [1, 1]} : vector<1x512xf32> to vector<1x128xf32>
    %352 = math.tanh %351 : vector<1x128xf32>
    %353 = vector.extract_strided_slice %350 {offsets = [0, 0], sizes = [1, 128], strides = [1, 1]} : vector<1x384xf32> to vector<1x128xf32>
    %354 = vector.extract_strided_slice %350 {offsets = [0, 128], sizes = [1, 128], strides = [1, 1]} : vector<1x384xf32> to vector<1x128xf32>
    %355 = vector.extract_strided_slice %350 {offsets = [0, 256], sizes = [1, 128], strides = [1, 1]} : vector<1x384xf32> to vector<1x128xf32>
    %356 = arith.mulf %354, %329 : vector<1x128xf32>
    %357 = arith.mulf %353, %352 : vector<1x128xf32>
    %358 = arith.addf %356, %357 : vector<1x128xf32>
    %359 = math.tanh %358 : vector<1x128xf32>
    %360 = arith.mulf %355, %359 : vector<1x128xf32>
    %361 = arith.index_cast %c2_i32_110 : i32 to index
    %c0_116 = arith.constant 0 : index
    %362 = vector.load %arg16[%361, %c0_116] : memref<8x128xf32, #tpu.memory_space<vmem>>, vector<1x128xf32>
    tpu.vector_store %arg16[%361, %c0_116], %360 {strides = array<i32>} : memref<8x128xf32, #tpu.memory_space<vmem>>, vector<1x128xf32>,
    %363 = arith.index_cast %336 : i32 to index
    %c0_117 = arith.constant 0 : index
    %364 = vector.load %arg17[%363, %c0_117] : memref<8x128xf32, #tpu.memory_space<vmem>>, vector<1x128xf32>
    tpu.vector_store %arg17[%363, %c0_117], %360 {strides = array<i32>} : memref<8x128xf32, #tpu.memory_space<vmem>>, vector<1x128xf32>,
    %c3_i32_118 = arith.constant 3 : i32
    %c7_i32_119 = arith.constant 7 : i32
    %365 = arith.subi %c7_i32_119, %c3_i32_118 : i32
    %366 = arith.index_cast %c3_i32_118 : i32 to index
    %c0_120 = arith.constant 0 : index
    %367 = vector.load %arg15[%366, %c0_120] : memref<8x1024xf32, #tpu.memory_space<vmem>>, vector<1x512xf32>
    %368 = arith.index_cast %365 : i32 to index
    %c512_121 = arith.constant 512 : index
    %369 = vector.load %arg15[%368, %c512_121] : memref<8x1024xf32, #tpu.memory_space<vmem>>, vector<1x512xf32>
    %370 = arith.addf %367, %369 : vector<1x512xf32>
    %371 = arith.truncf %360 : vector<1x128xf32> to vector<1x128xbf16>
    %cst_122 = arith.constant dense<0.000000e+00> : vector<1x512xf32>
    %372 = tpu.matmul %371, %276, %cst_122 {dimension_numbers = #tpu.dot_dimension_numbers<[1], [0], [0], [1], [0, 0, 1, 1], [], []>} : vector<1x128xbf16>, vector<128x512xbf16>, vector<1x512xf32> -> vector<1x512xf32>
    %373 = arith.addf %370, %372 : vector<1x512xf32>
    %374 = vector.extract_strided_slice %373 {offsets = [0, 0], sizes = [1, 384], strides = [1, 1]} : vector<1x512xf32> to vector<1x384xf32>
    %375 = arith.negf %374 : vector<1x384xf32>
    %376 = math.exp %375 : vector<1x384xf32>
    %cst_123 = arith.constant 1.000000e+00 : f32
    %377 = vector.broadcast %cst_123 : f32 to vector<1x384xf32>
    %378 = arith.addf %377, %376 : vector<1x384xf32>
    %379 = arith.divf %377, %378 : vector<1x384xf32>
    %380 = vector.extract_strided_slice %373 {offsets = [0, 384], sizes = [1, 128], strides = [1, 1]} : vector<1x512xf32> to vector<1x128xf32>
    %381 = math.tanh %380 : vector<1x128xf32>
    %382 = vector.extract_strided_slice %379 {offsets = [0, 0], sizes = [1, 128], strides = [1, 1]} : vector<1x384xf32> to vector<1x128xf32>
    %383 = vector.extract_strided_slice %379 {offsets = [0, 128], sizes = [1, 128], strides = [1, 1]} : vector<1x384xf32> to vector<1x128xf32>
    %384 = vector.extract_strided_slice %379 {offsets = [0, 256], sizes = [1, 128], strides = [1, 1]} : vector<1x384xf32> to vector<1x128xf32>
    %385 = arith.mulf %383, %358 : vector<1x128xf32>
    %386 = arith.mulf %382, %381 : vector<1x128xf32>
    %387 = arith.addf %385, %386 : vector<1x128xf32>
    %388 = math.tanh %387 : vector<1x128xf32>
    %389 = arith.mulf %384, %388 : vector<1x128xf32>
    %390 = arith.index_cast %c3_i32_118 : i32 to index
    %c0_124 = arith.constant 0 : index
    %391 = vector.load %arg16[%390, %c0_124] : memref<8x128xf32, #tpu.memory_space<vmem>>, vector<1x128xf32>
    tpu.vector_store %arg16[%390, %c0_124], %389 {strides = array<i32>} : memref<8x128xf32, #tpu.memory_space<vmem>>, vector<1x128xf32>,
    %392 = arith.index_cast %365 : i32 to index
    %c0_125 = arith.constant 0 : index
    %393 = vector.load %arg17[%392, %c0_125] : memref<8x128xf32, #tpu.memory_space<vmem>>, vector<1x128xf32>
    tpu.vector_store %arg17[%392, %c0_125], %389 {strides = array<i32>} : memref<8x128xf32, #tpu.memory_space<vmem>>, vector<1x128xf32>,
    %c4_i32_126 = arith.constant 4 : i32
    %c7_i32_127 = arith.constant 7 : i32
    %394 = arith.subi %c7_i32_127, %c4_i32_126 : i32
    %395 = arith.index_cast %c4_i32_126 : i32 to index
    %c0_128 = arith.constant 0 : index
    %396 = vector.load %arg15[%395, %c0_128] : memref<8x1024xf32, #tpu.memory_space<vmem>>, vector<1x512xf32>
    %397 = arith.index_cast %394 : i32 to index
    %c512_129 = arith.constant 512 : index
    %398 = vector.load %arg15[%397, %c512_129] : memref<8x1024xf32, #tpu.memory_space<vmem>>, vector<1x512xf32>
    %399 = arith.addf %396, %398 : vector<1x512xf32>
    %400 = arith.truncf %389 : vector<1x128xf32> to vector<1x128xbf16>
    %cst_130 = arith.constant dense<0.000000e+00> : vector<1x512xf32>
    %401 = tpu.matmul %400, %276, %cst_130 {dimension_numbers = #tpu.dot_dimension_numbers<[1], [0], [0], [1], [0, 0, 1, 1], [], []>} : vector<1x128xbf16>, vector<128x512xbf16>, vector<1x512xf32> -> vector<1x512xf32>
    %402 = arith.addf %399, %401 : vector<1x512xf32>
    %403 = vector.extract_strided_slice %402 {offsets = [0, 0], sizes = [1, 384], strides = [1, 1]} : vector<1x512xf32> to vector<1x384xf32>
    %404 = arith.negf %403 : vector<1x384xf32>
    %405 = math.exp %404 : vector<1x384xf32>
    %cst_131 = arith.constant 1.000000e+00 : f32
    %406 = vector.broadcast %cst_131 : f32 to vector<1x384xf32>
    %407 = arith.addf %406, %405 : vector<1x384xf32>
    %408 = arith.divf %406, %407 : vector<1x384xf32>
    %409 = vector.extract_strided_slice %402 {offsets = [0, 384], sizes = [1, 128], strides = [1, 1]} : vector<1x512xf32> to vector<1x128xf32>
    %410 = math.tanh %409 : vector<1x128xf32>
    %411 = vector.extract_strided_slice %408 {offsets = [0, 0], sizes = [1, 128], strides = [1, 1]} : vector<1x384xf32> to vector<1x128xf32>
    %412 = vector.extract_strided_slice %408 {offsets = [0, 128], sizes = [1, 128], strides = [1, 1]} : vector<1x384xf32> to vector<1x128xf32>
    %413 = vector.extract_strided_slice %408 {offsets = [0, 256], sizes = [1, 128], strides = [1, 1]} : vector<1x384xf32> to vector<1x128xf32>
    %414 = arith.mulf %412, %387 : vector<1x128xf32>
    %415 = arith.mulf %411, %410 : vector<1x128xf32>
    %416 = arith.addf %414, %415 : vector<1x128xf32>
    %417 = math.tanh %416 : vector<1x128xf32>
    %418 = arith.mulf %413, %417 : vector<1x128xf32>
    %419 = arith.index_cast %c4_i32_126 : i32 to index
    %c0_132 = arith.constant 0 : index
    %420 = vector.load %arg16[%419, %c0_132] : memref<8x128xf32, #tpu.memory_space<vmem>>, vector<1x128xf32>
    tpu.vector_store %arg16[%419, %c0_132], %418 {strides = array<i32>} : memref<8x128xf32, #tpu.memory_space<vmem>>, vector<1x128xf32>,
    %421 = arith.index_cast %394 : i32 to index
    %c0_133 = arith.constant 0 : index
    %422 = vector.load %arg17[%421, %c0_133] : memref<8x128xf32, #tpu.memory_space<vmem>>, vector<1x128xf32>
    tpu.vector_store %arg17[%421, %c0_133], %418 {strides = array<i32>} : memref<8x128xf32, #tpu.memory_space<vmem>>, vector<1x128xf32>,
    %c5_i32_134 = arith.constant 5 : i32
    %c7_i32_135 = arith.constant 7 : i32
    %423 = arith.subi %c7_i32_135, %c5_i32_134 : i32
    %424 = arith.index_cast %c5_i32_134 : i32 to index
    %c0_136 = arith.constant 0 : index
    %425 = vector.load %arg15[%424, %c0_136] : memref<8x1024xf32, #tpu.memory_space<vmem>>, vector<1x512xf32>
    %426 = arith.index_cast %423 : i32 to index
    %c512_137 = arith.constant 512 : index
    %427 = vector.load %arg15[%426, %c512_137] : memref<8x1024xf32, #tpu.memory_space<vmem>>, vector<1x512xf32>
    %428 = arith.addf %425, %427 : vector<1x512xf32>
    %429 = arith.truncf %418 : vector<1x128xf32> to vector<1x128xbf16>
    %cst_138 = arith.constant dense<0.000000e+00> : vector<1x512xf32>
    %430 = tpu.matmul %429, %276, %cst_138 {dimension_numbers = #tpu.dot_dimension_numbers<[1], [0], [0], [1], [0, 0, 1, 1], [], []>} : vector<1x128xbf16>, vector<128x512xbf16>, vector<1x512xf32> -> vector<1x512xf32>
    %431 = arith.addf %428, %430 : vector<1x512xf32>
    %432 = vector.extract_strided_slice %431 {offsets = [0, 0], sizes = [1, 384], strides = [1, 1]} : vector<1x512xf32> to vector<1x384xf32>
    %433 = arith.negf %432 : vector<1x384xf32>
    %434 = math.exp %433 : vector<1x384xf32>
    %cst_139 = arith.constant 1.000000e+00 : f32
    %435 = vector.broadcast %cst_139 : f32 to vector<1x384xf32>
    %436 = arith.addf %435, %434 : vector<1x384xf32>
    %437 = arith.divf %435, %436 : vector<1x384xf32>
    %438 = vector.extract_strided_slice %431 {offsets = [0, 384], sizes = [1, 128], strides = [1, 1]} : vector<1x512xf32> to vector<1x128xf32>
    %439 = math.tanh %438 : vector<1x128xf32>
    %440 = vector.extract_strided_slice %437 {offsets = [0, 0], sizes = [1, 128], strides = [1, 1]} : vector<1x384xf32> to vector<1x128xf32>
    %441 = vector.extract_strided_slice %437 {offsets = [0, 128], sizes = [1, 128], strides = [1, 1]} : vector<1x384xf32> to vector<1x128xf32>
    %442 = vector.extract_strided_slice %437 {offsets = [0, 256], sizes = [1, 128], strides = [1, 1]} : vector<1x384xf32> to vector<1x128xf32>
    %443 = arith.mulf %441, %416 : vector<1x128xf32>
    %444 = arith.mulf %440, %439 : vector<1x128xf32>
    %445 = arith.addf %443, %444 : vector<1x128xf32>
    %446 = math.tanh %445 : vector<1x128xf32>
    %447 = arith.mulf %442, %446 : vector<1x128xf32>
    %448 = arith.index_cast %c5_i32_134 : i32 to index
    %c0_140 = arith.constant 0 : index
    %449 = vector.load %arg16[%448, %c0_140] : memref<8x128xf32, #tpu.memory_space<vmem>>, vector<1x128xf32>
    tpu.vector_store %arg16[%448, %c0_140], %447 {strides = array<i32>} : memref<8x128xf32, #tpu.memory_space<vmem>>, vector<1x128xf32>,
    %450 = arith.index_cast %423 : i32 to index
    %c0_141 = arith.constant 0 : index
    %451 = vector.load %arg17[%450, %c0_141] : memref<8x128xf32, #tpu.memory_space<vmem>>, vector<1x128xf32>
    tpu.vector_store %arg17[%450, %c0_141], %447 {strides = array<i32>} : memref<8x128xf32, #tpu.memory_space<vmem>>, vector<1x128xf32>,
    %c6_i32_142 = arith.constant 6 : i32
    %c7_i32_143 = arith.constant 7 : i32
    %452 = arith.subi %c7_i32_143, %c6_i32_142 : i32
    %453 = arith.index_cast %c6_i32_142 : i32 to index
    %c0_144 = arith.constant 0 : index
    %454 = vector.load %arg15[%453, %c0_144] : memref<8x1024xf32, #tpu.memory_space<vmem>>, vector<1x512xf32>
    %455 = arith.index_cast %452 : i32 to index
    %c512_145 = arith.constant 512 : index
    %456 = vector.load %arg15[%455, %c512_145] : memref<8x1024xf32, #tpu.memory_space<vmem>>, vector<1x512xf32>
    %457 = arith.addf %454, %456 : vector<1x512xf32>
    %458 = arith.truncf %447 : vector<1x128xf32> to vector<1x128xbf16>
    %cst_146 = arith.constant dense<0.000000e+00> : vector<1x512xf32>
    %459 = tpu.matmul %458, %276, %cst_146 {dimension_numbers = #tpu.dot_dimension_numbers<[1], [0], [0], [1], [0, 0, 1, 1], [], []>} : vector<1x128xbf16>, vector<128x512xbf16>, vector<1x512xf32> -> vector<1x512xf32>
    %460 = arith.addf %457, %459 : vector<1x512xf32>
    %461 = vector.extract_strided_slice %460 {offsets = [0, 0], sizes = [1, 384], strides = [1, 1]} : vector<1x512xf32> to vector<1x384xf32>
    %462 = arith.negf %461 : vector<1x384xf32>
    %463 = math.exp %462 : vector<1x384xf32>
    %cst_147 = arith.constant 1.000000e+00 : f32
    %464 = vector.broadcast %cst_147 : f32 to vector<1x384xf32>
    %465 = arith.addf %464, %463 : vector<1x384xf32>
    %466 = arith.divf %464, %465 : vector<1x384xf32>
    %467 = vector.extract_strided_slice %460 {offsets = [0, 384], sizes = [1, 128], strides = [1, 1]} : vector<1x512xf32> to vector<1x128xf32>
    %468 = math.tanh %467 : vector<1x128xf32>
    %469 = vector.extract_strided_slice %466 {offsets = [0, 0], sizes = [1, 128], strides = [1, 1]} : vector<1x384xf32> to vector<1x128xf32>
    %470 = vector.extract_strided_slice %466 {offsets = [0, 128], sizes = [1, 128], strides = [1, 1]} : vector<1x384xf32> to vector<1x128xf32>
    %471 = vector.extract_strided_slice %466 {offsets = [0, 256], sizes = [1, 128], strides = [1, 1]} : vector<1x384xf32> to vector<1x128xf32>
    %472 = arith.mulf %470, %445 : vector<1x128xf32>
    %473 = arith.mulf %469, %468 : vector<1x128xf32>
    %474 = arith.addf %472, %473 : vector<1x128xf32>
    %475 = math.tanh %474 : vector<1x128xf32>
    %476 = arith.mulf %471, %475 : vector<1x128xf32>
    %477 = arith.index_cast %c6_i32_142 : i32 to index
    %c0_148 = arith.constant 0 : index
    %478 = vector.load %arg16[%477, %c0_148] : memref<8x128xf32, #tpu.memory_space<vmem>>, vector<1x128xf32>
    tpu.vector_store %arg16[%477, %c0_148], %476 {strides = array<i32>} : memref<8x128xf32, #tpu.memory_space<vmem>>, vector<1x128xf32>,
    %479 = arith.index_cast %452 : i32 to index
    %c0_149 = arith.constant 0 : index
    %480 = vector.load %arg17[%479, %c0_149] : memref<8x128xf32, #tpu.memory_space<vmem>>, vector<1x128xf32>
    tpu.vector_store %arg17[%479, %c0_149], %476 {strides = array<i32>} : memref<8x128xf32, #tpu.memory_space<vmem>>, vector<1x128xf32>,
    %c7_i32_150 = arith.constant 7 : i32
    %c7_i32_151 = arith.constant 7 : i32
    %481 = arith.subi %c7_i32_151, %c7_i32_150 : i32
    %482 = arith.index_cast %c7_i32_150 : i32 to index
    %c0_152 = arith.constant 0 : index
    %483 = vector.load %arg15[%482, %c0_152] : memref<8x1024xf32, #tpu.memory_space<vmem>>, vector<1x512xf32>
    %484 = arith.index_cast %481 : i32 to index
    %c512_153 = arith.constant 512 : index
    %485 = vector.load %arg15[%484, %c512_153] : memref<8x1024xf32, #tpu.memory_space<vmem>>, vector<1x512xf32>
    %486 = arith.addf %483, %485 : vector<1x512xf32>
    %487 = arith.truncf %476 : vector<1x128xf32> to vector<1x128xbf16>
    %cst_154 = arith.constant dense<0.000000e+00> : vector<1x512xf32>
    %488 = tpu.matmul %487, %276, %cst_154 {dimension_numbers = #tpu.dot_dimension_numbers<[1], [0], [0], [1], [0, 0, 1, 1], [], []>} : vector<1x128xbf16>, vector<128x512xbf16>, vector<1x512xf32> -> vector<1x512xf32>
    %489 = arith.addf %486, %488 : vector<1x512xf32>
    %490 = vector.extract_strided_slice %489 {offsets = [0, 0], sizes = [1, 384], strides = [1, 1]} : vector<1x512xf32> to vector<1x384xf32>
    %491 = arith.negf %490 : vector<1x384xf32>
    %492 = math.exp %491 : vector<1x384xf32>
    %cst_155 = arith.constant 1.000000e+00 : f32
    %493 = vector.broadcast %cst_155 : f32 to vector<1x384xf32>
    %494 = arith.addf %493, %492 : vector<1x384xf32>
    %495 = arith.divf %493, %494 : vector<1x384xf32>
    %496 = vector.extract_strided_slice %489 {offsets = [0, 384], sizes = [1, 128], strides = [1, 1]} : vector<1x512xf32> to vector<1x128xf32>
    %497 = math.tanh %496 : vector<1x128xf32>
    %498 = vector.extract_strided_slice %495 {offsets = [0, 0], sizes = [1, 128], strides = [1, 1]} : vector<1x384xf32> to vector<1x128xf32>
    %499 = vector.extract_strided_slice %495 {offsets = [0, 128], sizes = [1, 128], strides = [1, 1]} : vector<1x384xf32> to vector<1x128xf32>
    %500 = vector.extract_strided_slice %495 {offsets = [0, 256], sizes = [1, 128], strides = [1, 1]} : vector<1x384xf32> to vector<1x128xf32>
    %501 = arith.mulf %499, %474 : vector<1x128xf32>
    %502 = arith.mulf %498, %497 : vector<1x128xf32>
    %503 = arith.addf %501, %502 : vector<1x128xf32>
    %504 = math.tanh %503 : vector<1x128xf32>
    %505 = arith.mulf %500, %504 : vector<1x128xf32>
    %506 = arith.index_cast %c7_i32_150 : i32 to index
    %c0_156 = arith.constant 0 : index
    %507 = vector.load %arg16[%506, %c0_156] : memref<8x128xf32, #tpu.memory_space<vmem>>, vector<1x128xf32>
    tpu.vector_store %arg16[%506, %c0_156], %505 {strides = array<i32>} : memref<8x128xf32, #tpu.memory_space<vmem>>, vector<1x128xf32>,
    %508 = arith.index_cast %481 : i32 to index
    %c0_157 = arith.constant 0 : index
    %509 = vector.load %arg17[%508, %c0_157] : memref<8x128xf32, #tpu.memory_space<vmem>>, vector<1x128xf32>
    tpu.vector_store %arg17[%508, %c0_157], %505 {strides = array<i32>} : memref<8x128xf32, #tpu.memory_space<vmem>>, vector<1x128xf32>,
    %c8_i32_158 = arith.constant 8 : i32
    %c0_159 = arith.constant 0 : index
    %c0_160 = arith.constant 0 : index
    %510 = vector.load %arg16[%c0_159, %c0_160] : memref<8x128xf32, #tpu.memory_space<vmem>>, vector<8x128xf32>
    %c0_161 = arith.constant 0 : index
    %c0_162 = arith.constant 0 : index
    %511 = vector.load %arg17[%c0_161, %c0_162] : memref<8x128xf32, #tpu.memory_space<vmem>>, vector<8x128xf32>
    %512 = arith.select %20, %510, %511 : vector<8x128xi1>, vector<8x128xf32>
    %c2_i32_163 = arith.constant 2 : i32
    %513 = tpu.memref_slice %arg22[%c2_i32_163] : memref<4x!tpu.dma_semaphore, #tpu.memory_space<semaphore_mem>> -> memref<1x!tpu.dma_semaphore, #tpu.memory_space<semaphore_mem>>
    %514 = tpu.memref_squeeze %513 : memref<1x!tpu.dma_semaphore, #tpu.memory_space<semaphore_mem>> -> memref<!tpu.dma_semaphore, #tpu.memory_space<semaphore_mem>>
    tpu.wait_dma2 semaphore(%514 : memref<!tpu.dma_semaphore, #tpu.memory_space<semaphore_mem>>) src(%arg10 : memref<256x256xbf16, #tpu.memory_space<any>>) dst(%arg20 : memref<256x256xbf16, #tpu.memory_space<vmem>>)
    %c3_i32_164 = arith.constant 3 : i32
    %515 = tpu.memref_slice %arg22[%c3_i32_164] : memref<4x!tpu.dma_semaphore, #tpu.memory_space<semaphore_mem>> -> memref<1x!tpu.dma_semaphore, #tpu.memory_space<semaphore_mem>>
    %516 = tpu.memref_squeeze %515 : memref<1x!tpu.dma_semaphore, #tpu.memory_space<semaphore_mem>> -> memref<!tpu.dma_semaphore, #tpu.memory_space<semaphore_mem>>
    tpu.wait_dma2 semaphore(%516 : memref<!tpu.dma_semaphore, #tpu.memory_space<semaphore_mem>>) src(%arg12 : memref<128x128xbf16, #tpu.memory_space<any>>) dst(%arg21 : memref<128x128xbf16, #tpu.memory_space<vmem>>)
    %517 = arith.truncf %264 : vector<8x128xf32> to vector<8x128xbf16>
    %518 = arith.truncf %512 : vector<8x128xf32> to vector<8x128xbf16>
    %519 = tpu.concatenate %517, %518 in 1 : vector<8x128xbf16>, vector<8x128xbf16> -> vector<8x256xbf16>
    %c0_165 = arith.constant 0 : index
    %c0_166 = arith.constant 0 : index
    %520 = vector.load %arg20[%c0_165, %c0_166] : memref<256x256xbf16, #tpu.memory_space<vmem>>, vector<256x256xbf16>
    %cst_167 = arith.constant dense<0.000000e+00> : vector<8x256xf32>
    %521 = tpu.matmul %519, %520, %cst_167 {dimension_numbers = #tpu.dot_dimension_numbers<[1], [0], [0], [1], [0, 0, 1, 1], [], []>} : vector<8x256xbf16>, vector<256x256xbf16>, vector<8x256xf32> -> vector<8x256xf32>
    %c0_168 = arith.constant 0 : index
    %c0_169 = arith.constant 0 : index
    %522 = vector.load %arg11[%c0_168, %c0_169] : memref<1x256xf32, #tpu.memory_space<vmem>>, vector<1x256xf32>
    %523 = vector.broadcast %522 : vector<1x256xf32> to vector<8x256xf32>
    %524 = arith.addf %521, %523 : vector<8x256xf32>
    %cst_170 = arith.constant 0.000000e+00 : f32
    %525 = vector.broadcast %cst_170 : f32 to vector<8x256xf32>
    %526 = arith.maximumf %524, %525 : vector<8x256xf32>
    %527 = arith.addf %264, %512 : vector<8x128xf32>
    %528 = vector.extract_strided_slice %526 {offsets = [0, 0], sizes = [8, 128], strides = [1, 1]} : vector<8x256xf32> to vector<8x128xf32>
    %529 = arith.addf %527, %528 : vector<8x128xf32>
    %530 = vector.extract_strided_slice %526 {offsets = [0, 128], sizes = [8, 128], strides = [1, 1]} : vector<8x256xf32> to vector<8x128xf32>
    %531 = arith.addf %529, %530 : vector<8x128xf32>
    %532 = arith.truncf %531 : vector<8x128xf32> to vector<8x128xbf16>
    %c0_171 = arith.constant 0 : index
    %c0_172 = arith.constant 0 : index
    %533 = vector.load %arg21[%c0_171, %c0_172] : memref<128x128xbf16, #tpu.memory_space<vmem>>, vector<128x128xbf16>
    %cst_173 = arith.constant dense<0.000000e+00> : vector<8x128xf32>
    %534 = tpu.matmul %532, %533, %cst_173 {dimension_numbers = #tpu.dot_dimension_numbers<[1], [0], [0], [1], [0, 0, 1, 1], [], []>} : vector<8x128xbf16>, vector<128x128xbf16>, vector<8x128xf32> -> vector<8x128xf32>
    %c0_174 = arith.constant 0 : index
    %c0_175 = arith.constant 0 : index
    %535 = vector.load %arg13[%c0_174, %c0_175] : memref<2x128xf32, #tpu.memory_space<vmem>>, vector<1x128xf32>
    %536 = vector.broadcast %535 : vector<1x128xf32> to vector<8x128xf32>
    %537 = arith.addf %534, %536 : vector<8x128xf32>
    %c0_176 = arith.constant 0 : index
    %c0_177 = arith.constant 0 : index
    %538 = vector.load %arg14[%c0_176, %c0_177] : memref<9x128xf32, #tpu.memory_space<vmem>>, vector<8x128xf32>
    tpu.vector_store %arg14[%c0_176, %c0_177], %537 {strides = array<i32>} : memref<9x128xf32, #tpu.memory_space<vmem>>, vector<8x128xf32>,
    %cst_178 = arith.constant dense<0.000000e+00> : vector<128xf32>
    %539 = vector.multi_reduction <add>, %534, %cst_178 [0] : vector<8x128xf32> to vector<128xf32>
    %540 = vector.shape_cast %539 : vector<128xf32> to vector<1x128xf32>
    %cst_179 = arith.constant 8.000000e+00 : f32
    %541 = vector.broadcast %cst_179 : f32 to vector<1x128xf32>
    %542 = arith.divf %540, %541 : vector<1x128xf32>
    %c1 = arith.constant 1 : index
    %c0_180 = arith.constant 0 : index
    %543 = vector.load %arg13[%c1, %c0_180] : memref<2x128xf32, #tpu.memory_space<vmem>>, vector<1x128xf32>
    %544 = arith.addf %542, %543 : vector<1x128xf32>
    %c8 = arith.constant 8 : index
    %c0_181 = arith.constant 0 : index
    %545 = vector.load %arg14[%c8, %c0_181] : memref<9x128xf32, #tpu.memory_space<vmem>>, vector<1x128xf32>
    tpu.vector_store %arg14[%c8, %c0_181], %544 {strides = array<i32>} : memref<9x128xf32, #tpu.memory_space<vmem>>, vector<1x128xf32>,
    return
  }
}

</mosaic_0001>

<bundles_post_ra>
// kernel: neuralnet_forward.1
= control target key start
LH: loop header
LB: loop body
LE: loop exit
PB: predicated region body
PF: predicated region fallthrough
CT: control target
= control target key end

     0   :  { %s13795_s0 = inlined_call_operand.vmem [shape: f32[2048,4], index: 0, kind: input, shape index: {}]   ;;  %s13796_s1 = inlined_call_operand.vmem [shape: f32[8,2048], index: 1, kind: input, shape index: {}]   ;;  %s13797_s2 = inlined_call_operand.vmem [shape: f32[4,128], index: 2, kind: input, shape index: {}]   ;;  %s13798_s3 = inlined_call_operand.vmem [shape: f32[1,128], index: 3, kind: input, shape index: {}]   ;;  %s13799_s4 = inlined_call_operand.vmem [shape: bf16[128,1024], index: 4, kind: input, shape index: {}]   ;;  %s13800_s5 = inlined_call_operand.vmem [shape: f32[1,1024], index: 5, kind: input, shape index: {}]   ;;  %s13801_s6 = inlined_call_operand.vmem [shape: bf16[128,512], index: 6, kind: input, shape index: {}]   ;;  %s13802_s7 = inlined_call_operand.vmem [shape: bf16[128,1024], index: 7, kind: input, shape index: {}]   ;;  %s13803_s8 = inlined_call_operand.vmem [shape: f32[1,1024], index: 8, kind: input, shape index: {}]   ;;  %s13804_s9 = inlined_call_operand.vmem [shape: bf16[128,512], index: 9, kind: input, shape index: {}]   ;;  %s13805_s10 = inlined_call_operand.vmem [shape: bf16[256,256], index: 10, kind: input, shape index: {}]   ;;  %s13806_s11 = inlined_call_operand.vmem [shape: f32[1,256], index: 11, kind: input, shape index: {}]   ;;  %s13807_s12 = inlined_call_operand.vmem [shape: bf16[128,128], index: 12, kind: input, shape index: {}]   ;;  %s13808_s13 = inlined_call_operand.vmem [shape: f32[2,128], index: 13, kind: input, shape index: {}]   ;;  %s13809_s14 = inlined_call_operand.vmem [shape: f32[9,128], index: 14, kind: output, shape index: {}]  }
   0x1   :  { %v9730_v0 = vld [vmem:[%s13802_s7] sm:$0xff]  ;;  %v9735_v1 = vld [vmem:[%s13802_s7 + $0x8] sm:$0xff]  ;;  %v9740_v2 = vld [vmem:[%s13802_s7 + $0x10] sm:$0xff] }
   0x2   :  { %13944 = vst [vmem:[#allocation18_spill] sm:$0xff] %v9730_v0  ;;  %13945 = vst [vmem:[#allocation19_spill] sm:$0xff] %v9735_v1  ;;  %v9745_v3 = vld [vmem:[%s13802_s7 + $0x18] sm:$0xff]  ;;  %v9750_v4 = vld [vmem:[%s13802_s7 + $0x20] sm:$0xff] }
   0x3   :  { %13946 = vst [vmem:[#allocation20_spill] sm:$0xff] %v9740_v2  ;;  %13947 = vst [vmem:[#allocation21_spill] sm:$0xff] %v9745_v3  ;;  %v9755_v5 = vld [vmem:[%s13802_s7 + $0x28] sm:$0xff]  ;;  %v9760_v6 = vld [vmem:[%s13802_s7 + $0x30] sm:$0xff] }
   0x4   :  { %13948 = vst [vmem:[#allocation22_spill] sm:$0xff] %v9750_v4  ;;  %13949 = vst [vmem:[#allocation23_spill] sm:$0xff] %v9755_v5  ;;  %v9765_v7 = vld [vmem:[%s13802_s7 + $0x38] sm:$0xff]  ;;  %v9770_v8 = vld [vmem:[%s13802_s7 + $0x40] sm:$0xff] }
   0x5   :  { %13950 = vst [vmem:[#allocation24_spill] sm:$0xff] %v9760_v6  ;;  %13951 = vst [vmem:[#allocation25_spill] sm:$0xff] %v9765_v7  ;;  %v9775_v9 = vld [vmem:[%s13802_s7 + $0x48] sm:$0xff]  ;;  %v9780_v10 = vld [vmem:[%s13802_s7 + $0x50] sm:$0xff] }
   0x6   :  { %13952 = vst [vmem:[#allocation26_spill] sm:$0xff] %v9770_v8  ;;  %13953 = vst [vmem:[#allocation27_spill] sm:$0xff] %v9775_v9  ;;  %v9785_v11 = vld [vmem:[%s13802_s7 + $0x58] sm:$0xff]  ;;  %v9790_v12 = vld [vmem:[%s13802_s7 + $0x60] sm:$0xff] }
   0x7   :  { %13954 = vst [vmem:[#allocation28_spill] sm:$0xff] %v9780_v10  ;;  %13955 = vst [vmem:[#allocation29_spill] sm:$0xff] %v9785_v11  ;;  %v9795_v13 = vld [vmem:[%s13802_s7 + $0x68] sm:$0xff]  ;;  %v9800_v14 = vld [vmem:[%s13802_s7 + $0x70] sm:$0xff] }
   0x8   :  { %13956 = vst [vmem:[#allocation30_spill] sm:$0xff] %v9790_v12  ;;  %13957 = vst [vmem:[#allocation31_spill] sm:$0xff] %v9795_v13  ;;  %v9805_v15 = vld [vmem:[%s13802_s7 + $0x78] sm:$0xff]  ;;  %v9810_v16 = vld [vmem:[%s13802_s7 + $0x80] sm:$0xff] }
   0x9   :  { %13958 = vst [vmem:[#allocation32_spill] sm:$0xff] %v9800_v14  ;;  %13959 = vst [vmem:[#allocation33_spill] sm:$0xff] %v9805_v15  ;;  %v9815_v17 = vld [vmem:[%s13802_s7 + $0x88] sm:$0xff]  ;;  %v9820_v18 = vld [vmem:[%s13802_s7 + $0x90] sm:$0xff] }
   0xa   :  { %13960 = vst [vmem:[#allocation34_spill] sm:$0xff] %v9810_v16  ;;  %13961 = vst [vmem:[#allocation35_spill] sm:$0xff] %v9815_v17  ;;  %v9825_v19 = vld [vmem:[%s13802_s7 + $0x98] sm:$0xff]  ;;  %v9830_v20 = vld [vmem:[%s13802_s7 + $0xa0] sm:$0xff] }
   0xb   :  { %13962 = vst [vmem:[#allocation36_spill] sm:$0xff] %v9820_v18  ;;  %13963 = vst [vmem:[#allocation37_spill] sm:$0xff] %v9825_v19  ;;  %v9835_v21 = vld [vmem:[%s13802_s7 + $0xa8] sm:$0xff]  ;;  %v9840_v22 = vld [vmem:[%s13802_s7 + $0xb0] sm:$0xff] }
   0xc   :  { %13964 = vst [vmem:[#allocation38_spill] sm:$0xff] %v9830_v20  ;;  %13965 = vst [vmem:[#allocation39_spill] sm:$0xff] %v9835_v21  ;;  %v9845_v23 = vld [vmem:[%s13802_s7 + $0xb8] sm:$0xff]  ;;  %v9850_v24 = vld [vmem:[%s13802_s7 + $0xc0] sm:$0xff] }
   0xd   :  { %13966 = vst [vmem:[#allocation40_spill] sm:$0xff] %v9840_v22  ;;  %13967 = vst [vmem:[#allocation41_spill] sm:$0xff] %v9845_v23  ;;  %v9855_v25 = vld [vmem:[%s13802_s7 + $0xc8] sm:$0xff]  ;;  %v9860_v26 = vld [vmem:[%s13802_s7 + $0xd0] sm:$0xff] }
   0xe   :  { %13968 = vst [vmem:[#allocation42_spill] sm:$0xff] %v9850_v24  ;;  %13969 = vst [vmem:[#allocation43_spill] sm:$0xff] %v9855_v25  ;;  %v9865_v27 = vld [vmem:[%s13802_s7 + $0xd8] sm:$0xff]  ;;  %v9870_v28 = vld [vmem:[%s13802_s7 + $0xe0] sm:$0xff] }
   0xf   :  { %13970 = vst [vmem:[#allocation44_spill] sm:$0xff] %v9860_v26  ;;  %13971 = vst [vmem:[#allocation45_spill] sm:$0xff] %v9865_v27  ;;  %v9875_v29 = vld [vmem:[%s13802_s7 + $0xe8] sm:$0xff]  ;;  %v9880_v30 = vld [vmem:[%s13802_s7 + $0xf0] sm:$0xff] }
  0x10   :  { %13972 = vst [vmem:[#allocation46_spill] sm:$0xff] %v9870_v28  ;;  %13973 = vst [vmem:[#allocation47_spill] sm:$0xff] %v9875_v29  ;;  %v9885_v31 = vld [vmem:[%s13802_s7 + $0xf8] sm:$0xff]  ;;  %v9890_v32 = vld [vmem:[%s13802_s7 + $0x100] sm:$0xff] }
  0x11   :  { %13974 = vst [vmem:[#allocation48_spill] sm:$0xff] %v9880_v30  ;;  %13975 = vst [vmem:[#allocation49_spill] sm:$0xff] %v9885_v31  ;;  %v9895_v33 = vld [vmem:[%s13802_s7 + $0x108] sm:$0xff]  ;;  %v9900_v34 = vld [vmem:[%s13802_s7 + $0x110] sm:$0xff] }
  0x12   :  { %13976 = vst [vmem:[#allocation50_spill] sm:$0xff] %v9890_v32  ;;  %13977 = vst [vmem:[#allocation51_spill] sm:$0xff] %v9895_v33  ;;  %v9905_v35 = vld [vmem:[%s13802_s7 + $0x118] sm:$0xff]  ;;  %v9910_v36 = vld [vmem:[%s13802_s7 + $0x120] sm:$0xff] }
  0x13   :  { %13978 = vst [vmem:[#allocation52_spill] sm:$0xff] %v9900_v34  ;;  %13979 = vst [vmem:[#allocation53_spill] sm:$0xff] %v9905_v35  ;;  %v9915_v37 = vld [vmem:[%s13802_s7 + $0x128] sm:$0xff]  ;;  %v9920_v38 = vld [vmem:[%s13802_s7 + $0x130] sm:$0xff] }
  0x14   :  { %13980 = vst [vmem:[#allocation54_spill] sm:$0xff] %v9910_v36  ;;  %13981 = vst [vmem:[#allocation55_spill] sm:$0xff] %v9915_v37  ;;  %v9925_v39 = vld [vmem:[%s13802_s7 + $0x138] sm:$0xff]  ;;  %v9930_v40 = vld [vmem:[%s13802_s7 + $0x140] sm:$0xff] }
  0x15   :  { %13982 = vst [vmem:[#allocation56_spill] sm:$0xff] %v9920_v38  ;;  %13983 = vst [vmem:[#allocation57_spill] sm:$0xff] %v9925_v39  ;;  %v9935_v41 = vld [vmem:[%s13802_s7 + $0x148] sm:$0xff]  ;;  %v9940_v42 = vld [vmem:[%s13802_s7 + $0x150] sm:$0xff] }
  0x16   :  { %13984 = vst [vmem:[#allocation58_spill] sm:$0xff] %v9930_v40  ;;  %13985 = vst [vmem:[#allocation59_spill] sm:$0xff] %v9935_v41  ;;  %v9945_v43 = vld [vmem:[%s13802_s7 + $0x158] sm:$0xff]  ;;  %v9950_v44 = vld [vmem:[%s13802_s7 + $0x160] sm:$0xff] }
  0x17   :  { %13986 = vst [vmem:[#allocation60_spill] sm:$0xff] %v9940_v42  ;;  %13987 = vst [vmem:[#allocation61_spill] sm:$0xff] %v9945_v43  ;;  %v9955_v45 = vld [vmem:[%s13802_s7 + $0x168] sm:$0xff]  ;;  %v9960_v46 = vld [vmem:[%s13802_s7 + $0x170] sm:$0xff] }
  0x18   :  { %13988 = vst [vmem:[#allocation62_spill] sm:$0xff] %v9955_v45  ;;  %13989 = vst [vmem:[#allocation63_spill] sm:$0xff] %v9960_v46  ;;  %v9965_v47 = vld [vmem:[%s13802_s7 + $0x178] sm:$0xff]  ;;  %v9970_v48 = vld [vmem:[%s13802_s7 + $0x180] sm:$0xff] }
  0x19   :  { %13990 = vst [vmem:[#allocation64_spill] sm:$0xff] %v9965_v47  ;;  %v9975_v49 = vld [vmem:[%s13802_s7 + $0x188] sm:$0xff]  ;;  %v9980_v50 = vld [vmem:[%s13802_s7 + $0x190] sm:$0xff]  ;;  %v9985_v51 = vld [vmem:[%s13802_s7 + $0x198] sm:$0xff] }
  0x1a   :  { %13991 = vst [vmem:[#allocation65_spill] sm:$0xff] %v9980_v50  ;;  %13992 = vst [vmem:[#allocation66_spill] sm:$0xff] %v9985_v51  ;;  %v9990_v52 = vld [vmem:[%s13802_s7 + $0x1a0] sm:$0xff]  ;;  %v9995_v53 = vld [vmem:[%s13802_s7 + $0x1a8] sm:$0xff] }
  0x1b   :  { %v10000_v54 = vld [vmem:[%s13802_s7 + $0x1b0] sm:$0xff]  ;;  %v10005_v55 = vld [vmem:[%s13802_s7 + $0x1b8] sm:$0xff]  ;;  %v10010_v56 = vld [vmem:[%s13802_s7 + $0x1c0] sm:$0xff] }
  0x1c   :  { %13993 = vst [vmem:[#allocation67_spill] sm:$0xff] %v10000_v54  ;;  %13994 = vst [vmem:[#allocation68_spill] sm:$0xff] %v10005_v55  ;;  %v10015_v57 = vld [vmem:[%s13802_s7 + $0x1c8] sm:$0xff]  ;;  %v10020_v58 = vld [vmem:[%s13802_s7 + $0x1d0] sm:$0xff] }
  0x1d   :  { %13995 = vst [vmem:[#allocation69_spill] sm:$0xff] %v10020_v58  ;;  %v10025_v59 = vld [vmem:[%s13802_s7 + $0x1d8] sm:$0xff]  ;;  %v10030_v60 = vld [vmem:[%s13802_s7 + $0x1e0] sm:$0xff]  ;;  %v10035_v61 = vld [vmem:[%s13802_s7 + $0x1e8] sm:$0xff] }
  0x1e   :  { %13996 = vst [vmem:[#allocation70_spill] sm:$0xff] %v10025_v59  ;;  %v10040_v62 = vld [vmem:[%s13802_s7 + $0x1f0] sm:$0xff]  ;;  %v10045_v63 = vld [vmem:[%s13802_s7 + $0x1f8] sm:$0xff] }
  0x1f   :  { %13997 = vst [vmem:[#allocation71_spill] sm:$0xff] %v10040_v62  ;;  %13998 = vst [vmem:[#allocation72_spill] sm:$0xff] %v10045_v63 }
  0x20   :  { %208 = vsyncadd [#allocation9], 8192  ;;  %v10050_v3 = vld [vmem:[%s13804_s9] sm:$0xff]  ;;  %v10055_v7 = vld [vmem:[%s13804_s9 + $0x8] sm:$0xff] }
  0x21   :  { %13999 = vst [vmem:[#allocation73_spill] sm:$0xff] %v10050_v3  ;;  %14000 = vst [vmem:[#allocation74_spill] sm:$0xff] %v10055_v7  ;;  %v10060_v2 = vld [vmem:[%s13804_s9 + $0x10] sm:$0xff]  ;;  %v10065_v6 = vld [vmem:[%s13804_s9 + $0x18] sm:$0xff] }
  0x22   :  { %14001 = vst [vmem:[#allocation75_spill] sm:$0xff] %v10060_v2  ;;  %14002 = vst [vmem:[#allocation76_spill] sm:$0xff] %v10065_v6  ;;  %v10070_v11 = vld [vmem:[%s13804_s9 + $0x20] sm:$0xff]  ;;  %v10075_v3 = vld [vmem:[%s13804_s9 + $0x28] sm:$0xff] }
  0x23   :  { %14003 = vst [vmem:[#allocation77_spill] sm:$0xff] %v10070_v11  ;;  %14004 = vst [vmem:[#allocation78_spill] sm:$0xff] %v10075_v3  ;;  %v10080_v7 = vld [vmem:[%s13804_s9 + $0x30] sm:$0xff]  ;;  %v10085_v2 = vld [vmem:[%s13804_s9 + $0x38] sm:$0xff] }
  0x24   :  { %14005 = vst [vmem:[#allocation79_spill] sm:$0xff] %v10080_v7  ;;  %14006 = vst [vmem:[#allocation80_spill] sm:$0xff] %v10085_v2  ;;  %v10090_v6 = vld [vmem:[%s13804_s9 + $0x40] sm:$0xff]  ;;  %v10095_v11 = vld [vmem:[%s13804_s9 + $0x48] sm:$0xff] }
  0x25   :  { %14007 = vst [vmem:[#allocation81_spill] sm:$0xff] %v10090_v6  ;;  %14008 = vst [vmem:[#allocation82_spill] sm:$0xff] %v10095_v11  ;;  %v10100_v3 = vld [vmem:[%s13804_s9 + $0x50] sm:$0xff]  ;;  %v10105_v7 = vld [vmem:[%s13804_s9 + $0x58] sm:$0xff] }
  0x26   :  { %14009 = vst [vmem:[#allocation83_spill] sm:$0xff] %v10100_v3  ;;  %14010 = vst [vmem:[#allocation84_spill] sm:$0xff] %v10105_v7  ;;  %v10110_v2 = vld [vmem:[%s13804_s9 + $0x60] sm:$0xff]  ;;  %v10115_v6 = vld [vmem:[%s13804_s9 + $0x68] sm:$0xff] }
  0x27   :  { %14011 = vst [vmem:[#allocation85_spill] sm:$0xff] %v10110_v2  ;;  %14012 = vst [vmem:[#allocation86_spill] sm:$0xff] %v10115_v6  ;;  %v10120_v11 = vld [vmem:[%s13804_s9 + $0x70] sm:$0xff]  ;;  %v10125_v3 = vld [vmem:[%s13804_s9 + $0x78] sm:$0xff] }
  0x28   :  { %14013 = vst [vmem:[#allocation87_spill] sm:$0xff] %v10120_v11  ;;  %14014 = vst [vmem:[#allocation88_spill] sm:$0xff] %v10125_v3  ;;  %v10130_v7 = vld [vmem:[%s13804_s9 + $0x80] sm:$0xff]  ;;  %v10135_v2 = vld [vmem:[%s13804_s9 + $0x88] sm:$0xff] }
  0x29   :  { %14015 = vst [vmem:[#allocation89_spill] sm:$0xff] %v10130_v7  ;;  %14016 = vst [vmem:[#allocation90_spill] sm:$0xff] %v10135_v2  ;;  %v10140_v6 = vld [vmem:[%s13804_s9 + $0x90] sm:$0xff]  ;;  %v10145_v11 = vld [vmem:[%s13804_s9 + $0x98] sm:$0xff] }
  0x2a   :  { %14017 = vst [vmem:[#allocation91_spill] sm:$0xff] %v10140_v6  ;;  %14018 = vst [vmem:[#allocation92_spill] sm:$0xff] %v10145_v11  ;;  %v10150_v3 = vld [vmem:[%s13804_s9 + $0xa0] sm:$0xff]  ;;  %v10155_v7 = vld [vmem:[%s13804_s9 + $0xa8] sm:$0xff] }
  0x2b   :  { %14019 = vst [vmem:[#allocation93_spill] sm:$0xff] %v10150_v3  ;;  %14020 = vst [vmem:[#allocation94_spill] sm:$0xff] %v10155_v7  ;;  %v10160_v2 = vld [vmem:[%s13804_s9 + $0xb0] sm:$0xff]  ;;  %v10165_v6 = vld [vmem:[%s13804_s9 + $0xb8] sm:$0xff] }
  0x2c   :  { %14021 = vst [vmem:[#allocation95_spill] sm:$0xff] %v10160_v2  ;;  %14022 = vst [vmem:[#allocation96_spill] sm:$0xff] %v10165_v6  ;;  %v10170_v11 = vld [vmem:[%s13804_s9 + $0xc0] sm:$0xff]  ;;  %v10175_v3 = vld [vmem:[%s13804_s9 + $0xc8] sm:$0xff] }
  0x2d   :  { %14023 = vst [vmem:[#allocation97_spill] sm:$0xff] %v10170_v11  ;;  %14024 = vst [vmem:[#allocation98_spill] sm:$0xff] %v10175_v3  ;;  %v10180_v7 = vld [vmem:[%s13804_s9 + $0xd0] sm:$0xff]  ;;  %v10185_v2 = vld [vmem:[%s13804_s9 + $0xd8] sm:$0xff] }
  0x2e   :  { %14025 = vst [vmem:[#allocation99_spill] sm:$0xff] %v10180_v7  ;;  %14026 = vst [vmem:[#allocation100_spill] sm:$0xff] %v10185_v2  ;;  %v10190_v6 = vld [vmem:[%s13804_s9 + $0xe0] sm:$0xff]  ;;  %v10195_v11 = vld [vmem:[%s13804_s9 + $0xe8] sm:$0xff] }
  0x2f   :  { %14027 = vst [vmem:[#allocation101_spill] sm:$0xff] %v10190_v6  ;;  %14028 = vst [vmem:[#allocation102_spill] sm:$0xff] %v10195_v11  ;;  %v10200_v3 = vld [vmem:[%s13804_s9 + $0xf0] sm:$0xff]  ;;  %v10205_v7 = vld [vmem:[%s13804_s9 + $0xf8] sm:$0xff] }
  0x30   :  { %14029 = vst [vmem:[#allocation103_spill] sm:$0xff] %v10200_v3  ;;  %14030 = vst [vmem:[#allocation104_spill] sm:$0xff] %v10205_v7 }
  0x31   :  { %314 = vsyncadd [#allocation9 + $0x1], 4096  ;;  %v10210_v2 = vld [vmem:[%s13805_s10] sm:$0xff]  ;;  %v10215_v11 = vld [vmem:[%s13805_s10 + $0x8] sm:$0xff] }
  0x32   :  { %14031 = vst [vmem:[#allocation105_spill] sm:$0xff] %v10210_v2  ;;  %14032 = vst [vmem:[#allocation106_spill] sm:$0xff] %v10215_v11  ;;  %v10220_v6 = vld [vmem:[%s13805_s10 + $0x10] sm:$0xff]  ;;  %v10225_v7 = vld [vmem:[%s13805_s10 + $0x18] sm:$0xff] }
  0x33   :  { %14033 = vst [vmem:[#allocation107_spill] sm:$0xff] %v10220_v6  ;;  %14034 = vst [vmem:[#allocation108_spill] sm:$0xff] %v10225_v7  ;;  %v10230_v3 = vld [vmem:[%s13805_s10 + $0x20] sm:$0xff]  ;;  %v10235_v2 = vld [vmem:[%s13805_s10 + $0x28] sm:$0xff] }
  0x34   :  { %14035 = vst [vmem:[#allocation109_spill] sm:$0xff] %v10230_v3  ;;  %14036 = vst [vmem:[#allocation110_spill] sm:$0xff] %v10235_v2  ;;  %v10240_v11 = vld [vmem:[%s13805_s10 + $0x30] sm:$0xff]  ;;  %v10245_v6 = vld [vmem:[%s13805_s10 + $0x38] sm:$0xff] }
  0x35   :  { %14037 = vst [vmem:[#allocation111_spill] sm:$0xff] %v10240_v11  ;;  %14038 = vst [vmem:[#allocation112_spill] sm:$0xff] %v10245_v6  ;;  %v10250_v7 = vld [vmem:[%s13805_s10 + $0x40] sm:$0xff]  ;;  %v10255_v3 = vld [vmem:[%s13805_s10 + $0x48] sm:$0xff] }
  0x36   :  { %14039 = vst [vmem:[#allocation113_spill] sm:$0xff] %v10250_v7  ;;  %14040 = vst [vmem:[#allocation114_spill] sm:$0xff] %v10255_v3  ;;  %v10260_v2 = vld [vmem:[%s13805_s10 + $0x50] sm:$0xff]  ;;  %v10265_v11 = vld [vmem:[%s13805_s10 + $0x58] sm:$0xff] }
  0x37   :  { %14041 = vst [vmem:[#allocation115_spill] sm:$0xff] %v10260_v2  ;;  %14042 = vst [vmem:[#allocation116_spill] sm:$0xff] %v10265_v11  ;;  %v10270_v6 = vld [vmem:[%s13805_s10 + $0x60] sm:$0xff]  ;;  %v10275_v7 = vld [vmem:[%s13805_s10 + $0x68] sm:$0xff] }
  0x38   :  { %14043 = vst [vmem:[#allocation117_spill] sm:$0xff] %v10270_v6  ;;  %14044 = vst [vmem:[#allocation118_spill] sm:$0xff] %v10275_v7  ;;  %v10280_v3 = vld [vmem:[%s13805_s10 + $0x70] sm:$0xff]  ;;  %v10285_v2 = vld [vmem:[%s13805_s10 + $0x78] sm:$0xff] }
  0x39   :  { %14045 = vst [vmem:[#allocation119_spill] sm:$0xff] %v10280_v3  ;;  %14046 = vst [vmem:[#allocation120_spill] sm:$0xff] %v10285_v2  ;;  %v10290_v11 = vld [vmem:[%s13805_s10 + $0x80] sm:$0xff]  ;;  %v10295_v6 = vld [vmem:[%s13805_s10 + $0x88] sm:$0xff] }
  0x3a   :  { %14047 = vst [vmem:[#allocation121_spill] sm:$0xff] %v10290_v11  ;;  %14048 = vst [vmem:[#allocation122_spill] sm:$0xff] %v10295_v6  ;;  %v10300_v7 = vld [vmem:[%s13805_s10 + $0x90] sm:$0xff]  ;;  %v10305_v3 = vld [vmem:[%s13805_s10 + $0x98] sm:$0xff] }
  0x3b   :  { %14049 = vst [vmem:[#allocation123_spill] sm:$0xff] %v10300_v7  ;;  %14050 = vst [vmem:[#allocation124_spill] sm:$0xff] %v10305_v3  ;;  %v10310_v2 = vld [vmem:[%s13805_s10 + $0xa0] sm:$0xff]  ;;  %v10315_v11 = vld [vmem:[%s13805_s10 + $0xa8] sm:$0xff] }
  0x3c   :  { %14051 = vst [vmem:[#allocation125_spill] sm:$0xff] %v10310_v2  ;;  %14052 = vst [vmem:[#allocation126_spill] sm:$0xff] %v10315_v11  ;;  %v10320_v6 = vld [vmem:[%s13805_s10 + $0xb0] sm:$0xff]  ;;  %v10325_v7 = vld [vmem:[%s13805_s10 + $0xb8] sm:$0xff] }
  0x3d   :  { %14053 = vst [vmem:[#allocation127_spill] sm:$0xff] %v10320_v6  ;;  %14054 = vst [vmem:[#allocation128_spill] sm:$0xff] %v10325_v7  ;;  %v10330_v3 = vld [vmem:[%s13805_s10 + $0xc0] sm:$0xff]  ;;  %v10335_v2 = vld [vmem:[%s13805_s10 + $0xc8] sm:$0xff] }
  0x3e   :  { %14055 = vst [vmem:[#allocation129_spill] sm:$0xff] %v10330_v3  ;;  %14056 = vst [vmem:[#allocation130_spill] sm:$0xff] %v10335_v2  ;;  %v10340_v11 = vld [vmem:[%s13805_s10 + $0xd0] sm:$0xff]  ;;  %v10345_v6 = vld [vmem:[%s13805_s10 + $0xd8] sm:$0xff] }
  0x3f   :  { %14057 = vst [vmem:[#allocation131_spill] sm:$0xff] %v10340_v11  ;;  %14058 = vst [vmem:[#allocation132_spill] sm:$0xff] %v10345_v6  ;;  %v10350_v7 = vld [vmem:[%s13805_s10 + $0xe0] sm:$0xff]  ;;  %v10355_v3 = vld [vmem:[%s13805_s10 + $0xe8] sm:$0xff] }
  0x40   :  { %14059 = vst [vmem:[#allocation133_spill] sm:$0xff] %v10350_v7  ;;  %14060 = vst [vmem:[#allocation134_spill] sm:$0xff] %v10355_v3  ;;  %v10360_v2 = vld [vmem:[%s13805_s10 + $0xf0] sm:$0xff]  ;;  %v10365_v11 = vld [vmem:[%s13805_s10 + $0xf8] sm:$0xff] }
  0x41   :  { %14061 = vst [vmem:[#allocation135_spill] sm:$0xff] %v10360_v2  ;;  %14062 = vst [vmem:[#allocation136_spill] sm:$0xff] %v10365_v11 }
  0x42   :  { %420 = vsyncadd [#allocation9 + $0x2], 4096  ;;  %v455_v6 = vld [vmem:[%s13807_s12] sm:$0xff]  ;;  %v457_v7 = vld [vmem:[%s13807_s12 + $0x8] sm:$0xff] }
  0x43   :  { %456 = vst [vmem:[#allocation8] sm:$0xff] %v455_v6  ;;  %458 = vst [vmem:[#allocation8 + $0x8] sm:$0xff] %v457_v7  ;;  %v459_v3 = vld [vmem:[%s13807_s12 + $0x10] sm:$0xff]  ;;  %v461_v2 = vld [vmem:[%s13807_s12 + $0x18] sm:$0xff] }
  0x44   :  { %v463_v11 = vld [vmem:[%s13807_s12 + $0x20] sm:$0xff]  ;;  %460 = vst [vmem:[#allocation8 + $0x10] sm:$0xff] %v459_v3  ;;  %462 = vst [vmem:[#allocation8 + $0x18] sm:$0xff] %v461_v2  ;;  %v465_v6 = vld [vmem:[%s13807_s12 + $0x28] sm:$0xff] }
  0x45   :  { %464 = vst [vmem:[#allocation8 + $0x20] sm:$0xff] %v463_v11  ;;  %v467_v7 = vld [vmem:[%s13807_s12 + $0x30] sm:$0xff]  ;;  %v469_v15 = vld [vmem:[%s13807_s12 + $0x38] sm:$0xff]  ;;  %466 = vst [vmem:[#allocation8 + $0x28] sm:$0xff] %v465_v6 }
  0x46   :  { %468 = vst [vmem:[#allocation8 + $0x30] sm:$0xff] %v467_v7  ;;  %470 = vst [vmem:[#allocation8 + $0x38] sm:$0xff] %v469_v15 }
  0x47   :  { %478 = vsyncadd [#allocation9 + $0x3], 1024  ;;  %v735_v2 = vld [vmem:[%s13797_s2] sm:$0xf]  ;;  %vm1512_vm0 = vcmask 1043456   ;;  %vm743_vm1 = vcmask 31744  }
  0x48   :  { %v479_v3 = vld [vmem:[%s13795_s0] sm:$0xff]  ;;  %9013 = vmatprep.subr.msk.mxu0 %vm1512_vm0, %v735_v2  ;;  %v480_v11 = vld [vmem:[%s13795_s0 + $0x8] sm:$0xff]  ;;  %v481_v15 = vld [vmem:[%s13795_s0 + $0x10] sm:$0xff] }
  0x49   :  { %9014 = vmatpush3.msk.msra.mxu0 %vm1512_vm0, %v735_v2  ;;  %9015 = vmatprep.mubr.msk.f32.mxu0 %vm743_vm1, %v479_v3  ;;  %v482_v6 = vld [vmem:[%s13795_s0 + $0x18] sm:$0xff]  ;;  %v483_v7 = vld [vmem:[%s13795_s0 + $0x20] sm:$0xff]  ;;  %v484_v2 = vld [vmem:[%s13795_s0 + $0x28] sm:$0xff] }
  0x4a   :  { %9016 = vmatmul.mubr.msk.f32.vlgmr.msra.gmra.mxu0 %vm743_vm1, %v480_v11  ;;  %v485_v3 = vld [vmem:[%s13795_s0 + $0x30] sm:$0xff]  ;;  %v486_v11 = vld [vmem:[%s13795_s0 + $0x38] sm:$0xff]  ;;  %v579_v10 = vld [vmem:[%s13795_s0 + $0x320] sm:$0xff] }
  0x4b   :  { %9018 = vmatprep.mubr.msk.f32.mxu0 %vm743_vm1, %v481_v15  ;;  %v487_v15 = vld [vmem:[%s13795_s0 + $0x40] sm:$0xff]  ;;  %v585_v22 = vld [vmem:[%s13795_s0 + $0x350] sm:$0xff] }
  0x4c   :  { %v583_v23 = vld [vmem:[%s13795_s0 + $0x340] sm:$0xff]  ;;  %v589_v30 = vld [vmem:[%s13795_s0 + $0x370] sm:$0xff] }
  0x4d   :  { %v587_v31 = vld [vmem:[%s13795_s0 + $0x360] sm:$0xff]  ;;  %v593_v38 = vld [vmem:[%s13795_s0 + $0x390] sm:$0xff] }
  0x4e   :  { %9019 = vmatmul.mubr.msk.f32.gmra.mxu0 %vm743_vm1, %v482_v6  ;;  %v488_v6 = vld [vmem:[%s13795_s0 + $0x48] sm:$0xff]  ;;  %v591_v39 = vld [vmem:[%s13795_s0 + $0x380] sm:$0xff]  ;;  %v597_v46 = vld [vmem:[%s13795_s0 + $0x3b0] sm:$0xff] }
  0x4f   :  { %9021 = vmatprep.mubr.msk.f32.mxu0 %vm743_vm1, %v483_v7  ;;  %v489_v7 = vld [vmem:[%s13795_s0 + $0x50] sm:$0xff]  ;;  %v595_v47 = vld [vmem:[%s13795_s0 + $0x3a0] sm:$0xff] }
  0x50   :  { %v599_v55 = vld [vmem:[%s13795_s0 + $0x3c0] sm:$0xff]  ;;  %v601_v54 = vld [vmem:[%s13795_s0 + $0x3d0] sm:$0xff] }
  0x51   :  { %v603_v63 = vld [vmem:[%s13795_s0 + $0x3e0] sm:$0xff]  ;;  %v605_v62 = vld [vmem:[%s13795_s0 + $0x3f0] sm:$0xff] }
  0x52   :  { %9022 = vmatmul.mubr.msk.f32.gmra.mxu0 %vm743_vm1, %v484_v2  ;;  %v490_v2 = vld [vmem:[%s13795_s0 + $0x58] sm:$0xff]  ;;  %v10962_v0 = vld [vmem:[%s13798_s3] ss:$0 sm:$0xff]  ;;  %v609_v12 = vld [vmem:[%s13795_s0 + $0x410] sm:$0xff] }
  0x53   :  { %9024 = vmatprep.mubr.msk.f32.mxu0 %vm743_vm1, %v485_v3  ;;  %v491_v3 = vld [vmem:[%s13795_s0 + $0x60] sm:$0xff] }
  0x56   :  { %9025 = vmatmul.mubr.msk.f32.gmra.mxu0 %vm743_vm1, %v486_v11  ;;  %v492_v11 = vld [vmem:[%s13795_s0 + $0x68] sm:$0xff] }
  0x57   :  { %9027 = vmatprep.mubr.msk.f32.mxu0 %vm743_vm1, %v487_v15  ;;  %v493_v15 = vld [vmem:[%s13795_s0 + $0x70] sm:$0xff] }
  0x5a   :  { %9028 = vmatmul.mubr.msk.f32.gmra.mxu0 %vm743_vm1, %v488_v6  ;;  %v494_v6 = vld [vmem:[%s13795_s0 + $0x78] sm:$0xff] }
  0x5b   :  { %9030 = vmatprep.mubr.msk.f32.mxu0 %vm743_vm1, %v489_v7  ;;  %v495_v7 = vld [vmem:[%s13795_s0 + $0x80] sm:$0xff] }
  0x5e   :  { %9031 = vmatmul.mubr.msk.f32.gmra.mxu0 %vm743_vm1, %v490_v2  ;;  %v496_v2 = vld [vmem:[%s13795_s0 + $0x88] sm:$0xff] }
  0x5f   :  { %9033 = vmatprep.mubr.msk.f32.mxu0 %vm743_vm1, %v491_v3  ;;  %v497_v3 = vld [vmem:[%s13795_s0 + $0x90] sm:$0xff] }
  0x62   :  { %9034 = vmatmul.mubr.msk.f32.gmra.mxu0 %vm743_vm1, %v492_v11  ;;  %v498_v11 = vld [vmem:[%s13795_s0 + $0x98] sm:$0xff] }
  0x63   :  { %9036 = vmatprep.mubr.msk.f32.mxu0 %vm743_vm1, %v493_v15  ;;  %v499_v15 = vld [vmem:[%s13795_s0 + $0xa0] sm:$0xff] }
  0x66   :  { %9037 = vmatmul.mubr.msk.f32.gmra.mxu0 %vm743_vm1, %v494_v6  ;;  %v500_v6 = vld [vmem:[%s13795_s0 + $0xa8] sm:$0xff] }
  0x67   :  { %9039 = vmatprep.mubr.msk.f32.mxu0 %vm743_vm1, %v495_v7  ;;  %v501_v7 = vld [vmem:[%s13795_s0 + $0xb0] sm:$0xff] }
  0x6a   :  { %9040 = vmatmul.mubr.msk.f32.gmra.mxu0 %vm743_vm1, %v496_v2  ;;  %v502_v2 = vld [vmem:[%s13795_s0 + $0xb8] sm:$0xff] }
  0x6b   :  { %9042 = vmatprep.mubr.msk.f32.mxu0 %vm743_vm1, %v497_v3  ;;  %v503_v3 = vld [vmem:[%s13795_s0 + $0xc0] sm:$0xff] }
  0x6e   :  { %9043 = vmatmul.mubr.msk.f32.gmra.mxu0 %vm743_vm1, %v498_v11  ;;  %v504_v11 = vld [vmem:[%s13795_s0 + $0xc8] sm:$0xff] }
  0x6f   :  { %9045 = vmatprep.mubr.msk.f32.mxu0 %vm743_vm1, %v499_v15  ;;  %v505_v15 = vld [vmem:[%s13795_s0 + $0xd0] sm:$0xff] }
  0x72   :  { %9046 = vmatmul.mubr.msk.f32.gmra.mxu0 %vm743_vm1, %v500_v6  ;;  %v506_v6 = vld [vmem:[%s13795_s0 + $0xd8] sm:$0xff] }
  0x73   :  { %9048 = vmatprep.mubr.msk.f32.mxu0 %vm743_vm1, %v501_v7  ;;  %v507_v7 = vld [vmem:[%s13795_s0 + $0xe0] sm:$0xff] }
  0x76   :  { %9049 = vmatmul.mubr.msk.f32.gmra.mxu0 %vm743_vm1, %v502_v2  ;;  %v508_v2 = vld [vmem:[%s13795_s0 + $0xe8] sm:$0xff] }
  0x77   :  { %9051 = vmatprep.mubr.msk.f32.mxu0 %vm743_vm1, %v503_v3  ;;  %v509_v3 = vld [vmem:[%s13795_s0 + $0xf0] sm:$0xff] }
  0x7a   :  { %9052 = vmatmul.mubr.msk.f32.gmra.mxu0 %vm743_vm1, %v504_v11  ;;  %v510_v11 = vld [vmem:[%s13795_s0 + $0xf8] sm:$0xff] }
  0x7b   :  { %9054 = vmatprep.mubr.msk.f32.mxu0 %vm743_vm1, %v505_v15  ;;  %v511_v15 = vld [vmem:[%s13795_s0 + $0x100] sm:$0xff] }
  0x7e   :  { %9055 = vmatmul.mubr.msk.f32.gmra.mxu0 %vm743_vm1, %v506_v6  ;;  %v512_v6 = vld [vmem:[%s13795_s0 + $0x108] sm:$0xff] }
  0x7f   :  { %9057 = vmatprep.mubr.msk.f32.mxu0 %vm743_vm1, %v507_v7  ;;  %v513_v7 = vld [vmem:[%s13795_s0 + $0x110] sm:$0xff] }
  0x82   :  { %9058 = vmatmul.mubr.msk.f32.gmra.mxu0 %vm743_vm1, %v508_v2  ;;  %v514_v2 = vld [vmem:[%s13795_s0 + $0x118] sm:$0xff] }
  0x83   :  { %9060 = vmatprep.mubr.msk.f32.mxu0 %vm743_vm1, %v509_v3  ;;  %v515_v3 = vld [vmem:[%s13795_s0 + $0x120] sm:$0xff] }
  0x86   :  { %9061 = vmatmul.mubr.msk.f32.gmra.mxu0 %vm743_vm1, %v510_v11  ;;  %v516_v11 = vld [vmem:[%s13795_s0 + $0x128] sm:$0xff] }
  0x87   :  { %9063 = vmatprep.mubr.msk.f32.mxu0 %vm743_vm1, %v511_v15  ;;  %v517_v15 = vld [vmem:[%s13795_s0 + $0x130] sm:$0xff] }
  0x8a   :  { %9064 = vmatmul.mubr.msk.f32.gmra.mxu0 %vm743_vm1, %v512_v6  ;;  %v518_v6 = vld [vmem:[%s13795_s0 + $0x138] sm:$0xff] }
  0x8b   :  { %9066 = vmatprep.mubr.msk.f32.mxu0 %vm743_vm1, %v513_v7  ;;  %v519_v7 = vld [vmem:[%s13795_s0 + $0x140] sm:$0xff] }
  0x8e   :  { %9067 = vmatmul.mubr.msk.f32.gmra.mxu0 %vm743_vm1, %v514_v2  ;;  %v520_v2 = vld [vmem:[%s13795_s0 + $0x148] sm:$0xff] }
  0x8f   :  { %9069 = vmatprep.mubr.msk.f32.mxu0 %vm743_vm1, %v515_v3  ;;  %v521_v3 = vld [vmem:[%s13795_s0 + $0x150] sm:$0xff] }
  0x92   :  { %9070 = vmatmul.mubr.msk.f32.gmra.mxu0 %vm743_vm1, %v516_v11  ;;  %v522_v11 = vld [vmem:[%s13795_s0 + $0x158] sm:$0xff] }
  0x93   :  { %9072 = vmatprep.mubr.msk.f32.mxu0 %vm743_vm1, %v517_v15  ;;  %v523_v15 = vld [vmem:[%s13795_s0 + $0x160] sm:$0xff] }
  0x96   :  { %9073 = vmatmul.mubr.msk.f32.gmra.mxu0 %vm743_vm1, %v518_v6  ;;  %v524_v6 = vld [vmem:[%s13795_s0 + $0x168] sm:$0xff] }
  0x97   :  { %9075 = vmatprep.mubr.msk.f32.mxu0 %vm743_vm1, %v519_v7  ;;  %v525_v7 = vld [vmem:[%s13795_s0 + $0x170] sm:$0xff] }
  0x9a   :  { %9076 = vmatmul.mubr.msk.f32.gmra.mxu0 %vm743_vm1, %v520_v2  ;;  %v526_v2 = vld [vmem:[%s13795_s0 + $0x178] sm:$0xff] }
  0x9b   :  { %9078 = vmatprep.mubr.msk.f32.mxu0 %vm743_vm1, %v521_v3  ;;  %v527_v3 = vld [vmem:[%s13795_s0 + $0x180] sm:$0xff] }
  0x9e   :  { %9079 = vmatmul.mubr.msk.f32.gmra.mxu0 %vm743_vm1, %v522_v11  ;;  %v528_v11 = vld [vmem:[%s13795_s0 + $0x188] sm:$0xff] }
  0x9f   :  { %9081 = vmatprep.mubr.msk.f32.mxu0 %vm743_vm1, %v523_v15  ;;  %v529_v15 = vld [vmem:[%s13795_s0 + $0x190] sm:$0xff] }
  0xa2   :  { %9082 = vmatmul.mubr.msk.f32.gmra.mxu0 %vm743_vm1, %v524_v6  ;;  %v530_v6 = vld [vmem:[%s13795_s0 + $0x198] sm:$0xff] }
  0xa3   :  { %9084 = vmatprep.mubr.msk.f32.mxu0 %vm743_vm1, %v525_v7  ;;  %v531_v7 = vld [vmem:[%s13795_s0 + $0x1a0] sm:$0xff] }
  0xa6   :  { %9085 = vmatmul.mubr.msk.f32.gmra.mxu0 %vm743_vm1, %v526_v2  ;;  %v532_v2 = vld [vmem:[%s13795_s0 + $0x1a8] sm:$0xff] }
  0xa7   :  { %9087 = vmatprep.mubr.msk.f32.mxu0 %vm743_vm1, %v527_v3  ;;  %v533_v3 = vld [vmem:[%s13795_s0 + $0x1b0] sm:$0xff] }
  0xaa   :  { %9088 = vmatmul.mubr.msk.f32.gmra.mxu0 %vm743_vm1, %v528_v11  ;;  %v534_v11 = vld [vmem:[%s13795_s0 + $0x1b8] sm:$0xff] }
  0xab   :  { %9090 = vmatprep.mubr.msk.f32.mxu0 %vm743_vm1, %v529_v15  ;;  %v535_v15 = vld [vmem:[%s13795_s0 + $0x1c0] sm:$0xff] }
  0xae   :  { %9091 = vmatmul.mubr.msk.f32.gmra.mxu0 %vm743_vm1, %v530_v6  ;;  %v536_v6 = vld [vmem:[%s13795_s0 + $0x1c8] sm:$0xff] }
  0xaf   :  { %9093 = vmatprep.mubr.msk.f32.mxu0 %vm743_vm1, %v531_v7  ;;  %v537_v7 = vld [vmem:[%s13795_s0 + $0x1d0] sm:$0xff] }
  0xb2   :  { %9094 = vmatmul.mubr.msk.f32.gmra.mxu0 %vm743_vm1, %v532_v2  ;;  %v538_v2 = vld [vmem:[%s13795_s0 + $0x1d8] sm:$0xff] }
  0xb3   :  { %9096 = vmatprep.mubr.msk.f32.mxu0 %vm743_vm1, %v533_v3  ;;  %v539_v3 = vld [vmem:[%s13795_s0 + $0x1e0] sm:$0xff] }
  0xb6   :  { %9097 = vmatmul.mubr.msk.f32.gmra.mxu0 %vm743_vm1, %v534_v11  ;;  %v540_v11 = vld [vmem:[%s13795_s0 + $0x1e8] sm:$0xff] }
  0xb7   :  { %9099 = vmatprep.mubr.msk.f32.mxu0 %vm743_vm1, %v535_v15  ;;  %v541_v15 = vld [vmem:[%s13795_s0 + $0x1f0] sm:$0xff] }
  0xba   :  { %9100 = vmatmul.mubr.msk.f32.gmra.mxu0 %vm743_vm1, %v536_v6  ;;  %v542_v6 = vld [vmem:[%s13795_s0 + $0x1f8] sm:$0xff] }
  0xbb   :  { %9102 = vmatprep.mubr.msk.f32.mxu0 %vm743_vm1, %v537_v7  ;;  %v543_v7 = vld [vmem:[%s13795_s0 + $0x200] sm:$0xff] }
  0xbe   :  { %9103 = vmatmul.mubr.msk.f32.gmra.mxu0 %vm743_vm1, %v538_v2  ;;  %v544_v2 = vld [vmem:[%s13795_s0 + $0x208] sm:$0xff] }
  0xbf   :  { %9105 = vmatprep.mubr.msk.f32.mxu0 %vm743_vm1, %v539_v3  ;;  %v545_v3 = vld [vmem:[%s13795_s0 + $0x210] sm:$0xff] }
  0xc2   :  { %9106 = vmatmul.mubr.msk.f32.gmra.mxu0 %vm743_vm1, %v540_v11  ;;  %v546_v11 = vld [vmem:[%s13795_s0 + $0x218] sm:$0xff] }
  0xc3   :  { %9108 = vmatprep.mubr.msk.f32.mxu0 %vm743_vm1, %v541_v15  ;;  %v547_v15 = vld [vmem:[%s13795_s0 + $0x220] sm:$0xff] }
  0xc6   :  { %9109 = vmatmul.mubr.msk.f32.gmra.mxu0 %vm743_vm1, %v542_v6  ;;  %v548_v6 = vld [vmem:[%s13795_s0 + $0x228] sm:$0xff] }
  0xc7   :  { %9111 = vmatprep.mubr.msk.f32.mxu0 %vm743_vm1, %v543_v7  ;;  %v549_v7 = vld [vmem:[%s13795_s0 + $0x230] sm:$0xff] }
  0xca   :  { %9112 = vmatmul.mubr.msk.f32.gmra.mxu0 %vm743_vm1, %v544_v2  ;;  %v550_v2 = vld [vmem:[%s13795_s0 + $0x238] sm:$0xff] }
  0xcb   :  { %9114 = vmatprep.mubr.msk.f32.mxu0 %vm743_vm1, %v545_v3  ;;  %v551_v3 = vld [vmem:[%s13795_s0 + $0x240] sm:$0xff] }
  0xce   :  { %9115 = vmatmul.mubr.msk.f32.gmra.mxu0 %vm743_vm1, %v546_v11  ;;  %v552_v11 = vld [vmem:[%s13795_s0 + $0x248] sm:$0xff] }
  0xcf   :  { %9117 = vmatprep.mubr.msk.f32.mxu0 %vm743_vm1, %v547_v15  ;;  %v553_v15 = vld [vmem:[%s13795_s0 + $0x250] sm:$0xff] }
  0xd2   :  { %9118 = vmatmul.mubr.msk.f32.gmra.mxu0 %vm743_vm1, %v548_v6  ;;  %v554_v6 = vld [vmem:[%s13795_s0 + $0x258] sm:$0xff] }
  0xd3   :  { %9120 = vmatprep.mubr.msk.f32.mxu0 %vm743_vm1, %v549_v7  ;;  %v555_v7 = vld [vmem:[%s13795_s0 + $0x260] sm:$0xff] }
  0xd6   :  { %9121 = vmatmul.mubr.msk.f32.gmra.mxu0 %vm743_vm1, %v550_v2  ;;  %v556_v2 = vld [vmem:[%s13795_s0 + $0x268] sm:$0xff] }
  0xd7   :  { %9123 = vmatprep.mubr.msk.f32.mxu0 %vm743_vm1, %v551_v3  ;;  %v557_v3 = vld [vmem:[%s13795_s0 + $0x270] sm:$0xff] }
  0xda   :  { %9124 = vmatmul.mubr.msk.f32.gmra.mxu0 %vm743_vm1, %v552_v11  ;;  %v558_v11 = vld [vmem:[%s13795_s0 + $0x278] sm:$0xff] }
  0xdb   :  { %9126 = vmatprep.mubr.msk.f32.mxu0 %vm743_vm1, %v553_v15  ;;  %v559_v15 = vld [vmem:[%s13795_s0 + $0x280] sm:$0xff] }
  0xde   :  { %9127 = vmatmul.mubr.msk.f32.gmra.mxu0 %vm743_vm1, %v554_v6  ;;  %v560_v6 = vld [vmem:[%s13795_s0 + $0x288] sm:$0xff] }
  0xdf   :  { %9129 = vmatprep.mubr.msk.f32.mxu0 %vm743_vm1, %v555_v7  ;;  %v561_v7 = vld [vmem:[%s13795_s0 + $0x290] sm:$0xff] }
  0xe2   :  { %9130 = vmatmul.mubr.msk.f32.gmra.mxu0 %vm743_vm1, %v556_v2  ;;  %v562_v2 = vld [vmem:[%s13795_s0 + $0x298] sm:$0xff] }
  0xe3   :  { %9132 = vmatprep.mubr.msk.f32.mxu0 %vm743_vm1, %v557_v3  ;;  %v563_v3 = vld [vmem:[%s13795_s0 + $0x2a0] sm:$0xff] }
  0xe6   :  { %9133 = vmatmul.mubr.msk.f32.gmra.mxu0 %vm743_vm1, %v558_v11  ;;  %v564_v11 = vld [vmem:[%s13795_s0 + $0x2a8] sm:$0xff] }
  0xe7   :  { %9135 = vmatprep.mubr.msk.f32.mxu0 %vm743_vm1, %v559_v15  ;;  %v565_v15 = vld [vmem:[%s13795_s0 + $0x2b0] sm:$0xff] }
  0xea   :  { %9136 = vmatmul.mubr.msk.f32.gmra.mxu0 %vm743_vm1, %v560_v6  ;;  %v566_v6 = vld [vmem:[%s13795_s0 + $0x2b8] sm:$0xff] }
  0xeb   :  { %9138 = vmatprep.mubr.msk.f32.mxu0 %vm743_vm1, %v561_v7  ;;  %v567_v7 = vld [vmem:[%s13795_s0 + $0x2c0] sm:$0xff] }
  0xee   :  { %9139 = vmatmul.mubr.msk.f32.gmra.mxu0 %vm743_vm1, %v562_v2  ;;  %v568_v2 = vld [vmem:[%s13795_s0 + $0x2c8] sm:$0xff] }
  0xef   :  { %9141 = vmatprep.mubr.msk.f32.mxu0 %vm743_vm1, %v563_v3  ;;  %v569_v3 = vld [vmem:[%s13795_s0 + $0x2d0] sm:$0xff] }
  0xf2   :  { %9142 = vmatmul.mubr.msk.f32.gmra.mxu0 %vm743_vm1, %v564_v11  ;;  %v570_v11 = vld [vmem:[%s13795_s0 + $0x2d8] sm:$0xff] }
  0xf3   :  { %9144 = vmatprep.mubr.msk.f32.mxu0 %vm743_vm1, %v565_v15  ;;  %v571_v15 = vld [vmem:[%s13795_s0 + $0x2e0] sm:$0xff] }
  0xf6   :  { %9145 = vmatmul.mubr.msk.f32.gmra.mxu0 %vm743_vm1, %v566_v6  ;;  %v572_v6 = vld [vmem:[%s13795_s0 + $0x2e8] sm:$0xff] }
  0xf7   :  { %9147 = vmatprep.mubr.msk.f32.mxu0 %vm743_vm1, %v567_v7  ;;  %v573_v7 = vld [vmem:[%s13795_s0 + $0x2f0] sm:$0xff] }
  0xfa   :  { %9148 = vmatmul.mubr.msk.f32.gmra.mxu0 %vm743_vm1, %v568_v2  ;;  %v574_v2 = vld [vmem:[%s13795_s0 + $0x2f8] sm:$0xff] }
  0xfb   :  { %9150 = vmatprep.mubr.msk.f32.mxu0 %vm743_vm1, %v569_v3  ;;  %v575_v3 = vld [vmem:[%s13795_s0 + $0x300] sm:$0xff] }
  0xfe   :  { %9151 = vmatmul.mubr.msk.f32.gmra.mxu0 %vm743_vm1, %v570_v11  ;;  %v576_v11 = vld [vmem:[%s13795_s0 + $0x308] sm:$0xff] }
  0xff   :  { %9153 = vmatprep.mubr.msk.f32.mxu0 %vm743_vm1, %v571_v15  ;;  %v577_v15 = vld [vmem:[%s13795_s0 + $0x310] sm:$0xff] }
 0x102   :  { %9154 = vmatmul.mubr.msk.f32.gmra.mxu0 %vm743_vm1, %v572_v6 }
 0x103   :  { %9156 = vmatprep.mubr.msk.f32.mxu0 %vm743_vm1, %v573_v7  ;;  %v3118_v7 = vld [vmem:[%s13796_s1 + $0x8] sm:$0xff] }
 0x104   :  { %3197 = vmatprep.mubr.f32.mxu1 %v3118_v7  ;;  %v581_v7 = vld [vmem:[%s13795_s0 + $0x330] sm:$0xff] }
 0x106   :  { %9157 = vmatmul.mubr.msk.f32.gmra.mxu0 %vm743_vm1, %v574_v2  ;;  %v578_v2 = vld [vmem:[%s13795_s0 + $0x318] sm:$0xff] }
 0x107   :  { %9159 = vmatprep.mubr.msk.f32.mxu0 %vm743_vm1, %v575_v3 }
 0x10a   :  { %v10788_v6 = vpop.f32.mrf.mxu0  ;;  %9160 = vmatmul.mubr.msk.f32.gmra.mxu0 %vm743_vm1, %v576_v11  ;;  %v580_v11 = vld [vmem:[%s13795_s0 + $0x328] sm:$0xff] }
 0x10b   :  { %9162 = vmatprep.mubr.msk.f32.mxu0 %vm743_vm1, %v577_v15 }
 0x10c   :  { %v10798_v3 = vpop.f32.mrf.mxu0 }
 0x10e   :  { %v10803_v14 = vpop.f32.mrf.mxu0  ;;  %9163 = vmatmul.mubr.msk.f32.gmra.mxu0 %vm743_vm1, %v578_v2 }
 0x10f   :  { %9165 = vmatprep.mubr.msk.f32.mxu0 %vm743_vm1, %v579_v10  ;;  %v582_v10 = vld [vmem:[%s13795_s0 + $0x338] sm:$0xff] }
 0x110   :  { %v10810_v15 = vpop.f32.mrf.mxu0 }
 0x112   :  { %v10815_v19 = vpop.f32.mrf.mxu0  ;;  %9166 = vmatmul.mubr.msk.f32.gmra.mxu0 %vm743_vm1, %v580_v11  ;;  %v584_v11 = vld [vmem:[%s13795_s0 + $0x348] sm:$0xff] }
 0x113   :  { %9168 = vmatprep.mubr.msk.f32.mxu0 %vm743_vm1, %v581_v7 }
 0x114   :  { %v10822_v2 = vpop.f32.mrf.mxu0 }
 0x116   :  { %v10827_v18 = vpop.f32.mrf.mxu0  ;;  %9169 = vmatmul.mubr.msk.f32.gmra.mxu0 %vm743_vm1, %v582_v10 }
 0x117   :  { %9171 = vmatprep.mubr.msk.f32.mxu0 %vm743_vm1, %v583_v23  ;;  %v586_v23 = vld [vmem:[%s13795_s0 + $0x358] sm:$0xff] }
 0x118   :  { %v10834_v7 = vpop.f32.mrf.mxu0 }
 0x11a   :  { %v10839_v27 = vpop.f32.mrf.mxu0  ;;  %9172 = vmatmul.mubr.msk.f32.gmra.mxu0 %vm743_vm1, %v584_v11 }
 0x11b   :  { %9174 = vmatprep.mubr.msk.f32.mxu0 %vm743_vm1, %v585_v22  ;;  %v588_v22 = vld [vmem:[%s13795_s0 + $0x368] sm:$0xff] }
 0x11c   :  { %v10846_v10 = vpop.f32.mrf.mxu0 }
 0x11e   :  { %v10851_v26 = vpop.f32.mrf.mxu0  ;;  %9175 = vmatmul.mubr.msk.f32.gmra.mxu0 %vm743_vm1, %v586_v23 }
 0x11f   :  { %9177 = vmatprep.mubr.msk.f32.mxu0 %vm743_vm1, %v587_v31  ;;  %v590_v31 = vld [vmem:[%s13795_s0 + $0x378] sm:$0xff] }
 0x120   :  { %v10858_v11 = vpop.f32.mrf.mxu0 }
 0x122   :  { %v10863_v35 = vpop.f32.mrf.mxu0  ;;  %9178 = vmatmul.mubr.msk.f32.gmra.mxu0 %vm743_vm1, %v588_v22  ;;  %v592_v22 = vld [vmem:[%s13795_s0 + $0x388] sm:$0xff] }
 0x123   :  { %9180 = vmatprep.mubr.msk.f32.mxu0 %vm743_vm1, %v589_v30 }
 0x124   :  { %v10870_v23 = vpop.f32.mrf.mxu0 }
 0x126   :  { %v9038_v34 = vpop.f32.mrf.mxu0  ;;  %9181 = vmatmul.mubr.msk.f32.gmra.mxu0 %vm743_vm1, %v590_v31  ;;  %v594_v31 = vld [vmem:[%s13795_s0 + $0x398] sm:$0xff] }
 0x127   :  { %9183 = vmatprep.mubr.msk.f32.mxu0 %vm743_vm1, %v591_v39  ;;  %v1658_v4 = vadd.f32 %v9038_v34, %v10962_v0 }
 0x128   :  { %v1652_v30 = vpop.f32.mrf.mxu0 }
 0x129   :  { %v1653_v13 = vadd.f32 %v10962_v0, %v1652_v30  ;;  %v2876_v21 = vmax.f32 %v1658_v4, 0.0  ;;  %v611_v4 = vld [vmem:[%s13795_s0 + $0x420] sm:$0xff] }
 0x12a   :  { %v10883_v43 = vpop.f32.mrf.mxu0  ;;  %9184 = vmatmul.mubr.msk.f32.gmra.mxu0 %vm743_vm1, %v592_v22 }
 0x12b   :  { %9186 = vmatprep.mubr.msk.f32.mxu0 %vm743_vm1, %v593_v38  ;;  %v596_v38 = vld [vmem:[%s13795_s0 + $0x3a8] sm:$0xff] }
 0x12c   :  { %v10890_v39 = vpop.f32.mrf.mxu0 }
 0x12e   :  { %v10895_v42 = vpop.f32.mrf.mxu0  ;;  %9187 = vmatmul.mubr.msk.f32.gmra.mxu0 %vm743_vm1, %v594_v31 }
 0x12f   :  { %9189 = vmatprep.mubr.msk.f32.mxu0 %vm743_vm1, %v595_v47  ;;  %v598_v47 = vld [vmem:[%s13795_s0 + $0x3b8] sm:$0xff] }
 0x130   :  { %v10902_v22 = vpop.f32.mrf.mxu0 }
 0x132   :  { %v10907_v51 = vpop.f32.mrf.mxu0  ;;  %9190 = vmatmul.mubr.msk.f32.gmra.mxu0 %vm743_vm1, %v596_v38 }
 0x133   :  { %9192 = vmatprep.mubr.msk.f32.mxu0 %vm743_vm1, %v597_v46  ;;  %v600_v46 = vld [vmem:[%s13795_s0 + $0x3c8] sm:$0xff] }
 0x134   :  { %v10914_v31 = vpop.f32.mrf.mxu0 }
 0x136   :  { %v10919_v50 = vpop.f32.mrf.mxu0  ;;  %9193 = vmatmul.mubr.msk.f32.gmra.mxu0 %vm743_vm1, %v598_v47 }
 0x137   :  { %9195 = vmatprep.mubr.msk.f32.mxu0 %vm743_vm1, %v599_v55  ;;  %v602_v55 = vld [vmem:[%s13795_s0 + $0x3d8] sm:$0xff] }
 0x138   :  { %v10926_v38 = vpop.f32.mrf.mxu0 }
 0x13a   :  { %v10931_v59 = vpop.f32.mrf.mxu0  ;;  %9196 = vmatmul.mubr.msk.f32.gmra.mxu0 %vm743_vm1, %v600_v46  ;;  %v604_v46 = vld [vmem:[%s13795_s0 + $0x3e8] sm:$0xff] }
 0x13b   :  { %9198 = vmatprep.mubr.msk.f32.mxu0 %vm743_vm1, %v601_v54 }
 0x13c   :  { %v10938_v47 = vpop.f32.mrf.mxu0 }
 0x13e   :  { %v9056_v58 = vpop.f32.mrf.mxu0  ;;  %9199 = vmatmul.mubr.msk.f32.gmra.mxu0 %vm743_vm1, %v602_v55  ;;  %v606_v55 = vld [vmem:[%s13795_s0 + $0x3f8] sm:$0xff] }
 0x13f   :  { %9201 = vmatprep.mubr.msk.f32.mxu0 %vm743_vm1, %v603_v63  ;;  %v607_v63 = vld [vmem:[%s13795_s0 + $0x400] sm:$0xff] }
 0x140   :  { %v1712_v54 = vpop.f32.mrf.mxu0 }
 0x142   :  { %v9059_v1 = vpop.f32.mrf.mxu0  ;;  %9202 = vmatmul.mubr.msk.f32.gmra.mxu0 %vm743_vm1, %v604_v46 }
 0x143   :  { %9204 = vmatprep.mubr.msk.f32.mxu0 %vm743_vm1, %v605_v62  ;;  %v608_v62 = vld [vmem:[%s13795_s0 + $0x408] sm:$0xff]  ;;  %v1728_v34 = vadd.f32 %v9059_v1, %v10962_v0  ;;  %v610_v1 = vld [vmem:[%s13795_s0 + $0x418] sm:$0xff] }
 0x144   :  { %v1722_v5 = vpop.f32.mrf.mxu0 }
 0x146   :  { %v9062_v9 = vpop.f32.mrf.mxu0  ;;  %9205 = vmatmul.mubr.msk.f32.gmra.mxu0 %vm743_vm1, %v606_v55 }
 0x147   :  { %9207 = vmatprep.mubr.msk.f32.mxu0 %vm743_vm1, %v607_v63  ;;  %v1738_v46 = vadd.f32 %v9062_v9, %v10962_v0  ;;  %v1648_v63 = vadd.f32 %v10863_v35, %v10962_v0  ;;  %v1723_v9 = vadd.f32 %v10962_v0, %v1722_v5  ;;  %v1718_v5 = vadd.f32 %v9056_v58, %v10962_v0  ;;  %v612_v58 = vld [vmem:[%s13795_s0 + $0x428] sm:$0xff] }
 0x148   :  { %v1732_v8 = vpop.f32.mrf.mxu0 }
 0x149   :  { %v1733_v17 = vadd.f32 %v10962_v0, %v1732_v8  ;;  %v2892_v55 = vmax.f32 %v1738_v46, 0.0  ;;  %v1643_v8 = vadd.f32 %v10962_v0, %v10870_v23  ;;  %v2875_v46 = vmax.f32 %v1653_v13, 0.0 }
 0x14a   :  { %v10979_v16 = vpop.f32.mrf.mxu0  ;;  %9208 = vmatmul.mubr.msk.f32.gmra.mxu0 %vm743_vm1, %v608_v62  ;;  %v2874_v62 = vmax.f32 %v1648_v63, 0.0  ;;  %v1713_v13 = vadd.f32 %v10962_v0, %v1712_v54  ;;  %v1633_v23 = vadd.f32 %v10962_v0, %v10858_v11  ;;  %v613_v63 = vld [vmem:[%s13795_s0 + $0x430] sm:$0xff]  ;;  %v1708_v54 = vadd.f32 %v10931_v59, %v10962_v0  ;;  %v614_v59 = vld [vmem:[%s13795_s0 + $0x438] sm:$0xff] }
 0x14b   :  { %v2891_v30 = vmax.f32 %v1733_v17, 0.0  ;;  %8724 = vmatprep.subr.mxu1 %v2892_v55  ;;  %9210 = vmatprep.mubr.msk.f32.mxu0 %vm743_vm1, %v609_v12  ;;  %v2890_v17 = vmax.f32 %v1728_v34, 0.0  ;;  %v1638_v12 = vadd.f32 %v10851_v26, %v10962_v0  ;;  %v2873_v26 = vmax.f32 %v1643_v8, 0.0 }
 0x14c   :  { %v10989_v35 = vpop.f32.mrf.mxu0  ;;  %8725 = vmatpush3.msra.mxu1 %v2876_v21  ;;  %v2889_v21 = vmax.f32 %v1723_v9, 0.0  ;;  %v2888_v9 = vmax.f32 %v1718_v5, 0.0  ;;  %v1703_v11 = vadd.f32 %v10962_v0, %v10938_v47  ;;  %v2887_v8 = vmax.f32 %v1713_v13, 0.0 }
 0x14d   :  { %8726 = vmatprep.subr.mxu1 %v2891_v30  ;;  %v1628_v30 = vadd.f32 %v10839_v27, %v10962_v0  ;;  %v1623_v27 = vadd.f32 %v10962_v0, %v10846_v10  ;;  %v1698_v47 = vadd.f32 %v10919_v50, %v10962_v0  ;;  %v1693_v10 = vadd.f32 %v10962_v0, %v10926_v38  ;;  %v616_v50 = vld [vmem:[%s13795_s0 + $0x448] sm:$0xff] }
 0x14e   :  { %v10997_v55 = vpop.f32.mrf.mxu0  ;;  %9211 = vmatmul.mubr.msk.f32.gmra.mxu0 %vm743_vm1, %v610_v1  ;;  %8727 = vmatpush3.msra.mxu1 %v2875_v46  ;;  %v2872_v1 = vmax.f32 %v1638_v12, 0.0  ;;  %v2886_v12 = vmax.f32 %v1708_v54, 0.0  ;;  %v1688_v38 = vadd.f32 %v10907_v51, %v10962_v0  ;;  %v618_v51 = vld [vmem:[%s13795_s0 + $0x458] sm:$0xff] }
 0x14f   :  { %8728 = vmatprep.subr.mxu1 %v2890_v17  ;;  %9213 = vmatprep.mubr.msk.f32.mxu0 %vm743_vm1, %v611_v4  ;;  %v2871_v4 = vmax.f32 %v1633_v23, 0.0  ;;  %v615_v17 = vld [vmem:[%s13795_s0 + $0x440] sm:$0xff]  ;;  %v2870_v13 = vmax.f32 %v1628_v30, 0.0  ;;  %v2869_v23 = vmax.f32 %v1623_v27, 0.0  ;;  %v2884_v54 = vmax.f32 %v1698_v47, 0.0 }
 0x150   :  { %v11007_v34 = vpop.f32.mrf.mxu0  ;;  %8729 = vmatpush3.msra.mxu1 %v2874_v62  ;;  %v1618_v62 = vadd.f32 %v10827_v18, %v10962_v0  ;;  %v1613_v18 = vadd.f32 %v10962_v0, %v10834_v7  ;;  %v1683_v7 = vadd.f32 %v10962_v0, %v10914_v31  ;;  %v619_v27 = vld [vmem:[%s13795_s0 + $0x460] sm:$0xff]  ;;  %v1678_v31 = vadd.f32 %v10895_v42, %v10962_v0  ;;  %v620_v42 = vld [vmem:[%s13795_s0 + $0x468] sm:$0xff] }
 0x151   :  { %8730 = vmatprep.subr.mxu1 %v2889_v21 }
 0x152   :  { %v11016_v46 = vpop.f32.mrf.mxu0  ;;  %9214 = vmatmul.mubr.msk.f32.gmra.mxu0 %vm743_vm1, %v612_v58  ;;  %8731 = vmatpush3.msra.mxu1 %v2873_v26  ;;  %v2885_v58 = vmax.f32 %v1703_v11, 0.0  ;;  %v2868_v30 = vmax.f32 %v1618_v62, 0.0  ;;  %v2883_v11 = vmax.f32 %v1693_v10, 0.0  ;;  %v2881_v62 = vmax.f32 %v1683_v7, 0.0 }
 0x153   :  { %8732 = vmatprep.subr.mxu1 %v2888_v9  ;;  %9216 = vmatprep.mubr.msk.f32.mxu0 %vm743_vm1, %v613_v63  ;;  %v617_v63 = vld [vmem:[%s13795_s0 + $0x450] sm:$0xff]  ;;  %v1608_v9 = vadd.f32 %v10815_v19, %v10962_v0  ;;  %v1603_v19 = vadd.f32 %v10962_v0, %v10822_v2  ;;  %v1673_v2 = vadd.f32 %v10962_v0, %v10902_v22 }
 0x154   :  { %v11027_v5 = vpop.f32.mrf.mxu0  ;;  %8733 = vmatpush3.msra.mxu1 %v2872_v1  ;;  %v1668_v22 = vadd.f32 %v10883_v43, %v10962_v0  ;;  %v622_v43 = vld [vmem:[%s13795_s0 + $0x478] sm:$0xff] }
 0x155   :  { %8734 = vmatprep.subr.mxu1 %v2887_v8  ;;  %v2867_v8 = vmax.f32 %v1613_v18, 0.0  ;;  %v2866_v47 = vmax.f32 %v1608_v9, 0.0  ;;  %v1588_v18 = vadd.f32 %v10788_v6, %v10962_v0  ;;  %v1583_v6 = vadd.f32 %v10962_v0, %v10798_v3  ;;  %v624_v3 = vld [vmem:[%s13795_s0 + $0x488] sm:$0xff] }
 0x156   :  { %v11036_v21 = vpop.f32.mrf.mxu0  ;;  %9217 = vmatmul.mubr.msk.f32.gmra.mxu0 %vm743_vm1, %v614_v59  ;;  %8735 = vmatpush3.msra.mxu1 %v2871_v4  ;;  %v2882_v4 = vmax.f32 %v1688_v38, 0.0  ;;  %v2879_v38 = vmax.f32 %v1673_v2, 0.0 }
 0x157   :  { %8736 = vmatprep.subr.mxu1 %v2886_v12  ;;  %9219 = vmatprep.mubr.msk.f32.mxu0 %vm743_vm1, %v615_v17  ;;  %v1598_v17 = vadd.f32 %v10803_v14, %v10962_v0  ;;  %v1593_v14 = vadd.f32 %v10962_v0, %v10810_v15  ;;  %v1663_v15 = vadd.f32 %v10962_v0, %v10890_v39  ;;  %v2878_v39 = vmax.f32 %v1668_v22, 0.0 }
 0x158   :  { %v11047_v26 = vpop.f32.mrf.mxu0  ;;  %8737 = vmatpush3.msra.mxu1 %v2870_v13  ;;  %v2865_v13 = vmax.f32 %v1603_v19, 0.0  ;;  %v2862_v7 = vmax.f32 %v1588_v18, 0.0  ;;  %v2861_v19 = vmax.f32 %v1583_v6, 0.0  ;;  %v633_v6 = vld [vmem:[%s13795_s0 + $0x4d0] sm:$0xff] }
 0x159   :  { %8738 = vmatprep.subr.mxu1 %v2885_v58  ;;  %v621_v58 = vld [vmem:[%s13795_s0 + $0x470] sm:$0xff] }
 0x15a   :  { %v11056_v1 = vpop.f32.mrf.mxu0  ;;  %9220 = vmatmul.mubr.msk.f32.gmra.mxu0 %vm743_vm1, %v616_v50  ;;  %8739 = vmatpush3.msra.mxu1 %v2869_v23  ;;  %v2880_v50 = vmax.f32 %v1678_v31, 0.0  ;;  %v2864_v23 = vmax.f32 %v1598_v17, 0.0  ;;  %v3117_v31 = vld [vmem:[%s13796_s1] sm:$0xff] }
 0x15b   :  { %8740 = vmatprep.subr.mxu1 %v2884_v54  ;;  %9222 = vmatprep.mubr.msk.f32.mxu0 %vm743_vm1, %v617_v63  ;;  %v2863_v54 = vmax.f32 %v1593_v14, 0.0  ;;  %v628_v14 = vld [vmem:[%s13795_s0 + $0x4a8] sm:$0xff] }
 0x15c   :  { %v11067_v59 = vpop.f32.mrf.mxu0  ;;  %8741 = vmatpush3.msra.mxu1 %v2868_v30  ;;  %v623_v30 = vld [vmem:[%s13795_s0 + $0x480] sm:$0xff] }
 0x15d   :  { %8742 = vmatprep.subr.mxu1 %v2883_v11 }
 0x15e   :  { %v11076_v12 = vpop.f32.mrf.mxu0  ;;  %9223 = vmatmul.mubr.msk.f32.gmra.mxu0 %vm743_vm1, %v618_v51  ;;  %8743 = vmatpush3.msra.mxu1 %v2867_v8  ;;  %v2877_v51 = vmax.f32 %v1663_v15, 0.0 }
 0x15f   :  { %8744 = vmatprep.subr.mxu1 %v2882_v4  ;;  %9225 = vmatprep.mubr.msk.f32.mxu0 %vm743_vm1, %v619_v27  ;;  %v625_v27 = vld [vmem:[%s13795_s0 + $0x490] sm:$0xff]  ;;  %v3120_v4 = vld [vmem:[%s13796_s1 + $0x18] sm:$0xff] }
 0x160   :  { %v11087_v10 = vpop.f32.mrf.mxu0  ;;  %8745 = vmatpush3.msra.mxu1 %v2866_v47  ;;  %v626_v47 = vld [vmem:[%s13795_s0 + $0x498] sm:$0xff] }
 0x161   :  { %8746 = vmatprep.subr.mxu1 %v2881_v62  ;;  %v627_v62 = vld [vmem:[%s13795_s0 + $0x4a0] sm:$0xff] }
 0x162   :  { %v11096_v63 = vpop.f32.mrf.mxu0  ;;  %9226 = vmatmul.mubr.msk.f32.gmra.mxu0 %vm743_vm1, %v620_v42  ;;  %8747 = vmatpush3.msra.mxu1 %v2865_v13 }
 0x163   :  { %8748 = vmatprep.subr.mxu1 %v2880_v50  ;;  %9228 = vmatprep.mubr.msk.f32.mxu0 %vm743_vm1, %v621_v58  ;;  %v629_v58 = vld [vmem:[%s13795_s0 + $0x4b0] sm:$0xff]  ;;  %v630_v50 = vld [vmem:[%s13795_s0 + $0x4b8] sm:$0xff] }
 0x164   :  { %v11107_v9 = vpop.f32.mrf.mxu0  ;;  %8749 = vmatpush3.msra.mxu1 %v2864_v23  ;;  %v631_v23 = vld [vmem:[%s13795_s0 + $0x4c0] sm:$0xff] }
 0x165   :  { %8750 = vmatprep.subr.mxu1 %v2879_v38  ;;  %v632_v38 = vld [vmem:[%s13795_s0 + $0x4c8] sm:$0xff] }
 0x166   :  { %v9086_v11 = vpop.f32.mrf.mxu0  ;;  %9229 = vmatmul.mubr.msk.f32.gmra.mxu0 %vm743_vm1, %v622_v43  ;;  %8751 = vmatpush3.msra.mxu1 %v2863_v54 }
 0x167   :  { %8752 = vmatprep.subr.mxu1 %v2878_v39  ;;  %9231 = vmatprep.mubr.msk.f32.mxu0 %vm743_vm1, %v623_v30  ;;  %v634_v30 = vld [vmem:[%s13795_s0 + $0x4d8] sm:$0xff] }
 0x168   :  { %v1812_v8 = vpop.f32.mrf.mxu0  ;;  %8753 = vmatpush3.msra.mxu1 %v2862_v7  ;;  %v635_v7 = vld [vmem:[%s13795_s0 + $0x4e0] sm:$0xff] }
 0x169   :  { %8754 = vmatprep.subr.mxu1 %v2877_v51 }
 0x16a   :  { %v11126_v17 = vpop.f32.mrf.mxu0  ;;  %9232 = vmatmul.mubr.msk.f32.gmra.mxu0 %vm743_vm1, %v624_v3  ;;  %8755 = vmatpush3.msra.mxu1 %v2861_v19  ;;  %v636_v3 = vld [vmem:[%s13795_s0 + $0x4e8] sm:$0xff] }
 0x16b   :  { %9234 = vmatprep.mubr.msk.f32.mxu0 %vm743_vm1, %v625_v27  ;;  %3198 = vmatmul.mubr.f32.vlgmr.msra.gmra.mxu1 %v3117_v31  ;;  %v637_v27 = vld [vmem:[%s13795_s0 + $0x4f0] sm:$0xff] }
 0x16c   :  { %v11133_v2 = vpop.f32.mrf.mxu0  ;;  %3267 = vmatprep.mubr.f32.mxu1 %v3120_v4  ;;  %v638_v4 = vld [vmem:[%s13795_s0 + $0x4f8] sm:$0xff] }
 0x16e   :  { %v11138_v42 = vpop.f32.mrf.mxu0  ;;  %9235 = vmatmul.mubr.msk.f32.gmra.mxu0 %vm743_vm1, %v626_v47 }
 0x16f   :  { %9237 = vmatprep.mubr.msk.f32.mxu0 %vm743_vm1, %v627_v62  ;;  %v639_v62 = vld [vmem:[%s13795_s0 + $0x500] sm:$0xff] }
 0x170   :  { %v11145_v13 = vpop.f32.mrf.mxu0 }
 0x172   :  { %v11150_v22 = vpop.f32.mrf.mxu0  ;;  %9238 = vmatmul.mubr.msk.f32.gmra.mxu0 %vm743_vm1, %v628_v14  ;;  %v1818_v14 = vadd.f32 %v9086_v11, %v10962_v0 }
 0x173   :  { %9240 = vmatprep.mubr.msk.f32.mxu0 %vm743_vm1, %v629_v58 }
 0x174   :  { %v11157_v18 = vpop.f32.mrf.mxu0 }
 0x176   :  { %v11162_v15 = vpop.f32.mrf.mxu0  ;;  %9241 = vmatmul.mubr.msk.f32.gmra.mxu0 %vm743_vm1, %v630_v50 }
 0x177   :  { %9243 = vmatprep.mubr.msk.f32.mxu0 %vm743_vm1, %v631_v23  ;;  %v640_v23 = vld [vmem:[%s13795_s0 + $0x508] sm:$0xff] }
 0x178   :  { %v11169_v43 = vpop.f32.mrf.mxu0 }
 0x17a   :  { %v9101_v54 = vpop.f32.mrf.mxu0  ;;  %9244 = vmatmul.mubr.msk.f32.gmra.mxu0 %vm743_vm1, %v632_v38  ;;  %v1813_v38 = vadd.f32 %v10962_v0, %v1812_v8 }
 0x17b   :  { %9246 = vmatprep.mubr.msk.f32.mxu0 %vm743_vm1, %v633_v6 }
 0x17c   :  { %v11179_v39 = vpop.f32.mrf.mxu0 }
 0x17e   :  { %v9104_v51 = vpop.f32.mrf.mxu0  ;;  %9247 = vmatmul.mubr.msk.f32.gmra.mxu0 %vm743_vm1, %v634_v30  ;;  %v641_v30 = vld [vmem:[%s13795_s0 + $0x510] sm:$0xff] }
 0x17f   :  { %9249 = vmatprep.mubr.msk.f32.mxu0 %vm743_vm1, %v635_v7 }
 0x180   :  { %v1872_v19 = vpop.f32.mrf.mxu0 }
 0x182   :  { %v9107_v31 = vpop.f32.mrf.mxu0  ;;  %9250 = vmatmul.mubr.msk.f32.gmra.mxu0 %vm743_vm1, %v636_v3 }
 0x183   :  { %9252 = vmatprep.mubr.msk.f32.mxu0 %vm743_vm1, %v637_v27  ;;  %v1888_v11 = vadd.f32 %v9107_v31, %v10962_v0  ;;  %v1808_v27 = vadd.f32 %v11096_v63, %v10962_v0  ;;  %v642_v31 = vld [vmem:[%s13795_s0 + $0x518] sm:$0xff] }
 0x184   :  { %v1882_v47 = vpop.f32.mrf.mxu0 }
 0x185   :  { %v1883_v8 = vadd.f32 %v10962_v0, %v1882_v47  ;;  %v1878_v47 = vadd.f32 %v9104_v51, %v10962_v0  ;;  %v644_v51 = vld [vmem:[%s13795_s0 + $0x528] sm:$0xff] }
 0x186   :  { %v9110_v58 = vpop.f32.mrf.mxu0  ;;  %9253 = vmatmul.mubr.msk.f32.gmra.mxu0 %vm743_vm1, %v638_v4  ;;  %v2908_v4 = vmax.f32 %v1818_v14, 0.0  ;;  %v643_v14 = vld [vmem:[%s13795_s0 + $0x520] sm:$0xff] }
 0x187   :  { %v1898_v50 = vadd.f32 %v9110_v58, %v10962_v0  ;;  %9255 = vmatprep.mubr.msk.f32.mxu0 %vm743_vm1, %v639_v62 }
 0x188   :  { %v1892_v6 = vpop.f32.mrf.mxu0 }
 0x189   :  { %v2924_v7 = vmax.f32 %v1898_v50, 0.0  ;;  %v1893_v3 = vadd.f32 %v10962_v0, %v1892_v6  ;;  %v1803_v50 = vadd.f32 %v10962_v0, %v11107_v9  ;;  %v2907_v6 = vmax.f32 %v1813_v38, 0.0 }
 0x18a   :  { %v11215_v62 = vpop.f32.mrf.mxu0  ;;  %9256 = vmatmul.mubr.msk.f32.gmra.mxu0 %vm743_vm1, %v640_v23  ;;  %v2922_v23 = vmax.f32 %v1888_v11, 0.0  ;;  %v1873_v9 = vadd.f32 %v10962_v0, %v1872_v19  ;;  %v2921_v38 = vmax.f32 %v1883_v8, 0.0  ;;  %v1793_v11 = vadd.f32 %v10962_v0, %v11087_v10 }
 0x18b   :  { %v2923_v58 = vmax.f32 %v1893_v3, 0.0  ;;  %8759 = vmatprep.subr.mxu1 %v2924_v7  ;;  %9258 = vmatprep.mubr.msk.f32.mxu0 %vm743_vm1, %v641_v30  ;;  %v1798_v30 = vadd.f32 %v11076_v12, %v10962_v0  ;;  %v2906_v7 = vmax.f32 %v1808_v27, 0.0  ;;  %v2905_v12 = vmax.f32 %v1803_v50, 0.0 }
 0x18c   :  { %v11225_v63 = vpop.f32.mrf.mxu0  ;;  %8760 = vmatpush3.msra.mxu1 %v2908_v4  ;;  %v645_v4 = vld [vmem:[%s13795_s0 + $0x530] sm:$0xff]  ;;  %v1868_v19 = vadd.f32 %v9101_v54, %v10962_v0  ;;  %v2920_v8 = vmax.f32 %v1878_v47, 0.0  ;;  %v1863_v10 = vadd.f32 %v10962_v0, %v11179_v39  ;;  %v2919_v50 = vmax.f32 %v1873_v9, 0.0  ;;  %v646_v54 = vld [vmem:[%s13795_s0 + $0x538] sm:$0xff] }
 0x18d   :  { %8761 = vmatprep.subr.mxu1 %v2923_v58  ;;  %v1788_v58 = vadd.f32 %v11056_v1, %v10962_v0  ;;  %v1783_v1 = vadd.f32 %v10962_v0, %v11067_v59  ;;  %v1858_v39 = vadd.f32 %v11162_v15, %v10962_v0  ;;  %v1853_v59 = vadd.f32 %v10962_v0, %v11169_v43  ;;  %v648_v15 = vld [vmem:[%s13795_s0 + $0x548] sm:$0xff] }
 0x18e   :  { %v11233_v3 = vpop.f32.mrf.mxu0  ;;  %9259 = vmatmul.mubr.msk.f32.gmra.mxu0 %vm743_vm1, %v642_v31  ;;  %8762 = vmatpush3.msra.mxu1 %v2907_v6  ;;  %v2904_v31 = vmax.f32 %v1798_v30, 0.0  ;;  %v2918_v30 = vmax.f32 %v1868_v19, 0.0  ;;  %v1848_v43 = vadd.f32 %v11150_v22, %v10962_v0  ;;  %v650_v22 = vld [vmem:[%s13795_s0 + $0x558] sm:$0xff] }
 0x18f   :  { %8763 = vmatprep.subr.mxu1 %v2922_v23  ;;  %9261 = vmatprep.mubr.msk.f32.mxu0 %vm743_vm1, %v643_v14  ;;  %v2903_v14 = vmax.f32 %v1793_v11, 0.0  ;;  %v647_v23 = vld [vmem:[%s13795_s0 + $0x540] sm:$0xff]  ;;  %v2902_v9 = vmax.f32 %v1788_v58, 0.0  ;;  %v2901_v11 = vmax.f32 %v1783_v1, 0.0  ;;  %v2916_v19 = vmax.f32 %v1858_v39, 0.0 }
 0x190   :  { %v11243_v27 = vpop.f32.mrf.mxu0  ;;  %8764 = vmatpush3.msra.mxu1 %v2906_v7  ;;  %v1778_v7 = vadd.f32 %v11036_v21, %v10962_v0  ;;  %v1773_v21 = vadd.f32 %v10962_v0, %v11047_v26  ;;  %v1843_v26 = vadd.f32 %v10962_v0, %v11157_v18  ;;  %v651_v1 = vld [vmem:[%s13795_s0 + $0x560] sm:$0xff]  ;;  %v1838_v18 = vadd.f32 %v11138_v42, %v10962_v0  ;;  %v652_v42 = vld [vmem:[%s13795_s0 + $0x568] sm:$0xff] }
 0x191   :  { %8765 = vmatprep.subr.mxu1 %v2921_v38 }
 0x192   :  { %v11251_v6 = vpop.f32.mrf.mxu0  ;;  %9262 = vmatmul.mubr.msk.f32.gmra.mxu0 %vm743_vm1, %v644_v51  ;;  %8766 = vmatpush3.msra.mxu1 %v2905_v12  ;;  %v2917_v51 = vmax.f32 %v1863_v10, 0.0  ;;  %v2900_v58 = vmax.f32 %v1778_v7, 0.0  ;;  %v2915_v10 = vmax.f32 %v1853_v59, 0.0  ;;  %v2913_v7 = vmax.f32 %v1843_v26, 0.0 }
 0x193   :  { %8767 = vmatprep.subr.mxu1 %v2920_v8  ;;  %9264 = vmatprep.mubr.msk.f32.mxu0 %vm743_vm1, %v645_v4  ;;  %v649_v4 = vld [vmem:[%s13795_s0 + $0x550] sm:$0xff]  ;;  %v1768_v8 = vadd.f32 %v11016_v46, %v10962_v0  ;;  %v1763_v46 = vadd.f32 %v10962_v0, %v11027_v5  ;;  %v1833_v5 = vadd.f32 %v10962_v0, %v11145_v13 }
 0x194   :  { %v11262_v47 = vpop.f32.mrf.mxu0  ;;  %8768 = vmatpush3.msra.mxu1 %v2904_v31  ;;  %v1828_v13 = vadd.f32 %v11126_v17, %v10962_v0  ;;  %v654_v17 = vld [vmem:[%s13795_s0 + $0x578] sm:$0xff] }
 0x195   :  { %8769 = vmatprep.subr.mxu1 %v2919_v50  ;;  %v2899_v50 = vmax.f32 %v1773_v21, 0.0  ;;  %v2898_v39 = vmax.f32 %v1768_v8, 0.0  ;;  %v1748_v21 = vadd.f32 %v10979_v16, %v10962_v0  ;;  %v1743_v16 = vadd.f32 %v10962_v0, %v10989_v35  ;;  %v656_v35 = vld [vmem:[%s13795_s0 + $0x588] sm:$0xff] }
 0x196   :  { %v11271_v38 = vpop.f32.mrf.mxu0  ;;  %9265 = vmatmul.mubr.msk.f32.gmra.mxu0 %vm743_vm1, %v646_v54  ;;  %8770 = vmatpush3.msra.mxu1 %v2903_v14  ;;  %v2914_v14 = vmax.f32 %v1848_v43, 0.0  ;;  %v2911_v43 = vmax.f32 %v1833_v5, 0.0 }
 0x197   :  { %8771 = vmatprep.subr.mxu1 %v2918_v30  ;;  %9267 = vmatprep.mubr.msk.f32.mxu0 %vm743_vm1, %v647_v23  ;;  %v1758_v23 = vadd.f32 %v10997_v55, %v10962_v0  ;;  %v1753_v55 = vadd.f32 %v10962_v0, %v11007_v34  ;;  %v1823_v34 = vadd.f32 %v10962_v0, %v11133_v2  ;;  %v2910_v2 = vmax.f32 %v1828_v13, 0.0 }
 0x198   :  { %v11282_v12 = vpop.f32.mrf.mxu0  ;;  %8772 = vmatpush3.msra.mxu1 %v2902_v9  ;;  %v2897_v9 = vmax.f32 %v1763_v46, 0.0  ;;  %v2894_v26 = vmax.f32 %v1748_v21, 0.0  ;;  %v2893_v46 = vmax.f32 %v1743_v16, 0.0  ;;  %v665_v16 = vld [vmem:[%s13795_s0 + $0x5d0] sm:$0xff] }
 0x199   :  { %8773 = vmatprep.subr.mxu1 %v2917_v51  ;;  %v653_v51 = vld [vmem:[%s13795_s0 + $0x570] sm:$0xff] }
 0x19a   :  { %v11291_v31 = vpop.f32.mrf.mxu0  ;;  %9268 = vmatmul.mubr.msk.f32.gmra.mxu0 %vm743_vm1, %v648_v15  ;;  %8774 = vmatpush3.msra.mxu1 %v2901_v11  ;;  %v2912_v15 = vmax.f32 %v1838_v18, 0.0  ;;  %v2896_v11 = vmax.f32 %v1758_v23, 0.0  ;;  %v3119_v18 = vld [vmem:[%s13796_s1 + $0x10] sm:$0xff] }
 0x19b   :  { %8775 = vmatprep.subr.mxu1 %v2916_v19  ;;  %9270 = vmatprep.mubr.msk.f32.mxu0 %vm743_vm1, %v649_v4  ;;  %v2895_v19 = vmax.f32 %v1753_v55, 0.0  ;;  %v660_v55 = vld [vmem:[%s13795_s0 + $0x5a8] sm:$0xff] }
 0x19c   :  { %v11302_v54 = vpop.f32.mrf.mxu0  ;;  %8776 = vmatpush3.msra.mxu1 %v2900_v58  ;;  %v655_v58 = vld [vmem:[%s13795_s0 + $0x580] sm:$0xff] }
 0x19d   :  { %8777 = vmatprep.subr.mxu1 %v2915_v10 }
 0x19e   :  { %v11311_v30 = vpop.f32.mrf.mxu0  ;;  %9271 = vmatmul.mubr.msk.f32.gmra.mxu0 %vm743_vm1, %v650_v22  ;;  %8778 = vmatpush3.msra.mxu1 %v2899_v50  ;;  %v2909_v22 = vmax.f32 %v1823_v34, 0.0 }
 0x19f   :  { %8779 = vmatprep.subr.mxu1 %v2914_v14  ;;  %9273 = vmatprep.mubr.msk.f32.mxu0 %vm743_vm1, %v651_v1  ;;  %v657_v1 = vld [vmem:[%s13795_s0 + $0x590] sm:$0xff]  ;;  %v3122_v14 = vld [vmem:[%s13796_s1 + $0x28] sm:$0xff] }
 0x1a0   :  { %v11322_v59 = vpop.f32.mrf.mxu0  ;;  %8780 = vmatpush3.msra.mxu1 %v2898_v39  ;;  %v658_v39 = vld [vmem:[%s13795_s0 + $0x598] sm:$0xff] }
 0x1a1   :  { %8781 = vmatprep.subr.mxu1 %v2913_v7  ;;  %v659_v7 = vld [vmem:[%s13795_s0 + $0x5a0] sm:$0xff] }
 0x1a2   :  { %v11331_v4 = vpop.f32.mrf.mxu0  ;;  %9274 = vmatmul.mubr.msk.f32.gmra.mxu0 %vm743_vm1, %v652_v42  ;;  %8782 = vmatpush3.msra.mxu1 %v2897_v9 }
 0x1a3   :  { %8783 = vmatprep.subr.mxu1 %v2912_v15  ;;  %9276 = vmatprep.mubr.msk.f32.mxu0 %vm743_vm1, %v653_v51  ;;  %v661_v51 = vld [vmem:[%s13795_s0 + $0x5b0] sm:$0xff]  ;;  %v662_v15 = vld [vmem:[%s13795_s0 + $0x5b8] sm:$0xff] }
 0x1a4   :  { %v11342_v8 = vpop.f32.mrf.mxu0  ;;  %8784 = vmatpush3.msra.mxu1 %v2896_v11  ;;  %v663_v11 = vld [vmem:[%s13795_s0 + $0x5c0] sm:$0xff] }
 0x1a5   :  { %8785 = vmatprep.subr.mxu1 %v2911_v43  ;;  %v664_v43 = vld [vmem:[%s13795_s0 + $0x5c8] sm:$0xff] }
 0x1a6   :  { %v9134_v10 = vpop.f32.mrf.mxu0  ;;  %9277 = vmatmul.mubr.msk.f32.gmra.mxu0 %vm743_vm1, %v654_v17  ;;  %8786 = vmatpush3.msra.mxu1 %v2895_v19 }
 0x1a7   :  { %8787 = vmatprep.subr.mxu1 %v2910_v2  ;;  %9279 = vmatprep.mubr.msk.f32.mxu0 %vm743_vm1, %v655_v58  ;;  %v666_v58 = vld [vmem:[%s13795_s0 + $0x5d8] sm:$0xff] }
 0x1a8   :  { %v1972_v50 = vpop.f32.mrf.mxu0  ;;  %8788 = vmatpush3.msra.mxu1 %v2894_v26  ;;  %v667_v26 = vld [vmem:[%s13795_s0 + $0x5e0] sm:$0xff] }
 0x1a9   :  { %8789 = vmatprep.subr.mxu1 %v2909_v22 }
 0x1aa   :  { %v11361_v23 = vpop.f32.mrf.mxu0  ;;  %9280 = vmatmul.mubr.msk.f32.gmra.mxu0 %vm743_vm1, %v656_v35  ;;  %8790 = vmatpush3.msra.mxu1 %v2893_v46  ;;  %v668_v35 = vld [vmem:[%s13795_s0 + $0x5e8] sm:$0xff] }
 0x1ab   :  { %9282 = vmatprep.mubr.msk.f32.mxu0 %vm743_vm1, %v657_v1  ;;  %3268 = vmatmul.mubr.f32.vlgmr.msra.gmra.mxu1 %v3119_v18  ;;  %v669_v1 = vld [vmem:[%s13795_s0 + $0x5f0] sm:$0xff] }
 0x1ac   :  { %v11368_v5 = vpop.f32.mrf.mxu0  ;;  %3337 = vmatprep.mubr.f32.mxu1 %v3122_v14  ;;  %v670_v14 = vld [vmem:[%s13795_s0 + $0x5f8] sm:$0xff] }
 0x1ae   :  { %v11373_v42 = vpop.f32.mrf.mxu0  ;;  %9283 = vmatmul.mubr.msk.f32.gmra.mxu0 %vm743_vm1, %v658_v39 }
 0x1af   :  { %9285 = vmatprep.mubr.msk.f32.mxu0 %vm743_vm1, %v659_v7  ;;  %v671_v7 = vld [vmem:[%s13795_s0 + $0x600] sm:$0xff] }
 0x1b0   :  { %v11380_v9 = vpop.f32.mrf.mxu0 }
 0x1b2   :  { %v11385_v13 = vpop.f32.mrf.mxu0  ;;  %9286 = vmatmul.mubr.msk.f32.gmra.mxu0 %vm743_vm1, %v660_v55  ;;  %v1978_v55 = vadd.f32 %v9134_v10, %v10962_v0 }
 0x1b3   :  { %9288 = vmatprep.mubr.msk.f32.mxu0 %vm743_vm1, %v661_v51 }
 0x1b4   :  { %v11392_v21 = vpop.f32.mrf.mxu0 }
 0x1b6   :  { %v11397_v34 = vpop.f32.mrf.mxu0  ;;  %9289 = vmatmul.mubr.msk.f32.gmra.mxu0 %vm743_vm1, %v662_v15 }
 0x1b7   :  { %9291 = vmatprep.mubr.msk.f32.mxu0 %vm743_vm1, %v663_v11  ;;  %v672_v11 = vld [vmem:[%s13795_s0 + $0x608] sm:$0xff] }
 0x1b8   :  { %v11404_v17 = vpop.f32.mrf.mxu0 }
 0x1ba   :  { %v9149_v19 = vpop.f32.mrf.mxu0  ;;  %9292 = vmatmul.mubr.msk.f32.gmra.mxu0 %vm743_vm1, %v664_v43  ;;  %v1973_v43 = vadd.f32 %v10962_v0, %v1972_v50 }
 0x1bb   :  { %9294 = vmatprep.mubr.msk.f32.mxu0 %vm743_vm1, %v665_v16 }
 0x1bc   :  { %v11414_v2 = vpop.f32.mrf.mxu0 }
 0x1be   :  { %v9152_v22 = vpop.f32.mrf.mxu0  ;;  %9295 = vmatmul.mubr.msk.f32.gmra.mxu0 %vm743_vm1, %v666_v58  ;;  %v673_v58 = vld [vmem:[%s13795_s0 + $0x610] sm:$0xff] }
 0x1bf   :  { %9297 = vmatprep.mubr.msk.f32.mxu0 %vm743_vm1, %v667_v26 }
 0x1c0   :  { %v2032_v46 = vpop.f32.mrf.mxu0 }
 0x1c2   :  { %v9155_v18 = vpop.f32.mrf.mxu0  ;;  %9298 = vmatmul.mubr.msk.f32.gmra.mxu0 %vm743_vm1, %v668_v35 }
 0x1c3   :  { %9300 = vmatprep.mubr.msk.f32.mxu0 %vm743_vm1, %v669_v1  ;;  %v2048_v10 = vadd.f32 %v9155_v18, %v10962_v0  ;;  %v1968_v1 = vadd.f32 %v11331_v4, %v10962_v0  ;;  %v674_v18 = vld [vmem:[%s13795_s0 + $0x618] sm:$0xff] }
 0x1c4   :  { %v2042_v39 = vpop.f32.mrf.mxu0 }
 0x1c5   :  { %v2043_v50 = vadd.f32 %v10962_v0, %v2042_v39  ;;  %v2038_v39 = vadd.f32 %v9152_v22, %v10962_v0  ;;  %v676_v22 = vld [vmem:[%s13795_s0 + $0x628] sm:$0xff] }
 0x1c6   :  { %v9158_v51 = vpop.f32.mrf.mxu0  ;;  %9301 = vmatmul.mubr.msk.f32.gmra.mxu0 %vm743_vm1, %v670_v14  ;;  %v2940_v14 = vmax.f32 %v1978_v55, 0.0  ;;  %v675_v55 = vld [vmem:[%s13795_s0 + $0x620] sm:$0xff] }
 0x1c7   :  { %v2058_v15 = vadd.f32 %v9158_v51, %v10962_v0  ;;  %9303 = vmatprep.mubr.msk.f32.mxu0 %vm743_vm1, %v671_v7 }
 0x1c8   :  { %v2052_v16 = vpop.f32.mrf.mxu0 }
 0x1c9   :  { %v2956_v26 = vmax.f32 %v2058_v15, 0.0  ;;  %v2053_v35 = vadd.f32 %v10962_v0, %v2052_v16  ;;  %v1963_v15 = vadd.f32 %v10962_v0, %v11342_v8  ;;  %v2939_v16 = vmax.f32 %v1973_v43, 0.0 }
 0x1ca   :  { %v11450_v7 = vpop.f32.mrf.mxu0  ;;  %9304 = vmatmul.mubr.msk.f32.gmra.mxu0 %vm743_vm1, %v672_v11  ;;  %v2954_v11 = vmax.f32 %v2048_v10, 0.0  ;;  %v2033_v8 = vadd.f32 %v10962_v0, %v2032_v46  ;;  %v2953_v43 = vmax.f32 %v2043_v50, 0.0  ;;  %v1953_v10 = vadd.f32 %v10962_v0, %v11322_v59 }
 0x1cb   :  { %v2955_v51 = vmax.f32 %v2053_v35, 0.0  ;;  %8794 = vmatprep.subr.mxu1 %v2956_v26  ;;  %9306 = vmatprep.mubr.msk.f32.mxu0 %vm743_vm1, %v673_v58  ;;  %v1958_v58 = vadd.f32 %v11311_v30, %v10962_v0  ;;  %v2938_v26 = vmax.f32 %v1968_v1, 0.0  ;;  %v2937_v30 = vmax.f32 %v1963_v15, 0.0 }
 0x1cc   :  { %v11460_v4 = vpop.f32.mrf.mxu0  ;;  %8795 = vmatpush3.msra.mxu1 %v2940_v14  ;;  %v677_v14 = vld [vmem:[%s13795_s0 + $0x630] sm:$0xff]  ;;  %v2028_v46 = vadd.f32 %v9149_v19, %v10962_v0  ;;  %v2952_v50 = vmax.f32 %v2038_v39, 0.0  ;;  %v2023_v59 = vadd.f32 %v10962_v0, %v11414_v2  ;;  %v2951_v15 = vmax.f32 %v2033_v8, 0.0  ;;  %v678_v19 = vld [vmem:[%s13795_s0 + $0x638] sm:$0xff] }
 0x1cd   :  { %8796 = vmatprep.subr.mxu1 %v2955_v51  ;;  %v1948_v51 = vadd.f32 %v11291_v31, %v10962_v0  ;;  %v1943_v31 = vadd.f32 %v10962_v0, %v11302_v54  ;;  %v2018_v2 = vadd.f32 %v11397_v34, %v10962_v0  ;;  %v2013_v54 = vadd.f32 %v10962_v0, %v11404_v17  ;;  %v680_v34 = vld [vmem:[%s13795_s0 + $0x648] sm:$0xff] }
 0x1ce   :  { %v11468_v35 = vpop.f32.mrf.mxu0  ;;  %9307 = vmatmul.mubr.msk.f32.gmra.mxu0 %vm743_vm1, %v674_v18  ;;  %8797 = vmatpush3.msra.mxu1 %v2939_v16  ;;  %v2936_v18 = vmax.f32 %v1958_v58, 0.0  ;;  %v2950_v58 = vmax.f32 %v2028_v46, 0.0  ;;  %v2008_v17 = vadd.f32 %v11385_v13, %v10962_v0  ;;  %v682_v13 = vld [vmem:[%s13795_s0 + $0x658] sm:$0xff] }
 0x1cf   :  { %8798 = vmatprep.subr.mxu1 %v2954_v11  ;;  %9309 = vmatprep.mubr.msk.f32.mxu0 %vm743_vm1, %v675_v55  ;;  %v2935_v55 = vmax.f32 %v1953_v10, 0.0  ;;  %v679_v11 = vld [vmem:[%s13795_s0 + $0x640] sm:$0xff]  ;;  %v2934_v8 = vmax.f32 %v1948_v51, 0.0  ;;  %v2933_v10 = vmax.f32 %v1943_v31, 0.0  ;;  %v2948_v46 = vmax.f32 %v2018_v2, 0.0 }
 0x1d0   :  { %v11478_v1 = vpop.f32.mrf.mxu0  ;;  %8799 = vmatpush3.msra.mxu1 %v2938_v26  ;;  %v1938_v26 = vadd.f32 %v11271_v38, %v10962_v0  ;;  %v1933_v38 = vadd.f32 %v10962_v0, %v11282_v12  ;;  %v2003_v12 = vadd.f32 %v10962_v0, %v11392_v21  ;;  %v683_v31 = vld [vmem:[%s13795_s0 + $0x660] sm:$0xff]  ;;  %v1998_v21 = vadd.f32 %v11373_v42, %v10962_v0  ;;  %v684_v42 = vld [vmem:[%s13795_s0 + $0x668] sm:$0xff] }
 0x1d1   :  { %8800 = vmatprep.subr.mxu1 %v2953_v43 }
 0x1d2   :  { %v11486_v16 = vpop.f32.mrf.mxu0  ;;  %9310 = vmatmul.mubr.msk.f32.gmra.mxu0 %vm743_vm1, %v676_v22  ;;  %8801 = vmatpush3.msra.mxu1 %v2937_v30  ;;  %v2949_v22 = vmax.f32 %v2023_v59, 0.0  ;;  %v2932_v51 = vmax.f32 %v1938_v26, 0.0  ;;  %v2947_v59 = vmax.f32 %v2013_v54, 0.0  ;;  %v2945_v26 = vmax.f32 %v2003_v12, 0.0 }
 0x1d3   :  { %8802 = vmatprep.subr.mxu1 %v2952_v50  ;;  %9312 = vmatprep.mubr.msk.f32.mxu0 %vm743_vm1, %v677_v14  ;;  %v681_v14 = vld [vmem:[%s13795_s0 + $0x650] sm:$0xff]  ;;  %v1928_v50 = vadd.f32 %v11251_v6, %v10962_v0  ;;  %v1923_v6 = vadd.f32 %v10962_v0, %v11262_v47  ;;  %v1993_v47 = vadd.f32 %v10962_v0, %v11380_v9 }
 0x1d4   :  { %v11497_v39 = vpop.f32.mrf.mxu0  ;;  %8803 = vmatpush3.msra.mxu1 %v2936_v18  ;;  %v1988_v9 = vadd.f32 %v11361_v23, %v10962_v0  ;;  %v686_v23 = vld [vmem:[%s13795_s0 + $0x678] sm:$0xff] }
 0x1d5   :  { %8804 = vmatprep.subr.mxu1 %v2951_v15  ;;  %v2931_v15 = vmax.f32 %v1933_v38, 0.0  ;;  %v2930_v2 = vmax.f32 %v1928_v50, 0.0  ;;  %v11567_v38 = vld [vmem:[%s13798_s3] ss:$0 sm:$0xff] }
 0x1d6   :  { %v11506_v43 = vpop.f32.mrf.mxu0  ;;  %9313 = vmatmul.mubr.msk.f32.gmra.mxu0 %vm743_vm1, %v678_v19  ;;  %8805 = vmatpush3.msra.mxu1 %v2935_v55  ;;  %v2946_v55 = vmax.f32 %v2008_v17, 0.0  ;;  %v1983_v17 = vadd.f32 %v11567_v38, %v11368_v5  ;;  %v2942_v5 = vmax.f32 %v1988_v9, 0.0 }
 0x1d7   :  { %8806 = vmatprep.subr.mxu1 %v2950_v58  ;;  %9315 = vmatprep.mubr.msk.f32.mxu0 %vm743_vm1, %v679_v11  ;;  %v1918_v11 = vadd.f32 %v11233_v3, %v10962_v0  ;;  %v1913_v3 = vadd.f32 %v10962_v0, %v11243_v27  ;;  %v1908_v27 = vadd.f32 %v11567_v38, %v11215_v62  ;;  %v2943_v0 = vmax.f32 %v1993_v47, 0.0 }
 0x1d8   :  { %v11517_v30 = vpop.f32.mrf.mxu0  ;;  %8807 = vmatpush3.msra.mxu1 %v2934_v8  ;;  %v2929_v8 = vmax.f32 %v1923_v6, 0.0  ;;  %v1903_v62 = vadd.f32 %v11567_v38, %v11225_v63  ;;  %v688_v63 = vld [vmem:[%s13795_s0 + $0x688] sm:$0xff] }
 0x1d9   :  { %8808 = vmatprep.subr.mxu1 %v2949_v22  ;;  %v685_v22 = vld [vmem:[%s13795_s0 + $0x670] sm:$0xff]  ;;  %v2926_v12 = vmax.f32 %v1908_v27, 0.0 }
 0x1da   :  { %v11526_v18 = vpop.f32.mrf.mxu0  ;;  %9316 = vmatmul.mubr.msk.f32.gmra.mxu0 %vm743_vm1, %v680_v34  ;;  %8809 = vmatpush3.msra.mxu1 %v2933_v10  ;;  %v2944_v34 = vmax.f32 %v1998_v21, 0.0  ;;  %v2928_v10 = vmax.f32 %v1918_v11, 0.0  ;;  %v2925_v6 = vmax.f32 %v1903_v62, 0.0  ;;  %v3121_v21 = vld [vmem:[%s13796_s1 + $0x20] sm:$0xff]  ;;  %v697_v62 = vld [vmem:[%s13795_s0 + $0x6d0] sm:$0xff] }
 0x1db   :  { %8810 = vmatprep.subr.mxu1 %v2948_v46  ;;  %9318 = vmatprep.mubr.msk.f32.mxu0 %vm743_vm1, %v681_v14  ;;  %v2927_v46 = vmax.f32 %v1913_v3, 0.0  ;;  %v692_v3 = vld [vmem:[%s13795_s0 + $0x6a8] sm:$0xff] }
 0x1dc   :  { %v11537_v19 = vpop.f32.mrf.mxu0  ;;  %8811 = vmatpush3.msra.mxu1 %v2932_v51  ;;  %v687_v51 = vld [vmem:[%s13795_s0 + $0x680] sm:$0xff] }
 0x1dd   :  { %8812 = vmatprep.subr.mxu1 %v2947_v59 }
 0x1de   :  { %v11546_v58 = vpop.f32.mrf.mxu0  ;;  %9319 = vmatmul.mubr.msk.f32.gmra.mxu0 %vm743_vm1, %v682_v13  ;;  %8813 = vmatpush3.msra.mxu1 %v2931_v15  ;;  %v2941_v13 = vmax.f32 %v1983_v17, 0.0 }
 0x1df   :  { %8814 = vmatprep.subr.mxu1 %v2946_v55  ;;  %9321 = vmatprep.mubr.msk.f32.mxu0 %vm743_vm1, %v683_v31  ;;  %v689_v31 = vld [vmem:[%s13795_s0 + $0x690] sm:$0xff]  ;;  %v3124_v55 = vld [vmem:[%s13796_s1 + $0x38] sm:$0xff] }
 0x1e0   :  { %v11557_v54 = vpop.f32.mrf.mxu0  ;;  %8815 = vmatpush3.msra.mxu1 %v2930_v2  ;;  %v690_v2 = vld [vmem:[%s13795_s0 + $0x698] sm:$0xff] }
 0x1e1   :  { %8816 = vmatprep.subr.mxu1 %v2945_v26  ;;  %v691_v26 = vld [vmem:[%s13795_s0 + $0x6a0] sm:$0xff] }
 0x1e2   :  { %v11571_v14 = vpop.f32.mrf.mxu0  ;;  %9322 = vmatmul.mubr.msk.f32.gmra.mxu0 %vm743_vm1, %v684_v42  ;;  %8817 = vmatpush3.msra.mxu1 %v2929_v8 }
 0x1e3   :  { %8818 = vmatprep.subr.mxu1 %v2944_v34  ;;  %9324 = vmatprep.mubr.msk.f32.mxu0 %vm743_vm1, %v685_v22  ;;  %v693_v22 = vld [vmem:[%s13795_s0 + $0x6b0] sm:$0xff]  ;;  %v694_v34 = vld [vmem:[%s13795_s0 + $0x6b8] sm:$0xff] }
 0x1e4   :  { %v11582_v50 = vpop.f32.mrf.mxu0  ;;  %8819 = vmatpush3.msra.mxu1 %v2928_v10  ;;  %v695_v10 = vld [vmem:[%s13795_s0 + $0x6c0] sm:$0xff] }
 0x1e5   :  { %8820 = vmatprep.subr.mxu1 %v2943_v0  ;;  %v696_v0 = vld [vmem:[%s13795_s0 + $0x6c8] sm:$0xff] }
 0x1e6   :  { %v9182_v59 = vpop.f32.mrf.mxu0  ;;  %9325 = vmatmul.mubr.msk.f32.gmra.mxu0 %vm743_vm1, %v686_v23  ;;  %8821 = vmatpush3.msra.mxu1 %v2927_v46 }
 0x1e7   :  { %8822 = vmatprep.subr.mxu1 %v2942_v5  ;;  %9327 = vmatprep.mubr.msk.f32.mxu0 %vm743_vm1, %v687_v51  ;;  %v698_v51 = vld [vmem:[%s13795_s0 + $0x6d8] sm:$0xff] }
 0x1e8   :  { %v2132_v15 = vpop.f32.mrf.mxu0  ;;  %8823 = vmatpush3.msra.mxu1 %v2926_v12  ;;  %v699_v12 = vld [vmem:[%s13795_s0 + $0x6e0] sm:$0xff] }
 0x1e9   :  { %8824 = vmatprep.subr.mxu1 %v2941_v13 }
 0x1ea   :  { %v11601_v11 = vpop.f32.mrf.mxu0  ;;  %9328 = vmatmul.mubr.msk.f32.gmra.mxu0 %vm743_vm1, %v688_v63  ;;  %8825 = vmatpush3.msra.mxu1 %v2925_v6  ;;  %v700_v63 = vld [vmem:[%s13795_s0 + $0x6e8] sm:$0xff] }
 0x1eb   :  { %9330 = vmatprep.mubr.msk.f32.mxu0 %vm743_vm1, %v689_v31  ;;  %3338 = vmatmul.mubr.f32.vlgmr.msra.gmra.mxu1 %v3121_v21  ;;  %v701_v31 = vld [vmem:[%s13795_s0 + $0x6f0] sm:$0xff] }
 0x1ec   :  { %v11608_v47 = vpop.f32.mrf.mxu0  ;;  %3407 = vmatprep.mubr.f32.mxu1 %v3124_v55  ;;  %v702_v55 = vld [vmem:[%s13795_s0 + $0x6f8] sm:$0xff] }
 0x1ee   :  { %v11613_v42 = vpop.f32.mrf.mxu0  ;;  %9331 = vmatmul.mubr.msk.f32.gmra.mxu0 %vm743_vm1, %v690_v2 }
 0x1ef   :  { %9333 = vmatprep.mubr.msk.f32.mxu0 %vm743_vm1, %v691_v26  ;;  %v703_v26 = vld [vmem:[%s13795_s0 + $0x700] sm:$0xff] }
 0x1f0   :  { %v11620_v8 = vpop.f32.mrf.mxu0 }
 0x1f2   :  { %v11625_v9 = vpop.f32.mrf.mxu0  ;;  %9334 = vmatmul.mubr.msk.f32.gmra.mxu0 %vm743_vm1, %v692_v3  ;;  %v2138_v3 = vadd.f32 %v11567_v38, %v9182_v59 }
 0x1f3   :  { %9336 = vmatprep.mubr.msk.f32.mxu0 %vm743_vm1, %v693_v22 }
 0x1f4   :  { %v11632_v27 = vpop.f32.mrf.mxu0 }
 0x1f6   :  { %v11637_v17 = vpop.f32.mrf.mxu0  ;;  %9337 = vmatmul.mubr.msk.f32.gmra.mxu0 %vm743_vm1, %v694_v34 }
 0x1f7   :  { %9339 = vmatprep.mubr.msk.f32.mxu0 %vm743_vm1, %v695_v10  ;;  %v704_v10 = vld [vmem:[%s13795_s0 + $0x708] sm:$0xff] }
 0x1f8   :  { %v11644_v23 = vpop.f32.mrf.mxu0 }
 0x1fa   :  { %v9197_v46 = vpop.f32.mrf.mxu0  ;;  %9340 = vmatmul.mubr.msk.f32.gmra.mxu0 %vm743_vm1, %v696_v0  ;;  %v2133_v0 = vadd.f32 %v11567_v38, %v2132_v15 }
 0x1fb   :  { %9342 = vmatprep.mubr.msk.f32.mxu0 %vm743_vm1, %v697_v62 }
 0x1fc   :  { %v11654_v5 = vpop.f32.mrf.mxu0 }
 0x1fe   :  { %v9200_v13 = vpop.f32.mrf.mxu0  ;;  %9343 = vmatmul.mubr.msk.f32.gmra.mxu0 %vm743_vm1, %v698_v51  ;;  %v705_v51 = vld [vmem:[%s13795_s0 + $0x710] sm:$0xff] }
 0x1ff   :  { %9345 = vmatprep.mubr.msk.f32.mxu0 %vm743_vm1, %v699_v12 }
 0x200   :  { %v2192_v6 = vpop.f32.mrf.mxu0 }
 0x202   :  { %v9203_v21 = vpop.f32.mrf.mxu0  ;;  %9346 = vmatmul.mubr.msk.f32.gmra.mxu0 %vm743_vm1, %v700_v63 }
 0x203   :  { %9348 = vmatprep.mubr.msk.f32.mxu0 %vm743_vm1, %v701_v31  ;;  %v2208_v59 = vadd.f32 %v11567_v38, %v9203_v21  ;;  %v2128_v31 = vadd.f32 %v11567_v38, %v11571_v14  ;;  %v706_v21 = vld [vmem:[%s13795_s0 + $0x718] sm:$0xff] }
 0x204   :  { %v2202_v2 = vpop.f32.mrf.mxu0 }
 0x205   :  { %v2203_v15 = vadd.f32 %v11567_v38, %v2202_v2  ;;  %v2198_v2 = vadd.f32 %v11567_v38, %v9200_v13  ;;  %v708_v13 = vld [vmem:[%s13795_s0 + $0x728] sm:$0xff] }
 0x206   :  { %v9206_v22 = vpop.f32.mrf.mxu0  ;;  %9349 = vmatmul.mubr.msk.f32.gmra.mxu0 %vm743_vm1, %v702_v55  ;;  %v2972_v55 = vmax.f32 %v2138_v3, 0.0  ;;  %v707_v3 = vld [vmem:[%s13795_s0 + $0x720] sm:$0xff] }
 0x207   :  { %v2218_v34 = vadd.f32 %v11567_v38, %v9206_v22  ;;  %9351 = vmatprep.mubr.msk.f32.mxu0 %vm743_vm1, %v703_v26 }
 0x208   :  { %v2212_v62 = vpop.f32.mrf.mxu0 }
 0x209   :  { %v2988_v12 = vmax.f32 %v2218_v34, 0.0  ;;  %v2213_v63 = vadd.f32 %v11567_v38, %v2212_v62  ;;  %v2123_v34 = vadd.f32 %v11567_v38, %v11582_v50  ;;  %v2971_v62 = vmax.f32 %v2133_v0, 0.0 }
 0x20a   :  { %v11690_v26 = vpop.f32.mrf.mxu0  ;;  %9352 = vmatmul.mubr.msk.f32.gmra.mxu0 %vm743_vm1, %v704_v10  ;;  %v2986_v10 = vmax.f32 %v2208_v59, 0.0  ;;  %v2193_v50 = vadd.f32 %v11567_v38, %v2192_v6  ;;  %v2985_v0 = vmax.f32 %v2203_v15, 0.0  ;;  %v2113_v59 = vadd.f32 %v11567_v38, %v11557_v54 }
 0x20b   :  { %v2987_v22 = vmax.f32 %v2213_v63, 0.0  ;;  %8829 = vmatprep.subr.mxu1 %v2988_v12  ;;  %9354 = vmatprep.mubr.msk.f32.mxu0 %vm743_vm1, %v705_v51  ;;  %v2118_v51 = vadd.f32 %v11567_v38, %v11546_v58  ;;  %v2970_v12 = vmax.f32 %v2128_v31, 0.0  ;;  %v2969_v58 = vmax.f32 %v2123_v34, 0.0 }
 0x20c   :  { %v11700_v14 = vpop.f32.mrf.mxu0  ;;  %8830 = vmatpush3.msra.mxu1 %v2972_v55  ;;  %v709_v55 = vld [vmem:[%s13795_s0 + $0x730] sm:$0xff]  ;;  %v2188_v6 = vadd.f32 %v11567_v38, %v9197_v46  ;;  %v2984_v15 = vmax.f32 %v2198_v2, 0.0  ;;  %v2183_v54 = vadd.f32 %v11567_v38, %v11654_v5  ;;  %v2983_v34 = vmax.f32 %v2193_v50, 0.0  ;;  %v710_v46 = vld [vmem:[%s13795_s0 + $0x738] sm:$0xff] }
 0x20d   :  { %8831 = vmatprep.subr.mxu1 %v2987_v22  ;;  %v2108_v22 = vadd.f32 %v11567_v38, %v11526_v18  ;;  %v2103_v18 = vadd.f32 %v11567_v38, %v11537_v19  ;;  %v2178_v5 = vadd.f32 %v11567_v38, %v11637_v17  ;;  %v2173_v19 = vadd.f32 %v11567_v38, %v11644_v23  ;;  %v712_v17 = vld [vmem:[%s13795_s0 + $0x748] sm:$0xff] }
 0x20e   :  { %v11708_v63 = vpop.f32.mrf.mxu0  ;;  %9355 = vmatmul.mubr.msk.f32.gmra.mxu0 %vm743_vm1, %v706_v21  ;;  %8832 = vmatpush3.msra.mxu1 %v2971_v62  ;;  %v2968_v21 = vmax.f32 %v2118_v51, 0.0  ;;  %v2982_v51 = vmax.f32 %v2188_v6, 0.0  ;;  %v2168_v23 = vadd.f32 %v11567_v38, %v11625_v9  ;;  %v714_v9 = vld [vmem:[%s13795_s0 + $0x758] sm:$0xff] }
 0x20f   :  { %8833 = vmatprep.subr.mxu1 %v2986_v10  ;;  %9357 = vmatprep.mubr.msk.f32.mxu0 %vm743_vm1, %v707_v3  ;;  %v2967_v3 = vmax.f32 %v2113_v59, 0.0  ;;  %v711_v10 = vld [vmem:[%s13795_s0 + $0x740] sm:$0xff]  ;;  %v2966_v50 = vmax.f32 %v2108_v22, 0.0  ;;  %v2965_v59 = vmax.f32 %v2103_v18, 0.0  ;;  %v2980_v6 = vmax.f32 %v2178_v5, 0.0 }
 0x210   :  { %v11718_v31 = vpop.f32.mrf.mxu0  ;;  %8834 = vmatpush3.msra.mxu1 %v2970_v12  ;;  %v2098_v12 = vadd.f32 %v11567_v38, %v11506_v43  ;;  %v2093_v43 = vadd.f32 %v11567_v38, %v11517_v30  ;;  %v2163_v30 = vadd.f32 %v11567_v38, %v11632_v27  ;;  %v715_v18 = vld [vmem:[%s13795_s0 + $0x760] sm:$0xff]  ;;  %v2158_v27 = vadd.f32 %v11567_v38, %v11613_v42  ;;  %v716_v42 = vld [vmem:[%s13795_s0 + $0x768] sm:$0xff] }
 0x211   :  { %8835 = vmatprep.subr.mxu1 %v2985_v0 }
 0x212   :  { %v11726_v62 = vpop.f32.mrf.mxu0  ;;  %9358 = vmatmul.mubr.msk.f32.gmra.mxu0 %vm743_vm1, %v708_v13  ;;  %8836 = vmatpush3.msra.mxu1 %v2969_v58  ;;  %v2981_v13 = vmax.f32 %v2183_v54, 0.0  ;;  %v2964_v22 = vmax.f32 %v2098_v12, 0.0  ;;  %v2979_v54 = vmax.f32 %v2173_v19, 0.0  ;;  %v2977_v12 = vmax.f32 %v2163_v30, 0.0 }
 0x213   :  { %8837 = vmatprep.subr.mxu1 %v2984_v15  ;;  %9360 = vmatprep.mubr.msk.f32.mxu0 %vm743_vm1, %v709_v55  ;;  %v713_v55 = vld [vmem:[%s13795_s0 + $0x750] sm:$0xff]  ;;  %v2088_v15 = vadd.f32 %v11567_v38, %v11486_v16  ;;  %v2083_v16 = vadd.f32 %v11567_v38, %v11497_v39  ;;  %v2153_v39 = vadd.f32 %v11567_v38, %v11620_v8 }
 0x214   :  { %v11737_v2 = vpop.f32.mrf.mxu0  ;;  %8838 = vmatpush3.msra.mxu1 %v2968_v21  ;;  %v2148_v8 = vadd.f32 %v11567_v38, %v11601_v11  ;;  %v718_v11 = vld [vmem:[%s13795_s0 + $0x778] sm:$0xff] }
 0x215   :  { %8839 = vmatprep.subr.mxu1 %v2983_v34  ;;  %v2963_v34 = vmax.f32 %v2093_v43, 0.0  ;;  %v2962_v5 = vmax.f32 %v2088_v15, 0.0  ;;  %v2068_v43 = vadd.f32 %v11567_v38, %v11450_v7  ;;  %v2063_v7 = vadd.f32 %v11567_v38, %v11460_v4  ;;  %v720_v4 = vld [vmem:[%s13795_s0 + $0x788] sm:$0xff] }
 0x216   :  { %v11746_v0 = vpop.f32.mrf.mxu0  ;;  %9361 = vmatmul.mubr.msk.f32.gmra.mxu0 %vm743_vm1, %v710_v46  ;;  %8840 = vmatpush3.msra.mxu1 %v2967_v3  ;;  %v2978_v3 = vmax.f32 %v2168_v23, 0.0  ;;  %v2975_v23 = vmax.f32 %v2153_v39, 0.0 }
 0x217   :  { %8841 = vmatprep.subr.mxu1 %v2982_v51  ;;  %9363 = vmatprep.mubr.msk.f32.mxu0 %vm743_vm1, %v711_v10  ;;  %v2078_v10 = vadd.f32 %v11567_v38, %v11468_v35  ;;  %v2073_v35 = vadd.f32 %v11567_v38, %v11478_v1  ;;  %v2143_v1 = vadd.f32 %v11567_v38, %v11608_v47  ;;  %v2974_v47 = vmax.f32 %v2148_v8, 0.0 }
 0x218   :  { %v11757_v58 = vpop.f32.mrf.mxu0  ;;  %8842 = vmatpush3.msra.mxu1 %v2966_v50  ;;  %v2961_v50 = vmax.f32 %v2083_v16, 0.0  ;;  %v2958_v30 = vmax.f32 %v2068_v43, 0.0  ;;  %v2957_v16 = vmax.f32 %v2063_v7, 0.0  ;;  %v729_v7 = vld [vmem:[%s13795_s0 + $0x7d0] sm:$0xff] }
 0x219   :  { %8843 = vmatprep.subr.mxu1 %v2981_v13  ;;  %v717_v13 = vld [vmem:[%s13795_s0 + $0x770] sm:$0xff] }
 0x21a   :  { %v11766_v21 = vpop.f32.mrf.mxu0  ;;  %9364 = vmatmul.mubr.msk.f32.gmra.mxu0 %vm743_vm1, %v712_v17  ;;  %8844 = vmatpush3.msra.mxu1 %v2965_v59  ;;  %v2976_v17 = vmax.f32 %v2158_v27, 0.0  ;;  %v2960_v59 = vmax.f32 %v2078_v10, 0.0  ;;  %v3123_v27 = vld [vmem:[%s13796_s1 + $0x30] sm:$0xff] }
 0x21b   :  { %8845 = vmatprep.subr.mxu1 %v2980_v6  ;;  %9366 = vmatprep.mubr.msk.f32.mxu0 %vm743_vm1, %v713_v55  ;;  %v2959_v6 = vmax.f32 %v2073_v35, 0.0  ;;  %v724_v35 = vld [vmem:[%s13795_s0 + $0x7a8] sm:$0xff] }
 0x21c   :  { %v11777_v46 = vpop.f32.mrf.mxu0  ;;  %8846 = vmatpush3.msra.mxu1 %v2964_v22  ;;  %v719_v22 = vld [vmem:[%s13795_s0 + $0x780] sm:$0xff] }
 0x21d   :  { %8847 = vmatprep.subr.mxu1 %v2979_v54 }
 0x21e   :  { %v11786_v51 = vpop.f32.mrf.mxu0  ;;  %9367 = vmatmul.mubr.msk.f32.gmra.mxu0 %vm743_vm1, %v714_v9  ;;  %8848 = vmatpush3.msra.mxu1 %v2963_v34  ;;  %v2973_v9 = vmax.f32 %v2143_v1, 0.0 }
 0x21f   :  { %8849 = vmatprep.subr.mxu1 %v2978_v3  ;;  %9369 = vmatprep.mubr.msk.f32.mxu0 %vm743_vm1, %v715_v18  ;;  %v721_v18 = vld [vmem:[%s13795_s0 + $0x790] sm:$0xff]  ;;  %v3126_v3 = vld [vmem:[%s13796_s1 + $0x48] sm:$0xff] }
 0x220   :  { %v11797_v19 = vpop.f32.mrf.mxu0  ;;  %8850 = vmatpush3.msra.mxu1 %v2962_v5  ;;  %v722_v5 = vld [vmem:[%s13795_s0 + $0x798] sm:$0xff] }
 0x221   :  { %8851 = vmatprep.subr.mxu1 %v2977_v12  ;;  %v723_v12 = vld [vmem:[%s13795_s0 + $0x7a0] sm:$0xff] }
 0x222   :  { %v11806_v55 = vpop.f32.mrf.mxu0  ;;  %9370 = vmatmul.mubr.msk.f32.gmra.mxu0 %vm743_vm1, %v716_v42  ;;  %8852 = vmatpush3.msra.mxu1 %v2961_v50 }
 0x223   :  { %8853 = vmatprep.subr.mxu1 %v2976_v17  ;;  %9372 = vmatprep.mubr.msk.f32.mxu0 %vm743_vm1, %v717_v13  ;;  %v725_v13 = vld [vmem:[%s13795_s0 + $0x7b0] sm:$0xff]  ;;  %v726_v17 = vld [vmem:[%s13795_s0 + $0x7b8] sm:$0xff] }
 0x224   :  { %v11817_v15 = vpop.f32.mrf.mxu0  ;;  %8854 = vmatpush3.msra.mxu1 %v2960_v59  ;;  %v727_v59 = vld [vmem:[%s13795_s0 + $0x7c0] sm:$0xff] }
 0x225   :  { %8855 = vmatprep.subr.mxu1 %v2975_v23  ;;  %v728_v23 = vld [vmem:[%s13795_s0 + $0x7c8] sm:$0xff] }
 0x226   :  { %v9230_v54 = vpop.f32.mrf.mxu0  ;;  %9373 = vmatmul.mubr.msk.f32.gmra.mxu0 %vm743_vm1, %v718_v11  ;;  %8856 = vmatpush3.msra.mxu1 %v2959_v6 }
 0x227   :  { %8857 = vmatprep.subr.mxu1 %v2974_v47  ;;  %9375 = vmatprep.mubr.msk.f32.mxu0 %vm743_vm1, %v719_v22  ;;  %v730_v22 = vld [vmem:[%s13795_s0 + $0x7d8] sm:$0xff] }
 0x228   :  { %v2292_v34 = vpop.f32.mrf.mxu0  ;;  %8858 = vmatpush3.msra.mxu1 %v2958_v30  ;;  %v731_v30 = vld [vmem:[%s13795_s0 + $0x7e0] sm:$0xff] }
 0x229   :  { %8859 = vmatprep.subr.mxu1 %v2973_v9 }
 0x22a   :  { %v11836_v10 = vpop.f32.mrf.mxu0  ;;  %9376 = vmatmul.mubr.msk.f32.gmra.mxu0 %vm743_vm1, %v720_v4  ;;  %8860 = vmatpush3.msra.mxu1 %v2957_v16  ;;  %v732_v4 = vld [vmem:[%s13795_s0 + $0x7e8] sm:$0xff] }
 0x22b   :  { %9378 = vmatprep.mubr.msk.f32.mxu0 %vm743_vm1, %v721_v18  ;;  %3408 = vmatmul.mubr.f32.vlgmr.msra.gmra.mxu1 %v3123_v27  ;;  %v733_v18 = vld [vmem:[%s13795_s0 + $0x7f0] sm:$0xff] }
 0x22c   :  { %v11843_v39 = vpop.f32.mrf.mxu0  ;;  %3477 = vmatprep.mubr.f32.mxu1 %v3126_v3  ;;  %v734_v3 = vld [vmem:[%s13795_s0 + $0x7f8] sm:$0xff] }
 0x22e   :  { %v11848_v42 = vpop.f32.mrf.mxu0  ;;  %9379 = vmatmul.mubr.msk.f32.gmra.mxu0 %vm743_vm1, %v722_v5 }
 0x22f   :  { %9381 = vmatprep.mubr.msk.f32.mxu0 %vm743_vm1, %v723_v12  ;;  %v2298_v12 = vadd.f32 %v11567_v38, %v9230_v54 }
 0x230   :  { %v11855_v50 = vpop.f32.mrf.mxu0 }
 0x232   :  { %v11860_v8 = vpop.f32.mrf.mxu0  ;;  %9382 = vmatmul.mubr.msk.f32.gmra.mxu0 %vm743_vm1, %v724_v35 }
 0x233   :  { %9384 = vmatprep.mubr.msk.f32.mxu0 %vm743_vm1, %v725_v13 }
 0x234   :  { %v11867_v43 = vpop.f32.mrf.mxu0 }
 0x236   :  { %v11872_v1 = vpop.f32.mrf.mxu0  ;;  %9385 = vmatmul.mubr.msk.f32.gmra.mxu0 %vm743_vm1, %v726_v17  ;;  %v2293_v17 = vadd.f32 %v11567_v38, %v2292_v34 }
 0x237   :  { %9387 = vmatprep.mubr.msk.f32.mxu0 %vm743_vm1, %v727_v59 }
 0x238   :  { %v11879_v11 = vpop.f32.mrf.mxu0  ;;  %v3003_v34 = vmax.f32 %v2293_v17, 0.0 }
 0x23a   :  { %v9245_v6 = vpop.f32.mrf.mxu0  ;;  %9388 = vmatmul.mubr.msk.f32.gmra.mxu0 %vm743_vm1, %v728_v23 }
 0x23b   :  { %9390 = vmatprep.mubr.msk.f32.mxu0 %vm743_vm1, %v729_v7 }
 0x23c   :  { %v2342_v47 = vpop.f32.mrf.mxu0 }
 0x23e   :  { %v9248_v9 = vpop.f32.mrf.mxu0  ;;  %9391 = vmatmul.mubr.msk.f32.gmra.mxu0 %vm743_vm1, %v730_v22 }
 0x23f   :  { %9393 = vmatprep.mubr.msk.f32.mxu0 %vm743_vm1, %v731_v30  ;;  %v2288_v30 = vadd.f32 %v11567_v38, %v11806_v55  ;;  %v2278_v55 = vadd.f32 %v11567_v38, %v11786_v51  ;;  %v2268_v51 = vadd.f32 %v11567_v38, %v11766_v21  ;;  %v2258_v21 = vadd.f32 %v11567_v38, %v11746_v0 }
 0x240   :  { %v2352_v16 = vpop.f32.mrf.mxu0 }
 0x242   :  { %v9251_v27 = vpop.f32.mrf.mxu0  ;;  %9394 = vmatmul.mubr.msk.f32.gmra.mxu0 %vm743_vm1, %v732_v4  ;;  %v3004_v4 = vmax.f32 %v2298_v12, 0.0  ;;  %v3002_v12 = vmax.f32 %v2288_v30, 0.0 }
 0x243   :  { %9396 = vmatprep.mubr.msk.f32.mxu0 %vm743_vm1, %v733_v18  ;;  %v2368_v23 = vadd.f32 %v11567_v38, %v9251_v27  ;;  %v2358_v27 = vadd.f32 %v11567_v38, %v9248_v9 }
 0x244   :  { %v2362_v5 = vpop.f32.mrf.mxu0 }
 0x245   :  { %v2363_v54 = vadd.f32 %v11567_v38, %v2362_v5  ;;  %v2353_v5 = vadd.f32 %v11567_v38, %v2352_v16  ;;  %v3016_v9 = vmax.f32 %v2358_v27, 0.0  ;;  %v2343_v16 = vadd.f32 %v11567_v38, %v2342_v47 }
 0x246   :  { %v9254_v35 = vpop.f32.mrf.mxu0  ;;  %9397 = vmatmul.mubr.msk.f32.gmra.mxu0 %vm743_vm1, %v734_v3  ;;  %v2283_v3 = vadd.f32 %v11567_v38, %v11817_v15  ;;  %v2273_v15 = vadd.f32 %v11567_v38, %v11797_v19  ;;  %v2263_v19 = vadd.f32 %v11567_v38, %v11777_v46  ;;  %v2998_v27 = vmax.f32 %v2268_v51, 0.0 }
 0x247   :  { %v2378_v13 = vadd.f32 %v11567_v38, %v9254_v35  ;;  %v2333_v47 = vadd.f32 %v11567_v38, %v11879_v11  ;;  %v3013_v46 = vmax.f32 %v2343_v16, 0.0  ;;  %v2323_v11 = vadd.f32 %v11567_v38, %v11867_v43 }
 0x248   :  { %v2372_v59 = vpop.f32.mrf.mxu0  ;;  %v3001_v17 = vmax.f32 %v2283_v3, 0.0  ;;  %v2313_v43 = vadd.f32 %v11567_v38, %v11855_v50  ;;  %v2303_v50 = vadd.f32 %v11567_v38, %v11843_v39  ;;  %v3125_v39 = vld [vmem:[%s13796_s1 + $0x40] sm:$0xff] }
 0x249   :  { %v3020_v7 = vmax.f32 %v2378_v13, 0.0  ;;  %v2373_v22 = vadd.f32 %v11567_v38, %v2372_v59  ;;  %v3018_v13 = vmax.f32 %v2368_v23, 0.0  ;;  %v3000_v23 = vmax.f32 %v2278_v55, 0.0 }
 0x24a   :  { %v11913_v18 = vpop.f32.mrf.mxu0  ;;  %v2253_v55 = vadd.f32 %v11567_v38, %v11757_v58  ;;  %v3011_v58 = vmax.f32 %v2333_v47, 0.0  ;;  %v3007_v47 = vmax.f32 %v2313_v43, 0.0 }
 0x24b   :  { %v3019_v20 = vmax.f32 %v2373_v22, 0.0  ;;  %8864 = vmatprep.subr.mxu1 %v3020_v7  ;;  %v3017_v7 = vmax.f32 %v2363_v54, 0.0  ;;  %v2999_v54 = vmax.f32 %v2273_v15, 0.0  ;;  %v2996_v15 = vmax.f32 %v2258_v21, 0.0 }
 0x24c   :  { %v11918_v35 = vpop.f32.mrf.mxu0  ;;  %8865 = vmatpush3.msra.mxu1 %v3004_v4  ;;  %v3015_v4 = vmax.f32 %v2353_v5, 0.0 }
 0x24d   :  { %8866 = vmatprep.subr.mxu1 %v3019_v20  ;;  %v2348_v20 = vadd.f32 %v11567_v38, %v9245_v6  ;;  %v2338_v6 = vadd.f32 %v11567_v38, %v11872_v1  ;;  %v2328_v1 = vadd.f32 %v11567_v38, %v11860_v8  ;;  %v2318_v8 = vadd.f32 %v11567_v38, %v11848_v42 }
 0x24e   :  { %v11923_v59 = vpop.f32.mrf.mxu0  ;;  %8867 = vmatpush3.msra.mxu1 %v3003_v34  ;;  %v2308_v42 = vadd.f32 %v11567_v38, %v11836_v10 }
 0x24f   :  { %8868 = vmatprep.subr.mxu1 %v3018_v13  ;;  %v3014_v34 = vmax.f32 %v2348_v20, 0.0  ;;  %v3012_v0 = vmax.f32 %v2338_v6, 0.0  ;;  %v2243_v20 = vadd.f32 %v11567_v38, %v11737_v2  ;;  %v3009_v2 = vmax.f32 %v2323_v11, 0.0 }
 0x250   :  { %v11928_v22 = vpop.f32.mrf.mxu0  ;;  %8869 = vmatpush3.msra.mxu1 %v3002_v12  ;;  %v2997_v12 = vmax.f32 %v2263_v19, 0.0  ;;  %v2233_v19 = vadd.f32 %v11567_v38, %v11718_v31  ;;  %v2223_v31 = vadd.f32 %v11567_v38, %v11700_v14  ;;  %v3006_v10 = vmax.f32 %v2308_v42, 0.0  ;;  %v3128_v14 = vld [vmem:[%s13796_s1 + $0x58] sm:$0xff] }
 0x251   :  { %8870 = vmatprep.subr.mxu1 %v3017_v7  ;;  %v2248_v7 = vadd.f32 %v11567_v38, %v11726_v62  ;;  %v3010_v62 = vmax.f32 %v2328_v1, 0.0 }
 0x252   :  { %v11933_v30 = vpop.f32.mrf.mxu0  ;;  %8871 = vmatpush3.msra.mxu1 %v3001_v17 }
 0x253   :  { %8872 = vmatprep.subr.mxu1 %v3016_v9  ;;  %v2995_v9 = vmax.f32 %v2253_v55, 0.0  ;;  %v2994_v16 = vmax.f32 %v2248_v7, 0.0 }
 0x254   :  { %v11938_v3 = vpop.f32.mrf.mxu0  ;;  %8873 = vmatpush3.msra.mxu1 %v3000_v23  ;;  %v2238_v23 = vadd.f32 %v11567_v38, %v11708_v63  ;;  %v3008_v63 = vmax.f32 %v2318_v8, 0.0 }
 0x255   :  { %8874 = vmatprep.subr.mxu1 %v3015_v4 }
 0x256   :  { %v11944_v13 = vpop.f32.mrf.mxu0  ;;  %8875 = vmatpush3.msra.mxu1 %v2999_v54  ;;  %v2993_v54 = vmax.f32 %v2243_v20, 0.0  ;;  %v2992_v21 = vmax.f32 %v2238_v23, 0.0 }
 0x257   :  { %8876 = vmatprep.subr.mxu1 %v3014_v34  ;;  %v2228_v34 = vadd.f32 %v11567_v38, %v11690_v26  ;;  %v3005_v26 = vmax.f32 %v2303_v50, 0.0 }
 0x258   :  { %v11950_v5 = vpop.f32.mrf.mxu0  ;;  %8877 = vmatpush3.msra.mxu1 %v2998_v27 }
 0x259   :  { %8878 = vmatprep.subr.mxu1 %v3013_v46  ;;  %v2991_v46 = vmax.f32 %v2233_v19, 0.0 }
 0x25a   :  { %v11956_v17 = vpop.f32.mrf.mxu0  ;;  %8879 = vmatpush3.msra.mxu1 %v2997_v12  ;;  %v2990_v12 = vmax.f32 %v2228_v34, 0.0 }
 0x25b   :  { %8880 = vmatprep.subr.mxu1 %v3012_v0  ;;  %v2989_v0 = vmax.f32 %v2223_v31, 0.0 }
 0x25c   :  { %v11962_v51 = vpop.f32.mrf.mxu0  ;;  %8881 = vmatpush3.msra.mxu1 %v2996_v15 }
 0x25d   :  { %8882 = vmatprep.subr.mxu1 %v3011_v58 }
 0x25e   :  { %v11968_v4 = vpop.f32.mrf.mxu0  ;;  %8883 = vmatpush3.msra.mxu1 %v2995_v9 }
 0x25f   :  { %8884 = vmatprep.subr.mxu1 %v3010_v62 }
 0x260   :  { %v11974_v6 = vpop.f32.mrf.mxu0  ;;  %8885 = vmatpush3.msra.mxu1 %v2994_v16 }
 0x261   :  { %8886 = vmatprep.subr.mxu1 %v3009_v2 }
 0x262   :  { %v9275_v27 = vpop.f32.mrf.mxu0  ;;  %8887 = vmatpush3.msra.mxu1 %v2993_v54 }
 0x263   :  { %8888 = vmatprep.subr.mxu1 %v3008_v63 }
 0x264   :  { %v2442_v55 = vpop.f32.mrf.mxu0  ;;  %8889 = vmatpush3.msra.mxu1 %v2992_v21 }
 0x265   :  { %8890 = vmatprep.subr.mxu1 %v3007_v47 }
 0x266   :  { %v9278_v1 = vpop.f32.mrf.mxu0  ;;  %8891 = vmatpush3.msra.mxu1 %v2991_v46 }
 0x267   :  { %8892 = vmatprep.subr.mxu1 %v3006_v10  ;;  %v2458_v63 = vadd.f32 %v11567_v38, %v9278_v1  ;;  %v2443_v1 = vadd.f32 %v11567_v38, %v2442_v55  ;;  %v2433_v55 = vadd.f32 %v11567_v38, %v11974_v6  ;;  %v2423_v6 = vadd.f32 %v11567_v38, %v11962_v51 }
 0x268   :  { %v2452_v7 = vpop.f32.mrf.mxu0  ;;  %8893 = vmatpush3.msra.mxu1 %v2990_v12  ;;  %v2448_v12 = vadd.f32 %v11567_v38, %v9275_v27  ;;  %v2438_v27 = vadd.f32 %v11567_v38, %v11968_v4  ;;  %v2428_v4 = vadd.f32 %v11567_v38, %v11956_v17  ;;  %v2418_v17 = vadd.f32 %v11567_v38, %v11944_v13 }
 0x269   :  { %8894 = vmatprep.subr.mxu1 %v3005_v26  ;;  %v2453_v50 = vadd.f32 %v11567_v38, %v2452_v7  ;;  %v3036_v26 = vmax.f32 %v2458_v63, 0.0  ;;  %v2413_v51 = vadd.f32 %v11567_v38, %v11950_v5  ;;  %v2408_v13 = vadd.f32 %v11567_v38, %v11933_v30 }
 0x26a   :  { %v11990_v15 = vpop.f32.mrf.mxu0  ;;  %8895 = vmatpush3.msra.mxu1 %v2989_v0  ;;  %v3034_v63 = vmax.f32 %v2448_v12, 0.0 }
 0x26b   :  { %3478 = vmatmul.mubr.f32.vlgmr.msra.gmra.mxu1 %v3125_v39 }
 0x26c   :  { %v11992_v11 = vpop.f32.mrf.mxu0  ;;  %3547 = vmatprep.mubr.f32.mxu1 %v3128_v14 }
 0x26e   :  { %v11994_v58 = vpop.f32.mrf.mxu0 }
 0x270   :  { %v11996_v20 = vpop.f32.mrf.mxu0 }
 0x272   :  { %v11998_v9 = vpop.f32.mrf.mxu0 }
 0x274   :  { %v12000_v8 = vpop.f32.mrf.mxu0 }
 0x276   :  { %v9290_v62 = vpop.f32.mrf.mxu0 }
 0x278   :  { %v2492_v23 = vpop.f32.mrf.mxu0 }
 0x27a   :  { %v9293_v16 = vpop.f32.mrf.mxu0 }
 0x27c   :  { %v2502_v43 = vpop.f32.mrf.mxu0 }
 0x27e   :  { %v9296_v2 = vpop.f32.mrf.mxu0 }
 0x27f   :  { %v2518_v7 = vadd.f32 %v11567_v38, %v9296_v2  ;;  %v2508_v2 = vadd.f32 %v11567_v38, %v9293_v16  ;;  %v2498_v16 = vadd.f32 %v11567_v38, %v9290_v62  ;;  %v2488_v62 = vadd.f32 %v11567_v38, %v11998_v9 }
 0x280   :  { %v2512_v19 = vpop.f32.mrf.mxu0  ;;  %v2478_v9 = vadd.f32 %v11567_v38, %v11994_v58  ;;  %v2468_v58 = vadd.f32 %v11567_v38, %v11990_v15 }
 0x281   :  { %v3042_v30 = vmax.f32 %v2488_v62, 0.0 }
 0x282   :  { %v9299_v54 = vpop.f32.mrf.mxu0  ;;  %v3038_v15 = vmax.f32 %v2468_v58, 0.0 }
 0x283   :  { %v2528_v31 = vadd.f32 %v11567_v38, %v9299_v54 }
 0x284   :  { %v2522_v42 = vpop.f32.mrf.mxu0 }
 0x285   :  { %v2523_v39 = vadd.f32 %v11567_v38, %v2522_v42  ;;  %v3050_v54 = vmax.f32 %v2528_v31, 0.0  ;;  %v2513_v42 = vadd.f32 %v11567_v38, %v2512_v19  ;;  %v3048_v31 = vmax.f32 %v2518_v7, 0.0 }
 0x286   :  { %v9302_v34 = vpop.f32.mrf.mxu0  ;;  %v2503_v19 = vadd.f32 %v11567_v38, %v2502_v43  ;;  %v2493_v43 = vadd.f32 %v11567_v38, %v2492_v23  ;;  %v2483_v23 = vadd.f32 %v11567_v38, %v12000_v8  ;;  %v2473_v8 = vadd.f32 %v11567_v38, %v11996_v20 }
 0x287   :  { %v2538_v21 = vadd.f32 %v11567_v38, %v9302_v34  ;;  %v3035_v34 = vmax.f32 %v2453_v50, 0.0  ;;  %v3033_v50 = vmax.f32 %v2443_v1, 0.0  ;;  %v3046_v1 = vmax.f32 %v2508_v2, 0.0 }
 0x288   :  { %v2532_v47 = vpop.f32.mrf.mxu0  ;;  %v3043_v5 = vmax.f32 %v2493_v43, 0.0  ;;  %v3027_v2 = vmax.f32 %v2413_v51, 0.0  ;;  %v2463_v20 = vadd.f32 %v11567_v38, %v11992_v11  ;;  %v3127_v11 = vld [vmem:[%s13796_s1 + $0x50] sm:$0xff] }
 0x289   :  { %v3052_v46 = vmax.f32 %v2538_v21, 0.0  ;;  %v2533_v10 = vadd.f32 %v11567_v38, %v2532_v47  ;;  %v3049_v47 = vmax.f32 %v2523_v39, 0.0  ;;  %v3031_v39 = vmax.f32 %v2433_v55, 0.0 }
 0x28a   :  { %v12008_v0 = vpop.f32.mrf.mxu0 }
 0x28b   :  { %v3051_v14 = vmax.f32 %v2533_v10, 0.0  ;;  %8899 = vmatprep.subr.mxu1 %v3052_v46  ;;  %v3032_v10 = vmax.f32 %v2438_v27, 0.0  ;;  %v3029_v27 = vmax.f32 %v2423_v6, 0.0 }
 0x28c   :  { %v12012_v25 = vpop.f32.mrf.mxu0  ;;  %8900 = vmatpush3.msra.mxu1 %v3036_v26  ;;  %v3047_v26 = vmax.f32 %v2513_v42, 0.0  ;;  %v3044_v42 = vmax.f32 %v2498_v16, 0.0  ;;  %v2388_v16 = vadd.f32 %v11567_v38, %v11913_v18  ;;  %v3037_v18 = vmax.f32 %v2463_v20, 0.0 }
 0x28d   :  { %8901 = vmatprep.subr.mxu1 %v3051_v14 }
 0x28e   :  { %v12017_v21 = vpop.f32.mrf.mxu0  ;;  %8902 = vmatpush3.msra.mxu1 %v3035_v34  ;;  %v3030_v34 = vmax.f32 %v2428_v4, 0.0  ;;  %v2398_v4 = vadd.f32 %v11567_v38, %v11923_v59  ;;  %v3040_v59 = vmax.f32 %v2478_v9, 0.0  ;;  %v3022_v51 = vmax.f32 %v2388_v16, 0.0 }
 0x28f   :  { %8903 = vmatprep.subr.mxu1 %v3050_v54  ;;  %v3045_v54 = vmax.f32 %v2503_v19, 0.0 }
 0x290   :  { %v12022_v46 = vpop.f32.mrf.mxu0  ;;  %8904 = vmatpush3.msra.mxu1 %v3034_v63 }
 0x291   :  { %8905 = vmatprep.subr.mxu1 %v3049_v47  ;;  %v3028_v47 = vmax.f32 %v2418_v17, 0.0 }
 0x292   :  { %v12027_v12 = vpop.f32.mrf.mxu0  ;;  %8906 = vmatpush3.msra.mxu1 %v3033_v50  ;;  %v2403_v50 = vadd.f32 %v11567_v38, %v11938_v3  ;;  %v3041_v3 = vmax.f32 %v2483_v23, 0.0 }
 0x293   :  { %8907 = vmatprep.subr.mxu1 %v3048_v31 }
 0x294   :  { %v12032_v14 = vpop.f32.mrf.mxu0  ;;  %8908 = vmatpush3.msra.mxu1 %v3032_v10  ;;  %v3026_v10 = vmax.f32 %v2408_v13, 0.0  ;;  %v3025_v6 = vmax.f32 %v2403_v50, 0.0 }
 0x295   :  { %8909 = vmatprep.subr.mxu1 %v3047_v26  ;;  %v2393_v26 = vadd.f32 %v11567_v38, %v11928_v22  ;;  %v2383_v22 = vadd.f32 %v11567_v38, %v11918_v35  ;;  %v3130_v38 = vld [vmem:[%s13796_s1 + $0x68] sm:$0xff] }
 0x296   :  { %v12037_v7 = vpop.f32.mrf.mxu0  ;;  %8910 = vmatpush3.msra.mxu1 %v3031_v39 }
 0x297   :  { %8911 = vmatprep.subr.mxu1 %v3046_v1  ;;  %v3024_v1 = vmax.f32 %v2398_v4, 0.0  ;;  %v3023_v43 = vmax.f32 %v2393_v26, 0.0  ;;  %v3021_v62 = vmax.f32 %v2383_v22, 0.0 }
 0x298   :  { %v12042_v63 = vpop.f32.mrf.mxu0  ;;  %8912 = vmatpush3.msra.mxu1 %v3030_v34  ;;  %v3039_v34 = vmax.f32 %v2473_v8, 0.0 }
 0x299   :  { %8913 = vmatprep.subr.mxu1 %v3045_v54 }
 0x29a   :  { %v12048_v55 = vpop.f32.mrf.mxu0  ;;  %8914 = vmatpush3.msra.mxu1 %v3029_v27 }
 0x29b   :  { %8915 = vmatprep.subr.mxu1 %v3044_v42 }
 0x29c   :  { %v12054_v31 = vpop.f32.mrf.mxu0  ;;  %8916 = vmatpush3.msra.mxu1 %v3028_v47 }
 0x29d   :  { %8917 = vmatprep.subr.mxu1 %v3043_v5 }
 0x29e   :  { %v12060_v19 = vpop.f32.mrf.mxu0  ;;  %8918 = vmatpush3.msra.mxu1 %v3027_v2 }
 0x29f   :  { %8919 = vmatprep.subr.mxu1 %v3042_v30 }
 0x2a0   :  { %v12066_v39 = vpop.f32.mrf.mxu0  ;;  %8920 = vmatpush3.msra.mxu1 %v3026_v10 }
 0x2a1   :  { %8921 = vmatprep.subr.mxu1 %v3041_v3 }
 0x2a2   :  { %v9323_v17 = vpop.f32.mrf.mxu0  ;;  %8922 = vmatpush3.msra.mxu1 %v3025_v6  ;;  %v12097_v6 = vld [vmem:[%s13798_s3] ss:$0 sm:$0xff] }
 0x2a3   :  { %8923 = vmatprep.subr.mxu1 %v3040_v59 }
 0x2a4   :  { %v2602_v54 = vpop.f32.mrf.mxu0  ;;  %8924 = vmatpush3.msra.mxu1 %v3024_v1 }
 0x2a5   :  { %8925 = vmatprep.subr.mxu1 %v3039_v34 }
 0x2a6   :  { %v9326_v27 = vpop.f32.mrf.mxu0  ;;  %8926 = vmatpush3.msra.mxu1 %v3023_v43 }
 0x2a7   :  { %8927 = vmatprep.subr.mxu1 %v3038_v15  ;;  %v2618_v58 = vadd.f32 %v12097_v6, %v9326_v27  ;;  %v2608_v15 = vadd.f32 %v12097_v6, %v9323_v17  ;;  %v2603_v27 = vadd.f32 %v12097_v6, %v2602_v54  ;;  %v2598_v17 = vadd.f32 %v12097_v6, %v12060_v19 }
 0x2a8   :  { %v2612_v42 = vpop.f32.mrf.mxu0  ;;  %8928 = vmatpush3.msra.mxu1 %v3022_v51  ;;  %v2593_v54 = vadd.f32 %v12097_v6, %v12066_v39  ;;  %v2588_v19 = vadd.f32 %v12097_v6, %v12048_v55  ;;  %v2583_v39 = vadd.f32 %v12097_v6, %v12054_v31  ;;  %v2578_v55 = vadd.f32 %v12097_v6, %v12037_v7 }
 0x2a9   :  { %8929 = vmatprep.subr.mxu1 %v3037_v18  ;;  %v2613_v1 = vadd.f32 %v12097_v6, %v2612_v42  ;;  %v3068_v51 = vmax.f32 %v2618_v58, 0.0  ;;  %v3066_v58 = vmax.f32 %v2608_v15, 0.0  ;;  %v2573_v31 = vadd.f32 %v12097_v6, %v12042_v63 }
 0x2aa   :  { %v12082_v35 = vpop.f32.mrf.mxu0  ;;  %8930 = vmatpush3.msra.mxu1 %v3021_v62  ;;  %v2568_v7 = vadd.f32 %v12097_v6, %v12027_v12 }
 0x2ab   :  { %3548 = vmatmul.mubr.f32.vlgmr.msra.gmra.mxu1 %v3127_v11 }
 0x2ac   :  { %v12084_v13 = vpop.f32.mrf.mxu0  ;;  %3617 = vmatprep.mubr.f32.mxu1 %v3130_v38  ;;  %v3067_v38 = vmax.f32 %v2613_v1, 0.0  ;;  %v3065_v1 = vmax.f32 %v2603_v27, 0.0 }
 0x2ae   :  { %v12086_v47 = vpop.f32.mrf.mxu0 }
 0x2b0   :  { %v12088_v23 = vpop.f32.mrf.mxu0 }
 0x2b2   :  { %v12090_v5 = vpop.f32.mrf.mxu0 }
 0x2b4   :  { %v12092_v50 = vpop.f32.mrf.mxu0 }
 0x2b6   :  { %v9338_v2 = vpop.f32.mrf.mxu0 }
 0x2b8   :  { %v2652_v9 = vpop.f32.mrf.mxu0 }
 0x2ba   :  { %v9341_v30 = vpop.f32.mrf.mxu0 }
 0x2bc   :  { %v2662_v4 = vpop.f32.mrf.mxu0 }
 0x2be   :  { %v9344_v10 = vpop.f32.mrf.mxu0 }
 0x2bf   :  { %v2678_v42 = vadd.f32 %v12097_v6, %v9344_v10  ;;  %v2668_v10 = vadd.f32 %v12097_v6, %v9341_v30  ;;  %v2658_v30 = vadd.f32 %v12097_v6, %v9338_v2  ;;  %v2648_v2 = vadd.f32 %v12097_v6, %v12090_v5 }
 0x2c0   :  { %v2672_v8 = vpop.f32.mrf.mxu0  ;;  %v2638_v5 = vadd.f32 %v12097_v6, %v12086_v47  ;;  %v2628_v47 = vadd.f32 %v12097_v6, %v12082_v35 }
 0x2c1   :  { %v3078_v27 = vmax.f32 %v2668_v10, 0.0  ;;  %v3059_v10 = vmax.f32 %v2573_v31, 0.0  ;;  %v3074_v12 = vmax.f32 %v2648_v2, 0.0 }
 0x2c2   :  { %v9347_v3 = vpop.f32.mrf.mxu0  ;;  %v3070_v35 = vmax.f32 %v2628_v47, 0.0 }
 0x2c3   :  { %v2688_v34 = vadd.f32 %v12097_v6, %v9347_v3 }
 0x2c4   :  { %v2682_v26 = vpop.f32.mrf.mxu0 }
 0x2c5   :  { %v2683_v62 = vadd.f32 %v12097_v6, %v2682_v26  ;;  %v3082_v3 = vmax.f32 %v2688_v34, 0.0  ;;  %v2673_v26 = vadd.f32 %v12097_v6, %v2672_v8  ;;  %v3080_v34 = vmax.f32 %v2678_v42, 0.0 }
 0x2c6   :  { %v9350_v59 = vpop.f32.mrf.mxu0  ;;  %v2663_v8 = vadd.f32 %v12097_v6, %v2662_v4  ;;  %v2653_v4 = vadd.f32 %v12097_v6, %v2652_v9  ;;  %v2643_v9 = vadd.f32 %v12097_v6, %v12092_v50  ;;  %v2633_v50 = vadd.f32 %v12097_v6, %v12088_v23 }
 0x2c7   :  { %v2698_v16 = vadd.f32 %v12097_v6, %v9350_v59  ;;  %v2623_v23 = vadd.f32 %v12097_v6, %v12084_v13  ;;  %v3129_v13 = vld [vmem:[%s13796_s1 + $0x60] sm:$0xff] }
 0x2c8   :  { %v2692_v20 = vpop.f32.mrf.mxu0  ;;  %v3075_v63 = vmax.f32 %v2653_v4, 0.0 }
 0x2c9   :  { %v3084_v22 = vmax.f32 %v2698_v16, 0.0  ;;  %v2693_v43 = vadd.f32 %v12097_v6, %v2692_v20  ;;  %v3081_v20 = vmax.f32 %v2683_v62, 0.0  ;;  %v3063_v62 = vmax.f32 %v2593_v54, 0.0 }
 0x2ca   :  { %v12105_v18 = vpop.f32.mrf.mxu0 }
 0x2cb   :  { %v3083_v11 = vmax.f32 %v2693_v43, 0.0  ;;  %8934 = vmatprep.subr.mxu1 %v3084_v22  ;;  %v3064_v43 = vmax.f32 %v2598_v17, 0.0  ;;  %v3061_v17 = vmax.f32 %v2583_v39, 0.0 }
 0x2cc   :  { %v12109_v59 = vpop.f32.mrf.mxu0  ;;  %8935 = vmatpush3.msra.mxu1 %v3068_v51  ;;  %v3079_v51 = vmax.f32 %v2673_v26, 0.0  ;;  %v3076_v26 = vmax.f32 %v2658_v30, 0.0  ;;  %v2548_v30 = vadd.f32 %v12097_v6, %v12008_v0  ;;  %v3069_v0 = vmax.f32 %v2623_v23, 0.0 }
 0x2cd   :  { %8936 = vmatprep.subr.mxu1 %v3083_v11 }
 0x2ce   :  { %v12114_v16 = vpop.f32.mrf.mxu0  ;;  %8937 = vmatpush3.msra.mxu1 %v3067_v38  ;;  %v3062_v38 = vmax.f32 %v2588_v19, 0.0  ;;  %v2558_v19 = vadd.f32 %v12097_v6, %v12017_v21  ;;  %v3072_v21 = vmax.f32 %v2638_v5, 0.0  ;;  %v3054_v31 = vmax.f32 %v2548_v30, 0.0 }
 0x2cf   :  { %8938 = vmatprep.subr.mxu1 %v3082_v3  ;;  %v3077_v3 = vmax.f32 %v2663_v8, 0.0 }
 0x2d0   :  { %v12119_v22 = vpop.f32.mrf.mxu0  ;;  %8939 = vmatpush3.msra.mxu1 %v3066_v58 }
 0x2d1   :  { %8940 = vmatprep.subr.mxu1 %v3081_v20  ;;  %v3060_v20 = vmax.f32 %v2578_v55, 0.0 }
 0x2d2   :  { %v12124_v15 = vpop.f32.mrf.mxu0  ;;  %8941 = vmatpush3.msra.mxu1 %v3065_v1  ;;  %v2563_v1 = vadd.f32 %v12097_v6, %v12032_v14  ;;  %v3073_v14 = vmax.f32 %v2643_v9, 0.0 }
 0x2d3   :  { %8942 = vmatprep.subr.mxu1 %v3080_v34 }
 0x2d4   :  { %v12129_v11 = vpop.f32.mrf.mxu0  ;;  %8943 = vmatpush3.msra.mxu1 %v3064_v43  ;;  %v3058_v43 = vmax.f32 %v2568_v7, 0.0  ;;  %v3057_v39 = vmax.f32 %v2563_v1, 0.0 }
 0x2d5   :  { %8944 = vmatprep.subr.mxu1 %v3079_v51  ;;  %v2553_v51 = vadd.f32 %v12097_v6, %v12022_v46  ;;  %v2543_v46 = vadd.f32 %v12097_v6, %v12012_v25  ;;  %v3132_v25 = vld [vmem:[%s13796_s1 + $0x78] sm:$0xff] }
 0x2d6   :  { %v12134_v42 = vpop.f32.mrf.mxu0  ;;  %8945 = vmatpush3.msra.mxu1 %v3063_v62 }
 0x2d7   :  { %8946 = vmatprep.subr.mxu1 %v3078_v27  ;;  %v3056_v27 = vmax.f32 %v2558_v19, 0.0  ;;  %v3055_v4 = vmax.f32 %v2553_v51, 0.0  ;;  %v3053_v2 = vmax.f32 %v2543_v46, 0.0 }
 0x2d8   :  { %v12139_v58 = vpop.f32.mrf.mxu0  ;;  %8947 = vmatpush3.msra.mxu1 %v3062_v38  ;;  %v3071_v38 = vmax.f32 %v2633_v50, 0.0 }
 0x2d9   :  { %8948 = vmatprep.subr.mxu1 %v3077_v3 }
 0x2da   :  { %v12145_v54 = vpop.f32.mrf.mxu0  ;;  %8949 = vmatpush3.msra.mxu1 %v3061_v17 }
 0x2db   :  { %8950 = vmatprep.subr.mxu1 %v3076_v26 }
 0x2dc   :  { %v12151_v34 = vpop.f32.mrf.mxu0  ;;  %8951 = vmatpush3.msra.mxu1 %v3060_v20 }
 0x2dd   :  { %8952 = vmatprep.subr.mxu1 %v3075_v63 }
 0x2de   :  { %v12157_v8 = vpop.f32.mrf.mxu0  ;;  %8953 = vmatpush3.msra.mxu1 %v3059_v10 }
 0x2df   :  { %8954 = vmatprep.subr.mxu1 %v3074_v12 }
 0x2e0   :  { %v12163_v62 = vpop.f32.mrf.mxu0  ;;  %8955 = vmatpush3.msra.mxu1 %v3058_v43 }
 0x2e1   :  { %8956 = vmatprep.subr.mxu1 %v3073_v14 }
 0x2e2   :  { %v9371_v55 = vpop.f32.mrf.mxu0  ;;  %8957 = vmatpush3.msra.mxu1 %v3057_v39 }
 0x2e3   :  { %8958 = vmatprep.subr.mxu1 %v3072_v21 }
 0x2e4   :  { %v2762_v3 = vpop.f32.mrf.mxu0  ;;  %8959 = vmatpush3.msra.mxu1 %v3056_v27 }
 0x2e5   :  { %8960 = vmatprep.subr.mxu1 %v3071_v38 }
 0x2e6   :  { %v9374_v17 = vpop.f32.mrf.mxu0  ;;  %8961 = vmatpush3.msra.mxu1 %v3055_v4 }
 0x2e7   :  { %8962 = vmatprep.subr.mxu1 %v3070_v35  ;;  %v2778_v47 = vadd.f32 %v12097_v6, %v9374_v17  ;;  %v2768_v35 = vadd.f32 %v12097_v6, %v9371_v55  ;;  %v2763_v17 = vadd.f32 %v12097_v6, %v2762_v3 }
 0x2e8   :  { %v2772_v26 = vpop.f32.mrf.mxu0  ;;  %8963 = vmatpush3.msra.mxu1 %v3054_v31 }
 0x2e9   :  { %8964 = vmatprep.subr.mxu1 %v3069_v0  ;;  %v2773_v27 = vadd.f32 %v12097_v6, %v2772_v26  ;;  %v3100_v31 = vmax.f32 %v2778_v47, 0.0 }
 0x2ea   :  { %v12179_v7 = vpop.f32.mrf.mxu0  ;;  %8965 = vmatpush3.msra.mxu1 %v3053_v2 }
 0x2eb   :  { %3618 = vmatmul.mubr.f32.vlgmr.msra.gmra.mxu1 %v3129_v13  ;;  %v3099_v13 = vmax.f32 %v2773_v27, 0.0 }
 0x2ec   :  { %v12181_v20 = vpop.f32.mrf.mxu0  ;;  %3687 = vmatprep.mubr.f32.mxu1 %v3132_v25 }
 0x2ee   :  { %v12183_v9 = vpop.f32.mrf.mxu0 }
 0x2f0   :  { %v12185_v63 = vpop.f32.mrf.mxu0 }
 0x2f2   :  { %v9383_v1 = vpop.f32.mrf.mxu0 }
 0x2f4   :  { %v12187_v10 = vpop.f32.mrf.mxu0 }
 0x2f6   :  { %v9386_v5 = vpop.f32.mrf.mxu0 }
 0x2f8   :  { %v2812_v12 = vpop.f32.mrf.mxu0 }
 0x2fa   :  { %v9389_v19 = vpop.f32.mrf.mxu0 }
 0x2fb   :  { %v2828_v3 = vadd.f32 %v12097_v6, %v9389_v19  ;;  %v2738_v19 = vadd.f32 %v12097_v6, %v12134_v42  ;;  %v2803_v42 = vadd.f32 %v12097_v6, %v12187_v10  ;;  %v2793_v10 = vadd.f32 %v12097_v6, %v12185_v63 }
 0x2fc   :  { %v2822_v43 = vpop.f32.mrf.mxu0  ;;  %v2783_v63 = vadd.f32 %v12097_v6, %v12181_v20  ;;  %v3745_v20 = vld [vmem:[%s13799_s4 + $0x180] sm:$0xff] }
 0x2fe   :  { %v9392_v50 = vpop.f32.mrf.mxu0 }
 0x2ff   :  { %v2838_v25 = vadd.f32 %v12097_v6, %v9392_v50  ;;  %v2748_v50 = vadd.f32 %v12097_v6, %v12145_v54  ;;  %v2813_v54 = vadd.f32 %v12097_v6, %v2812_v12 }
 0x300   :  { %v2832_v14 = vpop.f32.mrf.mxu0 }
 0x301   :  { %v2833_v55 = vadd.f32 %v12097_v6, %v2832_v14  ;;  %v3112_v27 = vmax.f32 %v2838_v25, 0.0  ;;  %v2743_v14 = vadd.f32 %v12097_v6, %v12151_v34  ;;  %v2808_v34 = vadd.f32 %v12097_v6, %v9383_v1 }
 0x302   :  { %v9395_v51 = vpop.f32.mrf.mxu0  ;;  %v3107_v12 = vmax.f32 %v2813_v54, 0.0  ;;  %v2798_v1 = vadd.f32 %v12097_v6, %v12183_v9  ;;  %v2788_v9 = vadd.f32 %v12097_v6, %v12179_v7  ;;  %v3733_v54 = vld [vmem:[%s13799_s4 + $0x120] sm:$0xff] }
 0x303   :  { %v2848_v38 = vadd.f32 %v12097_v6, %v9395_v51  ;;  %v2758_v51 = vadd.f32 %v12097_v6, %v12157_v8  ;;  %v2823_v8 = vadd.f32 %v12097_v6, %v2822_v43  ;;  %v2733_v43 = vadd.f32 %v12097_v6, %v12139_v58 }
 0x304   :  { %v2842_v39 = vpop.f32.mrf.mxu0  ;;  %v3106_v25 = vmax.f32 %v2808_v34, 0.0  ;;  %v3725_v34 = vld [vmem:[%s13799_s4 + $0xe0] sm:$0xff] }
 0x305   :  { %v2843_v0 = vadd.f32 %v12097_v6, %v2842_v39  ;;  %v3114_v26 = vmax.f32 %v2848_v38, 0.0  ;;  %v2753_v39 = vadd.f32 %v12097_v6, %v12163_v62  ;;  %v3111_v38 = vmax.f32 %v2833_v55, 0.0 }
 0x306   :  { %v9398_v21 = vpop.f32.mrf.mxu0  ;;  %v2818_v62 = vadd.f32 %v12097_v6, %v9386_v5  ;;  %v2728_v5 = vadd.f32 %v12097_v6, %v12124_v15  ;;  %v3091_v58 = vmax.f32 %v2733_v43, 0.0  ;;  %v2718_v15 = vadd.f32 %v12097_v6, %v12114_v16 }
 0x307   :  { %v2858_v30 = vadd.f32 %v12097_v6, %v9398_v21  ;;  %v3098_v21 = vmax.f32 %v2768_v35, 0.0  ;;  %v3113_v47 = vmax.f32 %v2843_v0, 0.0  ;;  %v3094_v35 = vmax.f32 %v2748_v50, 0.0 }
 0x308   :  { %v2852_v23 = vpop.f32.mrf.mxu0  ;;  %v3093_v0 = vmax.f32 %v2743_v14, 0.0  ;;  %v3104_v55 = vmax.f32 %v2798_v1, 0.0  ;;  %v2708_v16 = vadd.f32 %v12097_v6, %v12105_v18  ;;  %v3131_v18 = vld [vmem:[%s13796_s1 + $0x70] sm:$0xff]  ;;  %v3705_v1 = vld [vmem:[%s13799_s4 + $0x40] sm:$0xff] }
 0x309   :  { %v3116_v46 = vmax.f32 %v2858_v30, 0.0  ;;  %v2853_v4 = vadd.f32 %v12097_v6, %v2852_v23  ;;  %v3097_v30 = vmax.f32 %v2763_v17, 0.0  ;;  %v3096_v23 = vmax.f32 %v2758_v51, 0.0 }
 0x30a   :  { %v3092_v17 = vmax.f32 %v2738_v19, 0.0  ;;  %v3105_v51 = vmax.f32 %v2803_v42, 0.0  ;;  %v3086_v7 = vmax.f32 %v2708_v16, 0.0  ;;  %v3717_v42 = vld [vmem:[%s13799_s4 + $0xa0] sm:$0xff] }
 0x30b   :  { %v3115_v2 = vmax.f32 %v2853_v4, 0.0  ;;  %8969 = vmatprep.subr.mxu1 %v3116_v46  ;;  %v3095_v46 = vmax.f32 %v2753_v39, 0.0  ;;  %v3110_v4 = vmax.f32 %v2828_v3, 0.0  ;;  %v3103_v39 = vmax.f32 %v2793_v10, 0.0  ;;  %v3697_v10 = vld [vmem:[%s13799_s4] sm:$0xff] }
 0x30c   :  { %8970 = vmatpush3.msra.mxu1 %v3100_v31  ;;  %v3109_v31 = vmax.f32 %v2823_v8, 0.0  ;;  %v3102_v3 = vmax.f32 %v2788_v9, 0.0  ;;  %v12292_v9 = vld [vmem:[%s13799_s4 + $0x1c8] sm:$0xff] }
 0x30d   :  { %8971 = vmatprep.subr.mxu1 %v3115_v2  ;;  %v3108_v2 = vmax.f32 %v2818_v62, 0.0  ;;  %v3741_v62 = vld [vmem:[%s13799_s4 + $0x160] sm:$0xff] }
 0x30e   :  { %8972 = vmatpush3.msra.mxu1 %v3099_v13  ;;  %v2723_v13 = vadd.f32 %v12097_v6, %v12129_v11  ;;  %v2713_v11 = vadd.f32 %v12097_v6, %v12119_v22  ;;  %v2703_v22 = vadd.f32 %v12097_v6, %v12109_v59  ;;  %v3753_v6 = vld [vmem:[%s13799_s4 + $0x1c0] sm:$0xff] }
 0x30f   :  { %8973 = vmatprep.subr.mxu1 %v3114_v26  ;;  %v3090_v26 = vmax.f32 %v2728_v5, 0.0  ;;  %v3757_v59 = vld [vmem:[%s13799_s4 + $0x1e0] sm:$0xff] }
 0x310   :  { %8974 = vmatpush3.msra.mxu1 %v3098_v21  ;;  %v3089_v21 = vmax.f32 %v2723_v13, 0.0  ;;  %v3085_v50 = vmax.f32 %v2703_v22, 0.0  ;;  %v8271_v8 = vcombine.high %v3753_v6, %v3757_v59 }
 0x311   :  { %8975 = vmatprep.subr.mxu1 %v3113_v47  ;;  %v3088_v47 = vmax.f32 %v2718_v15, 0.0 }
 0x312   :  { %8976 = vmatpush3.msra.mxu1 %v3097_v30  ;;  %v3087_v30 = vmax.f32 %v2713_v11, 0.0 }
 0x313   :  { %8977 = vmatprep.subr.mxu1 %v3112_v27  ;;  %v3101_v27 = vmax.f32 %v2783_v63, 0.0  ;;  %v13920_v63 = vmov 0  }
 0x314   :  { %8978 = vmatpush3.msra.mxu1 %v3096_v23  ;;  %v8270_v23 = vcombine.low %v3753_v6, %v3757_v59  ;;  %4803 = vmatprep.mubr.bf16.mxu0 %v13920_v63  ;;  %v12313_v6 = vld [vmem:[%s13801_s6 + $0xe0] ss:$16 sps:$4 sm:$0xff]  }
 0x315   :  { %8979 = vmatprep.subr.mxu1 %v3111_v38  ;;  %v3749_v38 = vld [vmem:[%s13799_s4 + $0x1a0] sm:$0xff] }
 0x316   :  { %8980 = vmatpush3.msra.mxu1 %v3095_v46  ;;  %v8263_v14 = vcombine.high %v3745_v20, %v3749_v38  ;;  %v3737_v46 = vld [vmem:[%s13799_s4 + $0x140] sm:$0xff] }
 0x317   :  { %8981 = vmatprep.subr.mxu1 %v3110_v4  ;;  %v8262_v4 = vcombine.low %v3745_v20, %v3749_v38  ;;  %v8255_v19 = vcombine.high %v3737_v46, %v3741_v62  ;;  %v12319_v20 = vld [vmem:[%s13801_s6 + $0xc4] ss:$16 sps:$4 sm:$0xff]  }
 0x318   :  { %8982 = vmatpush3.msra.mxu1 %v3094_v35  ;;  %v3729_v35 = vld [vmem:[%s13799_s4 + $0x100] sm:$0xff] }
 0x319   :  { %8983 = vmatprep.subr.mxu1 %v3109_v31  ;;  %v8254_v31 = vcombine.low %v3737_v46, %v3741_v62  ;;  %v8247_v43 = vcombine.high %v3729_v35, %v3733_v54  ;;  %v12331_v38 = vld [vmem:[%s13801_s6 + $0xa4] ss:$16 sps:$4 sm:$0xff]   ;;  %v12337_v46 = vld [vmem:[%s13801_s6 + $0xa0] ss:$16 sps:$4 sm:$0xff]  }
 0x31a   :  { %8984 = vmatpush3.msra.mxu1 %v3093_v0  ;;  %v3721_v0 = vld [vmem:[%s13799_s4 + $0xc0] sm:$0xff] }
 0x31b   :  { %8985 = vmatprep.subr.mxu1 %v3108_v2  ;;  %v8246_v2 = vcombine.low %v3729_v35, %v3733_v54  ;;  %v8239_v5 = vcombine.high %v3721_v0, %v3725_v34  ;;  %v12343_v35 = vld [vmem:[%s13801_s6 + $0x84] ss:$16 sps:$4 sm:$0xff]   ;;  %v12349_v54 = vld [vmem:[%s13801_s6 + $0x80] ss:$16 sps:$4 sm:$0xff]  }
 0x31c   :  { %8986 = vmatpush3.msra.mxu1 %v3092_v17  ;;  %v3713_v17 = vld [vmem:[%s13799_s4 + $0x80] sm:$0xff] }
 0x31d   :  { %8987 = vmatprep.subr.mxu1 %v3107_v12  ;;  %v8238_v12 = vcombine.low %v3721_v0, %v3725_v34  ;;  %v8231_v13 = vcombine.high %v3713_v17, %v3717_v42  ;;  %v12355_v34 = vld [vmem:[%s13801_s6 + $0x64] ss:$16 sps:$4 sm:$0xff]  }
 0x31e   :  { %8988 = vmatpush3.msra.mxu1 %v3091_v58  ;;  %v8230_v58 = vcombine.low %v3713_v17, %v3717_v42 }
 0x31f   :  { %8989 = vmatprep.subr.mxu1 %v3106_v25  ;;  %v3709_v25 = vld [vmem:[%s13799_s4 + $0x60] sm:$0xff] }
 0x320   :  { %8990 = vmatpush3.msra.mxu1 %v3090_v26  ;;  %v8223_v15 = vcombine.high %v3705_v1, %v3709_v25  ;;  %v8222_v26 = vcombine.low %v3705_v1, %v3709_v25  ;;  %v12373_v1 = vld [vmem:[%s13801_s6 + $0x40] ss:$16 sps:$4 sm:$0xff]  }
 0x321   :  { %8991 = vmatprep.subr.mxu1 %v3105_v51  ;;  %v3701_v51 = vld [vmem:[%s13799_s4 + $0x20] sm:$0xff] }
 0x322   :  { %8992 = vmatpush3.msra.mxu1 %v3089_v21  ;;  %v8215_v11 = vcombine.high %v3697_v10, %v3701_v51  ;;  %v8214_v21 = vcombine.low %v3697_v10, %v3701_v51 }
 0x323   :  { %8993 = vmatprep.subr.mxu1 %v3104_v55  ;;  %v12297_v55 = vld [vmem:[%s13799_s4 + $0x1e8] sm:$0xff] }
 0x324   :  { %8994 = vmatpush3.msra.mxu1 %v3088_v47  ;;  %v8273_v16 = vcombine.high %v12292_v9, %v12297_v55  ;;  %v8272_v47 = vcombine.low %v12292_v9, %v12297_v55  ;;  %v3722_v9 = vld [vmem:[%s13799_s4 + $0xc8] sm:$0xff] }
 0x325   :  { %8995 = vmatprep.subr.mxu1 %v3103_v39  ;;  %v8756_v39 = vpop.f32.mrf.mxu1  ;;  %v3726_v55 = vld [vmem:[%s13799_s4 + $0xe8] sm:$0xff] }
 0x326   :  { %8996 = vmatpush3.msra.mxu1 %v3087_v30 }
 0x327   :  { %8997 = vmatprep.subr.mxu1 %v3102_v3  ;;  %v8757_v22 = vpop.f32.mrf.mxu1 }
 0x328   :  { %8998 = vmatpush3.msra.mxu1 %v3086_v7  ;;  %v8758_v62 = vadd.f32 %v8757_v22, %v8756_v39  ;;  %v12391_v22 = vld [vmem:[%s13801_s6 + $0x4] ss:$16 sps:$4 sm:$0xff]  }
 0x329   :  { %8999 = vmatprep.subr.mxu1 %v3101_v27  ;;  %v8791_v30 = vpop.f32.mrf.mxu1 }
 0x32a   :  { %9000 = vmatpush3.msra.mxu1 %v3085_v50 }
 0x32b   :  { %3688 = vmatmul.mubr.f32.vlgmr.msra.gmra.mxu1 %v3131_v18  ;;  %4123 = vmatprep.subr.bf16.mxu1 %v8271_v8  ;;  %v8792_v3 = vpop.f32.mrf.mxu1  ;;  %v12308_v18 = vld [vmem:[%s13801_s6 + $0xe4] ss:$16 sps:$4 sm:$0xff]   ;;  %v12325_v8 = vld [vmem:[%s13801_s6 + $0xc0] ss:$16 sps:$4 sm:$0xff]  }
 0x32c   :  { %4124 = vmatpush1.bf16.msra.mxu1 %v8270_v23  ;;  %4155 = vmatprep.mubr.bf16.mxu1 %v13920_v63 }
 0x32d   :  { %4125 = vmatprep.subr.bf16.mxu1 %v8263_v14  ;;  %v8826_v7 = vpop.f32.mrf.mxu1  ;;  %4771 = vmatprep.subr.bf16.mxu0 %v12308_v18 }
 0x32e   :  { %4772 = vmatpush1.bf16.msra.mxu0 %v12313_v6 }
 0x32f   :  { %v8827_v27 = vpop.f32.mrf.mxu1  ;;  %4773 = vmatprep.subr.bf16.mxu0 %v12319_v20 }
 0x330   :  { %4126 = vmatpush1.bf16.msra.mxu1 %v8262_v4  ;;  %v8793_v4 = vadd.f32 %v8792_v3, %v8791_v30 }
 0x331   :  { %4127 = vmatprep.subr.bf16.mxu1 %v8255_v19  ;;  %v8861_v50 = vpop.f32.mrf.mxu1 }
 0x332   :  { %4774 = vmatpush1.bf16.msra.mxu0 %v12325_v8 }
 0x333   :  { %v8862_v59 = vpop.f32.mrf.mxu1  ;;  %4775 = vmatprep.subr.bf16.mxu0 %v12331_v38 }
 0x334   :  { %4128 = vmatpush1.bf16.msra.mxu1 %v8254_v31  ;;  %v3270_v31 = vadd.f32 %v8793_v4, %v8758_v62  ;;  %v8863_v42 = vadd.f32 %v8862_v59, %v8861_v50  ;;  %v12403_v50 = vld [vmem:[%s13801_s6] ss:$16 sps:$4 sm:$0xff]   ;;  %v3738_v62 = vld [vmem:[%s13799_s4 + $0x148] sm:$0xff] }
 0x335   :  { %4129 = vmatprep.subr.bf16.mxu1 %v8247_v43  ;;  %v8896_v23 = vpop.f32.mrf.mxu1  ;;  %v8828_v43 = vadd.f32 %v8827_v27, %v8826_v7  ;;  %v3746_v7 = vld [vmem:[%s13799_s4 + $0x188] sm:$0xff] }
 0x336   :  { %4776 = vmatpush1.bf16.msra.mxu0 %v12337_v46  ;;  %v3750_v27 = vld [vmem:[%s13799_s4 + $0x1a8] sm:$0xff] }
 0x337   :  { %v8897_v14 = vpop.f32.mrf.mxu1  ;;  %4777 = vmatprep.subr.bf16.mxu0 %v12343_v35  ;;  %v3340_v17 = vadd.f32 %v8828_v43, %v3270_v31  ;;  %v3742_v4 = vld [vmem:[%s13799_s4 + $0x168] sm:$0xff] }
 0x338   :  { %4130 = vmatpush1.bf16.msra.mxu1 %v8246_v2  ;;  %v8257_v31 = vcombine.high %v3738_v62, %v3742_v4  ;;  %v3730_v43 = vld [vmem:[%s13799_s4 + $0x108] sm:$0xff] }
 0x339   :  { %4131 = vmatprep.subr.bf16.mxu1 %v8239_v5  ;;  %v12361_v5 = vld [vmem:[%s13801_s6 + $0x60] ss:$16 sps:$4 sm:$0xff]   ;;  %v3410_v25 = vadd.f32 %v8863_v42, %v3340_v17  ;;  %v8241_v42 = vcombine.high %v3722_v9, %v3726_v55 }
 0x33a   :  { %4778 = vmatpush1.bf16.msra.mxu0 %v12349_v54 }
 0x33b   :  { %4779 = vmatprep.subr.bf16.mxu0 %v12355_v34 }
 0x33c   :  { %4132 = vmatpush1.bf16.msra.mxu1 %v8238_v12  ;;  %v12367_v12 = vld [vmem:[%s13801_s6 + $0x44] ss:$16 sps:$4 sm:$0xff]  }
 0x33d   :  { %4133 = vmatprep.subr.bf16.mxu1 %v8231_v13  ;;  %v8898_v13 = vadd.f32 %v8897_v14, %v8896_v23  ;;  %v8265_v14 = vcombine.high %v3746_v7, %v3750_v27 }
 0x33e   :  { %4780 = vmatpush1.bf16.msra.mxu0 %v12361_v5 }
 0x33f   :  { %4781 = vmatprep.subr.bf16.mxu0 %v12367_v12  ;;  %v3480_v10 = vadd.f32 %v8898_v13, %v3410_v25  ;;  %v3714_v13 = vld [vmem:[%s13799_s4 + $0x88] sm:$0xff]  ;;  %v8240_v25 = vcombine.low %v3722_v9, %v3726_v55  ;;  %v3731_v55 = vld [vmem:[%s13799_s4 + $0x110] sm:$0xff] }
 0x340   :  { %4134 = vmatpush1.bf16.msra.mxu1 %v8230_v58 }
 0x341   :  { %4135 = vmatprep.subr.bf16.mxu1 %v8223_v15 }
 0x342   :  { %4782 = vmatpush1.bf16.msra.mxu0 %v12373_v1 }
 0x344   :  { %4136 = vmatpush1.bf16.msra.mxu1 %v8222_v26  ;;  %v12379_v26 = vld [vmem:[%s13801_s6 + $0x24] ss:$16 sps:$4 sm:$0xff]  }
 0x345   :  { %4137 = vmatprep.subr.bf16.mxu1 %v8215_v11  ;;  %4783 = vmatprep.subr.bf16.mxu0 %v12379_v26 }
 0x348   :  { %4138 = vmatpush1.bf16.msra.mxu1 %v8214_v21  ;;  %v12385_v21 = vld [vmem:[%s13801_s6 + $0x20] ss:$16 sps:$4 sm:$0xff]  }
 0x349   :  { %4164 = vmatprep.subr.bf16.mxu1 %v8273_v16  ;;  %4784 = vmatpush1.bf16.msra.mxu0 %v12385_v21 }
 0x34a   :  { %4785 = vmatprep.subr.bf16.mxu0 %v12391_v22 }
 0x34d   :  { %4786 = vmatpush1.bf16.msra.mxu0 %v12403_v50 }
 0x34e   :  { %4911 = vmatprep.subr.bf16.mxu0 %v12308_v18 }
 0x36b   :  { %v8931_v19 = vpop.f32.mrf.mxu1 }
 0x36d   :  { %v8932_v0 = vpop.f32.mrf.mxu1 }
 0x36e   :  { %v8933_v15 = vadd.f32 %v8932_v0, %v8931_v19  ;;  %v8264_v19 = vcombine.low %v3746_v7, %v3750_v27  ;;  %v3734_v0 = vld [vmem:[%s13799_s4 + $0x128] sm:$0xff]  ;;  %v3755_v27 = vld [vmem:[%s13799_s4 + $0x1d0] sm:$0xff] }
 0x36f   :  { %v8249_v17 = vcombine.high %v3730_v43, %v3734_v0 }
 0x370   :  { %v3550_v16 = vadd.f32 %v8933_v15, %v3480_v10  ;;  %v3706_v10 = vld [vmem:[%s13799_s4 + $0x48] sm:$0xff] }
 0x3ab   :  { %v8966_v2 = vpop.f32.mrf.mxu1 }
 0x3ad   :  { %v8967_v58 = vpop.f32.mrf.mxu1 }
 0x3ae   :  { %v8968_v51 = vadd.f32 %v8967_v58, %v8966_v2  ;;  %v8256_v2 = vcombine.low %v3738_v62, %v3742_v4  ;;  %v3718_v58 = vld [vmem:[%s13799_s4 + $0xa8] sm:$0xff]  ;;  %v3747_v4 = vld [vmem:[%s13799_s4 + $0x190] sm:$0xff] }
 0x3af   :  { %v8233_v15 = vcombine.high %v3714_v13, %v3718_v58 }
 0x3b0   :  { %v3620_v30 = vadd.f32 %v8968_v51, %v3550_v16  ;;  %v3710_v51 = vld [vmem:[%s13799_s4 + $0x68] sm:$0xff] }
 0x3b1   :  { %v8225_v16 = vcombine.high %v3706_v10, %v3710_v51 }
 0x3eb   :  { %v9001_v11 = vpop.f32.mrf.mxu1 }
 0x3ed   :  { %v9002_v39 = vpop.f32.mrf.mxu1 }
 0x3ee   :  { %v9003_v3 = vadd.f32 %v9002_v39, %v9001_v11  ;;  %v8232_v11 = vcombine.low %v3714_v13, %v3718_v58  ;;  %v3698_v39 = vld [vmem:[%s13799_s4 + $0x8] sm:$0xff]  ;;  %v3723_v58 = vld [vmem:[%s13799_s4 + $0xd0] sm:$0xff] }
 0x3f0   :  { %v3690_v59 = vadd.f32 %v9003_v3, %v3620_v30  ;;  %v3702_v30 = vld [vmem:[%s13799_s4 + $0x28] sm:$0xff]  ;;  %v8224_v3 = vcombine.low %v3706_v10, %v3710_v51  ;;  %v3715_v51 = vld [vmem:[%s13799_s4 + $0x90] sm:$0xff] }
 0x3f1   :  { %v8217_v7 = vcombine.high %v3698_v39, %v3702_v30 }
 0x3f2   :  { %v12407_v23 = vpack.c.bf16 %v3690_v59, %v3690_v59  ;;  %v3759_v59 = vld [vmem:[%s13799_s4 + $0x1f0] sm:$0xff] }
 0x3f3   :  { %v8275_v62 = vcombine.high %v3755_v27, %v3759_v59 }
 0x3f4   :  { %4156 = vmatmul.mubr.bf16.vlgmr.msra.gmra.mxu1 %v12407_v23 }
 0x3f5   :  { %4165 = vmatpush1.bf16.msra.mxu1 %v8272_v47  ;;  %4196 = vmatprep.mubr.bf16.mxu1 %v13920_v63  ;;  %v8248_v47 = vcombine.low %v3730_v43, %v3734_v0  ;;  %v3739_v0 = vld [vmem:[%s13799_s4 + $0x150] sm:$0xff] }
 0x3f6   :  { %4166 = vmatprep.subr.bf16.mxu1 %v8265_v14  ;;  %v8216_v14 = vcombine.low %v3698_v39, %v3702_v30  ;;  %v3707_v30 = vld [vmem:[%s13799_s4 + $0x50] sm:$0xff] }
 0x3f9   :  { %4167 = vmatpush1.bf16.msra.mxu1 %v8264_v19  ;;  %v3751_v19 = vld [vmem:[%s13799_s4 + $0x1b0] sm:$0xff] }
 0x3fa   :  { %4168 = vmatprep.subr.bf16.mxu1 %v8257_v31  ;;  %v8274_v31 = vcombine.low %v3755_v27, %v3759_v59  ;;  %v8267_v43 = vcombine.high %v3747_v4, %v3751_v19  ;;  %v3699_v59 = vld [vmem:[%s13799_s4 + $0x10] sm:$0xff] }
 0x3fd   :  { %4169 = vmatpush1.bf16.msra.mxu1 %v8256_v2  ;;  %v3743_v2 = vld [vmem:[%s13799_s4 + $0x170] sm:$0xff] }
 0x3fe   :  { %4170 = vmatprep.subr.bf16.mxu1 %v8249_v17  ;;  %v8266_v17 = vcombine.low %v3747_v4, %v3751_v19  ;;  %v8259_v9 = vcombine.high %v3739_v0, %v3743_v2  ;;  %v3756_v19 = vld [vmem:[%s13799_s4 + $0x1d8] sm:$0xff] }
 0x401   :  { %4171 = vmatpush1.bf16.msra.mxu1 %v8248_v47  ;;  %v3735_v47 = vld [vmem:[%s13799_s4 + $0x130] sm:$0xff] }
 0x402   :  { %4172 = vmatprep.subr.bf16.mxu1 %v8241_v42  ;;  %v8258_v42 = vcombine.low %v3739_v0, %v3743_v2  ;;  %v8251_v13 = vcombine.high %v3731_v55, %v3735_v47  ;;  %v3748_v2 = vld [vmem:[%s13799_s4 + $0x198] sm:$0xff] }
 0x405   :  { %4173 = vmatpush1.bf16.msra.mxu1 %v8240_v25  ;;  %v3727_v25 = vld [vmem:[%s13799_s4 + $0xf0] sm:$0xff] }
 0x406   :  { %4174 = vmatprep.subr.bf16.mxu1 %v8233_v15  ;;  %v8250_v15 = vcombine.low %v3731_v55, %v3735_v47  ;;  %v8243_v10 = vcombine.high %v3723_v58, %v3727_v25  ;;  %v3740_v47 = vld [vmem:[%s13799_s4 + $0x158] sm:$0xff] }
 0x409   :  { %4175 = vmatpush1.bf16.msra.mxu1 %v8232_v11  ;;  %v3719_v11 = vld [vmem:[%s13799_s4 + $0xb0] sm:$0xff] }
 0x40a   :  { %4176 = vmatprep.subr.bf16.mxu1 %v8225_v16  ;;  %v8242_v16 = vcombine.low %v3723_v58, %v3727_v25  ;;  %v8235_v39 = vcombine.high %v3715_v51, %v3719_v11  ;;  %v3732_v25 = vld [vmem:[%s13799_s4 + $0x118] sm:$0xff] }
 0x40d   :  { %4177 = vmatpush1.bf16.msra.mxu1 %v8224_v3  ;;  %v3711_v3 = vld [vmem:[%s13799_s4 + $0x70] sm:$0xff] }
 0x40e   :  { %4178 = vmatprep.subr.bf16.mxu1 %v8217_v7  ;;  %v8234_v7 = vcombine.low %v3715_v51, %v3719_v11  ;;  %v8227_v27 = vcombine.high %v3707_v30, %v3711_v3  ;;  %v3724_v11 = vld [vmem:[%s13799_s4 + $0xd8] sm:$0xff] }
 0x411   :  { %4179 = vmatpush1.bf16.msra.mxu1 %v8216_v14  ;;  %v3703_v14 = vld [vmem:[%s13799_s4 + $0x30] sm:$0xff] }
 0x412   :  { %4205 = vmatprep.subr.bf16.mxu1 %v8275_v62  ;;  %v8226_v62 = vcombine.low %v3707_v30, %v3711_v3  ;;  %v8219_v4 = vcombine.high %v3699_v59, %v3703_v14  ;;  %v3716_v3 = vld [vmem:[%s13799_s4 + $0x98] sm:$0xff] }
 0x414   :  { %4197 = vmatmul.mubr.bf16.vlgmr.msra.gmra.mxu1 %v12407_v23 }
 0x415   :  { %4206 = vmatpush1.bf16.msra.mxu1 %v8274_v31  ;;  %4237 = vmatprep.mubr.bf16.mxu1 %v13920_v63  ;;  %v3760_v31 = vld [vmem:[%s13799_s4 + $0x1f8] sm:$0xff] }
 0x416   :  { %4207 = vmatprep.subr.bf16.mxu1 %v8267_v43  ;;  %v8218_v43 = vcombine.low %v3699_v59, %v3703_v14  ;;  %v8277_v0 = vcombine.high %v3756_v19, %v3760_v31  ;;  %v3708_v14 = vld [vmem:[%s13799_s4 + $0x58] sm:$0xff] }
 0x419   :  { %4208 = vmatpush1.bf16.msra.mxu1 %v8266_v17  ;;  %v3752_v17 = vld [vmem:[%s13799_s4 + $0x1b8] sm:$0xff] }
 0x41a   :  { %4209 = vmatprep.subr.bf16.mxu1 %v8259_v9  ;;  %v8276_v9 = vcombine.low %v3756_v19, %v3760_v31  ;;  %v8269_v55 = vcombine.high %v3748_v2, %v3752_v17  ;;  %v3700_v31 = vld [vmem:[%s13799_s4 + $0x18] sm:$0xff] }
 0x41d   :  { %4210 = vmatpush1.bf16.msra.mxu1 %v8258_v42  ;;  %v3744_v42 = vld [vmem:[%s13799_s4 + $0x178] sm:$0xff] }
 0x41e   :  { %4211 = vmatprep.subr.bf16.mxu1 %v8251_v13  ;;  %v8268_v13 = vcombine.low %v3748_v2, %v3752_v17  ;;  %v8261_v58 = vcombine.high %v3740_v47, %v3744_v42 }
 0x421   :  { %4212 = vmatpush1.bf16.msra.mxu1 %v8250_v15  ;;  %v3736_v15 = vld [vmem:[%s13799_s4 + $0x138] sm:$0xff] }
 0x422   :  { %4213 = vmatprep.subr.bf16.mxu1 %v8243_v10  ;;  %v8260_v10 = vcombine.low %v3740_v47, %v3744_v42  ;;  %v8253_v51 = vcombine.high %v3732_v25, %v3736_v15  ;;  %v12590_v47 = vld [vmem:[%s13801_s6 + $0xc8] ss:$16 sps:$4 sm:$0xff]   ;;  %v12597_v42 = vld [vmem:[%s13801_s6 + $0xac] ss:$16 sps:$4 sm:$0xff]  }
 0x425   :  { %4214 = vmatpush1.bf16.msra.mxu1 %v8242_v16  ;;  %v3728_v16 = vld [vmem:[%s13799_s4 + $0xf8] sm:$0xff] }
 0x426   :  { %4215 = vmatprep.subr.bf16.mxu1 %v8235_v39  ;;  %v8252_v39 = vcombine.low %v3732_v25, %v3736_v15  ;;  %v8245_v30 = vcombine.high %v3724_v11, %v3728_v16  ;;  %v12615_v25 = vld [vmem:[%s13801_s6 + $0x88] ss:$16 sps:$4 sm:$0xff]   ;;  %v12621_v15 = vld [vmem:[%s13801_s6 + $0x6c] ss:$16 sps:$4 sm:$0xff]  }
 0x429   :  { %4216 = vmatpush1.bf16.msra.mxu1 %v8234_v7  ;;  %v3720_v7 = vld [vmem:[%s13799_s4 + $0xb8] sm:$0xff] }
 0x42a   :  { %4217 = vmatprep.subr.bf16.mxu1 %v8227_v27  ;;  %v8244_v27 = vcombine.low %v3724_v11, %v3728_v16  ;;  %v8237_v59 = vcombine.high %v3716_v3, %v3720_v7  ;;  %v12639_v11 = vld [vmem:[%s13801_s6 + $0x48] ss:$16 sps:$4 sm:$0xff]   ;;  %v12645_v16 = vld [vmem:[%s13801_s6 + $0x2c] ss:$16 sps:$4 sm:$0xff]  }
 0x42d   :  { %4218 = vmatpush1.bf16.msra.mxu1 %v8226_v62  ;;  %v3712_v62 = vld [vmem:[%s13799_s4 + $0x78] sm:$0xff] }
 0x42e   :  { %4219 = vmatprep.subr.bf16.mxu1 %v8219_v4  ;;  %v8236_v4 = vcombine.low %v3716_v3, %v3720_v7  ;;  %v8229_v19 = vcombine.high %v3708_v14, %v3712_v62  ;;  %v12663_v3 = vld [vmem:[%s13801_s6 + $0x8] ss:$16 sps:$4 sm:$0xff]   ;;  %v13919_v7 = vlaneseq }
 0x431   :  { %4220 = vmatpush1.bf16.msra.mxu1 %v8218_v43  ;;  %v3704_v43 = vld [vmem:[%s13799_s4 + $0x38] sm:$0xff] }
 0x432   :  { %4246 = vmatprep.subr.bf16.mxu1 %v8277_v0  ;;  %v8228_v0 = vcombine.low %v3708_v14, %v3712_v62  ;;  %v8221_v2 = vcombine.high %v3700_v31, %v3704_v43  ;;  %v8220_v17 = vcombine.low %v3700_v31, %v3704_v43  ;;  %v3761_v14 = vld [vmem:[%s13800_s5] sm:$0xff] }
 0x434   :  { %4238 = vmatmul.mubr.bf16.vlgmr.msra.gmra.mxu1 %v12407_v23 }
 0x435   :  { %4247 = vmatpush1.bf16.msra.mxu1 %v8276_v9  ;;  %4278 = vmatprep.mubr.bf16.mxu1 %v13920_v63  ;;  %v12577_v9 = vld [vmem:[%s13801_s6 + $0xe8] ss:$16 sps:$4 sm:$0xff]  }
 0x436   :  { %4248 = vmatprep.subr.bf16.mxu1 %v8269_v55  ;;  %v12583_v55 = vld [vmem:[%s13801_s6 + $0xcc] ss:$16 sps:$4 sm:$0xff]  }
 0x439   :  { %4249 = vmatpush1.bf16.msra.mxu1 %v8268_v13  ;;  %v12603_v13 = vld [vmem:[%s13801_s6 + $0xa8] ss:$16 sps:$4 sm:$0xff]  }
 0x43a   :  { %4250 = vmatprep.subr.bf16.mxu1 %v8261_v58  ;;  %v12609_v58 = vld [vmem:[%s13801_s6 + $0x8c] ss:$16 sps:$4 sm:$0xff]  }
 0x43d   :  { %4251 = vmatpush1.bf16.msra.mxu1 %v8260_v10  ;;  %v12627_v10 = vld [vmem:[%s13801_s6 + $0x68] ss:$16 sps:$4 sm:$0xff]  }
 0x43e   :  { %4252 = vmatprep.subr.bf16.mxu1 %v8253_v51  ;;  %v12633_v51 = vld [vmem:[%s13801_s6 + $0x4c] ss:$16 sps:$4 sm:$0xff]  }
 0x441   :  { %4253 = vmatpush1.bf16.msra.mxu1 %v8252_v39  ;;  %v12651_v39 = vld [vmem:[%s13801_s6 + $0x28] ss:$16 sps:$4 sm:$0xff]  }
 0x442   :  { %4254 = vmatprep.subr.bf16.mxu1 %v8245_v30  ;;  %v12657_v30 = vld [vmem:[%s13801_s6 + $0xc] ss:$16 sps:$4 sm:$0xff]  }
 0x445   :  { %4255 = vmatpush1.bf16.msra.mxu1 %v8244_v27  ;;  %v12681_v27 = vshrl.u32 %v13919_v7, 7 }
 0x446   :  { %4256 = vmatprep.subr.bf16.mxu1 %v8237_v59 }
 0x447   :  { %14063 = vst [vmem:[#allocation137_spill] sm:$0xff] %v12681_v27  ;;  %v12686_v59 = vsub.s32 0, %v12681_v27  ;;  %v12694_v62 = vsub.s32 1, %v12681_v27  ;;  %v13930_v29 = vsub.s32 3, %v12681_v27 }
 0x449   :  { %4257 = vmatpush1.bf16.msra.mxu1 %v8236_v4  ;;  %14064 = vst [vmem:[#allocation138_spill] sm:$0xff] %v12686_v59  ;;  %14065 = vst [vmem:[#allocation139_spill] sm:$0xff] %v12694_v62  ;;  %v3766_v4 = vrot.slane %v3761_v14, %v12686_v59  ;;  %v3778_v24 = vrot.slane %v3761_v14, %v13930_v29 }
 0x44a   :  { %4258 = vmatprep.subr.bf16.mxu1 %v8229_v19  ;;  %v3770_v19 = vrot.slane %v3761_v14, %v12694_v62 }
 0x44d   :  { %4259 = vmatpush1.bf16.msra.mxu1 %v8228_v0 }
 0x44e   :  { %4260 = vmatprep.subr.bf16.mxu1 %v8221_v2 }
 0x451   :  { %4261 = vmatpush1.bf16.msra.mxu1 %v8220_v17 }
 0x452   :  { %4491 = vmatprep.subr.bf16.mxu1 %v12308_v18 }
 0x454   :  { %4279 = vmatmul.mubr.bf16.vlgmr.msra.gmra.mxu1 %v12407_v23  ;;  %v12571_v23 = vld [vmem:[%s13801_s6 + $0xec] ss:$16 sps:$4 sm:$0xff]  }
 0x455   :  { %4492 = vmatpush1.bf16.msra.mxu1 %v12313_v6  ;;  %4523 = vmatprep.mubr.bf16.mxu1 %v13920_v63 }
 0x456   :  { %4493 = vmatprep.subr.bf16.mxu1 %v12319_v20 }
 0x459   :  { %4494 = vmatpush1.bf16.msra.mxu1 %v12325_v8 }
 0x45a   :  { %4495 = vmatprep.subr.bf16.mxu1 %v12331_v38 }
 0x45d   :  { %4496 = vmatpush1.bf16.msra.mxu1 %v12337_v46 }
 0x45e   :  { %4497 = vmatprep.subr.bf16.mxu1 %v12343_v35 }
 0x461   :  { %4498 = vmatpush1.bf16.msra.mxu1 %v12349_v54 }
 0x462   :  { %4499 = vmatprep.subr.bf16.mxu1 %v12355_v34 }
 0x465   :  { %4500 = vmatpush1.bf16.msra.mxu1 %v12361_v5 }
 0x466   :  { %4501 = vmatprep.subr.bf16.mxu1 %v12367_v12 }
 0x469   :  { %4502 = vmatpush1.bf16.msra.mxu1 %v12373_v1 }
 0x46a   :  { %4503 = vmatprep.subr.bf16.mxu1 %v12379_v26 }
 0x46d   :  { %4504 = vmatpush1.bf16.msra.mxu1 %v12385_v21 }
 0x46e   :  { %4505 = vmatprep.subr.bf16.mxu1 %v12391_v22 }
 0x471   :  { %4506 = vmatpush1.bf16.msra.mxu1 %v12403_v50 }
 0x472   :  { %4532 = vmatprep.subr.bf16.mxu1 %v12571_v23 }
 0x474   :  { %4524 = vmatmul.mubr.bf16.vlgmr.msra.gmra.mxu1 %v13920_v63 }
 0x475   :  { %4533 = vmatpush1.bf16.msra.mxu1 %v12577_v9  ;;  %4564 = vmatprep.mubr.bf16.mxu1 %v13920_v63 }
 0x476   :  { %4534 = vmatprep.subr.bf16.mxu1 %v12583_v55 }
 0x479   :  { %4535 = vmatpush1.bf16.msra.mxu1 %v12590_v47 }
 0x47a   :  { %4536 = vmatprep.subr.bf16.mxu1 %v12597_v42 }
 0x47d   :  { %4537 = vmatpush1.bf16.msra.mxu1 %v12603_v13 }
 0x47e   :  { %4538 = vmatprep.subr.bf16.mxu1 %v12609_v58 }
 0x481   :  { %4539 = vmatpush1.bf16.msra.mxu1 %v12615_v25 }
 0x482   :  { %4540 = vmatprep.subr.bf16.mxu1 %v12621_v15 }
 0x485   :  { %4541 = vmatpush1.bf16.msra.mxu1 %v12627_v10 }
 0x486   :  { %4542 = vmatprep.subr.bf16.mxu1 %v12633_v51 }
 0x489   :  { %4543 = vmatpush1.bf16.msra.mxu1 %v12639_v11 }
 0x48a   :  { %4544 = vmatprep.subr.bf16.mxu1 %v12645_v16 }
 0x48d   :  { %4545 = vmatpush1.bf16.msra.mxu1 %v12651_v39 }
 0x48e   :  { %4546 = vmatprep.subr.bf16.mxu1 %v12657_v30 }
 0x491   :  { %4547 = vmatpush1.bf16.msra.mxu1 %v12663_v3 }
 0x492   :  { %4631 = vmatprep.subr.bf16.mxu1 %v12308_v18 }
 0x494   :  { %4565 = vmatmul.mubr.bf16.vlgmr.msra.gmra.mxu1 %v13920_v63 }
 0x495   :  { %4632 = vmatpush1.bf16.msra.mxu1 %v12313_v6  ;;  %4663 = vmatprep.mubr.bf16.mxu1 %v13920_v63  ;;  %v13931_v63 = vsub.s32 2, %v12681_v27 }
 0x496   :  { %4633 = vmatprep.subr.bf16.mxu1 %v12319_v20 }
 0x497   :  { %v3774_v59 = vrot.slane %v3761_v14, %v13931_v63 }
 0x499   :  { %4634 = vmatpush1.bf16.msra.mxu1 %v12325_v8 }
 0x49a   :  { %4635 = vmatprep.subr.bf16.mxu1 %v12331_v38 }
 0x49d   :  { %4636 = vmatpush1.bf16.msra.mxu1 %v12337_v46 }
 0x49e   :  { %4637 = vmatprep.subr.bf16.mxu1 %v12343_v35 }
 0x4a1   :  { %4638 = vmatpush1.bf16.msra.mxu1 %v12349_v54 }
 0x4a2   :  { %4639 = vmatprep.subr.bf16.mxu1 %v12355_v34 }
 0x4a5   :  { %4640 = vmatpush1.bf16.msra.mxu1 %v12361_v5 }
 0x4a6   :  { %4641 = vmatprep.subr.bf16.mxu1 %v12367_v12 }
 0x4a9   :  { %4642 = vmatpush1.bf16.msra.mxu1 %v12373_v1 }
 0x4aa   :  { %4643 = vmatprep.subr.bf16.mxu1 %v12379_v26 }
 0x4ad   :  { %4644 = vmatpush1.bf16.msra.mxu1 %v12385_v21 }
 0x4ae   :  { %4645 = vmatprep.subr.bf16.mxu1 %v12391_v22 }
 0x4b1   :  { %4646 = vmatpush1.bf16.msra.mxu1 %v12403_v50 }
 0x4b2   :  { %4672 = vmatprep.subr.bf16.mxu1 %v12571_v23 }
 0x4b4   :  { %v4157_v31 = vpop.f32.mrf.mxu1 }
 0x4b5   :  { %v4158_v43 = vadd.f32 %v4157_v31, %v3766_v4 }
 0x4b6   :  { %v4159_v0 = vpop.f32.mrf.mxu1 }
 0x4b7   :  { %4287 = vst [vmem:[#allocation2] sm:$0xff] %v4158_v43  ;;  %v4160_v2 = vadd.f32 %v4159_v0, %v3770_v19  ;;  %v13932_v43 = vsub.s32 5, %v12681_v27 }
 0x4b8   :  { %v4161_v17 = vpop.f32.mrf.mxu1 }
 0x4b9   :  { %4288 = vst [vmem:[#allocation2 + $0x8] sm:$0xff] %v4160_v2  ;;  %v3786_v2 = vrot.slane %v3761_v14, %v13932_v43 }
 0x4ba   :  { %v4162_v7 = vpop.f32.mrf.mxu1 }
 0x4bb   :  { %v13933_v7 = vsub.s32 4, %v12681_v27 }
 0x4bd   :  { %v3782_v0 = vrot.slane %v3761_v14, %v13933_v7 }
 0x4d4   :  { %v4198_v28 = vpop.f32.mrf.mxu1 }
 0x4d5   :  { %v4199_v62 = vadd.f32 %v4198_v28, %v3774_v59 }
 0x4d6   :  { %v4200_v33 = vpop.f32.mrf.mxu1 }
 0x4d7   :  { %4289 = vst [vmem:[#allocation2 + $0x10] sm:$0xff] %v4199_v62  ;;  %v4201_v4 = vadd.f32 %v4200_v33, %v3778_v24  ;;  %v13937_v33 = vsub.s32 6, %v12681_v27  ;;  %v13938_v62 = vsub.s32 7, %v12681_v27 }
 0x4d8   :  { %v4202_v31 = vpop.f32.mrf.mxu1 }
 0x4d9   :  { %4290 = vst [vmem:[#allocation2 + $0x18] sm:$0xff] %v4201_v4  ;;  %v3790_v4 = vrot.slane %v3761_v14, %v13937_v33  ;;  %v3794_v31 = vrot.slane %v3761_v14, %v13938_v62 }
 0x4da   :  { %v4203_v19 = vpop.f32.mrf.mxu1 }
 0x4f4   :  { %v4239_v17 = vpop.f32.mrf.mxu1 }
 0x4f5   :  { %v4240_v29 = vadd.f32 %v4239_v17, %v3782_v0 }
 0x4f6   :  { %v4241_v63 = vpop.f32.mrf.mxu1 }
 0x4f7   :  { %4291 = vst [vmem:[#allocation2 + $0x20] sm:$0xff] %v4240_v29  ;;  %v4242_v28 = vadd.f32 %v4241_v63, %v3786_v2 }
 0x4f8   :  { %v4243_v59 = vpop.f32.mrf.mxu1 }
 0x4f9   :  { %4292 = vst [vmem:[#allocation2 + $0x28] sm:$0xff] %v4242_v28 }
 0x4fa   :  { %v4244_v24 = vpop.f32.mrf.mxu1 }
 0x4fb   :  { %v9649_v24 = vmov 1966171168  }
 0x4fc   :  { %v4580_v37 = vunpack.c.l.s4 %v9649_v24 }
 0x4fe   :  { %v4581_v32 = vunpack.c.0.s8 %v4580_v37 }
 0x500   :  { %v12719_v33 = vsub.s32 %v4581_v32, %v12681_v27 }
 0x514   :  { %v4280_v19 = vpop.f32.mrf.mxu1 }
 0x515   :  { %v4281_v43 = vadd.f32 %v4280_v19, %v3790_v4 }
 0x516   :  { %v4282_v7 = vpop.f32.mrf.mxu1 }
 0x517   :  { %4293 = vst [vmem:[#allocation2 + $0x30] sm:$0xff] %v4281_v43  ;;  %v4283_v0 = vadd.f32 %v4282_v7, %v3794_v31 }
 0x518   :  { %v4284_v29 = vpop.f32.mrf.mxu1 }
 0x519   :  { %4294 = vst [vmem:[#allocation2 + $0x38] sm:$0xff] %v4283_v0 }
 0x51a   :  { %v4285_v63 = vpop.f32.mrf.mxu1 }
 0x51b   :  { %v4327_v63 = vld [vmem:[#allocation2] ss:$8 sm:$0xf] }
 0x520   :  { %v4329_v31 = vld [vmem:[#allocation2 + $0x27] ss:$8 sm:$0xf] }
 0x534   :  { %v4525_v2 = vpop.f32.mrf.mxu1 }
 0x536   :  { %v4527_v17 = vpop.f32.mrf.mxu1 }
 0x537   :  { %v4577_v14 = vcombine.low %v4525_v2, %v4527_v17 }
 0x538   :  { %v4529_v28 = vpop.f32.mrf.mxu1 }
 0x539   :  { %v4585_v7 = vrot.slane %v4577_v14, %v12719_v33  ;;  %v4330_v28 = vadd.f32 %v4329_v31, %v4327_v63 }
 0x53a   :  { %v4530_v59 = vpop.f32.mrf.mxu1 }
 0x554   :  { %v4566_v36 = vpop.f32.mrf.mxu1 }
 0x556   :  { %v4568_v62 = vpop.f32.mrf.mxu1 }
 0x557   :  { %v4578_v4 = vcombine.low %v4566_v36, %v4568_v62 }
 0x558   :  { %v4570_v19 = vpop.f32.mrf.mxu1 }
 0x559   :  { %v4592_v43 = vrot.slane %v4578_v4, %v12719_v33 }
 0x55a   :  { %v4571_v0 = vpop.f32.mrf.mxu1 }
 0x55b   :  { %v4593_v29 = vcombine.low %v4585_v7, %v4592_v43 }
 0x55d   :  { %v4600_v59 = vrot.slane %v4593_v29, %v12719_v33 }
 0x55f   :  { %v4602_v37 = vadd.f32 %v4600_v59, %v4330_v28 }
 0x561   :  { %v8310_v24 = vmul.f32 -1.442695, %v4602_v37  ;;  %v4610_v2 = vrot.slane %v4602_v37, 3 }
 0x563   :  { %9471 = vpow2.f32 %v8310_v24 }
 0x570   :  { %v9472_v32 = vpop.eup %9471 }
 0x571   :  { %v4606_v27 = vadd.f32 1.0, %v9472_v32 }
 0x573   :  { %9473 = vrcp.f32 %v4606_v27  ;;  %v14066_v27 = vmov 0  }
 0x574   :  { %9475 = vtanh.f32 %v4610_v2 }
 0x580   :  { %v9474_v36 = vpop.eup %9473 }
 0x581   :  { %v4614_v62 = vrot.slane %v9474_v36, 1  ;;  %v9476_v17 = vpop.eup %9475  ;;  %v4620_v7 = vrot.slane %v9474_v36, 2 }
 0x582   :  { %v4617_v4 = vmul.f32 %v9476_v17, %v9474_v36 }
 0x583   :  { %v4616_v14 = vmul.f32 0.0, %v4614_v62 }
 0x585   :  { %v12724_v19 = vadd.f32 %v4617_v4, %v4616_v14  ;;  %v4628_v14 = vld [vmem:[#allocation2 + $0x26] ss:$8 sm:$0xf] }
 0x587   :  { %9477 = vtanh.f32 %v12724_v19 }
 0x594   :  { %v9478_v43 = vpop.eup %9477 }
 0x595   :  { %v4622_v31 = vmul.f32 %v9478_v43, %v4620_v7  ;;  %v4626_v43 = vld [vmem:[#allocation2 + $0x1] ss:$8 sm:$0xf] }
 0x597   :  { %4623 = vst [vmem:[#allocation3] sm:$0x1] %v4622_v31  ;;  %4624 = vst [vmem:[#allocation4 + $0x7] sm:$0x1] %v4622_v31  ;;  %v4630_v0 = vpack.c.bf16 %v4622_v31, %v4622_v31  ;;  %v4629_v31 = vadd.f32 %v4628_v14, %v4626_v43 }
 0x599   :  { %4664 = vmatmul.mubr.bf16.vlgmr.msra.gmra.mxu1 %v4630_v0 }
 0x59a   :  { %4673 = vmatpush1.bf16.msra.mxu1 %v12577_v9  ;;  %4704 = vmatprep.mubr.bf16.mxu1 %v14066_v27 }
 0x59b   :  { %4674 = vmatprep.subr.bf16.mxu1 %v12583_v55 }
 0x59e   :  { %4675 = vmatpush1.bf16.msra.mxu1 %v12590_v47 }
 0x59f   :  { %4676 = vmatprep.subr.bf16.mxu1 %v12597_v42 }
 0x5a2   :  { %4677 = vmatpush1.bf16.msra.mxu1 %v12603_v13 }
 0x5a3   :  { %4678 = vmatprep.subr.bf16.mxu1 %v12609_v58 }
 0x5a6   :  { %4679 = vmatpush1.bf16.msra.mxu1 %v12615_v25 }
 0x5a7   :  { %4680 = vmatprep.subr.bf16.mxu1 %v12621_v15 }
 0x5aa   :  { %4681 = vmatpush1.bf16.msra.mxu1 %v12627_v10 }
 0x5ab   :  { %4682 = vmatprep.subr.bf16.mxu1 %v12633_v51 }
 0x5ae   :  { %4683 = vmatpush1.bf16.msra.mxu1 %v12639_v11 }
 0x5af   :  { %4684 = vmatprep.subr.bf16.mxu1 %v12645_v16 }
 0x5b2   :  { %4685 = vmatpush1.bf16.msra.mxu1 %v12651_v39 }
 0x5b3   :  { %4686 = vmatprep.subr.bf16.mxu1 %v12657_v30 }
 0x5b6   :  { %4687 = vmatpush1.bf16.msra.mxu1 %v12663_v3 }
 0x5b7   :  { %4812 = vmatprep.subr.bf16.mxu1 %v12571_v23 }
 0x5b9   :  { %4705 = vmatmul.mubr.bf16.vlgmr.msra.gmra.mxu1 %v4630_v0 }
 0x5ba   :  { %4813 = vmatpush1.bf16.msra.mxu1 %v12577_v9  ;;  %4844 = vmatprep.mubr.bf16.mxu1 %v14066_v27 }
 0x5bb   :  { %4814 = vmatprep.subr.bf16.mxu1 %v12583_v55 }
 0x5be   :  { %4815 = vmatpush1.bf16.msra.mxu1 %v12590_v47 }
 0x5bf   :  { %4816 = vmatprep.subr.bf16.mxu1 %v12597_v42 }
 0x5c2   :  { %4817 = vmatpush1.bf16.msra.mxu1 %v12603_v13 }
 0x5c3   :  { %4818 = vmatprep.subr.bf16.mxu1 %v12609_v58 }
 0x5c6   :  { %4819 = vmatpush1.bf16.msra.mxu1 %v12615_v25 }
 0x5c7   :  { %4820 = vmatprep.subr.bf16.mxu1 %v12621_v15 }
 0x5ca   :  { %4821 = vmatpush1.bf16.msra.mxu1 %v12627_v10 }
 0x5cb   :  { %4822 = vmatprep.subr.bf16.mxu1 %v12633_v51 }
 0x5ce   :  { %4823 = vmatpush1.bf16.msra.mxu1 %v12639_v11 }
 0x5cf   :  { %4824 = vmatprep.subr.bf16.mxu1 %v12645_v16 }
 0x5d2   :  { %4825 = vmatpush1.bf16.msra.mxu1 %v12651_v39 }
 0x5d3   :  { %4826 = vmatprep.subr.bf16.mxu1 %v12657_v30 }
 0x5d6   :  { %4827 = vmatpush1.bf16.msra.mxu1 %v12663_v3 }
 0x5d7   :  { %4952 = vmatprep.subr.bf16.mxu1 %v12571_v23 }
 0x659   :  { %v4665_v29 = vpop.f32.mrf.mxu1 }
 0x65b   :  { %v4667_v63 = vpop.f32.mrf.mxu1 }
 0x65c   :  { %v4717_v24 = vcombine.low %v4665_v29, %v4667_v63 }
 0x65d   :  { %v4669_v28 = vpop.f32.mrf.mxu1 }
 0x65e   :  { %v4725_v62 = vrot.slane %v4717_v24, %v12719_v33 }
 0x65f   :  { %v4670_v59 = vpop.f32.mrf.mxu1 }
 0x679   :  { %v4706_v37 = vpop.f32.mrf.mxu1 }
 0x67b   :  { %v4708_v32 = vpop.f32.mrf.mxu1 }
 0x67c   :  { %v4718_v2 = vcombine.low %v4706_v37, %v4708_v32 }
 0x67d   :  { %v4710_v36 = vpop.f32.mrf.mxu1 }
 0x67e   :  { %v4732_v17 = vrot.slane %v4718_v2, %v12719_v33 }
 0x67f   :  { %v4711_v4 = vpop.f32.mrf.mxu1 }
 0x680   :  { %v4733_v7 = vcombine.low %v4725_v62, %v4732_v17 }
 0x682   :  { %v4740_v0 = vrot.slane %v4733_v7, %v12719_v33  ;;  %v4768_v7 = vld [vmem:[#allocation2 + $0x25] ss:$8 sm:$0xf] }
 0x684   :  { %v4742_v41 = vadd.f32 %v4740_v0, %v4629_v31 }
 0x686   :  { %v8311_v45 = vmul.f32 -1.442695, %v4742_v41  ;;  %v4750_v29 = vrot.slane %v4742_v41, 3 }
 0x688   :  { %9479 = vpow2.f32 %v8311_v45 }
 0x695   :  { %v9480_v28 = vpop.eup %9479 }
 0x696   :  { %v4746_v59 = vadd.f32 1.0, %v9480_v28  ;;  %v4766_v28 = vld [vmem:[#allocation2 + $0x2] ss:$8 sm:$0xf] }
 0x698   :  { %9481 = vrcp.f32 %v4746_v59 }
 0x699   :  { %9483 = vtanh.f32 %v4750_v29 }
 0x6a5   :  { %v9482_v63 = vpop.eup %9481 }
 0x6a6   :  { %v4754_v37 = vrot.slane %v9482_v63, 1  ;;  %v9484_v24 = vpop.eup %9483  ;;  %v4760_v62 = vrot.slane %v9482_v63, 2 }
 0x6a7   :  { %v4757_v2 = vmul.f32 %v9484_v24, %v9482_v63 }
 0x6a8   :  { %v4756_v32 = vmul.f32 %v4754_v37, %v12724_v19 }
 0x6aa   :  { %v12765_v36 = vadd.f32 %v4757_v2, %v4756_v32 }
 0x6ac   :  { %9485 = vtanh.f32 %v12765_v36 }
 0x6b9   :  { %v9486_v17 = vpop.eup %9485 }
 0x6ba   :  { %v4762_v14 = vmul.f32 %v9486_v17, %v4760_v62 }
 0x6bc   :  { %4763 = vst [vmem:[#allocation3 + $0x1] sm:$0x1] %v4762_v14  ;;  %4764 = vst [vmem:[#allocation4 + $0x6] sm:$0x1] %v4762_v14  ;;  %v4770_v45 = vpack.c.bf16 %v4762_v14, %v4762_v14 }
 0x6be   :  { %4804 = vmatmul.mubr.bf16.vlgmr.msra.gmra.mxu0 %v4770_v45  ;;  %4845 = vmatmul.mubr.bf16.vlgmr.msra.gmra.mxu1 %v4770_v45 }
 0x6bf   :  { %4912 = vmatpush1.bf16.msra.mxu0 %v12313_v6  ;;  %4953 = vmatpush1.bf16.msra.mxu1 %v12577_v9 }
 0x6c0   :  { %4913 = vmatprep.subr.bf16.mxu0 %v12319_v20  ;;  %4954 = vmatprep.subr.bf16.mxu1 %v12583_v55 }
 0x6c1   :  { %4943 = vmatprep.mubr.bf16.mxu0 %v14066_v27  ;;  %4984 = vmatprep.mubr.bf16.mxu1 %v14066_v27 }
 0x6c3   :  { %4914 = vmatpush1.bf16.msra.mxu0 %v12325_v8  ;;  %4955 = vmatpush1.bf16.msra.mxu1 %v12590_v47 }
 0x6c4   :  { %4915 = vmatprep.subr.bf16.mxu0 %v12331_v38  ;;  %4956 = vmatprep.subr.bf16.mxu1 %v12597_v42 }
 0x6c7   :  { %4916 = vmatpush1.bf16.msra.mxu0 %v12337_v46  ;;  %4957 = vmatpush1.bf16.msra.mxu1 %v12603_v13 }
 0x6c8   :  { %4917 = vmatprep.subr.bf16.mxu0 %v12343_v35  ;;  %4958 = vmatprep.subr.bf16.mxu1 %v12609_v58 }
 0x6cb   :  { %4918 = vmatpush1.bf16.msra.mxu0 %v12349_v54  ;;  %4959 = vmatpush1.bf16.msra.mxu1 %v12615_v25 }
 0x6cc   :  { %4919 = vmatprep.subr.bf16.mxu0 %v12355_v34  ;;  %4960 = vmatprep.subr.bf16.mxu1 %v12621_v15 }
 0x6cf   :  { %4920 = vmatpush1.bf16.msra.mxu0 %v12361_v5  ;;  %4961 = vmatpush1.bf16.msra.mxu1 %v12627_v10 }
 0x6d0   :  { %4921 = vmatprep.subr.bf16.mxu0 %v12367_v12  ;;  %4962 = vmatprep.subr.bf16.mxu1 %v12633_v51 }
 0x6d3   :  { %4922 = vmatpush1.bf16.msra.mxu0 %v12373_v1  ;;  %4963 = vmatpush1.bf16.msra.mxu1 %v12639_v11 }
 0x6d4   :  { %4923 = vmatprep.subr.bf16.mxu0 %v12379_v26  ;;  %4964 = vmatprep.subr.bf16.mxu1 %v12645_v16 }
 0x6d7   :  { %4924 = vmatpush1.bf16.msra.mxu0 %v12385_v21  ;;  %4965 = vmatpush1.bf16.msra.mxu1 %v12651_v39 }
 0x6d8   :  { %4925 = vmatprep.subr.bf16.mxu0 %v12391_v22  ;;  %4966 = vmatprep.subr.bf16.mxu1 %v12657_v30 }
 0x6db   :  { %4926 = vmatpush1.bf16.msra.mxu0 %v12403_v50  ;;  %4967 = vmatpush1.bf16.msra.mxu1 %v12663_v3 }
 0x6dc   :  { %5051 = vmatprep.subr.bf16.mxu0 %v12308_v18  ;;  %5092 = vmatprep.subr.bf16.mxu1 %v12571_v23  ;;  %v4769_v18 = vadd.f32 %v4768_v7, %v4766_v28  ;;  %v12856_v7 = vld [vmem:[%s13801_s6 + $0x80] ss:$16 sps:$4 sm:$0xff]   ;;  %v4908_v28 = vld [vmem:[#allocation2 + $0x24] ss:$8 sm:$0xf] }
 0x77e   :  { %v4805_v41 = vpop.f32.mrf.mxu0  ;;  %v4846_v6 = vpop.f32.mrf.mxu1 }
 0x780   :  { %v4807_v20 = vpop.f32.mrf.mxu0  ;;  %v4848_v8 = vpop.f32.mrf.mxu1 }
 0x781   :  { %v4857_v38 = vcombine.low %v4805_v41, %v4807_v20  ;;  %v4858_v46 = vcombine.low %v4846_v6, %v4848_v8 }
 0x782   :  { %v4809_v35 = vpop.f32.mrf.mxu0  ;;  %v4850_v54 = vpop.f32.mrf.mxu1 }
 0x783   :  { %v4865_v19 = vrot.slane %v4857_v38, %v12719_v33  ;;  %v4872_v4 = vrot.slane %v4858_v46, %v12719_v33  ;;  %v12812_v46 = vld [vmem:[%s13801_s6 + $0xe0] ss:$16 sps:$4 sm:$0xff]   ;;  %v12835_v54 = vld [vmem:[%s13801_s6 + $0xa4] ss:$16 sps:$4 sm:$0xff]  }
 0x784   :  { %v4810_v43 = vpop.f32.mrf.mxu0  ;;  %v4851_v31 = vpop.f32.mrf.mxu1  ;;  %v12828_v35 = vld [vmem:[%s13801_s6 + $0xc0] ss:$16 sps:$4 sm:$0xff]  }
 0x785   :  { %v4873_v0 = vcombine.low %v4865_v19, %v4872_v4  ;;  %v12842_v19 = vld [vmem:[%s13801_s6 + $0xa0] ss:$16 sps:$4 sm:$0xff]   ;;  %v12849_v4 = vld [vmem:[%s13801_s6 + $0x84] ss:$16 sps:$4 sm:$0xff]  }
 0x787   :  { %v4880_v59 = vrot.slane %v4873_v0, %v12719_v33 }
 0x789   :  { %v4882_v29 = vadd.f32 %v4880_v59, %v4769_v18 }
 0x78b   :  { %v8312_v63 = vmul.f32 -1.442695, %v4882_v29  ;;  %v4890_v32 = vrot.slane %v4882_v29, 3 }
 0x78d   :  { %9487 = vpow2.f32 %v8312_v63  ;;  %v4906_v63 = vld [vmem:[#allocation2 + $0x3] ss:$8 sm:$0xf] }
 0x79a   :  { %v9488_v37 = vpop.eup %9487 }
 0x79b   :  { %v4886_v24 = vadd.f32 1.0, %v9488_v37  ;;  %v4909_v37 = vadd.f32 %v4908_v28, %v4906_v63  ;;  %v12951_v28 = vld [vmem:[%s13801_s6 + $0x4] ss:$16 sps:$4 sm:$0xff]  }
 0x79d   :  { %9489 = vrcp.f32 %v4886_v24 }
 0x79e   :  { %9491 = vtanh.f32 %v4890_v32 }
 0x7aa   :  { %v9490_v2 = vpop.eup %9489 }
 0x7ab   :  { %v4894_v62 = vrot.slane %v9490_v2, 1  ;;  %v9492_v17 = vpop.eup %9491  ;;  %v4900_v6 = vrot.slane %v9490_v2, 2 }
 0x7ac   :  { %v4897_v45 = vmul.f32 %v9492_v17, %v9490_v2 }
 0x7ad   :  { %v4896_v14 = vmul.f32 %v4894_v62, %v12765_v36  ;;  %v12819_v36 = vld [vmem:[%s13801_s6 + $0xc4] ss:$16 sps:$4 sm:$0xff]  }
 0x7af   :  { %v12806_v41 = vadd.f32 %v4897_v45, %v4896_v14 }
 0x7b1   :  { %9493 = vtanh.f32 %v12806_v41 }
 0x7be   :  { %v9494_v20 = vpop.eup %9493 }
 0x7bf   :  { %v4902_v8 = vmul.f32 %v9494_v20, %v4900_v6 }
 0x7c1   :  { %4903 = vst [vmem:[#allocation3 + $0x2] sm:$0x1] %v4902_v8  ;;  %4904 = vst [vmem:[#allocation4 + $0x5] sm:$0x1] %v4902_v8  ;;  %v4910_v38 = vpack.c.bf16 %v4902_v8, %v4902_v8 }
 0x7c3   :  { %4944 = vmatmul.mubr.bf16.vlgmr.msra.gmra.mxu0 %v4910_v38  ;;  %4985 = vmatmul.mubr.bf16.vlgmr.msra.gmra.mxu1 %v4910_v38 }
 0x7c4   :  { %5052 = vmatpush1.bf16.msra.mxu0 %v12812_v46  ;;  %5093 = vmatpush1.bf16.msra.mxu1 %v12577_v9 }
 0x7c5   :  { %5053 = vmatprep.subr.bf16.mxu0 %v12819_v36  ;;  %5094 = vmatprep.subr.bf16.mxu1 %v12583_v55 }
 0x7c6   :  { %5083 = vmatprep.mubr.bf16.mxu0 %v14066_v27  ;;  %5124 = vmatprep.mubr.bf16.mxu1 %v14066_v27 }
 0x7c8   :  { %5054 = vmatpush1.bf16.msra.mxu0 %v12828_v35  ;;  %5095 = vmatpush1.bf16.msra.mxu1 %v12590_v47 }
 0x7c9   :  { %5055 = vmatprep.subr.bf16.mxu0 %v12835_v54  ;;  %5096 = vmatprep.subr.bf16.mxu1 %v12597_v42 }
 0x7cc   :  { %5056 = vmatpush1.bf16.msra.mxu0 %v12842_v19  ;;  %5097 = vmatpush1.bf16.msra.mxu1 %v12603_v13 }
 0x7cd   :  { %5057 = vmatprep.subr.bf16.mxu0 %v12849_v4  ;;  %5098 = vmatprep.subr.bf16.mxu1 %v12609_v58 }
 0x7d0   :  { %5058 = vmatpush1.bf16.msra.mxu0 %v12856_v7  ;;  %5099 = vmatpush1.bf16.msra.mxu1 %v12615_v25 }
 0x7d1   :  { %5059 = vmatprep.subr.bf16.mxu0 %v12355_v34  ;;  %5100 = vmatprep.subr.bf16.mxu1 %v12621_v15  ;;  %v12879_v34 = vld [vmem:[%s13801_s6 + $0xe4] ss:$16 sps:$4 sm:$0xff]  }
 0x7d4   :  { %5060 = vmatpush1.bf16.msra.mxu0 %v12361_v5  ;;  %5101 = vmatpush1.bf16.msra.mxu1 %v12627_v10 }
 0x7d5   :  { %5061 = vmatprep.subr.bf16.mxu0 %v12367_v12  ;;  %5102 = vmatprep.subr.bf16.mxu1 %v12633_v51 }
 0x7d8   :  { %5062 = vmatpush1.bf16.msra.mxu0 %v12373_v1  ;;  %5103 = vmatpush1.bf16.msra.mxu1 %v12639_v11 }
 0x7d9   :  { %5063 = vmatprep.subr.bf16.mxu0 %v12379_v26  ;;  %5104 = vmatprep.subr.bf16.mxu1 %v12645_v16 }
 0x7dc   :  { %5064 = vmatpush1.bf16.msra.mxu0 %v12385_v21  ;;  %5105 = vmatpush1.bf16.msra.mxu1 %v12651_v39 }
 0x7dd   :  { %5065 = vmatprep.subr.bf16.mxu0 %v12391_v22  ;;  %5106 = vmatprep.subr.bf16.mxu1 %v12657_v30 }
 0x7e0   :  { %5066 = vmatpush1.bf16.msra.mxu0 %v12403_v50  ;;  %5107 = vmatpush1.bf16.msra.mxu1 %v12663_v3 }
 0x7e1   :  { %5191 = vmatprep.subr.bf16.mxu0 %v12879_v34  ;;  %5232 = vmatprep.subr.bf16.mxu1 %v12571_v23 }
 0x883   :  { %v4945_v5 = vpop.f32.mrf.mxu0  ;;  %v4986_v12 = vpop.f32.mrf.mxu1 }
 0x885   :  { %v4947_v1 = vpop.f32.mrf.mxu0  ;;  %v4988_v26 = vpop.f32.mrf.mxu1 }
 0x886   :  { %v4997_v21 = vcombine.low %v4945_v5, %v4947_v1  ;;  %v4998_v22 = vcombine.low %v4986_v12, %v4988_v26 }
 0x887   :  { %v4949_v43 = vpop.f32.mrf.mxu0  ;;  %v4990_v31 = vpop.f32.mrf.mxu1 }
 0x888   :  { %v5005_v50 = vrot.slane %v4997_v21, %v12719_v33  ;;  %v5012_v0 = vrot.slane %v4998_v22, %v12719_v33  ;;  %v12916_v22 = vld [vmem:[%s13801_s6 + $0x60] ss:$16 sps:$4 sm:$0xff]   ;;  %v12923_v43 = vld [vmem:[%s13801_s6 + $0x44] ss:$16 sps:$4 sm:$0xff]  }
 0x889   :  { %v4950_v18 = vpop.f32.mrf.mxu0  ;;  %v4991_v59 = vpop.f32.mrf.mxu1  ;;  %v12930_v31 = vld [vmem:[%s13801_s6 + $0x40] ss:$16 sps:$4 sm:$0xff]  }
 0x88a   :  { %v5013_v29 = vcombine.low %v5005_v50, %v5012_v0  ;;  %v12937_v50 = vld [vmem:[%s13801_s6 + $0x24] ss:$16 sps:$4 sm:$0xff]   ;;  %v12944_v0 = vld [vmem:[%s13801_s6 + $0x20] ss:$16 sps:$4 sm:$0xff]  }
 0x88b   :  { %v12958_v18 = vld [vmem:[%s13801_s6] ss:$16 sps:$4 sm:$0xff]  }
 0x88c   :  { %v5020_v24 = vrot.slane %v5013_v29, %v12719_v33 }
 0x88e   :  { %v5022_v32 = vadd.f32 %v5020_v24, %v4909_v37 }
 0x890   :  { %v8313_v2 = vmul.f32 -1.442695, %v5022_v32  ;;  %v5030_v14 = vrot.slane %v5022_v32, 3 }
 0x892   :  { %9495 = vpow2.f32 %v8313_v2 }
 0x89f   :  { %v9496_v62 = vpop.eup %9495 }
 0x8a0   :  { %v5026_v17 = vadd.f32 1.0, %v9496_v62 }
 0x8a2   :  { %9497 = vrcp.f32 %v5026_v17 }
 0x8a3   :  { %9499 = vtanh.f32 %v5030_v14 }
 0x8af   :  { %v9498_v45 = vpop.eup %9497 }
 0x8b0   :  { %v5034_v6 = vrot.slane %v9498_v45, 1  ;;  %v9500_v20 = vpop.eup %9499  ;;  %v5040_v12 = vrot.slane %v9498_v45, 2 }
 0x8b1   :  { %v5037_v38 = vmul.f32 %v9500_v20, %v9498_v45  ;;  %v5048_v45 = vld [vmem:[#allocation2 + $0x23] ss:$8 sm:$0xf] }
 0x8b2   :  { %v5036_v8 = vmul.f32 %v5034_v6, %v12806_v41  ;;  %v12909_v41 = vld [vmem:[%s13801_s6 + $0x64] ss:$16 sps:$4 sm:$0xff]  }
 0x8b4   :  { %v12887_v5 = vadd.f32 %v5037_v38, %v5036_v8  ;;  %v5046_v38 = vld [vmem:[#allocation2 + $0x4] ss:$8 sm:$0xf] }
 0x8b6   :  { %9501 = vtanh.f32 %v12887_v5 }
 0x8c3   :  { %v9502_v1 = vpop.eup %9501 }
 0x8c4   :  { %v5042_v26 = vmul.f32 %v9502_v1, %v5040_v12  ;;  %v5049_v12 = vadd.f32 %v5048_v45, %v5046_v38 }
 0x8c6   :  { %5043 = vst [vmem:[#allocation3 + $0x3] sm:$0x1] %v5042_v26  ;;  %5044 = vst [vmem:[#allocation4 + $0x4] sm:$0x1] %v5042_v26  ;;  %v5050_v21 = vpack.c.bf16 %v5042_v26, %v5042_v26 }
 0x8c8   :  { %5084 = vmatmul.mubr.bf16.vlgmr.msra.gmra.mxu0 %v5050_v21  ;;  %5125 = vmatmul.mubr.bf16.vlgmr.msra.gmra.mxu1 %v5050_v21 }
 0x8c9   :  { %5192 = vmatpush1.bf16.msra.mxu0 %v12812_v46  ;;  %5233 = vmatpush1.bf16.msra.mxu1 %v12577_v9 }
 0x8ca   :  { %5193 = vmatprep.subr.bf16.mxu0 %v12819_v36  ;;  %5234 = vmatprep.subr.bf16.mxu1 %v12583_v55 }
 0x8cb   :  { %5223 = vmatprep.mubr.bf16.mxu0 %v14066_v27  ;;  %5264 = vmatprep.mubr.bf16.mxu1 %v14066_v27 }
 0x8cd   :  { %5194 = vmatpush1.bf16.msra.mxu0 %v12828_v35  ;;  %5235 = vmatpush1.bf16.msra.mxu1 %v12590_v47 }
 0x8ce   :  { %5195 = vmatprep.subr.bf16.mxu0 %v12835_v54  ;;  %5236 = vmatprep.subr.bf16.mxu1 %v12597_v42 }
 0x8d1   :  { %5196 = vmatpush1.bf16.msra.mxu0 %v12842_v19  ;;  %5237 = vmatpush1.bf16.msra.mxu1 %v12603_v13 }
 0x8d2   :  { %5197 = vmatprep.subr.bf16.mxu0 %v12849_v4  ;;  %5238 = vmatprep.subr.bf16.mxu1 %v12609_v58 }
 0x8d5   :  { %5198 = vmatpush1.bf16.msra.mxu0 %v12856_v7  ;;  %5239 = vmatpush1.bf16.msra.mxu1 %v12615_v25 }
 0x8d6   :  { %5199 = vmatprep.subr.bf16.mxu0 %v12909_v41  ;;  %5240 = vmatprep.subr.bf16.mxu1 %v12621_v15 }
 0x8d9   :  { %5200 = vmatpush1.bf16.msra.mxu0 %v12916_v22  ;;  %5241 = vmatpush1.bf16.msra.mxu1 %v12627_v10 }
 0x8da   :  { %5201 = vmatprep.subr.bf16.mxu0 %v12923_v43  ;;  %5242 = vmatprep.subr.bf16.mxu1 %v12633_v51 }
 0x8dd   :  { %5202 = vmatpush1.bf16.msra.mxu0 %v12930_v31  ;;  %5243 = vmatpush1.bf16.msra.mxu1 %v12639_v11 }
 0x8de   :  { %5203 = vmatprep.subr.bf16.mxu0 %v12937_v50  ;;  %5244 = vmatprep.subr.bf16.mxu1 %v12645_v16 }
 0x8e1   :  { %5204 = vmatpush1.bf16.msra.mxu0 %v12944_v0  ;;  %5245 = vmatpush1.bf16.msra.mxu1 %v12651_v39 }
 0x8e2   :  { %5205 = vmatprep.subr.bf16.mxu0 %v12951_v28  ;;  %5246 = vmatprep.subr.bf16.mxu1 %v12657_v30 }
 0x8e5   :  { %5206 = vmatpush1.bf16.msra.mxu0 %v12958_v18  ;;  %5247 = vmatpush1.bf16.msra.mxu1 %v12663_v3 }
 0x8e6   :  { %5331 = vmatprep.subr.bf16.mxu0 %v12879_v34  ;;  %5372 = vmatprep.subr.bf16.mxu1 %v12571_v23 }
 0x988   :  { %v5085_v59 = vpop.f32.mrf.mxu0  ;;  %v5126_v29 = vpop.f32.mrf.mxu1 }
 0x98a   :  { %v5087_v63 = vpop.f32.mrf.mxu0  ;;  %v5128_v37 = vpop.f32.mrf.mxu1 }
 0x98b   :  { %v5137_v24 = vcombine.low %v5085_v59, %v5087_v63  ;;  %v5138_v32 = vcombine.low %v5126_v29, %v5128_v37 }
 0x98c   :  { %v5089_v2 = vpop.f32.mrf.mxu0  ;;  %v5130_v62 = vpop.f32.mrf.mxu1 }
 0x98d   :  { %v5145_v17 = vrot.slane %v5137_v24, %v12719_v33  ;;  %v5152_v14 = vrot.slane %v5138_v32, %v12719_v33 }
 0x98e   :  { %v5090_v6 = vpop.f32.mrf.mxu0  ;;  %v5131_v20 = vpop.f32.mrf.mxu1 }
 0x98f   :  { %v5153_v8 = vcombine.low %v5145_v17, %v5152_v14 }
 0x991   :  { %v5160_v1 = vrot.slane %v5153_v8, %v12719_v33 }
 0x993   :  { %v5162_v26 = vadd.f32 %v5160_v1, %v5049_v12 }
 0x995   :  { %v8314_v21 = vmul.f32 -1.442695, %v5162_v26  ;;  %v5170_v29 = vrot.slane %v5162_v26, 3 }
 0x997   :  { %9503 = vpow2.f32 %v8314_v21 }
 0x9a4   :  { %v9504_v40 = vpop.eup %9503 }
 0x9a5   :  { %v5166_v59 = vadd.f32 1.0, %v9504_v40 }
 0x9a7   :  { %9505 = vrcp.f32 %v5166_v59 }
 0x9a8   :  { %9507 = vtanh.f32 %v5170_v29 }
 0x9b4   :  { %v9506_v63 = vpop.eup %9505 }
 0x9b5   :  { %v5174_v37 = vrot.slane %v9506_v63, 1  ;;  %v9508_v24 = vpop.eup %9507  ;;  %v5180_v17 = vrot.slane %v9506_v63, 2 }
 0x9b6   :  { %v5177_v2 = vmul.f32 %v9508_v24, %v9506_v63 }
 0x9b7   :  { %v5176_v32 = vmul.f32 %v5174_v37, %v12887_v5 }
 0x9b9   :  { %v12968_v62 = vadd.f32 %v5177_v2, %v5176_v32  ;;  %v9553_v2 = vld [vmem:[%s13801_s6 + $0xe8] ss:$16 sps:$4 sm:$0xff]  }
 0x9bb   :  { %9509 = vtanh.f32 %v12968_v62 }
 0x9c8   :  { %v9510_v14 = vpop.eup %9509 }
 0x9c9   :  { %v5182_v45 = vmul.f32 %v9510_v14, %v5180_v17  ;;  %v9557_v17 = vld [vmem:[%s13801_s6 + $0xa8] ss:$16 sps:$4 sm:$0xff]  }
 0x9cb   :  { %5183 = vst [vmem:[#allocation3 + $0x4] sm:$0x1] %v5182_v45  ;;  %5184 = vst [vmem:[#allocation4 + $0x3] sm:$0x1] %v5182_v45  ;;  %v5190_v6 = vpack.c.bf16 %v5182_v45, %v5182_v45 }
 0x9cd   :  { %5224 = vmatmul.mubr.bf16.vlgmr.msra.gmra.mxu0 %v5190_v6  ;;  %5265 = vmatmul.mubr.bf16.vlgmr.msra.gmra.mxu1 %v5190_v6 }
 0x9ce   :  { %5332 = vmatpush1.bf16.msra.mxu0 %v12812_v46  ;;  %5373 = vmatpush1.bf16.msra.mxu1 %v12577_v9 }
 0x9cf   :  { %5333 = vmatprep.subr.bf16.mxu0 %v12819_v36  ;;  %5374 = vmatprep.subr.bf16.mxu1 %v12583_v55 }
 0x9d0   :  { %5363 = vmatprep.mubr.bf16.mxu0 %v14066_v27  ;;  %5404 = vmatprep.mubr.bf16.mxu1 %v14066_v27 }
 0x9d2   :  { %5334 = vmatpush1.bf16.msra.mxu0 %v12828_v35  ;;  %5375 = vmatpush1.bf16.msra.mxu1 %v12590_v47 }
 0x9d3   :  { %5335 = vmatprep.subr.bf16.mxu0 %v12835_v54  ;;  %5376 = vmatprep.subr.bf16.mxu1 %v12597_v42 }
 0x9d6   :  { %5336 = vmatpush1.bf16.msra.mxu0 %v12842_v19  ;;  %5377 = vmatpush1.bf16.msra.mxu1 %v12603_v13 }
 0x9d7   :  { %5337 = vmatprep.subr.bf16.mxu0 %v12849_v4  ;;  %5378 = vmatprep.subr.bf16.mxu1 %v12609_v58 }
 0x9da   :  { %5338 = vmatpush1.bf16.msra.mxu0 %v12856_v7  ;;  %5379 = vmatpush1.bf16.msra.mxu1 %v12615_v25 }
 0x9db   :  { %5339 = vmatprep.subr.bf16.mxu0 %v12909_v41  ;;  %5380 = vmatprep.subr.bf16.mxu1 %v12621_v15 }
 0x9de   :  { %5340 = vmatpush1.bf16.msra.mxu0 %v12916_v22  ;;  %5381 = vmatpush1.bf16.msra.mxu1 %v12627_v10 }
 0x9df   :  { %5341 = vmatprep.subr.bf16.mxu0 %v12923_v43  ;;  %5382 = vmatprep.subr.bf16.mxu1 %v12633_v51  ;;  %v5188_v51 = vld [vmem:[#allocation2 + $0x22] ss:$8 sm:$0xf] }
 0x9e2   :  { %5342 = vmatpush1.bf16.msra.mxu0 %v12930_v31  ;;  %5383 = vmatpush1.bf16.msra.mxu1 %v12639_v11 }
 0x9e3   :  { %5343 = vmatprep.subr.bf16.mxu0 %v12937_v50  ;;  %5384 = vmatprep.subr.bf16.mxu1 %v12645_v16 }
 0x9e6   :  { %5344 = vmatpush1.bf16.msra.mxu0 %v12944_v0  ;;  %5385 = vmatpush1.bf16.msra.mxu1 %v12651_v39 }
 0x9e7   :  { %5345 = vmatprep.subr.bf16.mxu0 %v12951_v28  ;;  %5386 = vmatprep.subr.bf16.mxu1 %v12657_v30  ;;  %v5186_v30 = vld [vmem:[#allocation2 + $0x5] ss:$8 sm:$0xf] }
 0x9ea   :  { %5346 = vmatpush1.bf16.msra.mxu0 %v12958_v18  ;;  %5387 = vmatpush1.bf16.msra.mxu1 %v12663_v3  ;;  %v5189_v3 = vadd.f32 %v5188_v51, %v5186_v30 }
 0x9eb   :  { %5471 = vmatprep.subr.bf16.mxu0 %v12879_v34  ;;  %5512 = vmatprep.subr.bf16.mxu1 %v12571_v23 }
 0xa8d   :  { %v5225_v40 = vpop.f32.mrf.mxu0  ;;  %v5266_v9 = vpop.f32.mrf.mxu1 }
 0xa8f   :  { %v5227_v55 = vpop.f32.mrf.mxu0  ;;  %v5268_v47 = vpop.f32.mrf.mxu1 }
 0xa90   :  { %v5277_v42 = vcombine.low %v5225_v40, %v5227_v55  ;;  %v5278_v13 = vcombine.low %v5266_v9, %v5268_v47 }
 0xa91   :  { %v5229_v58 = vpop.f32.mrf.mxu0  ;;  %v5270_v25 = vpop.f32.mrf.mxu1 }
 0xa92   :  { %v5285_v15 = vrot.slane %v5277_v42, %v12719_v33  ;;  %v5292_v10 = vrot.slane %v5278_v13, %v12719_v33  ;;  %v5328_v13 = vld [vmem:[#allocation2 + $0x21] ss:$8 sm:$0xf] }
 0xa93   :  { %v5230_v11 = vpop.f32.mrf.mxu0  ;;  %v5271_v16 = vpop.f32.mrf.mxu1 }
 0xa94   :  { %v5293_v39 = vcombine.low %v5285_v15, %v5292_v10  ;;  %v5326_v15 = vld [vmem:[#allocation2 + $0x6] ss:$8 sm:$0xf] }
 0xa95   :  { %v5329_v10 = vadd.f32 %v5328_v13, %v5326_v15  ;;  %v14067_v13 = vlaneseq }
 0xa96   :  { %v5300_v23 = vrot.slane %v5293_v39, %v12719_v33 }
 0xa98   :  { %v5302_v34 = vadd.f32 %v5300_v23, %v5189_v3 }
 0xa9a   :  { %v8315_v5 = vmul.f32 -1.442695, %v5302_v34  ;;  %v5310_v38 = vrot.slane %v5302_v34, 3 }
 0xa9c   :  { %9511 = vpow2.f32 %v8315_v5 }
 0xaa9   :  { %v9512_v20 = vpop.eup %9511 }
 0xaaa   :  { %v5306_v8 = vadd.f32 1.0, %v9512_v20 }
 0xaac   :  { %9513 = vrcp.f32 %v5306_v8 }
 0xaad   :  { %9515 = vtanh.f32 %v5310_v38 }
 0xab9   :  { %v9514_v12 = vpop.eup %9513 }
 0xaba   :  { %v5314_v1 = vrot.slane %v9514_v12, 1  ;;  %v9516_v26 = vpop.eup %9515  ;;  %v5320_v63 = vrot.slane %v9514_v12, 2 }
 0xabb   :  { %v5317_v59 = vmul.f32 %v9516_v26, %v9514_v12 }
 0xabc   :  { %v5316_v21 = vmul.f32 %v5314_v1, %v12968_v62  ;;  %v9554_v62 = vld [vmem:[%s13801_s6 + $0xcc] ss:$16 sps:$4 sm:$0xff]  }
 0xabe   :  { %v13009_v29 = vadd.f32 %v5317_v59, %v5316_v21 }
 0xac0   :  { %9517 = vtanh.f32 %v13009_v29 }
 0xacd   :  { %v9518_v37 = vpop.eup %9517 }
 0xace   :  { %v5322_v24 = vmul.f32 %v9518_v37, %v5320_v63 }
 0xad0   :  { %5323 = vst [vmem:[#allocation3 + $0x5] sm:$0x1] %v5322_v24  ;;  %5324 = vst [vmem:[#allocation4 + $0x2] sm:$0x1] %v5322_v24  ;;  %v5330_v32 = vpack.c.bf16 %v5322_v24, %v5322_v24 }
 0xad2   :  { %5364 = vmatmul.mubr.bf16.vlgmr.msra.gmra.mxu0 %v5330_v32  ;;  %5405 = vmatmul.mubr.bf16.vlgmr.msra.gmra.mxu1 %v5330_v32 }
 0xad3   :  { %5472 = vmatpush1.bf16.msra.mxu0 %v12812_v46  ;;  %5513 = vmatpush1.bf16.msra.mxu1 %v9553_v2  ;;  %v9555_v46 = vld [vmem:[%s13801_s6 + $0xc8] ss:$16 sps:$4 sm:$0xff]  }
 0xad4   :  { %5473 = vmatprep.subr.bf16.mxu0 %v12819_v36  ;;  %5514 = vmatprep.subr.bf16.mxu1 %v9554_v62  ;;  %v9556_v36 = vld [vmem:[%s13801_s6 + $0xac] ss:$16 sps:$4 sm:$0xff]  }
 0xad5   :  { %5503 = vmatprep.mubr.bf16.mxu0 %v14066_v27  ;;  %5544 = vmatprep.mubr.bf16.mxu1 %v14066_v27 }
 0xad7   :  { %5474 = vmatpush1.bf16.msra.mxu0 %v12828_v35  ;;  %5515 = vmatpush1.bf16.msra.mxu1 %v9555_v46  ;;  %v9558_v35 = vld [vmem:[%s13801_s6 + $0x8c] ss:$16 sps:$4 sm:$0xff]  }
 0xad8   :  { %5475 = vmatprep.subr.bf16.mxu0 %v12835_v54  ;;  %5516 = vmatprep.subr.bf16.mxu1 %v9556_v36  ;;  %v9559_v54 = vld [vmem:[%s13801_s6 + $0x88] ss:$16 sps:$4 sm:$0xff]  }
 0xadb   :  { %5476 = vmatpush1.bf16.msra.mxu0 %v12842_v19  ;;  %5517 = vmatpush1.bf16.msra.mxu1 %v9557_v17  ;;  %v9560_v19 = vld [vmem:[%s13801_s6 + $0x6c] ss:$16 sps:$4 sm:$0xff]   ;;  %v5468_v17 = vld [vmem:[#allocation2 + $0x20] ss:$8 sm:$0xf] }
 0xadc   :  { %5477 = vmatprep.subr.bf16.mxu0 %v12849_v4  ;;  %5518 = vmatprep.subr.bf16.mxu1 %v9558_v35  ;;  %v9561_v4 = vld [vmem:[%s13801_s6 + $0x68] ss:$16 sps:$4 sm:$0xff]  }
 0xadf   :  { %5478 = vmatpush1.bf16.msra.mxu0 %v12856_v7  ;;  %5519 = vmatpush1.bf16.msra.mxu1 %v9559_v54  ;;  %v9562_v7 = vld [vmem:[%s13801_s6 + $0x4c] ss:$16 sps:$4 sm:$0xff]  }
 0xae0   :  { %5479 = vmatprep.subr.bf16.mxu0 %v12909_v41  ;;  %5520 = vmatprep.subr.bf16.mxu1 %v9560_v19  ;;  %v9563_v41 = vld [vmem:[%s13801_s6 + $0x48] ss:$16 sps:$4 sm:$0xff]  }
 0xae3   :  { %5480 = vmatpush1.bf16.msra.mxu0 %v12916_v22  ;;  %5521 = vmatpush1.bf16.msra.mxu1 %v9561_v4  ;;  %v9564_v22 = vld [vmem:[%s13801_s6 + $0x2c] ss:$16 sps:$4 sm:$0xff]  }
 0xae4   :  { %5481 = vmatprep.subr.bf16.mxu0 %v12923_v43  ;;  %5522 = vmatprep.subr.bf16.mxu1 %v9562_v7  ;;  %v9565_v43 = vld [vmem:[%s13801_s6 + $0x28] ss:$16 sps:$4 sm:$0xff]   ;;  %v5466_v4 = vld [vmem:[#allocation2 + $0x7] ss:$8 sm:$0xf] }
 0xae5   :  { %v5469_v7 = vadd.f32 %v5468_v17, %v5466_v4 }
 0xae7   :  { %5482 = vmatpush1.bf16.msra.mxu0 %v12930_v31  ;;  %5523 = vmatpush1.bf16.msra.mxu1 %v9563_v41  ;;  %v9566_v31 = vld [vmem:[%s13801_s6 + $0xc] ss:$16 sps:$4 sm:$0xff]  }
 0xae8   :  { %5483 = vmatprep.subr.bf16.mxu0 %v12937_v50  ;;  %5524 = vmatprep.subr.bf16.mxu1 %v9564_v22  ;;  %v9567_v50 = vld [vmem:[%s13801_s6 + $0x8] ss:$16 sps:$4 sm:$0xff]  }
 0xaeb   :  { %5484 = vmatpush1.bf16.msra.mxu0 %v12944_v0  ;;  %5525 = vmatpush1.bf16.msra.mxu1 %v9565_v43 }
 0xaec   :  { %5485 = vmatprep.subr.bf16.mxu0 %v12951_v28  ;;  %5526 = vmatprep.subr.bf16.mxu1 %v9566_v31 }
 0xaef   :  { %5486 = vmatpush1.bf16.msra.mxu0 %v12958_v18  ;;  %5527 = vmatpush1.bf16.msra.mxu1 %v9567_v50 }
 0xb92   :  { %v5365_v0 = vpop.f32.mrf.mxu0  ;;  %v5406_v14 = vpop.f32.mrf.mxu1 }
 0xb94   :  { %v5367_v45 = vpop.f32.mrf.mxu0  ;;  %v5408_v6 = vpop.f32.mrf.mxu1 }
 0xb95   :  { %v5417_v40 = vcombine.low %v5365_v0, %v5367_v45  ;;  %v5418_v9 = vcombine.low %v5406_v14, %v5408_v6 }
 0xb96   :  { %v5369_v55 = vpop.f32.mrf.mxu0  ;;  %v5410_v28 = vpop.f32.mrf.mxu1 }
 0xb97   :  { %v5425_v47 = vrot.slane %v5417_v40, %v12719_v33  ;;  %v5432_v42 = vrot.slane %v5418_v9, %v12719_v33 }
 0xb98   :  { %v5370_v58 = vpop.f32.mrf.mxu0  ;;  %v5411_v18 = vpop.f32.mrf.mxu1 }
 0xb99   :  { %v5433_v25 = vcombine.low %v5425_v47, %v5432_v42  ;;  %v13082_v58 = vand.u32 127, %v14067_v13 }
 0xb9b   :  { %v5440_v51 = vrot.slane %v5433_v25, %v12719_v33  ;;  %vm3695_vm2 = vcmp.lt.s32.totalorder %v13082_v58, 64 }
 0xb9d   :  { %v5442_v11 = vadd.f32 %v5440_v51, %v5329_v10 }
 0xb9f   :  { %v8316_v16 = vmul.f32 -1.442695, %v5442_v11  ;;  %v5450_v3 = vrot.slane %v5442_v11, 3 }
 0xba1   :  { %9519 = vpow2.f32 %v8316_v16 }
 0xbae   :  { %v9520_v39 = vpop.eup %9519 }
 0xbaf   :  { %v5446_v30 = vadd.f32 1.0, %v9520_v39 }
 0xbb1   :  { %9521 = vrcp.f32 %v5446_v30 }
 0xbb2   :  { %9523 = vtanh.f32 %v5450_v3 }
 0xbbe   :  { %v9522_v23 = vpop.eup %9521 }
 0xbbf   :  { %v5454_v34 = vrot.slane %v9522_v23, 1  ;;  %v9524_v5 = vpop.eup %9523  ;;  %v5460_v12 = vrot.slane %v9522_v23, 2 }
 0xbc0   :  { %v5457_v8 = vmul.f32 %v9524_v5, %v9522_v23 }
 0xbc1   :  { %v5456_v20 = vmul.f32 %v5454_v34, %v13009_v29 }
 0xbc3   :  { %v5458_v38 = vadd.f32 %v5457_v8, %v5456_v20 }
 0xbc5   :  { %9525 = vtanh.f32 %v5458_v38 }
 0xbd2   :  { %v9526_v1 = vpop.eup %9525 }
 0xbd3   :  { %v5462_v26 = vmul.f32 %v9526_v1, %v5460_v12 }
 0xbd5   :  { %5463 = vst [vmem:[#allocation3 + $0x6] sm:$0x1] %v5462_v26  ;;  %5464 = vst [vmem:[#allocation4 + $0x1] sm:$0x1] %v5462_v26  ;;  %v5470_v21 = vpack.c.bf16 %v5462_v26, %v5462_v26 }
 0xbd7   :  { %5504 = vmatmul.mubr.bf16.vlgmr.msra.gmra.mxu0 %v5470_v21  ;;  %5545 = vmatmul.mubr.bf16.vlgmr.msra.gmra.mxu1 %v5470_v21 }
 0xc97   :  { %v5505_v59 = vpop.f32.mrf.mxu0  ;;  %v5546_v63 = vpop.f32.mrf.mxu1 }
 0xc99   :  { %v5507_v37 = vpop.f32.mrf.mxu0  ;;  %v5548_v24 = vpop.f32.mrf.mxu1 }
 0xc9a   :  { %v5557_v32 = vcombine.low %v5505_v59, %v5507_v37  ;;  %v5558_v2 = vcombine.low %v5546_v63, %v5548_v24 }
 0xc9b   :  { %v5509_v62 = vpop.f32.mrf.mxu0  ;;  %v5550_v46 = vpop.f32.mrf.mxu1 }
 0xc9c   :  { %v5565_v29 = vrot.slane %v5557_v32, %v12719_v33  ;;  %v5572_v36 = vrot.slane %v5558_v2, %v12719_v33 }
 0xc9d   :  { %v5510_v35 = vpop.f32.mrf.mxu0  ;;  %v5551_v54 = vpop.f32.mrf.mxu1 }
 0xc9e   :  { %v5573_v19 = vcombine.low %v5565_v29, %v5572_v36 }
 0xca0   :  { %v5580_v41 = vrot.slane %v5573_v19, %v12719_v33 }
 0xca2   :  { %v5582_v22 = vadd.f32 %v5580_v41, %v5469_v7 }
 0xca4   :  { %v8317_v43 = vmul.f32 -1.442695, %v5582_v22  ;;  %v5590_v0 = vrot.slane %v5582_v22, 3 }
 0xca6   :  { %9527 = vpow2.f32 %v8317_v43 }
 0xcb3   :  { %v9528_v31 = vpop.eup %9527 }
 0xcb4   :  { %v5586_v50 = vadd.f32 1.0, %v9528_v31 }
 0xcb6   :  { %9529 = vrcp.f32 %v5586_v50 }
 0xcb7   :  { %9531 = vtanh.f32 %v5590_v0 }
 0xcc3   :  { %v9530_v14 = vpop.eup %9529 }
 0xcc4   :  { %v5594_v45 = vrot.slane %v9530_v14, 1  ;;  %v9532_v6 = vpop.eup %9531  ;;  %v5600_v28 = vrot.slane %v9530_v14, 2 }
 0xcc5   :  { %v5597_v9 = vmul.f32 %v9532_v6, %v9530_v14 }
 0xcc6   :  { %v5596_v40 = vmul.f32 %v5594_v45, %v5458_v38 }
 0xcc8   :  { %v5598_v55 = vadd.f32 %v5597_v9, %v5596_v40 }
 0xcca   :  { %9533 = vtanh.f32 %v5598_v55 }
 0xcd7   :  { %v9534_v47 = vpop.eup %9533 }
 0xcd8   :  { %v5602_v42 = vmul.f32 %v9534_v47, %v5600_v28 }
 0xcda   :  { %5603 = vst [vmem:[#allocation3 + $0x7] sm:$0x1] %v5602_v42  ;;  %5604 = vst [vmem:[#allocation4] sm:$0x1] %v5602_v42 }
 0xce1   :  { %v5605_v18 = vld [vmem:[#allocation3] sm:$0xff]  ;;  %v5606_v25 = vld [vmem:[#allocation4] sm:$0xff] }
 0xce2   :  { %v13087_v15 = vsel %vm3695_vm2, %v5605_v18, %v5606_v25 }
 0xce3   :  { %9640 = dma.done.wait [#allocation9], 8192 }
 0xce4   :  { %9641 = vsyncadd [#allocation9], 4294959104  ;;  %v8375_v10 = vcombine.high %v10010_v56, %v10030_v60  ;;  %v8377_v51 = vcombine.high %v10015_v57, %v10035_v61  ;;  %v8374_v11 = vcombine.low %v10010_v56, %v10030_v60  ;;  %v8376_v16 = vcombine.low %v10015_v57, %v10035_v61  ;;  %6074 = vmatprep.mubr.bf16.mxu0 %v14066_v27 }
 0xce5   :  { %9642 = dma.done.wait [#allocation9 + $0x1], 4096 }
 0xce6   :  { %9643 = vsyncadd [#allocation9 + $0x1], 4294963200  ;;  %v8367_v39 = vcombine.high %v9970_v48, %v9990_v52  ;;  %v8369_v30 = vcombine.high %v9975_v49, %v9995_v53  ;;  %6115 = vmatprep.mubr.bf16.mxu1 %v14066_v27  ;;  %6042 = vmatprep.subr.bf16.mxu0 %v8375_v10  ;;  %v8366_v56 = vcombine.low %v9970_v48, %v9990_v52  ;;  %v14068_v60 = vld [vmem:[#allocation58_spill] sm:$0xff]  ;;  %v14070_v23 = vld [vmem:[#allocation59_spill] sm:$0xff] }
 0xce7   :  { %6083 = vmatprep.subr.bf16.mxu1 %v8377_v51  ;;  %6043 = vmatpush1.bf16.msra.mxu0 %v8374_v11  ;;  %v8368_v57 = vcombine.low %v9975_v49, %v9995_v53  ;;  %v8359_v61 = vcombine.high %v14068_v60, %v9950_v44  ;;  %v14069_v3 = vld [vmem:[#allocation62_spill] sm:$0xff]  ;;  %v8358_v5 = vcombine.low %v14068_v60, %v9950_v44  ;;  %v14073_v53 = vld [vmem:[#allocation55_spill] sm:$0xff]  ;;  %v14092_v42 = vld [vmem:[#allocation69_spill] sm:$0xff] }
 0xce8   :  { %6084 = vmatpush1.bf16.msra.mxu1 %v8376_v16  ;;  %6044 = vmatprep.subr.bf16.mxu0 %v8367_v39  ;;  %v8361_v34 = vcombine.high %v14070_v23, %v14069_v3  ;;  %v8360_v20 = vcombine.low %v14070_v23, %v14069_v3  ;;  %v14071_v48 = vld [vmem:[#allocation54_spill] sm:$0xff]  ;;  %v14074_v8 = vld [vmem:[#allocation51_spill] sm:$0xff]  ;;  %v14093_v18 = vld [vmem:[#allocation72_spill] sm:$0xff]  ;;  %v13161_v51 = vpack.c.bf16 %v13087_v15, %v13087_v15 }
 0xce9   :  { %6085 = vmatprep.subr.bf16.mxu1 %v8369_v30  ;;  %v14072_v49 = vld [vmem:[#allocation50_spill] sm:$0xff]  ;;  %v8353_v38 = vcombine.high %v14074_v8, %v14073_v53  ;;  %v8352_v1 = vcombine.low %v14074_v8, %v14073_v53  ;;  %v14077_v59 = vld [vmem:[#allocation47_spill] sm:$0xff]  ;;  %v14096_v30 = vld [vmem:[#allocation65_spill] sm:$0xff] }
 0xcea   :  { %v8351_v52 = vcombine.high %v14072_v49, %v14071_v48  ;;  %v8350_v12 = vcombine.low %v14072_v49, %v14071_v48  ;;  %v14075_v44 = vld [vmem:[#allocation46_spill] sm:$0xff]  ;;  %v14078_v63 = vld [vmem:[#allocation43_spill] sm:$0xff]  ;;  %v14101_v48 = vld [vmem:[#allocation64_spill] sm:$0xff] }
 0xceb   :  { %6045 = vmatpush1.bf16.msra.mxu0 %v8366_v56  ;;  %v14076_v26 = vld [vmem:[#allocation42_spill] sm:$0xff]  ;;  %v8345_v37 = vcombine.high %v14078_v63, %v14077_v59  ;;  %v8344_v32 = vcombine.low %v14078_v63, %v14077_v59  ;;  %v14081_v29 = vld [vmem:[#allocation39_spill] sm:$0xff]  ;;  %v14102_v49 = vld [vmem:[#allocation61_spill] sm:$0xff] }
 0xcec   :  { %6086 = vmatpush1.bf16.msra.mxu1 %v8368_v57  ;;  %6046 = vmatprep.subr.bf16.mxu0 %v8359_v61  ;;  %v8343_v21 = vcombine.high %v14076_v26, %v14075_v44  ;;  %v8342_v24 = vcombine.low %v14076_v26, %v14075_v44  ;;  %v14079_v2 = vld [vmem:[#allocation38_spill] sm:$0xff]  ;;  %v14082_v36 = vld [vmem:[#allocation35_spill] sm:$0xff]  ;;  %v14097_v57 = vld [vmem:[#allocation68_spill] sm:$0xff]  ;;  %v8364_v8 = vcombine.low %v14102_v49, %v14101_v48 }
 0xced   :  { %6087 = vmatprep.subr.bf16.mxu1 %v8361_v34  ;;  %v14080_v62 = vld [vmem:[#allocation34_spill] sm:$0xff]  ;;  %v8337_v17 = vcombine.high %v14082_v36, %v14081_v29  ;;  %v8336_v54 = vcombine.low %v14082_v36, %v14081_v29  ;;  %v14085_v41 = vld [vmem:[#allocation31_spill] sm:$0xff]  ;;  %v14105_v44 = vld [vmem:[#allocation57_spill] sm:$0xff] }
 0xcee   :  { %v8335_v46 = vcombine.high %v14080_v62, %v14079_v2  ;;  %v8334_v35 = vcombine.low %v14080_v62, %v14079_v2  ;;  %v14083_v19 = vld [vmem:[#allocation30_spill] sm:$0xff]  ;;  %v14086_v22 = vld [vmem:[#allocation27_spill] sm:$0xff]  ;;  %v14106_v26 = vld [vmem:[#allocation53_spill] sm:$0xff] }
 0xcef   :  { %6047 = vmatpush1.bf16.msra.mxu0 %v8358_v5  ;;  %v14084_v4 = vld [vmem:[#allocation26_spill] sm:$0xff]  ;;  %v8329_v43 = vcombine.high %v14086_v22, %v14085_v41  ;;  %v8328_v50 = vcombine.low %v14086_v22, %v14085_v41  ;;  %v14089_v6 = vld [vmem:[#allocation23_spill] sm:$0xff]  ;;  %v14100_v5 = vld [vmem:[#allocation60_spill] sm:$0xff]  ;;  %v8356_v63 = vcombine.low %v14106_v26, %v14105_v44 }
 0xcf0   :  { %6088 = vmatpush1.bf16.msra.mxu1 %v8360_v20  ;;  %6048 = vmatprep.subr.bf16.mxu0 %v8351_v52  ;;  %v8327_v7 = vcombine.high %v14084_v4, %v14083_v19  ;;  %v8326_v31 = vcombine.low %v14084_v4, %v14083_v19  ;;  %v14087_v0 = vld [vmem:[#allocation22_spill] sm:$0xff]  ;;  %v14090_v40 = vld [vmem:[#allocation19_spill] sm:$0xff]  ;;  %v8365_v52 = vcombine.high %v14102_v49, %v14101_v48  ;;  %v14109_v2 = vld [vmem:[#allocation49_spill] sm:$0xff] }
 0xcf1   :  { %6089 = vmatprep.subr.bf16.mxu1 %v8353_v38  ;;  %v14088_v14 = vld [vmem:[#allocation18_spill] sm:$0xff]  ;;  %v8321_v9 = vcombine.high %v14090_v40, %v14089_v6  ;;  %v8320_v28 = vcombine.low %v14090_v40, %v14089_v6  ;;  %v14091_v47 = vld [vmem:[#allocation71_spill] sm:$0xff]  ;;  %v14103_v38 = vld [vmem:[#allocation56_spill] sm:$0xff] }
 0xcf2   :  { %v8319_v45 = vcombine.high %v14088_v14, %v14087_v0  ;;  %v8318_v55 = vcombine.low %v14088_v14, %v14087_v0  ;;  %v8379_v13 = vcombine.high %v14092_v42, %v14091_v47  ;;  %v14094_v25 = vld [vmem:[#allocation70_spill] sm:$0xff]  ;;  %v8378_v11 = vcombine.low %v14092_v42, %v14091_v47  ;;  %v14095_v39 = vld [vmem:[#allocation67_spill] sm:$0xff]  ;;  %v14110_v62 = vld [vmem:[#allocation45_spill] sm:$0xff] }
 0xcf3   :  { %6049 = vmatpush1.bf16.msra.mxu0 %v8350_v12  ;;  %v8381_v10 = vcombine.high %v14094_v25, %v14093_v18  ;;  %v8380_v16 = vcombine.low %v14094_v25, %v14093_v18  ;;  %v8371_v56 = vcombine.high %v14096_v30, %v14095_v39  ;;  %v14098_v60 = vld [vmem:[#allocation66_spill] sm:$0xff]  ;;  %v8370_v3 = vcombine.low %v14096_v30, %v14095_v39  ;;  %v14099_v34 = vld [vmem:[#allocation63_spill] sm:$0xff]  ;;  %v14104_v12 = vld [vmem:[#allocation52_spill] sm:$0xff] }
 0xcf4   :  { %6090 = vmatpush1.bf16.msra.mxu1 %v8352_v1  ;;  %6050 = vmatprep.subr.bf16.mxu0 %v8343_v21  ;;  %v8373_v61 = vcombine.high %v14098_v60, %v14097_v57  ;;  %v8372_v23 = vcombine.low %v14098_v60, %v14097_v57  ;;  %v8363_v20 = vcombine.high %v14100_v5, %v14099_v34  ;;  %v14113_v19 = vld [vmem:[#allocation41_spill] sm:$0xff]  ;;  %v14125_v39 = vld [vmem:[#allocation104_spill] sm:$0xff]  ;;  %v14126_v30 = vld [vmem:[#allocation102_spill] sm:$0xff] }
 0xcf5   :  { %6091 = vmatprep.subr.bf16.mxu1 %v8345_v37  ;;  %v8362_v53 = vcombine.low %v14100_v5, %v14099_v34  ;;  %v8355_v1 = vcombine.high %v14104_v12, %v14103_v38  ;;  %v8357_v21 = vcombine.high %v14106_v26, %v14105_v44  ;;  %v8354_v59 = vcombine.low %v14104_v12, %v14103_v38  ;;  %v14107_v37 = vld [vmem:[#allocation48_spill] sm:$0xff]  ;;  %v14114_v4 = vld [vmem:[#allocation37_spill] sm:$0xff]  ;;  %v14130_v5 = vld [vmem:[#allocation98_spill] sm:$0xff] }
 0xcf6   :  { %v8348_v36 = vcombine.low %v14110_v62, %v14109_v2  ;;  %v8340_v22 = vcombine.low %v14114_v4, %v14113_v19  ;;  %v14117_v0 = vld [vmem:[#allocation33_spill] sm:$0xff]  ;;  %v13241_v60 = vcombine.low %v14126_v30, %v14125_v39  ;;  %v14129_v34 = vld [vmem:[#allocation100_spill] sm:$0xff]  ;;  %v14134_v12 = vld [vmem:[#allocation94_spill] sm:$0xff] }
 0xcf7   :  { %6051 = vmatpush1.bf16.msra.mxu0 %v8342_v24  ;;  %v14108_v24 = vld [vmem:[#allocation44_spill] sm:$0xff]  ;;  %v14118_v14 = vld [vmem:[#allocation29_spill] sm:$0xff]  ;;  %v13263_v49 = vcombine.low %v14130_v5, %v14129_v34 }
 0xcf8   :  { %6092 = vmatpush1.bf16.msra.mxu1 %v8344_v32  ;;  %6052 = vmatprep.subr.bf16.mxu0 %v8335_v46  ;;  %v8347_v32 = vcombine.high %v14108_v24, %v14107_v37  ;;  %v8349_v46 = vcombine.high %v14110_v62, %v14109_v2  ;;  %v8346_v29 = vcombine.low %v14108_v24, %v14107_v37  ;;  %v14121_v47 = vld [vmem:[#allocation25_spill] sm:$0xff]  ;;  %v14133_v38 = vld [vmem:[#allocation96_spill] sm:$0xff]  ;;  %v14138_v24 = vld [vmem:[#allocation90_spill] sm:$0xff] }
 0xcf9   :  { %6093 = vmatprep.subr.bf16.mxu1 %v8337_v17  ;;  %v14111_v17 = vld [vmem:[#allocation40_spill] sm:$0xff]  ;;  %v8332_v40 = vcombine.low %v14118_v14, %v14117_v0  ;;  %v14122_v42 = vld [vmem:[#allocation21_spill] sm:$0xff]  ;;  %v13285_v26 = vcombine.low %v14134_v12, %v14133_v38 }
 0xcfa   :  { %v8324_v25 = vcombine.low %v14122_v42, %v14121_v47  ;;  %v14137_v37 = vld [vmem:[#allocation92_spill] sm:$0xff] }
 0xcfb   :  { %6053 = vmatpush1.bf16.msra.mxu0 %v8334_v35  ;;  %v14112_v35 = vld [vmem:[#allocation36_spill] sm:$0xff]  ;;  %v13305_v62 = vcombine.low %v14138_v24, %v14137_v37 }
 0xcfc   :  { %6094 = vmatpush1.bf16.msra.mxu1 %v8336_v54  ;;  %6054 = vmatprep.subr.bf16.mxu0 %v8327_v7  ;;  %v8339_v54 = vcombine.high %v14112_v35, %v14111_v17  ;;  %v8341_v7 = vcombine.high %v14114_v4, %v14113_v19  ;;  %v8338_v41 = vcombine.low %v14112_v35, %v14111_v17  ;;  %v14141_v17 = vld [vmem:[#allocation88_spill] sm:$0xff]  ;;  %v14142_v35 = vld [vmem:[#allocation86_spill] sm:$0xff] }
 0xcfd   :  { %6095 = vmatprep.subr.bf16.mxu1 %v8329_v43  ;;  %v14115_v43 = vld [vmem:[#allocation32_spill] sm:$0xff]  ;;  %v13325_v4 = vcombine.low %v14142_v35, %v14141_v17 }
 0xcff   :  { %6055 = vmatpush1.bf16.msra.mxu0 %v8326_v31  ;;  %v14116_v31 = vld [vmem:[#allocation28_spill] sm:$0xff] }
 0xd00   :  { %6096 = vmatpush1.bf16.msra.mxu1 %v8328_v50  ;;  %6056 = vmatprep.subr.bf16.mxu0 %v8319_v45  ;;  %v8331_v50 = vcombine.high %v14116_v31, %v14115_v43  ;;  %v8333_v45 = vcombine.high %v14118_v14, %v14117_v0  ;;  %v8330_v6 = vcombine.low %v14116_v31, %v14115_v43  ;;  %v14145_v43 = vld [vmem:[#allocation84_spill] sm:$0xff]  ;;  %v14146_v31 = vld [vmem:[#allocation82_spill] sm:$0xff] }
 0xd01   :  { %6097 = vmatprep.subr.bf16.mxu1 %v8321_v9  ;;  %v14119_v9 = vld [vmem:[#allocation24_spill] sm:$0xff]  ;;  %v13345_v14 = vcombine.low %v14146_v31, %v14145_v43 }
 0xd03   :  { %6057 = vmatpush1.bf16.msra.mxu0 %v8318_v55  ;;  %v14120_v55 = vld [vmem:[#allocation20_spill] sm:$0xff] }
 0xd04   :  { %6098 = vmatpush1.bf16.msra.mxu1 %v8320_v28  ;;  %6124 = vmatprep.subr.bf16.mxu0 %v8379_v13  ;;  %v8323_v28 = vcombine.high %v14120_v55, %v14119_v9  ;;  %v8325_v13 = vcombine.high %v14122_v42, %v14121_v47  ;;  %v8322_v18 = vcombine.low %v14120_v55, %v14119_v9  ;;  %v14149_v9 = vld [vmem:[#allocation80_spill] sm:$0xff]  ;;  %v14150_v55 = vld [vmem:[#allocation78_spill] sm:$0xff] }
 0xd05   :  { %6165 = vmatprep.subr.bf16.mxu1 %v8381_v10  ;;  %v14123_v10 = vld [vmem:[#allocation103_spill] sm:$0xff]  ;;  %v13365_v42 = vcombine.low %v14150_v55, %v14149_v9 }
 0xd06   :  { %6075 = vmatmul.mubr.bf16.vlgmr.msra.gmra.mxu0 %v13161_v51 }
 0xd07   :  { %6116 = vmatmul.mubr.bf16.vlgmr.msra.gmra.mxu1 %v13161_v51  ;;  %6125 = vmatpush1.bf16.msra.mxu0 %v8378_v11  ;;  %v14124_v11 = vld [vmem:[#allocation101_spill] sm:$0xff] }
 0xd08   :  { %6166 = vmatpush1.bf16.msra.mxu1 %v8380_v16  ;;  %6126 = vmatprep.subr.bf16.mxu0 %v8371_v56  ;;  %v13229_v16 = vcombine.high %v14124_v11, %v14123_v10  ;;  %v13233_v56 = vcombine.high %v14126_v30, %v14125_v39  ;;  %v13237_v57 = vcombine.low %v14124_v11, %v14123_v10  ;;  %v14153_v10 = vld [vmem:[#allocation76_spill] sm:$0xff]  ;;  %v14154_v11 = vld [vmem:[#allocation74_spill] sm:$0xff] }
 0xd09   :  { %6167 = vmatprep.subr.bf16.mxu1 %v8373_v61  ;;  %6156 = vmatprep.mubr.bf16.mxu0 %v14066_v27  ;;  %v14127_v61 = vld [vmem:[#allocation99_spill] sm:$0xff]  ;;  %v13375_v39 = vcombine.high %v14154_v11, %v14153_v10 }
 0xd0a   :  { %6197 = vmatprep.mubr.bf16.mxu1 %v14066_v27 }
 0xd0b   :  { %6127 = vmatpush1.bf16.msra.mxu0 %v8370_v3  ;;  %v14128_v3 = vld [vmem:[#allocation97_spill] sm:$0xff] }
 0xd0c   :  { %6168 = vmatpush1.bf16.msra.mxu1 %v8372_v23  ;;  %6128 = vmatprep.subr.bf16.mxu0 %v8363_v20  ;;  %v13247_v23 = vcombine.high %v14128_v3, %v14127_v61  ;;  %v13251_v20 = vcombine.high %v14130_v5, %v14129_v34  ;;  %v13259_v48 = vcombine.low %v14128_v3, %v14127_v61  ;;  %v5680_v3 = vld [vmem:[%s13803_s8] sm:$0xff]  ;;  %v14155_v34 = vld [vmem:[#allocation138_spill] sm:$0xff] }
 0xd0d   :  { %6169 = vmatprep.subr.bf16.mxu1 %v8365_v52  ;;  %v14131_v52 = vld [vmem:[#allocation95_spill] sm:$0xff]  ;;  %v13385_v61 = vcombine.low %v14154_v11, %v14153_v10  ;;  %v5685_v5 = vrot.slane %v5680_v3, %v14155_v34 }
 0xd0f   :  { %6129 = vmatpush1.bf16.msra.mxu0 %v8362_v53  ;;  %v14132_v53 = vld [vmem:[#allocation93_spill] sm:$0xff] }
 0xd10   :  { %6170 = vmatpush1.bf16.msra.mxu1 %v8364_v8  ;;  %6130 = vmatprep.subr.bf16.mxu0 %v8355_v1  ;;  %v13269_v8 = vcombine.high %v14132_v53, %v14131_v52  ;;  %v13273_v1 = vcombine.high %v14134_v12, %v14133_v38  ;;  %v13281_v44 = vcombine.low %v14132_v53, %v14131_v52  ;;  %v14156_v52 = vld [vmem:[#allocation137_spill] sm:$0xff]  ;;  %v14158_v12 = vld [vmem:[#allocation139_spill] sm:$0xff] }
 0xd11   :  { %6171 = vmatprep.subr.bf16.mxu1 %v8357_v21  ;;  %v14135_v21 = vld [vmem:[#allocation91_spill] sm:$0xff]  ;;  %v14157_v53 = vsub.s32 2, %v14156_v52  ;;  %v14162_v11 = vsub.s32 5, %v14156_v52 }
 0xd13   :  { %6131 = vmatpush1.bf16.msra.mxu0 %v8354_v59  ;;  %v14136_v59 = vld [vmem:[#allocation89_spill] sm:$0xff]  ;;  %v5693_v38 = vrot.slane %v5680_v3, %v14157_v53  ;;  %v14163_v53 = vsub.s32 7, %v14156_v52 }
 0xd14   :  { %6172 = vmatpush1.bf16.msra.mxu1 %v8356_v63  ;;  %6132 = vmatprep.subr.bf16.mxu0 %v8347_v32  ;;  %v13291_v63 = vcombine.high %v14136_v59, %v14135_v21  ;;  %v13295_v32 = vcombine.high %v14138_v24, %v14137_v37  ;;  %v13301_v2 = vcombine.low %v14136_v59, %v14135_v21  ;;  %v14159_v59 = vsub.s32 3, %v14156_v52 }
 0xd15   :  { %6173 = vmatprep.subr.bf16.mxu1 %v8349_v46  ;;  %v14139_v46 = vld [vmem:[#allocation87_spill] sm:$0xff]  ;;  %v5689_v21 = vrot.slane %v5680_v3, %v14158_v12 }
 0xd16   :  { %v5697_v37 = vrot.slane %v5680_v3, %v14159_v59 }
 0xd17   :  { %6133 = vmatpush1.bf16.msra.mxu0 %v8346_v29  ;;  %v14140_v29 = vld [vmem:[#allocation85_spill] sm:$0xff] }
 0xd18   :  { %6174 = vmatpush1.bf16.msra.mxu1 %v8348_v36  ;;  %6134 = vmatprep.subr.bf16.mxu0 %v8339_v54  ;;  %v13311_v36 = vcombine.high %v14140_v29, %v14139_v46  ;;  %v13315_v54 = vcombine.high %v14142_v35, %v14141_v17  ;;  %v13321_v19 = vcombine.low %v14140_v29, %v14139_v46 }
 0xd19   :  { %6175 = vmatprep.subr.bf16.mxu1 %v8341_v7  ;;  %v14143_v7 = vld [vmem:[#allocation83_spill] sm:$0xff] }
 0xd1b   :  { %6135 = vmatpush1.bf16.msra.mxu0 %v8338_v41  ;;  %v14144_v41 = vld [vmem:[#allocation81_spill] sm:$0xff] }
 0xd1c   :  { %6176 = vmatpush1.bf16.msra.mxu1 %v8340_v22  ;;  %6136 = vmatprep.subr.bf16.mxu0 %v8331_v50  ;;  %v13331_v22 = vcombine.high %v14144_v41, %v14143_v7  ;;  %v13335_v50 = vcombine.high %v14146_v31, %v14145_v43  ;;  %v13341_v0 = vcombine.low %v14144_v41, %v14143_v7 }
 0xd1d   :  { %6177 = vmatprep.subr.bf16.mxu1 %v8333_v45  ;;  %v14147_v45 = vld [vmem:[#allocation79_spill] sm:$0xff] }
 0xd1f   :  { %6137 = vmatpush1.bf16.msra.mxu0 %v8330_v6  ;;  %v14148_v6 = vld [vmem:[#allocation77_spill] sm:$0xff] }
 0xd20   :  { %6178 = vmatpush1.bf16.msra.mxu1 %v8332_v40  ;;  %6138 = vmatprep.subr.bf16.mxu0 %v8323_v28  ;;  %v13351_v40 = vcombine.high %v14148_v6, %v14147_v45  ;;  %v13355_v28 = vcombine.high %v14150_v55, %v14149_v9  ;;  %v13361_v47 = vcombine.low %v14148_v6, %v14147_v45  ;;  %v14160_v55 = vsub.s32 4, %v14156_v52 }
 0xd21   :  { %6179 = vmatprep.subr.bf16.mxu1 %v8325_v13  ;;  %v14151_v13 = vld [vmem:[#allocation75_spill] sm:$0xff] }
 0xd23   :  { %6139 = vmatpush1.bf16.msra.mxu0 %v8322_v18  ;;  %v14152_v18 = vld [vmem:[#allocation73_spill] sm:$0xff] }
 0xd24   :  { %6180 = vmatpush1.bf16.msra.mxu1 %v8324_v25  ;;  %6409 = vmatprep.subr.bf16.mxu0 %v13229_v16  ;;  %v13371_v25 = vcombine.high %v14152_v18, %v14151_v13  ;;  %v13381_v30 = vcombine.low %v14152_v18, %v14151_v13  ;;  %v5701_v13 = vrot.slane %v5680_v3, %v14160_v55  ;;  %v14161_v18 = vsub.s32 6, %v14156_v52 }
 0xd25   :  { %6450 = vmatprep.subr.bf16.mxu1 %v13233_v56 }
 0xd26   :  { %6157 = vmatmul.mubr.bf16.vlgmr.msra.gmra.mxu0 %v13161_v51  ;;  %v5709_v10 = vrot.slane %v5680_v3, %v14161_v18 }
 0xd27   :  { %6198 = vmatmul.mubr.bf16.vlgmr.msra.gmra.mxu1 %v13161_v51  ;;  %6410 = vmatpush1.bf16.msra.mxu0 %v13237_v57 }
 0xd28   :  { %6451 = vmatpush1.bf16.msra.mxu1 %v13241_v60  ;;  %6411 = vmatprep.subr.bf16.mxu0 %v13247_v23 }
 0xd29   :  { %6452 = vmatprep.subr.bf16.mxu1 %v13251_v20  ;;  %6441 = vmatprep.mubr.bf16.mxu0 %v14066_v27 }
 0xd2a   :  { %6482 = vmatprep.mubr.bf16.mxu1 %v14066_v27 }
 0xd2b   :  { %6412 = vmatpush1.bf16.msra.mxu0 %v13259_v48 }
 0xd2c   :  { %6453 = vmatpush1.bf16.msra.mxu1 %v13263_v49  ;;  %6413 = vmatprep.subr.bf16.mxu0 %v13269_v8 }
 0xd2d   :  { %6454 = vmatprep.subr.bf16.mxu1 %v13273_v1 }
 0xd2f   :  { %6414 = vmatpush1.bf16.msra.mxu0 %v13281_v44 }
 0xd30   :  { %6455 = vmatpush1.bf16.msra.mxu1 %v13285_v26  ;;  %6415 = vmatprep.subr.bf16.mxu0 %v13291_v63 }
 0xd31   :  { %6456 = vmatprep.subr.bf16.mxu1 %v13295_v32 }
 0xd33   :  { %6416 = vmatpush1.bf16.msra.mxu0 %v13301_v2 }
 0xd34   :  { %6457 = vmatpush1.bf16.msra.mxu1 %v13305_v62  ;;  %6417 = vmatprep.subr.bf16.mxu0 %v13311_v36 }
 0xd35   :  { %6458 = vmatprep.subr.bf16.mxu1 %v13315_v54 }
 0xd37   :  { %6418 = vmatpush1.bf16.msra.mxu0 %v13321_v19 }
 0xd38   :  { %6459 = vmatpush1.bf16.msra.mxu1 %v13325_v4  ;;  %6419 = vmatprep.subr.bf16.mxu0 %v13331_v22 }
 0xd39   :  { %6460 = vmatprep.subr.bf16.mxu1 %v13335_v50 }
 0xd3b   :  { %6420 = vmatpush1.bf16.msra.mxu0 %v13341_v0 }
 0xd3c   :  { %6461 = vmatpush1.bf16.msra.mxu1 %v13345_v14  ;;  %6421 = vmatprep.subr.bf16.mxu0 %v13351_v40 }
 0xd3d   :  { %6462 = vmatprep.subr.bf16.mxu1 %v13355_v28 }
 0xd3f   :  { %6422 = vmatpush1.bf16.msra.mxu0 %v13361_v47 }
 0xd40   :  { %6463 = vmatpush1.bf16.msra.mxu1 %v13365_v42  ;;  %6423 = vmatprep.subr.bf16.mxu0 %v13371_v25 }
 0xd41   :  { %6464 = vmatprep.subr.bf16.mxu1 %v13375_v39 }
 0xd43   :  { %6424 = vmatpush1.bf16.msra.mxu0 %v13381_v30 }
 0xd44   :  { %6465 = vmatpush1.bf16.msra.mxu1 %v13385_v61  ;;  %6547 = vmatprep.subr.bf16.mxu0 %v13229_v16 }
 0xd45   :  { %6588 = vmatprep.subr.bf16.mxu1 %v13233_v56 }
 0xd46   :  { %6442 = vmatmul.mubr.bf16.vlgmr.msra.gmra.mxu0 %v14066_v27 }
 0xd47   :  { %6483 = vmatmul.mubr.bf16.vlgmr.msra.gmra.mxu1 %v14066_v27  ;;  %6548 = vmatpush1.bf16.msra.mxu0 %v13237_v57 }
 0xd48   :  { %6589 = vmatpush1.bf16.msra.mxu1 %v13241_v60  ;;  %6549 = vmatprep.subr.bf16.mxu0 %v13247_v23 }
 0xd49   :  { %6590 = vmatprep.subr.bf16.mxu1 %v13251_v20  ;;  %6579 = vmatprep.mubr.bf16.mxu0 %v14066_v27 }
 0xd4a   :  { %6620 = vmatprep.mubr.bf16.mxu1 %v14066_v27 }
 0xd4b   :  { %6550 = vmatpush1.bf16.msra.mxu0 %v13259_v48 }
 0xd4c   :  { %6591 = vmatpush1.bf16.msra.mxu1 %v13263_v49  ;;  %6551 = vmatprep.subr.bf16.mxu0 %v13269_v8 }
 0xd4d   :  { %6592 = vmatprep.subr.bf16.mxu1 %v13273_v1 }
 0xd4f   :  { %6552 = vmatpush1.bf16.msra.mxu0 %v13281_v44 }
 0xd50   :  { %6593 = vmatpush1.bf16.msra.mxu1 %v13285_v26  ;;  %6553 = vmatprep.subr.bf16.mxu0 %v13291_v63 }
 0xd51   :  { %6594 = vmatprep.subr.bf16.mxu1 %v13295_v32 }
 0xd53   :  { %6554 = vmatpush1.bf16.msra.mxu0 %v13301_v2 }
 0xd54   :  { %6595 = vmatpush1.bf16.msra.mxu1 %v13305_v62  ;;  %6555 = vmatprep.subr.bf16.mxu0 %v13311_v36 }
 0xd55   :  { %6596 = vmatprep.subr.bf16.mxu1 %v13315_v54 }
 0xd57   :  { %6556 = vmatpush1.bf16.msra.mxu0 %v13321_v19 }
 0xd58   :  { %6597 = vmatpush1.bf16.msra.mxu1 %v13325_v4  ;;  %6557 = vmatprep.subr.bf16.mxu0 %v13331_v22 }
 0xd59   :  { %6598 = vmatprep.subr.bf16.mxu1 %v13335_v50 }
 0xd5b   :  { %6558 = vmatpush1.bf16.msra.mxu0 %v13341_v0 }
 0xd5c   :  { %6599 = vmatpush1.bf16.msra.mxu1 %v13345_v14  ;;  %6559 = vmatprep.subr.bf16.mxu0 %v13351_v40 }
 0xd5d   :  { %6600 = vmatprep.subr.bf16.mxu1 %v13355_v28 }
 0xd5f   :  { %6560 = vmatpush1.bf16.msra.mxu0 %v13361_v47 }
 0xd60   :  { %6601 = vmatpush1.bf16.msra.mxu1 %v13365_v42  ;;  %6561 = vmatprep.subr.bf16.mxu0 %v13371_v25 }
 0xd61   :  { %6602 = vmatprep.subr.bf16.mxu1 %v13375_v39 }
 0xd63   :  { %6562 = vmatpush1.bf16.msra.mxu0 %v13381_v30 }
 0xd64   :  { %6603 = vmatpush1.bf16.msra.mxu1 %v13385_v61  ;;  %6685 = vmatprep.subr.bf16.mxu0 %v13229_v16 }
 0xd65   :  { %6726 = vmatprep.subr.bf16.mxu1 %v13233_v56 }
 0xdc6   :  { %v6076_v24 = vpop.f32.mrf.mxu0 }
 0xdc7   :  { %v6117_v46 = vpop.f32.mrf.mxu1  ;;  %v6077_v29 = vadd.f32 %v6076_v24, %v5685_v5  ;;  %v5705_v5 = vrot.slane %v5680_v3, %v14162_v11 }
 0xdc8   :  { %v6118_v17 = vadd.f32 %v6117_v46, %v5693_v38  ;;  %v6078_v35 = vpop.f32.mrf.mxu0  ;;  %v5713_v38 = vrot.slane %v5680_v3, %v14163_v53 }
 0xdc9   :  { %v6119_v7 = vpop.f32.mrf.mxu1  ;;  %6206 = vst [vmem:[#allocation2] sm:$0xff] %v6077_v29  ;;  %v6079_v41 = vadd.f32 %v6078_v35, %v5689_v21 }
 0xdca   :  { %6208 = vst [vmem:[#allocation2 + $0x10] sm:$0xff] %v6118_v17  ;;  %v6120_v43 = vadd.f32 %v6119_v7, %v5697_v37  ;;  %v6080_v31 = vpop.f32.mrf.mxu0 }
 0xdcb   :  { %v6121_v45 = vpop.f32.mrf.mxu1  ;;  %6207 = vst [vmem:[#allocation2 + $0x8] sm:$0xff] %v6079_v41 }
 0xdcc   :  { %6209 = vst [vmem:[#allocation2 + $0x18] sm:$0xff] %v6120_v43  ;;  %v6081_v6 = vpop.f32.mrf.mxu0 }
 0xdcd   :  { %v6122_v9 = vpop.f32.mrf.mxu1 }
 0xde6   :  { %v6158_v21 = vpop.f32.mrf.mxu0 }
 0xde7   :  { %v6199_v59 = vpop.f32.mrf.mxu1  ;;  %v6159_v37 = vadd.f32 %v6158_v21, %v5701_v13 }
 0xde8   :  { %v6200_v24 = vadd.f32 %v6199_v59, %v5709_v10  ;;  %v6160_v46 = vpop.f32.mrf.mxu0  ;;  %v6246_v59 = vld [vmem:[#allocation2] ss:$8 sm:$0xf] }
 0xde9   :  { %v6201_v29 = vpop.f32.mrf.mxu1  ;;  %6210 = vst [vmem:[#allocation2 + $0x20] sm:$0xff] %v6159_v37  ;;  %v6161_v17 = vadd.f32 %v6160_v46, %v5705_v5 }
 0xdea   :  { %6212 = vst [vmem:[#allocation2 + $0x30] sm:$0xff] %v6200_v24  ;;  %v6202_v35 = vadd.f32 %v6201_v29, %v5713_v38  ;;  %v6162_v7 = vpop.f32.mrf.mxu0 }
 0xdeb   :  { %v6203_v41 = vpop.f32.mrf.mxu1  ;;  %6211 = vst [vmem:[#allocation2 + $0x28] sm:$0xff] %v6161_v17 }
 0xdec   :  { %6213 = vst [vmem:[#allocation2 + $0x38] sm:$0xff] %v6202_v35  ;;  %v6163_v43 = vpop.f32.mrf.mxu0 }
 0xded   :  { %v6204_v31 = vpop.f32.mrf.mxu1 }
 0xdf3   :  { %v6247_v5 = vld [vmem:[#allocation2 + $0x27] ss:$8 sm:$0xf] }
 0xdf4   :  { %v6248_v37 = vadd.f32 %v6247_v5, %v6246_v59 }
 0xe06   :  { %v6443_v45 = vpop.f32.mrf.mxu0 }
 0xe07   :  { %v6484_v6 = vpop.f32.mrf.mxu1 }
 0xe08   :  { %v6445_v52 = vpop.f32.mrf.mxu0 }
 0xe09   :  { %v6486_v3 = vpop.f32.mrf.mxu1  ;;  %v6495_v9 = vcombine.low %v6443_v45, %v6445_v52 }
 0xe0a   :  { %v6496_v55 = vcombine.low %v6484_v6, %v6486_v3  ;;  %v6447_v13 = vpop.f32.mrf.mxu0 }
 0xe0b   :  { %v6488_v18 = vpop.f32.mrf.mxu1  ;;  %v6503_v10 = vrot.slane %v6495_v9, %v12719_v33 }
 0xe0c   :  { %v6510_v11 = vrot.slane %v6496_v55, %v12719_v33  ;;  %v6448_v53 = vpop.f32.mrf.mxu0 }
 0xe0d   :  { %v6489_v38 = vpop.f32.mrf.mxu1 }
 0xe0e   :  { %v6511_v21 = vcombine.low %v6503_v10, %v6510_v11 }
 0xe10   :  { %v6518_v24 = vrot.slane %v6511_v21, %v12719_v33 }
 0xe12   :  { %v6520_v46 = vadd.f32 %v6518_v24, %v6248_v37 }
 0xe14   :  { %v8414_v29 = vmul.f32 -1.442695, %v6520_v46  ;;  %v6528_v7 = vrot.slane %v6520_v46, 3  ;;  %v6544_v46 = vld [vmem:[#allocation2 + $0x26] ss:$8 sm:$0xf] }
 0xe16   :  { %9568 = vpow2.f32 %v8414_v29 }
 0xe23   :  { %v9569_v17 = vpop.eup %9568 }
 0xe24   :  { %v6524_v35 = vadd.f32 1.0, %v9569_v17 }
 0xe26   :  { %9570 = vrcp.f32 %v6524_v35 }
 0xe27   :  { %9572 = vtanh.f32 %v6528_v7  ;;  %v6543_v7 = vld [vmem:[#allocation2 + $0x1] ss:$8 sm:$0xf] }
 0xe33   :  { %v9571_v41 = vpop.eup %9570 }
 0xe34   :  { %v6532_v43 = vrot.slane %v9571_v41, 1  ;;  %v9573_v31 = vpop.eup %9572  ;;  %v6538_v3 = vrot.slane %v9571_v41, 2 }
 0xe35   :  { %v6535_v6 = vmul.f32 %v9573_v31, %v9571_v41  ;;  %v6545_v41 = vadd.f32 %v6544_v46, %v6543_v7 }
 0xe36   :  { %v6534_v45 = vmul.f32 0.0, %v6532_v43 }
 0xe38   :  { %v13449_v52 = vadd.f32 %v6535_v6, %v6534_v45 }
 0xe3a   :  { %9574 = vtanh.f32 %v13449_v52 }
 0xe47   :  { %v9575_v9 = vpop.eup %9574 }
 0xe48   :  { %v6540_v55 = vmul.f32 %v9575_v9, %v6538_v3 }
 0xe4a   :  { %6541 = vst [vmem:[#allocation3] sm:$0x1] %v6540_v55  ;;  %6542 = vst [vmem:[#allocation4 + $0x7] sm:$0x1] %v6540_v55  ;;  %v6546_v13 = vpack.c.bf16 %v6540_v55, %v6540_v55 }
 0xe4c   :  { %6580 = vmatmul.mubr.bf16.vlgmr.msra.gmra.mxu0 %v6546_v13  ;;  %6621 = vmatmul.mubr.bf16.vlgmr.msra.gmra.mxu1 %v6546_v13 }
 0xe4d   :  { %6686 = vmatpush1.bf16.msra.mxu0 %v13237_v57  ;;  %6727 = vmatpush1.bf16.msra.mxu1 %v13241_v60 }
 0xe4e   :  { %6687 = vmatprep.subr.bf16.mxu0 %v13247_v23  ;;  %6728 = vmatprep.subr.bf16.mxu1 %v13251_v20 }
 0xe4f   :  { %6717 = vmatprep.mubr.bf16.mxu0 %v14066_v27  ;;  %6758 = vmatprep.mubr.bf16.mxu1 %v14066_v27 }
 0xe51   :  { %6688 = vmatpush1.bf16.msra.mxu0 %v13259_v48  ;;  %6729 = vmatpush1.bf16.msra.mxu1 %v13263_v49 }
 0xe52   :  { %6689 = vmatprep.subr.bf16.mxu0 %v13269_v8  ;;  %6730 = vmatprep.subr.bf16.mxu1 %v13273_v1 }
 0xe55   :  { %6690 = vmatpush1.bf16.msra.mxu0 %v13281_v44  ;;  %6731 = vmatpush1.bf16.msra.mxu1 %v13285_v26 }
 0xe56   :  { %6691 = vmatprep.subr.bf16.mxu0 %v13291_v63  ;;  %6732 = vmatprep.subr.bf16.mxu1 %v13295_v32 }
 0xe59   :  { %6692 = vmatpush1.bf16.msra.mxu0 %v13301_v2  ;;  %6733 = vmatpush1.bf16.msra.mxu1 %v13305_v62 }
 0xe5a   :  { %6693 = vmatprep.subr.bf16.mxu0 %v13311_v36  ;;  %6734 = vmatprep.subr.bf16.mxu1 %v13315_v54 }
 0xe5d   :  { %6694 = vmatpush1.bf16.msra.mxu0 %v13321_v19  ;;  %6735 = vmatpush1.bf16.msra.mxu1 %v13325_v4 }
 0xe5e   :  { %6695 = vmatprep.subr.bf16.mxu0 %v13331_v22  ;;  %6736 = vmatprep.subr.bf16.mxu1 %v13335_v50 }
 0xe61   :  { %6696 = vmatpush1.bf16.msra.mxu0 %v13341_v0  ;;  %6737 = vmatpush1.bf16.msra.mxu1 %v13345_v14 }
 0xe62   :  { %6697 = vmatprep.subr.bf16.mxu0 %v13351_v40  ;;  %6738 = vmatprep.subr.bf16.mxu1 %v13355_v28 }
 0xe65   :  { %6698 = vmatpush1.bf16.msra.mxu0 %v13361_v47  ;;  %6739 = vmatpush1.bf16.msra.mxu1 %v13365_v42 }
 0xe66   :  { %6699 = vmatprep.subr.bf16.mxu0 %v13371_v25  ;;  %6740 = vmatprep.subr.bf16.mxu1 %v13375_v39 }
 0xe69   :  { %6700 = vmatpush1.bf16.msra.mxu0 %v13381_v30  ;;  %6741 = vmatpush1.bf16.msra.mxu1 %v13385_v61 }
 0xe6a   :  { %6823 = vmatprep.subr.bf16.mxu0 %v13229_v16  ;;  %6864 = vmatprep.subr.bf16.mxu1 %v13233_v56 }
 0xf0c   :  { %v6581_v18 = vpop.f32.mrf.mxu0  ;;  %v6622_v10 = vpop.f32.mrf.mxu1 }
 0xf0e   :  { %v6583_v11 = vpop.f32.mrf.mxu0  ;;  %v6624_v5 = vpop.f32.mrf.mxu1 }
 0xf0f   :  { %v6633_v53 = vcombine.low %v6581_v18, %v6583_v11  ;;  %v6634_v38 = vcombine.low %v6622_v10, %v6624_v5 }
 0xf10   :  { %v6585_v21 = vpop.f32.mrf.mxu0  ;;  %v6626_v59 = vpop.f32.mrf.mxu1 }
 0xf11   :  { %v6641_v37 = vrot.slane %v6633_v53, %v12719_v33  ;;  %v6648_v24 = vrot.slane %v6634_v38, %v12719_v33 }
 0xf12   :  { %v6586_v29 = vpop.f32.mrf.mxu0  ;;  %v6627_v17 = vpop.f32.mrf.mxu1 }
 0xf13   :  { %v6649_v35 = vcombine.low %v6641_v37, %v6648_v24 }
 0xf15   :  { %v6656_v43 = vrot.slane %v6649_v35, %v12719_v33 }
 0xf17   :  { %v6658_v31 = vadd.f32 %v6656_v43, %v6545_v41 }
 0xf19   :  { %v8415_v45 = vmul.f32 -1.442695, %v6658_v31  ;;  %v6666_v9 = vrot.slane %v6658_v31, 3  ;;  %v6682_v31 = vld [vmem:[#allocation2 + $0x25] ss:$8 sm:$0xf] }
 0xf1b   :  { %9576 = vpow2.f32 %v8415_v45 }
 0xf28   :  { %v9577_v6 = vpop.eup %9576 }
 0xf29   :  { %v6662_v3 = vadd.f32 1.0, %v9577_v6 }
 0xf2b   :  { %9578 = vrcp.f32 %v6662_v3 }
 0xf2c   :  { %9580 = vtanh.f32 %v6666_v9  ;;  %v6681_v9 = vld [vmem:[#allocation2 + $0x2] ss:$8 sm:$0xf] }
 0xf38   :  { %v9579_v55 = vpop.eup %9578 }
 0xf39   :  { %v6670_v13 = vrot.slane %v9579_v55, 1  ;;  %v9581_v18 = vpop.eup %9580  ;;  %v6676_v53 = vrot.slane %v9579_v55, 2 }
 0xf3a   :  { %v6673_v11 = vmul.f32 %v9581_v18, %v9579_v55  ;;  %v6683_v55 = vadd.f32 %v6682_v31, %v6681_v9 }
 0xf3b   :  { %v6672_v10 = vmul.f32 %v6670_v13, %v13449_v52 }
 0xf3d   :  { %v13490_v5 = vadd.f32 %v6673_v11, %v6672_v10 }
 0xf3f   :  { %9582 = vtanh.f32 %v13490_v5 }
 0xf4c   :  { %v9583_v38 = vpop.eup %9582 }
 0xf4d   :  { %v6678_v21 = vmul.f32 %v9583_v38, %v6676_v53 }
 0xf4f   :  { %6679 = vst [vmem:[#allocation3 + $0x1] sm:$0x1] %v6678_v21  ;;  %6680 = vst [vmem:[#allocation4 + $0x6] sm:$0x1] %v6678_v21  ;;  %v6684_v59 = vpack.c.bf16 %v6678_v21, %v6678_v21 }
 0xf51   :  { %6718 = vmatmul.mubr.bf16.vlgmr.msra.gmra.mxu0 %v6684_v59  ;;  %6759 = vmatmul.mubr.bf16.vlgmr.msra.gmra.mxu1 %v6684_v59 }
 0xf52   :  { %6824 = vmatpush1.bf16.msra.mxu0 %v13237_v57  ;;  %6865 = vmatpush1.bf16.msra.mxu1 %v13241_v60 }
 0xf53   :  { %6825 = vmatprep.subr.bf16.mxu0 %v13247_v23  ;;  %6866 = vmatprep.subr.bf16.mxu1 %v13251_v20 }
 0xf54   :  { %6855 = vmatprep.mubr.bf16.mxu0 %v14066_v27  ;;  %6896 = vmatprep.mubr.bf16.mxu1 %v14066_v27 }
 0xf56   :  { %6826 = vmatpush1.bf16.msra.mxu0 %v13259_v48  ;;  %6867 = vmatpush1.bf16.msra.mxu1 %v13263_v49 }
 0xf57   :  { %6827 = vmatprep.subr.bf16.mxu0 %v13269_v8  ;;  %6868 = vmatprep.subr.bf16.mxu1 %v13273_v1 }
 0xf5a   :  { %6828 = vmatpush1.bf16.msra.mxu0 %v13281_v44  ;;  %6869 = vmatpush1.bf16.msra.mxu1 %v13285_v26 }
 0xf5b   :  { %6829 = vmatprep.subr.bf16.mxu0 %v13291_v63  ;;  %6870 = vmatprep.subr.bf16.mxu1 %v13295_v32 }
 0xf5e   :  { %6830 = vmatpush1.bf16.msra.mxu0 %v13301_v2  ;;  %6871 = vmatpush1.bf16.msra.mxu1 %v13305_v62 }
 0xf5f   :  { %6831 = vmatprep.subr.bf16.mxu0 %v13311_v36  ;;  %6872 = vmatprep.subr.bf16.mxu1 %v13315_v54 }
 0xf62   :  { %6832 = vmatpush1.bf16.msra.mxu0 %v13321_v19  ;;  %6873 = vmatpush1.bf16.msra.mxu1 %v13325_v4 }
 0xf63   :  { %6833 = vmatprep.subr.bf16.mxu0 %v13331_v22  ;;  %6874 = vmatprep.subr.bf16.mxu1 %v13335_v50 }
 0xf66   :  { %6834 = vmatpush1.bf16.msra.mxu0 %v13341_v0  ;;  %6875 = vmatpush1.bf16.msra.mxu1 %v13345_v14 }
 0xf67   :  { %6835 = vmatprep.subr.bf16.mxu0 %v13351_v40  ;;  %6876 = vmatprep.subr.bf16.mxu1 %v13355_v28 }
 0xf6a   :  { %6836 = vmatpush1.bf16.msra.mxu0 %v13361_v47  ;;  %6877 = vmatpush1.bf16.msra.mxu1 %v13365_v42 }
 0xf6b   :  { %6837 = vmatprep.subr.bf16.mxu0 %v13371_v25  ;;  %6878 = vmatprep.subr.bf16.mxu1 %v13375_v39 }
 0xf6e   :  { %6838 = vmatpush1.bf16.msra.mxu0 %v13381_v30  ;;  %6879 = vmatpush1.bf16.msra.mxu1 %v13385_v61 }
 0xf6f   :  { %6961 = vmatprep.subr.bf16.mxu0 %v13229_v16  ;;  %7002 = vmatprep.subr.bf16.mxu1 %v13233_v56 }
0x1011   :  { %v6719_v52 = vpop.f32.mrf.mxu0  ;;  %v6760_v37 = vpop.f32.mrf.mxu1 }
0x1013   :  { %v6721_v24 = vpop.f32.mrf.mxu0  ;;  %v6762_v46 = vpop.f32.mrf.mxu1 }
0x1014   :  { %v6771_v29 = vcombine.low %v6719_v52, %v6721_v24  ;;  %v6772_v17 = vcombine.low %v6760_v37, %v6762_v46 }
0x1015   :  { %v6723_v35 = vpop.f32.mrf.mxu0  ;;  %v6764_v7 = vpop.f32.mrf.mxu1 }
0x1016   :  { %v6779_v41 = vrot.slane %v6771_v29, %v12719_v33  ;;  %v6786_v43 = vrot.slane %v6772_v17, %v12719_v33 }
0x1017   :  { %v6724_v45 = vpop.f32.mrf.mxu0  ;;  %v6765_v6 = vpop.f32.mrf.mxu1 }
0x1018   :  { %v6787_v3 = vcombine.low %v6779_v41, %v6786_v43 }
0x101a   :  { %v6794_v13 = vrot.slane %v6787_v3, %v12719_v33 }
0x101c   :  { %v6796_v18 = vadd.f32 %v6794_v13, %v6683_v55 }
0x101e   :  { %v8416_v10 = vmul.f32 -1.442695, %v6796_v18  ;;  %v6804_v38 = vrot.slane %v6796_v18, 3  ;;  %v6820_v18 = vld [vmem:[#allocation2 + $0x24] ss:$8 sm:$0xf] }
0x1020   :  { %9584 = vpow2.f32 %v8416_v10 }
0x102d   :  { %v9585_v11 = vpop.eup %9584 }
0x102e   :  { %v6800_v53 = vadd.f32 1.0, %v9585_v11 }
0x1030   :  { %9586 = vrcp.f32 %v6800_v53 }
0x1031   :  { %9588 = vtanh.f32 %v6804_v38  ;;  %v6819_v38 = vld [vmem:[#allocation2 + $0x3] ss:$8 sm:$0xf] }
0x103d   :  { %v9587_v21 = vpop.eup %9586 }
0x103e   :  { %v6808_v59 = vrot.slane %v9587_v21, 1  ;;  %v9589_v52 = vpop.eup %9588  ;;  %v6814_v29 = vrot.slane %v9587_v21, 2 }
0x103f   :  { %v6811_v24 = vmul.f32 %v9589_v52, %v9587_v21  ;;  %v6821_v21 = vadd.f32 %v6820_v18, %v6819_v38 }
0x1040   :  { %v6810_v37 = vmul.f32 %v6808_v59, %v13490_v5 }
0x1042   :  { %v13531_v46 = vadd.f32 %v6811_v24, %v6810_v37 }
0x1044   :  { %9590 = vtanh.f32 %v13531_v46 }
0x1051   :  { %v9591_v17 = vpop.eup %9590 }
0x1052   :  { %v6816_v35 = vmul.f32 %v9591_v17, %v6814_v29 }
0x1054   :  { %6817 = vst [vmem:[#allocation3 + $0x2] sm:$0x1] %v6816_v35  ;;  %6818 = vst [vmem:[#allocation4 + $0x5] sm:$0x1] %v6816_v35  ;;  %v6822_v7 = vpack.c.bf16 %v6816_v35, %v6816_v35 }
0x1056   :  { %6856 = vmatmul.mubr.bf16.vlgmr.msra.gmra.mxu0 %v6822_v7  ;;  %6897 = vmatmul.mubr.bf16.vlgmr.msra.gmra.mxu1 %v6822_v7 }
0x1057   :  { %6962 = vmatpush1.bf16.msra.mxu0 %v13237_v57  ;;  %7003 = vmatpush1.bf16.msra.mxu1 %v13241_v60 }
0x1058   :  { %6963 = vmatprep.subr.bf16.mxu0 %v13247_v23  ;;  %7004 = vmatprep.subr.bf16.mxu1 %v13251_v20 }
0x1059   :  { %6993 = vmatprep.mubr.bf16.mxu0 %v14066_v27  ;;  %7034 = vmatprep.mubr.bf16.mxu1 %v14066_v27 }
0x105b   :  { %6964 = vmatpush1.bf16.msra.mxu0 %v13259_v48  ;;  %7005 = vmatpush1.bf16.msra.mxu1 %v13263_v49 }
0x105c   :  { %6965 = vmatprep.subr.bf16.mxu0 %v13269_v8  ;;  %7006 = vmatprep.subr.bf16.mxu1 %v13273_v1 }
0x105f   :  { %6966 = vmatpush1.bf16.msra.mxu0 %v13281_v44  ;;  %7007 = vmatpush1.bf16.msra.mxu1 %v13285_v26 }
0x1060   :  { %6967 = vmatprep.subr.bf16.mxu0 %v13291_v63  ;;  %7008 = vmatprep.subr.bf16.mxu1 %v13295_v32 }
0x1063   :  { %6968 = vmatpush1.bf16.msra.mxu0 %v13301_v2  ;;  %7009 = vmatpush1.bf16.msra.mxu1 %v13305_v62 }
0x1064   :  { %6969 = vmatprep.subr.bf16.mxu0 %v13311_v36  ;;  %7010 = vmatprep.subr.bf16.mxu1 %v13315_v54 }
0x1067   :  { %6970 = vmatpush1.bf16.msra.mxu0 %v13321_v19  ;;  %7011 = vmatpush1.bf16.msra.mxu1 %v13325_v4 }
0x1068   :  { %6971 = vmatprep.subr.bf16.mxu0 %v13331_v22  ;;  %7012 = vmatprep.subr.bf16.mxu1 %v13335_v50 }
0x106b   :  { %6972 = vmatpush1.bf16.msra.mxu0 %v13341_v0  ;;  %7013 = vmatpush1.bf16.msra.mxu1 %v13345_v14 }
0x106c   :  { %6973 = vmatprep.subr.bf16.mxu0 %v13351_v40  ;;  %7014 = vmatprep.subr.bf16.mxu1 %v13355_v28 }
0x106f   :  { %6974 = vmatpush1.bf16.msra.mxu0 %v13361_v47  ;;  %7015 = vmatpush1.bf16.msra.mxu1 %v13365_v42 }
0x1070   :  { %6975 = vmatprep.subr.bf16.mxu0 %v13371_v25  ;;  %7016 = vmatprep.subr.bf16.mxu1 %v13375_v39 }
0x1073   :  { %6976 = vmatpush1.bf16.msra.mxu0 %v13381_v30  ;;  %7017 = vmatpush1.bf16.msra.mxu1 %v13385_v61 }
0x1074   :  { %7099 = vmatprep.subr.bf16.mxu0 %v13229_v16  ;;  %7140 = vmatprep.subr.bf16.mxu1 %v13233_v56 }
0x1116   :  { %v6857_v5 = vpop.f32.mrf.mxu0  ;;  %v6898_v41 = vpop.f32.mrf.mxu1 }
0x1118   :  { %v6859_v43 = vpop.f32.mrf.mxu0  ;;  %v6900_v31 = vpop.f32.mrf.mxu1 }
0x1119   :  { %v6909_v45 = vcombine.low %v6857_v5, %v6859_v43  ;;  %v6910_v6 = vcombine.low %v6898_v41, %v6900_v31 }
0x111a   :  { %v6861_v3 = vpop.f32.mrf.mxu0  ;;  %v6902_v9 = vpop.f32.mrf.mxu1 }
0x111b   :  { %v6917_v55 = vrot.slane %v6909_v45, %v12719_v33  ;;  %v6924_v13 = vrot.slane %v6910_v6, %v12719_v33 }
0x111c   :  { %v6862_v10 = vpop.f32.mrf.mxu0  ;;  %v6903_v11 = vpop.f32.mrf.mxu1 }
0x111d   :  { %v6925_v53 = vcombine.low %v6917_v55, %v6924_v13 }
0x111f   :  { %v6932_v59 = vrot.slane %v6925_v53, %v12719_v33 }
0x1121   :  { %v6934_v52 = vadd.f32 %v6932_v59, %v6821_v21 }
0x1123   :  { %v8417_v37 = vmul.f32 -1.442695, %v6934_v52  ;;  %v6942_v17 = vrot.slane %v6934_v52, 3  ;;  %v6958_v52 = vld [vmem:[#allocation2 + $0x23] ss:$8 sm:$0xf] }
0x1125   :  { %9592 = vpow2.f32 %v8417_v37 }
0x1132   :  { %v9593_v24 = vpop.eup %9592 }
0x1133   :  { %v6938_v29 = vadd.f32 1.0, %v9593_v24 }
0x1135   :  { %9594 = vrcp.f32 %v6938_v29 }
0x1136   :  { %9596 = vtanh.f32 %v6942_v17  ;;  %v6957_v17 = vld [vmem:[#allocation2 + $0x4] ss:$8 sm:$0xf] }
0x1142   :  { %v9595_v35 = vpop.eup %9594 }
0x1143   :  { %v6946_v7 = vrot.slane %v9595_v35, 1  ;;  %v9597_v5 = vpop.eup %9596  ;;  %v6952_v45 = vrot.slane %v9595_v35, 2 }
0x1144   :  { %v6949_v43 = vmul.f32 %v9597_v5, %v9595_v35  ;;  %v6959_v35 = vadd.f32 %v6958_v52, %v6957_v17 }
0x1145   :  { %v6948_v41 = vmul.f32 %v6946_v7, %v13531_v46 }
0x1147   :  { %v13572_v31 = vadd.f32 %v6949_v43, %v6948_v41 }
0x1149   :  { %9598 = vtanh.f32 %v13572_v31 }
0x1156   :  { %v9599_v6 = vpop.eup %9598 }
0x1157   :  { %v6954_v3 = vmul.f32 %v9599_v6, %v6952_v45 }
0x1159   :  { %6955 = vst [vmem:[#allocation3 + $0x3] sm:$0x1] %v6954_v3  ;;  %6956 = vst [vmem:[#allocation4 + $0x4] sm:$0x1] %v6954_v3  ;;  %v6960_v9 = vpack.c.bf16 %v6954_v3, %v6954_v3 }
0x115b   :  { %6994 = vmatmul.mubr.bf16.vlgmr.msra.gmra.mxu0 %v6960_v9  ;;  %7035 = vmatmul.mubr.bf16.vlgmr.msra.gmra.mxu1 %v6960_v9 }
0x115c   :  { %7100 = vmatpush1.bf16.msra.mxu0 %v13237_v57  ;;  %7141 = vmatpush1.bf16.msra.mxu1 %v13241_v60 }
0x115d   :  { %7101 = vmatprep.subr.bf16.mxu0 %v13247_v23  ;;  %7142 = vmatprep.subr.bf16.mxu1 %v13251_v20 }
0x115e   :  { %7131 = vmatprep.mubr.bf16.mxu0 %v14066_v27  ;;  %7172 = vmatprep.mubr.bf16.mxu1 %v14066_v27 }
0x1160   :  { %7102 = vmatpush1.bf16.msra.mxu0 %v13259_v48  ;;  %7143 = vmatpush1.bf16.msra.mxu1 %v13263_v49 }
0x1161   :  { %7103 = vmatprep.subr.bf16.mxu0 %v13269_v8  ;;  %7144 = vmatprep.subr.bf16.mxu1 %v13273_v1 }
0x1164   :  { %7104 = vmatpush1.bf16.msra.mxu0 %v13281_v44  ;;  %7145 = vmatpush1.bf16.msra.mxu1 %v13285_v26 }
0x1165   :  { %7105 = vmatprep.subr.bf16.mxu0 %v13291_v63  ;;  %7146 = vmatprep.subr.bf16.mxu1 %v13295_v32 }
0x1168   :  { %7106 = vmatpush1.bf16.msra.mxu0 %v13301_v2  ;;  %7147 = vmatpush1.bf16.msra.mxu1 %v13305_v62 }
0x1169   :  { %7107 = vmatprep.subr.bf16.mxu0 %v13311_v36  ;;  %7148 = vmatprep.subr.bf16.mxu1 %v13315_v54 }
0x116c   :  { %7108 = vmatpush1.bf16.msra.mxu0 %v13321_v19  ;;  %7149 = vmatpush1.bf16.msra.mxu1 %v13325_v4 }
0x116d   :  { %7109 = vmatprep.subr.bf16.mxu0 %v13331_v22  ;;  %7150 = vmatprep.subr.bf16.mxu1 %v13335_v50 }
0x1170   :  { %7110 = vmatpush1.bf16.msra.mxu0 %v13341_v0  ;;  %7151 = vmatpush1.bf16.msra.mxu1 %v13345_v14 }
0x1171   :  { %7111 = vmatprep.subr.bf16.mxu0 %v13351_v40  ;;  %7152 = vmatprep.subr.bf16.mxu1 %v13355_v28 }
0x1174   :  { %7112 = vmatpush1.bf16.msra.mxu0 %v13361_v47  ;;  %7153 = vmatpush1.bf16.msra.mxu1 %v13365_v42 }
0x1175   :  { %7113 = vmatprep.subr.bf16.mxu0 %v13371_v25  ;;  %7154 = vmatprep.subr.bf16.mxu1 %v13375_v39 }
0x1178   :  { %7114 = vmatpush1.bf16.msra.mxu0 %v13381_v30  ;;  %7155 = vmatpush1.bf16.msra.mxu1 %v13385_v61 }
0x1179   :  { %7237 = vmatprep.subr.bf16.mxu0 %v13229_v16  ;;  %7278 = vmatprep.subr.bf16.mxu1 %v13233_v56 }
0x121b   :  { %v6995_v46 = vpop.f32.mrf.mxu0  ;;  %v7036_v55 = vpop.f32.mrf.mxu1 }
0x121d   :  { %v6997_v13 = vpop.f32.mrf.mxu0  ;;  %v7038_v18 = vpop.f32.mrf.mxu1 }
0x121e   :  { %v7047_v10 = vcombine.low %v6995_v46, %v6997_v13  ;;  %v7048_v11 = vcombine.low %v7036_v55, %v7038_v18 }
0x121f   :  { %v6999_v53 = vpop.f32.mrf.mxu0  ;;  %v7040_v38 = vpop.f32.mrf.mxu1 }
0x1220   :  { %v7055_v21 = vrot.slane %v7047_v10, %v12719_v33  ;;  %v7062_v59 = vrot.slane %v7048_v11, %v12719_v33 }
0x1221   :  { %v7000_v37 = vpop.f32.mrf.mxu0  ;;  %v7041_v24 = vpop.f32.mrf.mxu1 }
0x1222   :  { %v7063_v29 = vcombine.low %v7055_v21, %v7062_v59 }
0x1224   :  { %v7070_v7 = vrot.slane %v7063_v29, %v12719_v33 }
0x1226   :  { %v7072_v5 = vadd.f32 %v7070_v7, %v6959_v35 }
0x1228   :  { %v8418_v41 = vmul.f32 -1.442695, %v7072_v5  ;;  %v7080_v6 = vrot.slane %v7072_v5, 3  ;;  %v7096_v5 = vld [vmem:[#allocation2 + $0x22] ss:$8 sm:$0xf] }
0x122a   :  { %9600 = vpow2.f32 %v8418_v41 }
0x1237   :  { %v9601_v43 = vpop.eup %9600 }
0x1238   :  { %v7076_v45 = vadd.f32 1.0, %v9601_v43 }
0x123a   :  { %9602 = vrcp.f32 %v7076_v45 }
0x123b   :  { %9604 = vtanh.f32 %v7080_v6  ;;  %v7095_v6 = vld [vmem:[#allocation2 + $0x5] ss:$8 sm:$0xf] }
0x1247   :  { %v9603_v3 = vpop.eup %9602 }
0x1248   :  { %v7084_v9 = vrot.slane %v9603_v3, 1  ;;  %v9605_v46 = vpop.eup %9604  ;;  %v7090_v10 = vrot.slane %v9603_v3, 2 }
0x1249   :  { %v7087_v13 = vmul.f32 %v9605_v46, %v9603_v3 }
0x124a   :  { %v7086_v55 = vmul.f32 %v7084_v9, %v13572_v31 }
0x124c   :  { %v13613_v18 = vadd.f32 %v7087_v13, %v7086_v55 }
0x124e   :  { %9606 = vtanh.f32 %v13613_v18 }
0x125b   :  { %v9607_v11 = vpop.eup %9606 }
0x125c   :  { %v7092_v53 = vmul.f32 %v9607_v11, %v7090_v10 }
0x125e   :  { %7093 = vst [vmem:[#allocation3 + $0x4] sm:$0x1] %v7092_v53  ;;  %7094 = vst [vmem:[#allocation4 + $0x3] sm:$0x1] %v7092_v53  ;;  %v7098_v38 = vpack.c.bf16 %v7092_v53, %v7092_v53 }
0x1260   :  { %7132 = vmatmul.mubr.bf16.vlgmr.msra.gmra.mxu0 %v7098_v38  ;;  %7173 = vmatmul.mubr.bf16.vlgmr.msra.gmra.mxu1 %v7098_v38 }
0x1261   :  { %7238 = vmatpush1.bf16.msra.mxu0 %v13237_v57  ;;  %7279 = vmatpush1.bf16.msra.mxu1 %v13241_v60 }
0x1262   :  { %7239 = vmatprep.subr.bf16.mxu0 %v13247_v23  ;;  %7280 = vmatprep.subr.bf16.mxu1 %v13251_v20 }
0x1263   :  { %7269 = vmatprep.mubr.bf16.mxu0 %v14066_v27  ;;  %7310 = vmatprep.mubr.bf16.mxu1 %v14066_v27 }
0x1265   :  { %7240 = vmatpush1.bf16.msra.mxu0 %v13259_v48  ;;  %7281 = vmatpush1.bf16.msra.mxu1 %v13263_v49 }
0x1266   :  { %7241 = vmatprep.subr.bf16.mxu0 %v13269_v8  ;;  %7282 = vmatprep.subr.bf16.mxu1 %v13273_v1 }
0x1269   :  { %7242 = vmatpush1.bf16.msra.mxu0 %v13281_v44  ;;  %7283 = vmatpush1.bf16.msra.mxu1 %v13285_v26 }
0x126a   :  { %7243 = vmatprep.subr.bf16.mxu0 %v13291_v63  ;;  %7284 = vmatprep.subr.bf16.mxu1 %v13295_v32 }
0x126d   :  { %7244 = vmatpush1.bf16.msra.mxu0 %v13301_v2  ;;  %7285 = vmatpush1.bf16.msra.mxu1 %v13305_v62 }
0x126e   :  { %7245 = vmatprep.subr.bf16.mxu0 %v13311_v36  ;;  %7286 = vmatprep.subr.bf16.mxu1 %v13315_v54 }
0x1271   :  { %7246 = vmatpush1.bf16.msra.mxu0 %v13321_v19  ;;  %7287 = vmatpush1.bf16.msra.mxu1 %v13325_v4 }
0x1272   :  { %7247 = vmatprep.subr.bf16.mxu0 %v13331_v22  ;;  %7288 = vmatprep.subr.bf16.mxu1 %v13335_v50 }
0x1275   :  { %7248 = vmatpush1.bf16.msra.mxu0 %v13341_v0  ;;  %7289 = vmatpush1.bf16.msra.mxu1 %v13345_v14 }
0x1276   :  { %7249 = vmatprep.subr.bf16.mxu0 %v13351_v40  ;;  %7290 = vmatprep.subr.bf16.mxu1 %v13355_v28 }
0x1279   :  { %7250 = vmatpush1.bf16.msra.mxu0 %v13361_v47  ;;  %7291 = vmatpush1.bf16.msra.mxu1 %v13365_v42 }
0x127a   :  { %7251 = vmatprep.subr.bf16.mxu0 %v13371_v25  ;;  %7292 = vmatprep.subr.bf16.mxu1 %v13375_v39 }
0x127d   :  { %7252 = vmatpush1.bf16.msra.mxu0 %v13381_v30  ;;  %7293 = vmatpush1.bf16.msra.mxu1 %v13385_v61 }
0x127e   :  { %7375 = vmatprep.subr.bf16.mxu0 %v13229_v16  ;;  %7416 = vmatprep.subr.bf16.mxu1 %v13233_v56  ;;  %v7097_v16 = vadd.f32 %v7096_v5, %v7095_v6 }
0x1320   :  { %v7133_v31 = vpop.f32.mrf.mxu0  ;;  %v7174_v21 = vpop.f32.mrf.mxu1 }
0x1322   :  { %v7135_v59 = vpop.f32.mrf.mxu0  ;;  %v7176_v52 = vpop.f32.mrf.mxu1 }
0x1323   :  { %v7185_v37 = vcombine.low %v7133_v31, %v7135_v59  ;;  %v7186_v24 = vcombine.low %v7174_v21, %v7176_v52 }
0x1324   :  { %v7137_v29 = vpop.f32.mrf.mxu0  ;;  %v7178_v17 = vpop.f32.mrf.mxu1 }
0x1325   :  { %v7193_v35 = vrot.slane %v7185_v37, %v12719_v33  ;;  %v7200_v7 = vrot.slane %v7186_v24, %v12719_v33 }
0x1326   :  { %v7138_v41 = vpop.f32.mrf.mxu0  ;;  %v7179_v43 = vpop.f32.mrf.mxu1 }
0x1327   :  { %v7201_v45 = vcombine.low %v7193_v35, %v7200_v7 }
0x1329   :  { %v7208_v56 = vrot.slane %v7201_v45, %v12719_v33 }
0x132b   :  { %v7210_v3 = vadd.f32 %v7208_v56, %v7097_v16  ;;  %v7372_v56 = vld [vmem:[#allocation2 + $0x20] ss:$8 sm:$0xf] }
0x132d   :  { %v8419_v9 = vmul.f32 -1.442695, %v7210_v3  ;;  %v7218_v13 = vrot.slane %v7210_v3, 3 }
0x132f   :  { %9608 = vpow2.f32 %v8419_v9 }
0x133c   :  { %v9609_v46 = vpop.eup %9608 }
0x133d   :  { %v7214_v55 = vadd.f32 1.0, %v9609_v46 }
0x133f   :  { %9610 = vrcp.f32 %v7214_v55  ;;  %v7371_v55 = vld [vmem:[#allocation2 + $0x7] ss:$8 sm:$0xf] }
0x1340   :  { %9612 = vtanh.f32 %v7218_v13  ;;  %v7373_v13 = vadd.f32 %v7372_v56, %v7371_v55 }
0x134c   :  { %v9611_v10 = vpop.eup %9610 }
0x134d   :  { %v7222_v11 = vrot.slane %v9611_v10, 1  ;;  %v9613_v53 = vpop.eup %9612  ;;  %v7228_v59 = vrot.slane %v9611_v10, 2 }
0x134e   :  { %v7225_v31 = vmul.f32 %v9613_v53, %v9611_v10 }
0x134f   :  { %v7224_v38 = vmul.f32 %v7222_v11, %v13613_v18 }
0x1351   :  { %v13654_v21 = vadd.f32 %v7225_v31, %v7224_v38 }
0x1353   :  { %9614 = vtanh.f32 %v13654_v21 }
0x1360   :  { %v9615_v52 = vpop.eup %9614 }
0x1361   :  { %v7230_v37 = vmul.f32 %v9615_v52, %v7228_v59 }
0x1363   :  { %7231 = vst [vmem:[#allocation3 + $0x5] sm:$0x1] %v7230_v37  ;;  %7232 = vst [vmem:[#allocation4 + $0x2] sm:$0x1] %v7230_v37  ;;  %v7236_v24 = vpack.c.bf16 %v7230_v37, %v7230_v37 }
0x1365   :  { %7270 = vmatmul.mubr.bf16.vlgmr.msra.gmra.mxu0 %v7236_v24  ;;  %7311 = vmatmul.mubr.bf16.vlgmr.msra.gmra.mxu1 %v7236_v24 }
0x1366   :  { %7376 = vmatpush1.bf16.msra.mxu0 %v13237_v57  ;;  %7417 = vmatpush1.bf16.msra.mxu1 %v13241_v60 }
0x1367   :  { %7377 = vmatprep.subr.bf16.mxu0 %v13247_v23  ;;  %7418 = vmatprep.subr.bf16.mxu1 %v13251_v20 }
0x1368   :  { %7407 = vmatprep.mubr.bf16.mxu0 %v14066_v27  ;;  %7448 = vmatprep.mubr.bf16.mxu1 %v14066_v27 }
0x136a   :  { %7378 = vmatpush1.bf16.msra.mxu0 %v13259_v48  ;;  %7419 = vmatpush1.bf16.msra.mxu1 %v13263_v49 }
0x136b   :  { %7379 = vmatprep.subr.bf16.mxu0 %v13269_v8  ;;  %7420 = vmatprep.subr.bf16.mxu1 %v13273_v1 }
0x136e   :  { %7380 = vmatpush1.bf16.msra.mxu0 %v13281_v44  ;;  %7421 = vmatpush1.bf16.msra.mxu1 %v13285_v26  ;;  %v7234_v26 = vld [vmem:[#allocation2 + $0x21] ss:$8 sm:$0xf] }
0x136f   :  { %7381 = vmatprep.subr.bf16.mxu0 %v13291_v63  ;;  %7422 = vmatprep.subr.bf16.mxu1 %v13295_v32 }
0x1372   :  { %7382 = vmatpush1.bf16.msra.mxu0 %v13301_v2  ;;  %7423 = vmatpush1.bf16.msra.mxu1 %v13305_v62  ;;  %v7233_v62 = vld [vmem:[#allocation2 + $0x6] ss:$8 sm:$0xf] }
0x1373   :  { %7383 = vmatprep.subr.bf16.mxu0 %v13311_v36  ;;  %7424 = vmatprep.subr.bf16.mxu1 %v13315_v54  ;;  %v7235_v36 = vadd.f32 %v7234_v26, %v7233_v62 }
0x1376   :  { %7384 = vmatpush1.bf16.msra.mxu0 %v13321_v19  ;;  %7425 = vmatpush1.bf16.msra.mxu1 %v13325_v4 }
0x1377   :  { %7385 = vmatprep.subr.bf16.mxu0 %v13331_v22  ;;  %7426 = vmatprep.subr.bf16.mxu1 %v13335_v50 }
0x137a   :  { %7386 = vmatpush1.bf16.msra.mxu0 %v13341_v0  ;;  %7427 = vmatpush1.bf16.msra.mxu1 %v13345_v14 }
0x137b   :  { %7387 = vmatprep.subr.bf16.mxu0 %v13351_v40  ;;  %7428 = vmatprep.subr.bf16.mxu1 %v13355_v28 }
0x137e   :  { %7388 = vmatpush1.bf16.msra.mxu0 %v13361_v47  ;;  %7429 = vmatpush1.bf16.msra.mxu1 %v13365_v42 }
0x137f   :  { %7389 = vmatprep.subr.bf16.mxu0 %v13371_v25  ;;  %7430 = vmatprep.subr.bf16.mxu1 %v13375_v39 }
0x1382   :  { %7390 = vmatpush1.bf16.msra.mxu0 %v13381_v30  ;;  %7431 = vmatpush1.bf16.msra.mxu1 %v13385_v61 }
0x1425   :  { %v7271_v27 = vpop.f32.mrf.mxu0  ;;  %v7312_v57 = vpop.f32.mrf.mxu1 }
0x1427   :  { %v7273_v60 = vpop.f32.mrf.mxu0  ;;  %v7314_v23 = vpop.f32.mrf.mxu1 }
0x1428   :  { %v7323_v20 = vcombine.low %v7271_v27, %v7273_v60  ;;  %v7324_v48 = vcombine.low %v7312_v57, %v7314_v23 }
0x1429   :  { %v7275_v49 = vpop.f32.mrf.mxu0  ;;  %v7316_v8 = vpop.f32.mrf.mxu1 }
0x142a   :  { %v7331_v1 = vrot.slane %v7323_v20, %v12719_v33  ;;  %v7338_v44 = vrot.slane %v7324_v48, %v12719_v33 }
0x142b   :  { %v7276_v63 = vpop.f32.mrf.mxu0  ;;  %v7317_v32 = vpop.f32.mrf.mxu1 }
0x142c   :  { %v7339_v2 = vcombine.low %v7331_v1, %v7338_v44 }
0x142e   :  { %v7346_v54 = vrot.slane %v7339_v2, %v12719_v33 }
0x1430   :  { %v7348_v19 = vadd.f32 %v7346_v54, %v7235_v36 }
0x1432   :  { %v8420_v4 = vmul.f32 -1.442695, %v7348_v19  ;;  %v7356_v0 = vrot.slane %v7348_v19, 3 }
0x1434   :  { %9616 = vpow2.f32 %v8420_v4 }
0x1441   :  { %v9617_v22 = vpop.eup %9616 }
0x1442   :  { %v7352_v50 = vadd.f32 1.0, %v9617_v22 }
0x1444   :  { %9618 = vrcp.f32 %v7352_v50 }
0x1445   :  { %9620 = vtanh.f32 %v7356_v0 }
0x1451   :  { %v9619_v14 = vpop.eup %9618 }
0x1452   :  { %v7360_v40 = vrot.slane %v9619_v14, 1  ;;  %v9621_v28 = vpop.eup %9620  ;;  %v7366_v39 = vrot.slane %v9619_v14, 2 }
0x1453   :  { %v7363_v42 = vmul.f32 %v9621_v28, %v9619_v14 }
0x1454   :  { %v7362_v47 = vmul.f32 %v7360_v40, %v13654_v21 }
0x1456   :  { %v7364_v25 = vadd.f32 %v7363_v42, %v7362_v47 }
0x1458   :  { %9622 = vtanh.f32 %v7364_v25 }
0x1465   :  { %v9623_v30 = vpop.eup %9622 }
0x1466   :  { %v7368_v61 = vmul.f32 %v9623_v30, %v7366_v39 }
0x1468   :  { %7369 = vst [vmem:[#allocation3 + $0x6] sm:$0x1] %v7368_v61  ;;  %7370 = vst [vmem:[#allocation4 + $0x1] sm:$0x1] %v7368_v61  ;;  %v7374_v18 = vpack.c.bf16 %v7368_v61, %v7368_v61 }
0x146a   :  { %7408 = vmatmul.mubr.bf16.vlgmr.msra.gmra.mxu0 %v7374_v18  ;;  %7449 = vmatmul.mubr.bf16.vlgmr.msra.gmra.mxu1 %v7374_v18 }
0x152a   :  { %v7409_v29 = vpop.f32.mrf.mxu0  ;;  %v7450_v17 = vpop.f32.mrf.mxu1 }
0x152c   :  { %v7411_v35 = vpop.f32.mrf.mxu0  ;;  %v7452_v7 = vpop.f32.mrf.mxu1 }
0x152d   :  { %v7461_v5 = vcombine.low %v7409_v29, %v7411_v35  ;;  %v7462_v41 = vcombine.low %v7450_v17, %v7452_v7 }
0x152e   :  { %v7413_v43 = vpop.f32.mrf.mxu0  ;;  %v7454_v45 = vpop.f32.mrf.mxu1 }
0x152f   :  { %v7469_v6 = vrot.slane %v7461_v5, %v12719_v33  ;;  %v7476_v16 = vrot.slane %v7462_v41, %v12719_v33 }
0x1530   :  { %v7414_v3 = vpop.f32.mrf.mxu0  ;;  %v7455_v9 = vpop.f32.mrf.mxu1 }
0x1531   :  { %v7477_v46 = vcombine.low %v7469_v6, %v7476_v16 }
0x1533   :  { %v7484_v10 = vrot.slane %v7477_v46, %v12719_v33 }
0x1535   :  { %v7486_v11 = vadd.f32 %v7484_v10, %v7373_v13 }
0x1537   :  { %v8421_v53 = vmul.f32 -1.442695, %v7486_v11  ;;  %v7494_v21 = vrot.slane %v7486_v11, 3 }
0x1539   :  { %9624 = vpow2.f32 %v8421_v53 }
0x1546   :  { %v9625_v38 = vpop.eup %9624 }
0x1547   :  { %v7490_v31 = vadd.f32 1.0, %v9625_v38 }
0x1549   :  { %9626 = vrcp.f32 %v7490_v31 }
0x154a   :  { %9628 = vtanh.f32 %v7494_v21 }
0x1556   :  { %v9627_v59 = vpop.eup %9626 }
0x1557   :  { %v7498_v52 = vrot.slane %v9627_v59, 1  ;;  %v9629_v37 = vpop.eup %9628  ;;  %v7504_v60 = vrot.slane %v9627_v59, 2 }
0x1558   :  { %v7501_v27 = vmul.f32 %v9629_v37, %v9627_v59 }
0x1559   :  { %v7500_v24 = vmul.f32 %v7498_v52, %v7364_v25 }
0x155b   :  { %v7502_v57 = vadd.f32 %v7501_v27, %v7500_v24 }
0x155d   :  { %9630 = vtanh.f32 %v7502_v57 }
0x156a   :  { %v9631_v23 = vpop.eup %9630 }
0x156b   :  { %v7506_v20 = vmul.f32 %v9631_v23, %v7504_v60 }
0x156d   :  { %7507 = vst [vmem:[#allocation3 + $0x7] sm:$0x1] %v7506_v20  ;;  %7508 = vst [vmem:[#allocation4] sm:$0x1] %v7506_v20 }
0x1574   :  { %v7509_v33 = vld [vmem:[#allocation3] sm:$0xff]  ;;  %v7510_v48 = vld [vmem:[#allocation4] sm:$0xff] }
0x1575   :  { %v13698_v49 = vsel %vm3695_vm2, %v7509_v33, %v7510_v48 }
0x1576   :  { %9644 = dma.done.wait [#allocation9 + $0x2], 4096 }
0x1577   :  { %9645 = vsyncadd [#allocation9 + $0x2], 4294963200  ;;  %v14164_v8 = vld [vmem:[#allocation120_spill] sm:$0xff]  ;;  %v14165_v1 = vld [vmem:[#allocation119_spill] sm:$0xff] }
0x1578   :  { %v8437_v44 = vcombine.high %v14165_v1, %v14164_v8  ;;  %v8436_v26 = vcombine.low %v14165_v1, %v14164_v8  ;;  %v14166_v63 = vld [vmem:[#allocation118_spill] sm:$0xff]  ;;  %v14167_v32 = vld [vmem:[#allocation117_spill] sm:$0xff] }
0x1579   :  { %v8435_v2 = vcombine.high %v14167_v32, %v14166_v63 }
0x157a   :  { %9646 = dma.done.wait [#allocation9 + $0x3], 1024 }
0x157b   :  { %9647 = vsyncadd [#allocation9 + $0x3], 4294966272  ;;  %7724 = vmatprep.subr.bf16.mxu0 %v8437_v44  ;;  %v8434_v58 = vcombine.low %v14167_v32, %v14166_v63  ;;  %v14168_v62 = vld [vmem:[#allocation116_spill] sm:$0xff]  ;;  %v14169_v36 = vld [vmem:[#allocation115_spill] sm:$0xff]  ;;  %v7519_v14 = vpack.c.bf16 %v13698_v49, %v13698_v49  ;;  %v9650_v40 = vmov 0.0   ;;  %vm9651_vm3 = vmmov 0  }
0x157c   :  { %7725 = vmatpush1.bf16.msra.mxu0 %v8436_v26  ;;  %v8433_v54 = vcombine.high %v14169_v36, %v14168_v62  ;;  %v8432_v19 = vcombine.low %v14169_v36, %v14168_v62  ;;  %v9632_v4 = vld [vmem:[#allocation8 + $0x38] sm:$0xff]   ;;  %v14170_v22 = vld [vmem:[#allocation114_spill] sm:$0xff]  ;;  %9399 = vmatprep.subr.bf16.mxu1 %v9650_v40  ;;  %v9633_v28 = vld [vmem:[#allocation8 + $0x30] sm:$0xff]  }
0x157d   :  { %7726 = vmatprep.subr.bf16.mxu0 %v8435_v2  ;;  %v14171_v50 = vld [vmem:[#allocation113_spill] sm:$0xff]  ;;  %7756 = vmatprep.mubr.bf16.mxu0 %v7519_v14  ;;  %v14172_v42 = vld [vmem:[#allocation112_spill] sm:$0xff]  ;;  %v14173_v25 = vld [vmem:[#allocation111_spill] sm:$0xff] }
0x157e   :  { %v8431_v0 = vcombine.high %v14171_v50, %v14170_v22  ;;  %9400 = vmatpush3.bf16.msra.mxu1 %v9632_v4  ;;  %v8430_v47 = vcombine.low %v14171_v50, %v14170_v22  ;;  %v8429_v39 = vcombine.high %v14173_v25, %v14172_v42  ;;  %v9634_v30 = vld [vmem:[#allocation8 + $0x28] sm:$0xff]   ;;  %v8428_v61 = vcombine.low %v14173_v25, %v14172_v42  ;;  %v14174_v18 = vld [vmem:[#allocation110_spill] sm:$0xff]  ;;  %v14175_v29 = vld [vmem:[#allocation109_spill] sm:$0xff] }
0x157f   :  { %9401 = vmatprep.subr.bf16.mxu1 %v9650_v40  ;;  %v8427_v17 = vcombine.high %v14175_v29, %v14174_v18  ;;  %v9635_v35 = vld [vmem:[#allocation8 + $0x20] sm:$0xff]   ;;  %v8426_v7 = vcombine.low %v14175_v29, %v14174_v18  ;;  %v14176_v5 = vld [vmem:[#allocation108_spill] sm:$0xff]  ;;  %v14177_v41 = vld [vmem:[#allocation107_spill] sm:$0xff]  ;;  %9415 = vmatprep.mubr.msk.bf16.mxu1 %vm9651_vm3, %v9650_v40  ;;  %v7767_v42 = vadd.f32 %v13698_v49, %v13087_v15 }
0x1580   :  { %7727 = vmatpush1.bf16.msra.mxu0 %v8434_v58  ;;  %v8425_v43 = vcombine.high %v14177_v41, %v14176_v5  ;;  %v9636_v45 = vld [vmem:[#allocation8 + $0x18] sm:$0xff]   ;;  %v8424_v6 = vcombine.low %v14177_v41, %v14176_v5  ;;  %v14178_v16 = vld [vmem:[#allocation106_spill] sm:$0xff]  ;;  %v14180_v46 = vld [vmem:[#allocation136_spill] sm:$0xff] }
0x1581   :  { %7728 = vmatprep.subr.bf16.mxu0 %v8433_v54  ;;  %v14179_v56 = vld [vmem:[#allocation105_spill] sm:$0xff]  ;;  %v14181_v55 = vld [vmem:[#allocation135_spill] sm:$0xff]  ;;  %v14182_v11 = vld [vmem:[#allocation134_spill] sm:$0xff] }
0x1582   :  { %9402 = vmatpush3.bf16.msra.mxu1 %v9633_v28  ;;  %v8423_v3 = vcombine.high %v14179_v56, %v14178_v16  ;;  %v8422_v9 = vcombine.low %v14179_v56, %v14178_v16  ;;  %v8453_v13 = vcombine.high %v14181_v55, %v14180_v46  ;;  %v8452_v10 = vcombine.low %v14181_v55, %v14180_v46  ;;  %v14183_v53 = vld [vmem:[#allocation133_spill] sm:$0xff]  ;;  %v14184_v21 = vld [vmem:[#allocation132_spill] sm:$0xff]  ;;  %v14185_v59 = vld [vmem:[#allocation131_spill] sm:$0xff] }
0x1583   :  { %9403 = vmatprep.subr.bf16.mxu1 %v9650_v40  ;;  %v8451_v38 = vcombine.high %v14183_v53, %v14182_v11  ;;  %v8450_v31 = vcombine.low %v14183_v53, %v14182_v11  ;;  %v8449_v52 = vcombine.high %v14185_v59, %v14184_v21  ;;  %v8448_v37 = vcombine.low %v14185_v59, %v14184_v21  ;;  %v14186_v24 = vld [vmem:[#allocation130_spill] sm:$0xff]  ;;  %v14187_v27 = vld [vmem:[#allocation129_spill] sm:$0xff]  ;;  %v14188_v23 = vld [vmem:[#allocation128_spill] sm:$0xff] }
0x1584   :  { %7729 = vmatpush1.bf16.msra.mxu0 %v8432_v19  ;;  %v8447_v57 = vcombine.high %v14187_v27, %v14186_v24  ;;  %v8446_v60 = vcombine.low %v14187_v27, %v14186_v24  ;;  %v14189_v20 = vld [vmem:[#allocation127_spill] sm:$0xff]  ;;  %v14190_v8 = vld [vmem:[#allocation126_spill] sm:$0xff]  ;;  %v14191_v1 = vld [vmem:[#allocation125_spill] sm:$0xff] }
0x1585   :  { %7730 = vmatprep.subr.bf16.mxu0 %v8431_v0  ;;  %v8445_v33 = vcombine.high %v14189_v20, %v14188_v23  ;;  %v8444_v48 = vcombine.low %v14189_v20, %v14188_v23  ;;  %v8443_v44 = vcombine.high %v14191_v1, %v14190_v8  ;;  %v8442_v26 = vcombine.low %v14191_v1, %v14190_v8  ;;  %v14192_v63 = vld [vmem:[#allocation124_spill] sm:$0xff]  ;;  %v14193_v32 = vld [vmem:[#allocation123_spill] sm:$0xff]  ;;  %v14194_v62 = vld [vmem:[#allocation122_spill] sm:$0xff] }
0x1586   :  { %9404 = vmatpush3.bf16.msra.mxu1 %v9634_v30  ;;  %v8441_v2 = vcombine.high %v14193_v32, %v14192_v63  ;;  %v8440_v58 = vcombine.low %v14193_v32, %v14192_v63  ;;  %v14195_v36 = vld [vmem:[#allocation121_spill] sm:$0xff]  ;;  %v9637_v4 = vld [vmem:[#allocation8 + $0x10] sm:$0xff]   ;;  %v9638_v22 = vld [vmem:[#allocation8 + $0x8] sm:$0xff]  }
0x1587   :  { %9405 = vmatprep.subr.bf16.mxu1 %v9650_v40  ;;  %v8439_v54 = vcombine.high %v14195_v36, %v14194_v62  ;;  %v8438_v19 = vcombine.low %v14195_v36, %v14194_v62  ;;  %v9639_v50 = vld [vmem:[#allocation8] sm:$0xff]   ;;  %v7552_v0 = vld [vmem:[%s13806_s11] sm:$0x3] }
0x1588   :  { %7731 = vmatpush1.bf16.msra.mxu0 %v8430_v47  ;;  %v7557_v14 = vrot.slane %v7552_v0, %v14155_v34  ;;  %v8462_v34 = vld [vmem:[%s13808_s13] ss:$0 sm:$0xff] }
0x1589   :  { %7732 = vmatprep.subr.bf16.mxu0 %v8429_v39 }
0x158a   :  { %9406 = vmatpush3.bf16.msra.mxu1 %v9635_v35 }
0x158b   :  { %9407 = vmatprep.subr.bf16.mxu1 %v9650_v40 }
0x158c   :  { %7733 = vmatpush1.bf16.msra.mxu0 %v8428_v61 }
0x158d   :  { %7734 = vmatprep.subr.bf16.mxu0 %v8427_v17 }
0x158e   :  { %9408 = vmatpush3.bf16.msra.mxu1 %v9636_v45 }
0x158f   :  { %9409 = vmatprep.subr.bf16.mxu1 %v9650_v40 }
0x1590   :  { %7735 = vmatpush1.bf16.msra.mxu0 %v8426_v7 }
0x1591   :  { %7736 = vmatprep.subr.bf16.mxu0 %v8425_v43 }
0x1592   :  { %9410 = vmatpush3.bf16.msra.mxu1 %v9637_v4 }
0x1593   :  { %9411 = vmatprep.subr.bf16.mxu1 %v9650_v40 }
0x1594   :  { %7737 = vmatpush1.bf16.msra.mxu0 %v8424_v6 }
0x1595   :  { %7738 = vmatprep.subr.bf16.mxu0 %v8423_v3  ;;  %v7890_v3 = vld [vmem:[%s13808_s13 + $0x1] sm:$0x1] }
0x1596   :  { %9412 = vmatpush3.bf16.msra.mxu1 %v9638_v22 }
0x1597   :  { %9413 = vmatprep.subr.bf16.mxu1 %v9650_v40 }
0x1598   :  { %7739 = vmatpush1.bf16.msra.mxu0 %v8422_v9 }
0x1599   :  { %7740 = vmatprep.subr.bf16.mxu0 %v8453_v13 }
0x159a   :  { %9414 = vmatpush3.bf16.msra.mxu1 %v9639_v50 }
0x159c   :  { %7741 = vmatpush2.bf16.msra.mxu0 %v8452_v10 }
0x159d   :  { %7742 = vmatprep.subr.bf16.mxu0 %v8451_v38 }
0x15a0   :  { %7743 = vmatpush2.bf16.msra.mxu0 %v8450_v31 }
0x15a1   :  { %7744 = vmatprep.subr.bf16.mxu0 %v8449_v52 }
0x15a4   :  { %7745 = vmatpush2.bf16.msra.mxu0 %v8448_v37 }
0x15a5   :  { %7746 = vmatprep.subr.bf16.mxu0 %v8447_v57 }
0x15a8   :  { %7747 = vmatpush2.bf16.msra.mxu0 %v8446_v60 }
0x15a9   :  { %7748 = vmatprep.subr.bf16.mxu0 %v8445_v33 }
0x15ac   :  { %7749 = vmatpush2.bf16.msra.mxu0 %v8444_v48 }
0x15ad   :  { %7750 = vmatprep.subr.bf16.mxu0 %v8443_v44 }
0x15b0   :  { %7751 = vmatpush2.bf16.msra.mxu0 %v8442_v26 }
0x15b1   :  { %7752 = vmatprep.subr.bf16.mxu0 %v8441_v2 }
0x15b4   :  { %7753 = vmatpush2.bf16.msra.mxu0 %v8440_v58 }
0x15b5   :  { %7754 = vmatprep.subr.bf16.mxu0 %v8439_v54 }
0x15b8   :  { %7755 = vmatpush2.bf16.msra.mxu0 %v8438_v19 }
0x15bb   :  { %7757 = vmatmul.mubr.bf16.vlgmr.msra.gmra.mxu0 %v13161_v51  ;;  %v7561_v51 = vrot.slane %v7552_v0, %v14158_v12 }
0x167b   :  { %v7758_v28 = vpop.f32.mrf.mxu0 }
0x167c   :  { %v7759_v47 = vadd.f32 %v7758_v28, %v7557_v14 }
0x167d   :  { %v7760_v25 = vpop.f32.mrf.mxu0 }
0x167e   :  { %v7765_v39 = vmax.f32 %v7759_v47, 0.0  ;;  %v7761_v30 = vadd.f32 %v7760_v25, %v7561_v51 }
0x167f   :  { %v7762_v61 = vpop.f32.mrf.mxu0 }
0x1680   :  { %v7768_v18 = vadd.f32 %v7767_v42, %v7765_v39  ;;  %v7766_v29 = vmax.f32 %v7761_v30, 0.0 }
0x1681   :  { %v7763_v40 = vpop.f32.mrf.mxu0 }
0x1682   :  { %v7769_v17 = vadd.f32 %v7768_v18, %v7766_v29 }
0x1684   :  { %v7770_v35 = vpack.c.bf16 %v7769_v17, %v7769_v17 }
0x1686   :  { %9416 = vmatmul.mubr.bf16.vlgmr.msra.gmra.mxu1 %v7770_v35 }
0x1746   :  { %v7869_v12 = vpop.f32.mrf.mxu1 }
0x1747   :  { %v7880_v7 = vadd.f32 %v8462_v34, %v7869_v12  ;;  %v7882_v5 = vrot.slane %v7869_v12, 4 }
0x1748   :  { %v9417_v41 = vpop.f32.mrf.mxu1 }
0x1749   :  { %7881 = vst [vmem:[%s13809_s14] sm:$0xff] %v7880_v7  ;;  %v7883_v15 = vadd.f32 %v7882_v5, %v7869_v12 }
0x174a   :  { %v7872_v49 = vpop.f32.mrf.mxu1 }
0x174b   :  { %v7884_v43 = vrot.slane %v7883_v15, 2 }
0x174c   :  { %v9418_v45 = vpop.f32.mrf.mxu1 }
0x174d   :  { %v7885_v6 = vadd.f32 %v7884_v43, %v7883_v15 }
0x174f   :  { %v7886_v16 = vrot.slane %v7885_v6, 1 }
0x1751   :  { %v7887_v56 = vadd.f32 %v7886_v16, %v7885_v6 }
0x1753   :  { %v7889_v9 = vmul.f32 0.125, %v7887_v56 }
0x1755   :  { %v7891_v46 = vadd.f32 %v7890_v3, %v7889_v9 }
0x1757   :  { %7892 = vst [vmem:[%s13809_s14 + $0x8] sm:$0x1] %v7891_v46 }
0x1758   :  { %7897 = vsyncmov [#allocation9] }
0x175b   :  { %s7898_s30 = vpop.sfrf %7897 }
0x175c   :  { %p8463_p0 = scmp.ne.s32.totalorder %s7898_s30, 0 }
0x175e   :  { %7902 = shalt.err (%p8463_p0)  }
0x175f   :  { %7904 = vsyncmov [#allocation9 + $0x1] }
0x1762   :  { %s7905_s3 = vpop.sfrf %7904 }
0x1763   :  { %p8464_p1 = scmp.ne.s32.totalorder %s7905_s3, 0 }
0x1765   :  { %7909 = shalt.err (%p8464_p1)  }
0x1766   :  { %7911 = vsyncmov [#allocation9 + $0x2] }
0x1769   :  { %s7912_s15 = vpop.sfrf %7911 }
0x176a   :  { %p8465_p2 = scmp.ne.s32.totalorder %s7912_s15, 0 }
0x176c   :  { %7916 = shalt.err (%p8465_p2)  }
0x176d   :  { %7918 = vsyncmov [#allocation9 + $0x3] }
0x1770   :  { %s7919_s13 = vpop.sfrf %7918 }
0x1771   :  { %p8466_p3 = scmp.ne.s32.totalorder %s7919_s13, 0 }
0x1773   :  { %7923 = shalt.err (%p8466_p3)  }

</bundles_post_ra>
